<compile_context>
chip_gen: v6e
topology: v6e:2x2x1
jax: 0.10.0
libtpu: 0.0.40
codegen_flags: <defaults>
</compile_context>

<pallas_src>
import functools

import numpy as np
import jax
import jax.numpy as jnp
from jax import lax
from jax.experimental import pallas as pl
from jax.experimental.pallas import tpu as pltpu

DTYPE = jnp.float32


# ------------------------------ in-kernel math ------------------------------ #

def _layernorm(x, g, b, eps=1e-5):
    mean = jnp.mean(x, axis=-1, keepdims=True)
    var = jnp.mean((x - mean) ** 2, axis=-1, keepdims=True)
    return (x - mean) * lax.rsqrt(var + eps) * g + b


def _gelu(x):
    # TODO(synk): PyTorch nn.GELU() default is the exact erf form; the tanh
    # approximation is used here so the activation lowers to the TPU EUP
    # inside the fused kernel (numerical difference is ~1e-3).
    c = float(np.sqrt(2.0 / np.pi))
    return 0.5 * x * (1.0 + jnp.tanh(c * (x + 0.044715 * x * x * x)))


# ---------------------------- fused layer kernel ---------------------------- #

def _fused_layer_kernel(*refs, heads, dim_head, piece_dims, has_pre,
                        emit_dots, apply_hs, scale):
    it = iter(refs)
    hs_ref = next(it) if apply_hs else None          # SMEM (heads,) f32
    x_refs = [next(it) for _ in piece_dims]          # each (1, N, Dp) VMEM
    if has_pre:
        pre_w_ref = next(it)                         # (sum(Dp), D)
        pre_b_ref = next(it)                         # (1, D)
    wqkv_ref = next(it)                              # (3*heads, D, dh)
    wo_ref = next(it)                                # (heads, dh, D)
    bo_ref = next(it)                                # (1, D)
    lng_ref = next(it)                               # (1, D)
    lnb_ref = next(it)                               # (1, D)
    w1_ref = next(it)                                # (D, mlp)
    b1_ref = next(it)                                # (1, mlp)
    w2_ref = next(it)                                # (mlp, D)
    b2_ref = next(it)                                # (1, D)
    out_ref = next(it)                               # (1, N, D)
    dots_ref = next(it) if emit_dots else None       # (1, heads, N, N)

    f32 = jnp.float32

    # ---- optional fused dense projection over concatenated hierarchy inputs
    if has_pre:
        x = pre_b_ref[...]                           # (1, D) -> broadcasts
        off = 0
        for xr, dp in zip(x_refs, piece_dims):
            x = x + jnp.dot(xr[0], pre_w_ref[off:off + dp, :],
                            preferred_element_type=f32)
            off += dp                                # sublane-dim static slice
    else:
        x = x_refs[0][0]                             # (N, D)

    # ---- multi-head self attention (heads unrolled inside one kernel) ----
    dh = dim_head
    y = bo_ref[...]                                  # (1, D) output-proj bias
    for h in range(heads):
        q_h = jnp.dot(x, wqkv_ref[h], preferred_element_type=f32)           # (N, dh)
        k_h = jnp.dot(x, wqkv_ref[heads + h], preferred_element_type=f32)   # (N, dh)
        v_h = jnp.dot(x, wqkv_ref[2 * heads + h], preferred_element_type=f32)
        d_h = lax.dot_general(q_h, k_h, (((1,), (1,)), ((), ())),
                              preferred_element_type=f32) * scale           # (N, N)
        if emit_dots:
            dots_ref[0, h] = d_h.astype(dots_ref.dtype)
        m = jnp.max(d_h, axis=-1, keepdims=True)
        e = jnp.exp(d_h - m)
        attn = e / jnp.sum(e, axis=-1, keepdims=True)
        o_h = jnp.dot(attn, v_h, preferred_element_type=f32)                # (N, dh)
        if apply_hs:
            # post-softmax per-head scale; (attn * s) @ v == s * (attn @ v)
            o_h = o_h * hs_ref[h]
        y = y + jnp.dot(o_h, wo_ref[h], preferred_element_type=f32)         # (N, D)

    # ---- residual + LayerNorm (fused) ----
    x = _layernorm(y + x, lng_ref[...], lnb_ref[...])

    # ---- feed-forward: matmul + bias + GELU + matmul + bias (fused) ----
    h1 = jnp.dot(x, w1_ref[...], preferred_element_type=f32) + b1_ref[...]
    h1 = _gelu(h1)
    h2 = jnp.dot(h1, w2_ref[...], preferred_element_type=f32) + b2_ref[...]

    # ---- residual + LayerNorm (fused) ----
    x = _layernorm(h2 + x, lng_ref[...], lnb_ref[...])
    out_ref[0] = x.astype(out_ref.dtype)


def fused_layer(x_pieces, pre, lp, ln_g, ln_b, head_scale_np,
                heads, dim_head, emit_dots):
    """One full transformer layer (optionally with the hierarchy dense
    projection fused in front) as a single pallas_call.

    x_pieces : list of (B, N, Dp) arrays.  len > 1 implies `pre` is the dense
               projection over their concatenation.
    Returns x_out (B, N, D) and, if emit_dots, also dots (B, heads, N, N).
    """
    B, N = x_pieces[0].shape[0], x_pieces[0].shape[1]
    D = lp['attn']['wo'].shape[-1]
    piece_dims = tuple(int(xp.shape[-1]) for xp in x_pieces)
    has_pre = pre is not None
    apply_hs = not bool(np.all(np.asarray(head_scale_np) == 1.0))
    scale = float(dim_head) ** (-0.5)

    inputs, in_specs = [], []

    def add_full(a):
        inputs.append(a)
        in_specs.append(pl.BlockSpec(a.shape, lambda b, _n=a.ndim: (0,) * _n))

    if apply_hs:
        inputs.append(jnp.asarray(head_scale_np, DTYPE))
        in_specs.append(pl.BlockSpec(memory_space=pltpu.MemorySpace.SMEM))
    for xp in x_pieces:
        inputs.append(xp)
        in_specs.append(pl.BlockSpec((1,) + xp.shape[1:], lambda b: (b, 0, 0)))
    if has_pre:
        add_full(pre['w'])
        add_full(pre['b'])
    ap, fp = lp['attn'], lp['ff']
    add_full(ap['wqkv'])     # (3*heads, D, dh)  -- per-head, no bias (bias=False)
    add_full(ap['wo'])       # (heads, dh, D)
    add_full(ap['bo'])       # (1, D)
    add_full(ln_g)           # (1, D)
    add_full(ln_b)           # (1, D)
    add_full(fp['w1'])
    add_full(fp['b1'])
    add_full(fp['w2'])
    add_full(fp['b2'])

    out_shapes = [jax.ShapeDtypeStruct((B, N, D), DTYPE)]
    out_specs = [pl.BlockSpec((1, N, D), lambda b: (b, 0, 0))]
    if emit_dots:
        out_shapes.append(jax.ShapeDtypeStruct((B, heads, N, N), DTYPE))
        out_specs.append(pl.BlockSpec((1, heads, N, N), lambda b: (b, 0, 0, 0)))

    kernel = functools.partial(
        _fused_layer_kernel, heads=heads, dim_head=dim_head,
        piece_dims=piece_dims, has_pre=has_pre, emit_dots=emit_dots,
        apply_hs=apply_hs, scale=scale)

    res = pl.pallas_call(
        kernel,
        out_shape=tuple(out_shapes),
        grid=(B,),
        in_specs=in_specs,
        out_specs=tuple(out_specs),
        compiler_params=pltpu.CompilerParams(
            dimension_semantics=("parallel",)),
    )(*inputs)
    return (res[0], res[1]) if emit_dots else res[0]


# ---------------- host-side head-dropout masks (numpy, as in reference) ----- #

def _head_scale_regular(p, heads, rng):       # Attention (branch 0)
    a = rng.binomial(1, 1 - p, size=heads)
    while a.sum() == 0:
        a = rng.binomial(1, 1 - p, size=heads)
    return (a * heads / float(a.sum())).astype(np.float32)


def _head_scale_give(p, heads, rng):          # Attention_give (branch 1)
    a = rng.binomial(1, p, size=heads)
    return (1 - a).astype(np.float32)


def make_head_scales(p, heads, depths, rng):
    scales = []
    for i, d in enumerate(depths):
        fn = _head_scale_give if i == 1 else _head_scale_regular
        scales.append([fn(p, heads, rng) for _ in range(d)])
    return scales


# ------------------------------- full forward ------------------------------- #

def airwayformer_give(out_list, params, head_scales, heads, dim_head):
    pieces = [out_list[0], out_list[1]]
    x_, give = [], None
    for i, tp in enumerate(params['transformer']):
        depth = len(tp['layers'])
        x = None
        for li, lp in enumerate(tp['layers']):
            first = (li == 0)
            emit = (i == 1) and (li == depth - 1)   # only the returned dots
            x_in = pieces if first else [x]
            pre = params['dense'][i] if first else None
            res = fused_layer(x_in, pre, lp, tp['ln_g'], tp['ln_b'],
                              head_scales[i][li], heads, dim_head, emit)
            if emit:
                x, give = res
            else:
                x = res
        x_.append(x)
        pieces.append(x)
    return x_[0], x_[1], lax.stop_gradient(give)


# ------------------------------- param init --------------------------------- #

def init_params(key, dim, heads, dim_head, mlp_dim, depth=2):
    keys = iter(jax.random.split(key, 128))

    def lin(fin, fout):
        w = jax.random.normal(next(keys), (fin, fout), DTYPE) * 0.02
        b = jax.random.normal(next(keys), (1, fout), DTYPE) * 0.02
        return w, b

    dense = []
    for i in range(2):
        w, b = lin((i + 2) * dim, dim)
        dense.append({'w': w, 'b': b})

    transformers = []
    for _ in range(2):
        layers = []
        for _ in range(depth):
            # QKV weight stored per (q/k/v, head): (3*heads, dim, dim_head);
            # output projection per head: (heads, dim_head, dim).
            wqkv = jax.random.normal(next(keys), (3 * heads, dim, dim_head), DTYPE) * 0.02
            wo = jax.random.normal(next(keys), (heads, dim_head, dim), DTYPE) * 0.02
            bo = jax.random.normal(next(keys), (1, dim), DTYPE) * 0.02
            w1, b1 = lin(dim, mlp_dim)
            w2, b2 = lin(mlp_dim, dim)
            layers.append({'attn': {'wqkv': wqkv, 'wo': wo, 'bo': bo},
                           'ff': {'w1': w1, 'b1': b1, 'w2': w2, 'b2': b2}})
        transformers.append({'ln_g': jnp.ones((1, dim), DTYPE),
                             'ln_b': jnp.zeros((1, dim), DTYPE),
                             'layers': layers})
    return {'dense': dense, 'transformer': transformers}


# ---------------------------------- main ------------------------------------ #

if __name__ == "__main__":
    dim, heads, dim_head, mlp_dim = 32, 4, 8, 64
    B, N = 2, 16

    key = jax.random.PRNGKey(0)
    kp, k0, k1 = jax.random.split(key, 3)
    params = init_params(kp, dim, heads, dim_head, mlp_dim)

    out0 = jax.random.normal(k0, (B, N, dim), DTYPE)
    out1 = jax.random.normal(k1, (B, N, dim), DTYPE)

    # NOTE: dropout layers in the reference are identity at p=0 / eval; the
    # head-dropout masks are drawn host-side with numpy exactly as in the
    # PyTorch module.  p=0.0 makes both mask branches the identity, so the
    # per-head scale multiply is statically compiled out of the kernels.
    rng = np.random.default_rng(0)
    p = 0.0
    depths = tuple(len(t['layers']) for t in params['transformer'])
    head_scales = make_head_scales(p, heads, depths, rng)

    fwd = jax.jit(lambda prm, o0, o1: airwayformer_give(
        [o0, o1], prm, head_scales, heads, dim_head))

    x1, x2, give = fwd(params, out0, out1)
    jax.block_until_ready((x1, x2, give))

    assert x1.shape == (B, N, dim)
    assert x2.shape == (B, N, dim)
    assert give.shape == (B, heads, N, N)
    print("KERNEL_OK")
</pallas_src>

<mosaic_0001>
module attributes {stable_mosaic.version = 11 : i64} {
  func.func @_fused_layer_kernel(%arg0: i32, %arg1: memref<1x16x32xf32, #tpu.memory_space<vmem>>, %arg2: memref<1x16x32xf32, #tpu.memory_space<vmem>>, %arg3: memref<64x32xf32, #tpu.memory_space<vmem>>, %arg4: memref<1x32xf32, #tpu.memory_space<vmem>>, %arg5: memref<12x32x8xf32, #tpu.memory_space<vmem>>, %arg6: memref<4x8x32xf32, #tpu.memory_space<vmem>>, %arg7: memref<1x32xf32, #tpu.memory_space<vmem>>, %arg8: memref<1x32xf32, #tpu.memory_space<vmem>>, %arg9: memref<1x32xf32, #tpu.memory_space<vmem>>, %arg10: memref<32x64xf32, #tpu.memory_space<vmem>>, %arg11: memref<1x64xf32, #tpu.memory_space<vmem>>, %arg12: memref<64x32xf32, #tpu.memory_space<vmem>>, %arg13: memref<1x32xf32, #tpu.memory_space<vmem>>, %arg14: memref<1x16x32xf32, #tpu.memory_space<vmem>>) attributes {dimension_semantics = [#tpu.dimension_semantics<parallel>], iteration_bounds = array<i64: 2>, scalar_prefetch = 0 : i64, scratch_operands = 0 : i64, tpu.core_type = #tpu.core_type<tc>, window_params = [{transform_indices = @transform_0, window_bounds = array<i64: 1, 16, 32>}, {transform_indices = @transform_1, window_bounds = array<i64: 1, 16, 32>}, {pipeline_mode = #tpu.pipeline_mode<synchronous>, transform_indices = @transform_2, window_bounds = array<i64: 64, 32>}, {pipeline_mode = #tpu.pipeline_mode<synchronous>, transform_indices = @transform_3, window_bounds = array<i64: 1, 32>}, {pipeline_mode = #tpu.pipeline_mode<synchronous>, transform_indices = @transform_4, window_bounds = array<i64: 12, 32, 8>}, {pipeline_mode = #tpu.pipeline_mode<synchronous>, transform_indices = @transform_5, window_bounds = array<i64: 4, 8, 32>}, {pipeline_mode = #tpu.pipeline_mode<synchronous>, transform_indices = @transform_6, window_bounds = array<i64: 1, 32>}, {pipeline_mode = #tpu.pipeline_mode<synchronous>, transform_indices = @transform_7, window_bounds = array<i64: 1, 32>}, {pipeline_mode = #tpu.pipeline_mode<synchronous>, transform_indices = @transform_8, window_bounds = array<i64: 1, 32>}, {pipeline_mode = #tpu.pipeline_mode<synchronous>, transform_indices = @transform_9, window_bounds = array<i64: 32, 64>}, {pipeline_mode = #tpu.pipeline_mode<synchronous>, transform_indices = @transform_10, window_bounds = array<i64: 1, 64>}, {pipeline_mode = #tpu.pipeline_mode<synchronous>, transform_indices = @transform_11, window_bounds = array<i64: 64, 32>}, {pipeline_mode = #tpu.pipeline_mode<synchronous>, transform_indices = @transform_12, window_bounds = array<i64: 1, 32>}, {transform_indices = @transform_13, window_bounds = array<i64: 1, 16, 32>}]} {
    %c0 = arith.constant 0 : index
    %c0_0 = arith.constant 0 : index
    %0 = vector.load %arg4[%c0, %c0_0] : memref<1x32xf32, #tpu.memory_space<vmem>>, vector<1x32xf32>
    %c0_1 = arith.constant 0 : index
    %c0_2 = arith.constant 0 : index
    %c0_3 = arith.constant 0 : index
    %1 = vector.load %arg1[%c0_1, %c0_2, %c0_3] : memref<1x16x32xf32, #tpu.memory_space<vmem>>, vector<1x16x32xf32>
    %2 = vector.shape_cast %1 : vector<1x16x32xf32> to vector<16x32xf32>
    %c0_4 = arith.constant 0 : index
    %c0_5 = arith.constant 0 : index
    %3 = vector.load %arg3[%c0_4, %c0_5] : memref<64x32xf32, #tpu.memory_space<vmem>>, vector<32x32xf32>
    %cst = arith.constant dense<0.000000e+00> : vector<16x32xf32>
    %4 = tpu.matmul %2, %3, %cst {dimension_numbers = #tpu.dot_dimension_numbers<[1], [0], [0], [1], [0, 0, 1, 1], [], []>} : vector<16x32xf32>, vector<32x32xf32>, vector<16x32xf32> -> vector<16x32xf32>
    %5 = vector.broadcast %0 : vector<1x32xf32> to vector<16x32xf32>
    %6 = arith.addf %5, %4 : vector<16x32xf32>
    %c0_6 = arith.constant 0 : index
    %c0_7 = arith.constant 0 : index
    %c0_8 = arith.constant 0 : index
    %7 = vector.load %arg2[%c0_6, %c0_7, %c0_8] : memref<1x16x32xf32, #tpu.memory_space<vmem>>, vector<1x16x32xf32>
    %8 = vector.shape_cast %7 : vector<1x16x32xf32> to vector<16x32xf32>
    %c32 = arith.constant 32 : index
    %c0_9 = arith.constant 0 : index
    %9 = vector.load %arg3[%c32, %c0_9] : memref<64x32xf32, #tpu.memory_space<vmem>>, vector<32x32xf32>
    %cst_10 = arith.constant dense<0.000000e+00> : vector<16x32xf32>
    %10 = tpu.matmul %8, %9, %cst_10 {dimension_numbers = #tpu.dot_dimension_numbers<[1], [0], [0], [1], [0, 0, 1, 1], [], []>} : vector<16x32xf32>, vector<32x32xf32>, vector<16x32xf32> -> vector<16x32xf32>
    %11 = arith.addf %6, %10 : vector<16x32xf32>
    %c0_11 = arith.constant 0 : index
    %c0_12 = arith.constant 0 : index
    %12 = vector.load %arg7[%c0_11, %c0_12] : memref<1x32xf32, #tpu.memory_space<vmem>>, vector<1x32xf32>
    %c0_13 = arith.constant 0 : index
    %c0_14 = arith.constant 0 : index
    %c0_15 = arith.constant 0 : index
    %13 = vector.load %arg5[%c0_13, %c0_14, %c0_15] : memref<12x32x8xf32, #tpu.memory_space<vmem>>, vector<1x32x8xf32>
    %14 = vector.shape_cast %13 : vector<1x32x8xf32> to vector<32x8xf32>
    %cst_16 = arith.constant dense<0.000000e+00> : vector<16x8xf32>
    %15 = tpu.matmul %11, %14, %cst_16 {dimension_numbers = #tpu.dot_dimension_numbers<[1], [0], [0], [1], [0, 0, 1, 1], [], []>} : vector<16x32xf32>, vector<32x8xf32>, vector<16x8xf32> -> vector<16x8xf32>
    %c4 = arith.constant 4 : index
    %c0_17 = arith.constant 0 : index
    %c0_18 = arith.constant 0 : index
    %16 = vector.load %arg5[%c4, %c0_17, %c0_18] : memref<12x32x8xf32, #tpu.memory_space<vmem>>, vector<1x32x8xf32>
    %17 = vector.shape_cast %16 : vector<1x32x8xf32> to vector<32x8xf32>
    %cst_19 = arith.constant dense<0.000000e+00> : vector<16x8xf32>
    %18 = tpu.matmul %11, %17, %cst_19 {dimension_numbers = #tpu.dot_dimension_numbers<[1], [0], [0], [1], [0, 0, 1, 1], [], []>} : vector<16x32xf32>, vector<32x8xf32>, vector<16x8xf32> -> vector<16x8xf32>
    %c8 = arith.constant 8 : index
    %c0_20 = arith.constant 0 : index
    %c0_21 = arith.constant 0 : index
    %19 = vector.load %arg5[%c8, %c0_20, %c0_21] : memref<12x32x8xf32, #tpu.memory_space<vmem>>, vector<1x32x8xf32>
    %20 = vector.shape_cast %19 : vector<1x32x8xf32> to vector<32x8xf32>
    %cst_22 = arith.constant dense<0.000000e+00> : vector<16x8xf32>
    %21 = tpu.matmul %11, %20, %cst_22 {dimension_numbers = #tpu.dot_dimension_numbers<[1], [0], [0], [1], [0, 0, 1, 1], [], []>} : vector<16x32xf32>, vector<32x8xf32>, vector<16x8xf32> -> vector<16x8xf32>
    %cst_23 = arith.constant dense<0.000000e+00> : vector<16x16xf32>
    %22 = tpu.matmul %15, %18, %cst_23 {dimension_numbers = #tpu.dot_dimension_numbers<[1], [1], [0], [0], [0, 0, 1, 0], [], []>} : vector<16x8xf32>, vector<16x8xf32>, vector<16x16xf32> -> vector<16x16xf32>
    %cst_24 = arith.constant 0.353553385 : f32
    %23 = vector.broadcast %cst_24 : f32 to vector<16x16xf32>
    %24 = arith.mulf %22, %23 : vector<16x16xf32>
    %cst_25 = arith.constant dense<0xFF800000> : vector<16xf32>
    %25 = vector.multi_reduction <maximumf>, %24, %cst_25 [1] : vector<16x16xf32> to vector<16xf32>
    %26 = vector.shape_cast %25 : vector<16xf32> to vector<16x1xf32>
    %27 = vector.broadcast %26 : vector<16x1xf32> to vector<16x16xf32>
    %28 = arith.subf %24, %27 : vector<16x16xf32>
    %29 = math.exp %28 : vector<16x16xf32>
    %cst_26 = arith.constant dense<0.000000e+00> : vector<16xf32>
    %30 = vector.multi_reduction <add>, %29, %cst_26 [1] : vector<16x16xf32> to vector<16xf32>
    %31 = vector.shape_cast %30 : vector<16xf32> to vector<16x1xf32>
    %32 = vector.broadcast %31 : vector<16x1xf32> to vector<16x16xf32>
    %33 = arith.divf %29, %32 : vector<16x16xf32>
    %cst_27 = arith.constant dense<0.000000e+00> : vector<16x8xf32>
    %34 = tpu.matmul %33, %21, %cst_27 {dimension_numbers = #tpu.dot_dimension_numbers<[1], [0], [0], [1], [0, 0, 1, 1], [], []>} : vector<16x16xf32>, vector<16x8xf32>, vector<16x8xf32> -> vector<16x8xf32>
    %c0_28 = arith.constant 0 : index
    %c0_29 = arith.constant 0 : index
    %c0_30 = arith.constant 0 : index
    %35 = vector.load %arg6[%c0_28, %c0_29, %c0_30] : memref<4x8x32xf32, #tpu.memory_space<vmem>>, vector<1x8x32xf32>
    %36 = vector.shape_cast %35 : vector<1x8x32xf32> to vector<8x32xf32>
    %cst_31 = arith.constant dense<0.000000e+00> : vector<16x32xf32>
    %37 = tpu.matmul %34, %36, %cst_31 {dimension_numbers = #tpu.dot_dimension_numbers<[1], [0], [0], [1], [0, 0, 1, 1], [], []>} : vector<16x8xf32>, vector<8x32xf32>, vector<16x32xf32> -> vector<16x32xf32>
    %38 = vector.broadcast %12 : vector<1x32xf32> to vector<16x32xf32>
    %39 = arith.addf %38, %37 : vector<16x32xf32>
    %c1 = arith.constant 1 : index
    %c0_32 = arith.constant 0 : index
    %c0_33 = arith.constant 0 : index
    %40 = vector.load %arg5[%c1, %c0_32, %c0_33] : memref<12x32x8xf32, #tpu.memory_space<vmem>>, vector<1x32x8xf32>
    %41 = vector.shape_cast %40 : vector<1x32x8xf32> to vector<32x8xf32>
    %cst_34 = arith.constant dense<0.000000e+00> : vector<16x8xf32>
    %42 = tpu.matmul %11, %41, %cst_34 {dimension_numbers = #tpu.dot_dimension_numbers<[1], [0], [0], [1], [0, 0, 1, 1], [], []>} : vector<16x32xf32>, vector<32x8xf32>, vector<16x8xf32> -> vector<16x8xf32>
    %c5 = arith.constant 5 : index
    %c0_35 = arith.constant 0 : index
    %c0_36 = arith.constant 0 : index
    %43 = vector.load %arg5[%c5, %c0_35, %c0_36] : memref<12x32x8xf32, #tpu.memory_space<vmem>>, vector<1x32x8xf32>
    %44 = vector.shape_cast %43 : vector<1x32x8xf32> to vector<32x8xf32>
    %cst_37 = arith.constant dense<0.000000e+00> : vector<16x8xf32>
    %45 = tpu.matmul %11, %44, %cst_37 {dimension_numbers = #tpu.dot_dimension_numbers<[1], [0], [0], [1], [0, 0, 1, 1], [], []>} : vector<16x32xf32>, vector<32x8xf32>, vector<16x8xf32> -> vector<16x8xf32>
    %c9 = arith.constant 9 : index
    %c0_38 = arith.constant 0 : index
    %c0_39 = arith.constant 0 : index
    %46 = vector.load %arg5[%c9, %c0_38, %c0_39] : memref<12x32x8xf32, #tpu.memory_space<vmem>>, vector<1x32x8xf32>
    %47 = vector.shape_cast %46 : vector<1x32x8xf32> to vector<32x8xf32>
    %cst_40 = arith.constant dense<0.000000e+00> : vector<16x8xf32>
    %48 = tpu.matmul %11, %47, %cst_40 {dimension_numbers = #tpu.dot_dimension_numbers<[1], [0], [0], [1], [0, 0, 1, 1], [], []>} : vector<16x32xf32>, vector<32x8xf32>, vector<16x8xf32> -> vector<16x8xf32>
    %cst_41 = arith.constant dense<0.000000e+00> : vector<16x16xf32>
    %49 = tpu.matmul %42, %45, %cst_41 {dimension_numbers = #tpu.dot_dimension_numbers<[1], [1], [0], [0], [0, 0, 1, 0], [], []>} : vector<16x8xf32>, vector<16x8xf32>, vector<16x16xf32> -> vector<16x16xf32>
    %cst_42 = arith.constant 0.353553385 : f32
    %50 = vector.broadcast %cst_42 : f32 to vector<16x16xf32>
    %51 = arith.mulf %49, %50 : vector<16x16xf32>
    %cst_43 = arith.constant dense<0xFF800000> : vector<16xf32>
    %52 = vector.multi_reduction <maximumf>, %51, %cst_43 [1] : vector<16x16xf32> to vector<16xf32>
    %53 = vector.shape_cast %52 : vector<16xf32> to vector<16x1xf32>
    %54 = vector.broadcast %53 : vector<16x1xf32> to vector<16x16xf32>
    %55 = arith.subf %51, %54 : vector<16x16xf32>
    %56 = math.exp %55 : vector<16x16xf32>
    %cst_44 = arith.constant dense<0.000000e+00> : vector<16xf32>
    %57 = vector.multi_reduction <add>, %56, %cst_44 [1] : vector<16x16xf32> to vector<16xf32>
    %58 = vector.shape_cast %57 : vector<16xf32> to vector<16x1xf32>
    %59 = vector.broadcast %58 : vector<16x1xf32> to vector<16x16xf32>
    %60 = arith.divf %56, %59 : vector<16x16xf32>
    %cst_45 = arith.constant dense<0.000000e+00> : vector<16x8xf32>
    %61 = tpu.matmul %60, %48, %cst_45 {dimension_numbers = #tpu.dot_dimension_numbers<[1], [0], [0], [1], [0, 0, 1, 1], [], []>} : vector<16x16xf32>, vector<16x8xf32>, vector<16x8xf32> -> vector<16x8xf32>
    %c1_46 = arith.constant 1 : index
    %c0_47 = arith.constant 0 : index
    %c0_48 = arith.constant 0 : index
    %62 = vector.load %arg6[%c1_46, %c0_47, %c0_48] : memref<4x8x32xf32, #tpu.memory_space<vmem>>, vector<1x8x32xf32>
    %63 = vector.shape_cast %62 : vector<1x8x32xf32> to vector<8x32xf32>
    %cst_49 = arith.constant dense<0.000000e+00> : vector<16x32xf32>
    %64 = tpu.matmul %61, %63, %cst_49 {dimension_numbers = #tpu.dot_dimension_numbers<[1], [0], [0], [1], [0, 0, 1, 1], [], []>} : vector<16x8xf32>, vector<8x32xf32>, vector<16x32xf32> -> vector<16x32xf32>
    %65 = arith.addf %39, %64 : vector<16x32xf32>
    %c2 = arith.constant 2 : index
    %c0_50 = arith.constant 0 : index
    %c0_51 = arith.constant 0 : index
    %66 = vector.load %arg5[%c2, %c0_50, %c0_51] : memref<12x32x8xf32, #tpu.memory_space<vmem>>, vector<1x32x8xf32>
    %67 = vector.shape_cast %66 : vector<1x32x8xf32> to vector<32x8xf32>
    %cst_52 = arith.constant dense<0.000000e+00> : vector<16x8xf32>
    %68 = tpu.matmul %11, %67, %cst_52 {dimension_numbers = #tpu.dot_dimension_numbers<[1], [0], [0], [1], [0, 0, 1, 1], [], []>} : vector<16x32xf32>, vector<32x8xf32>, vector<16x8xf32> -> vector<16x8xf32>
    %c6 = arith.constant 6 : index
    %c0_53 = arith.constant 0 : index
    %c0_54 = arith.constant 0 : index
    %69 = vector.load %arg5[%c6, %c0_53, %c0_54] : memref<12x32x8xf32, #tpu.memory_space<vmem>>, vector<1x32x8xf32>
    %70 = vector.shape_cast %69 : vector<1x32x8xf32> to vector<32x8xf32>
    %cst_55 = arith.constant dense<0.000000e+00> : vector<16x8xf32>
    %71 = tpu.matmul %11, %70, %cst_55 {dimension_numbers = #tpu.dot_dimension_numbers<[1], [0], [0], [1], [0, 0, 1, 1], [], []>} : vector<16x32xf32>, vector<32x8xf32>, vector<16x8xf32> -> vector<16x8xf32>
    %c10 = arith.constant 10 : index
    %c0_56 = arith.constant 0 : index
    %c0_57 = arith.constant 0 : index
    %72 = vector.load %arg5[%c10, %c0_56, %c0_57] : memref<12x32x8xf32, #tpu.memory_space<vmem>>, vector<1x32x8xf32>
    %73 = vector.shape_cast %72 : vector<1x32x8xf32> to vector<32x8xf32>
    %cst_58 = arith.constant dense<0.000000e+00> : vector<16x8xf32>
    %74 = tpu.matmul %11, %73, %cst_58 {dimension_numbers = #tpu.dot_dimension_numbers<[1], [0], [0], [1], [0, 0, 1, 1], [], []>} : vector<16x32xf32>, vector<32x8xf32>, vector<16x8xf32> -> vector<16x8xf32>
    %cst_59 = arith.constant dense<0.000000e+00> : vector<16x16xf32>
    %75 = tpu.matmul %68, %71, %cst_59 {dimension_numbers = #tpu.dot_dimension_numbers<[1], [1], [0], [0], [0, 0, 1, 0], [], []>} : vector<16x8xf32>, vector<16x8xf32>, vector<16x16xf32> -> vector<16x16xf32>
    %cst_60 = arith.constant 0.353553385 : f32
    %76 = vector.broadcast %cst_60 : f32 to vector<16x16xf32>
    %77 = arith.mulf %75, %76 : vector<16x16xf32>
    %cst_61 = arith.constant dense<0xFF800000> : vector<16xf32>
    %78 = vector.multi_reduction <maximumf>, %77, %cst_61 [1] : vector<16x16xf32> to vector<16xf32>
    %79 = vector.shape_cast %78 : vector<16xf32> to vector<16x1xf32>
    %80 = vector.broadcast %79 : vector<16x1xf32> to vector<16x16xf32>
    %81 = arith.subf %77, %80 : vector<16x16xf32>
    %82 = math.exp %81 : vector<16x16xf32>
    %cst_62 = arith.constant dense<0.000000e+00> : vector<16xf32>
    %83 = vector.multi_reduction <add>, %82, %cst_62 [1] : vector<16x16xf32> to vector<16xf32>
    %84 = vector.shape_cast %83 : vector<16xf32> to vector<16x1xf32>
    %85 = vector.broadcast %84 : vector<16x1xf32> to vector<16x16xf32>
    %86 = arith.divf %82, %85 : vector<16x16xf32>
    %cst_63 = arith.constant dense<0.000000e+00> : vector<16x8xf32>
    %87 = tpu.matmul %86, %74, %cst_63 {dimension_numbers = #tpu.dot_dimension_numbers<[1], [0], [0], [1], [0, 0, 1, 1], [], []>} : vector<16x16xf32>, vector<16x8xf32>, vector<16x8xf32> -> vector<16x8xf32>
    %c2_64 = arith.constant 2 : index
    %c0_65 = arith.constant 0 : index
    %c0_66 = arith.constant 0 : index
    %88 = vector.load %arg6[%c2_64, %c0_65, %c0_66] : memref<4x8x32xf32, #tpu.memory_space<vmem>>, vector<1x8x32xf32>
    %89 = vector.shape_cast %88 : vector<1x8x32xf32> to vector<8x32xf32>
    %cst_67 = arith.constant dense<0.000000e+00> : vector<16x32xf32>
    %90 = tpu.matmul %87, %89, %cst_67 {dimension_numbers = #tpu.dot_dimension_numbers<[1], [0], [0], [1], [0, 0, 1, 1], [], []>} : vector<16x8xf32>, vector<8x32xf32>, vector<16x32xf32> -> vector<16x32xf32>
    %91 = arith.addf %65, %90 : vector<16x32xf32>
    %c3 = arith.constant 3 : index
    %c0_68 = arith.constant 0 : index
    %c0_69 = arith.constant 0 : index
    %92 = vector.load %arg5[%c3, %c0_68, %c0_69] : memref<12x32x8xf32, #tpu.memory_space<vmem>>, vector<1x32x8xf32>
    %93 = vector.shape_cast %92 : vector<1x32x8xf32> to vector<32x8xf32>
    %cst_70 = arith.constant dense<0.000000e+00> : vector<16x8xf32>
    %94 = tpu.matmul %11, %93, %cst_70 {dimension_numbers = #tpu.dot_dimension_numbers<[1], [0], [0], [1], [0, 0, 1, 1], [], []>} : vector<16x32xf32>, vector<32x8xf32>, vector<16x8xf32> -> vector<16x8xf32>
    %c7 = arith.constant 7 : index
    %c0_71 = arith.constant 0 : index
    %c0_72 = arith.constant 0 : index
    %95 = vector.load %arg5[%c7, %c0_71, %c0_72] : memref<12x32x8xf32, #tpu.memory_space<vmem>>, vector<1x32x8xf32>
    %96 = vector.shape_cast %95 : vector<1x32x8xf32> to vector<32x8xf32>
    %cst_73 = arith.constant dense<0.000000e+00> : vector<16x8xf32>
    %97 = tpu.matmul %11, %96, %cst_73 {dimension_numbers = #tpu.dot_dimension_numbers<[1], [0], [0], [1], [0, 0, 1, 1], [], []>} : vector<16x32xf32>, vector<32x8xf32>, vector<16x8xf32> -> vector<16x8xf32>
    %c11 = arith.constant 11 : index
    %c0_74 = arith.constant 0 : index
    %c0_75 = arith.constant 0 : index
    %98 = vector.load %arg5[%c11, %c0_74, %c0_75] : memref<12x32x8xf32, #tpu.memory_space<vmem>>, vector<1x32x8xf32>
    %99 = vector.shape_cast %98 : vector<1x32x8xf32> to vector<32x8xf32>
    %cst_76 = arith.constant dense<0.000000e+00> : vector<16x8xf32>
    %100 = tpu.matmul %11, %99, %cst_76 {dimension_numbers = #tpu.dot_dimension_numbers<[1], [0], [0], [1], [0, 0, 1, 1], [], []>} : vector<16x32xf32>, vector<32x8xf32>, vector<16x8xf32> -> vector<16x8xf32>
    %cst_77 = arith.constant dense<0.000000e+00> : vector<16x16xf32>
    %101 = tpu.matmul %94, %97, %cst_77 {dimension_numbers = #tpu.dot_dimension_numbers<[1], [1], [0], [0], [0, 0, 1, 0], [], []>} : vector<16x8xf32>, vector<16x8xf32>, vector<16x16xf32> -> vector<16x16xf32>
    %cst_78 = arith.constant 0.353553385 : f32
    %102 = vector.broadcast %cst_78 : f32 to vector<16x16xf32>
    %103 = arith.mulf %101, %102 : vector<16x16xf32>
    %cst_79 = arith.constant dense<0xFF800000> : vector<16xf32>
    %104 = vector.multi_reduction <maximumf>, %103, %cst_79 [1] : vector<16x16xf32> to vector<16xf32>
    %105 = vector.shape_cast %104 : vector<16xf32> to vector<16x1xf32>
    %106 = vector.broadcast %105 : vector<16x1xf32> to vector<16x16xf32>
    %107 = arith.subf %103, %106 : vector<16x16xf32>
    %108 = math.exp %107 : vector<16x16xf32>
    %cst_80 = arith.constant dense<0.000000e+00> : vector<16xf32>
    %109 = vector.multi_reduction <add>, %108, %cst_80 [1] : vector<16x16xf32> to vector<16xf32>
    %110 = vector.shape_cast %109 : vector<16xf32> to vector<16x1xf32>
    %111 = vector.broadcast %110 : vector<16x1xf32> to vector<16x16xf32>
    %112 = arith.divf %108, %111 : vector<16x16xf32>
    %cst_81 = arith.constant dense<0.000000e+00> : vector<16x8xf32>
    %113 = tpu.matmul %112, %100, %cst_81 {dimension_numbers = #tpu.dot_dimension_numbers<[1], [0], [0], [1], [0, 0, 1, 1], [], []>} : vector<16x16xf32>, vector<16x8xf32>, vector<16x8xf32> -> vector<16x8xf32>
    %c3_82 = arith.constant 3 : index
    %c0_83 = arith.constant 0 : index
    %c0_84 = arith.constant 0 : index
    %114 = vector.load %arg6[%c3_82, %c0_83, %c0_84] : memref<4x8x32xf32, #tpu.memory_space<vmem>>, vector<1x8x32xf32>
    %115 = vector.shape_cast %114 : vector<1x8x32xf32> to vector<8x32xf32>
    %cst_85 = arith.constant dense<0.000000e+00> : vector<16x32xf32>
    %116 = tpu.matmul %113, %115, %cst_85 {dimension_numbers = #tpu.dot_dimension_numbers<[1], [0], [0], [1], [0, 0, 1, 1], [], []>} : vector<16x8xf32>, vector<8x32xf32>, vector<16x32xf32> -> vector<16x32xf32>
    %117 = arith.addf %91, %116 : vector<16x32xf32>
    %118 = arith.addf %117, %11 : vector<16x32xf32>
    %c0_86 = arith.constant 0 : index
    %c0_87 = arith.constant 0 : index
    %119 = vector.load %arg8[%c0_86, %c0_87] : memref<1x32xf32, #tpu.memory_space<vmem>>, vector<1x32xf32>
    %c0_88 = arith.constant 0 : index
    %c0_89 = arith.constant 0 : index
    %120 = vector.load %arg9[%c0_88, %c0_89] : memref<1x32xf32, #tpu.memory_space<vmem>>, vector<1x32xf32>
    %cst_90 = arith.constant dense<0.000000e+00> : vector<16xf32>
    %121 = vector.multi_reduction <add>, %118, %cst_90 [1] : vector<16x32xf32> to vector<16xf32>
    %122 = vector.shape_cast %121 : vector<16xf32> to vector<16x1xf32>
    %cst_91 = arith.constant 3.200000e+01 : f32
    %123 = vector.broadcast %cst_91 : f32 to vector<16x1xf32>
    %124 = arith.divf %122, %123 : vector<16x1xf32>
    %125 = vector.broadcast %124 : vector<16x1xf32> to vector<16x32xf32>
    %126 = arith.subf %118, %125 : vector<16x32xf32>
    %127 = arith.mulf %126, %126 : vector<16x32xf32>
    %cst_92 = arith.constant dense<0.000000e+00> : vector<16xf32>
    %128 = vector.multi_reduction <add>, %127, %cst_92 [1] : vector<16x32xf32> to vector<16xf32>
    %129 = vector.shape_cast %128 : vector<16xf32> to vector<16x1xf32>
    %cst_93 = arith.constant 3.200000e+01 : f32
    %130 = vector.broadcast %cst_93 : f32 to vector<16x1xf32>
    %131 = arith.divf %129, %130 : vector<16x1xf32>
    %132 = vector.broadcast %124 : vector<16x1xf32> to vector<16x32xf32>
    %133 = arith.subf %118, %132 : vector<16x32xf32>
    %cst_94 = arith.constant 9.99999974E-6 : f32
    %134 = vector.broadcast %cst_94 : f32 to vector<16x1xf32>
    %135 = arith.addf %131, %134 : vector<16x1xf32>
    %136 = math.rsqrt %135 : vector<16x1xf32>
    %137 = vector.broadcast %136 : vector<16x1xf32> to vector<16x32xf32>
    %138 = arith.mulf %133, %137 : vector<16x32xf32>
    %139 = vector.broadcast %119 : vector<1x32xf32> to vector<16x32xf32>
    %140 = arith.mulf %138, %139 : vector<16x32xf32>
    %141 = vector.broadcast %120 : vector<1x32xf32> to vector<16x32xf32>
    %142 = arith.addf %140, %141 : vector<16x32xf32>
    %c0_95 = arith.constant 0 : index
    %c0_96 = arith.constant 0 : index
    %143 = vector.load %arg10[%c0_95, %c0_96] : memref<32x64xf32, #tpu.memory_space<vmem>>, vector<32x64xf32>
    %cst_97 = arith.constant dense<0.000000e+00> : vector<16x64xf32>
    %144 = tpu.matmul %142, %143, %cst_97 {dimension_numbers = #tpu.dot_dimension_numbers<[1], [0], [0], [1], [0, 0, 1, 1], [], []>} : vector<16x32xf32>, vector<32x64xf32>, vector<16x64xf32> -> vector<16x64xf32>
    %c0_98 = arith.constant 0 : index
    %c0_99 = arith.constant 0 : index
    %145 = vector.load %arg11[%c0_98, %c0_99] : memref<1x64xf32, #tpu.memory_space<vmem>>, vector<1x64xf32>
    %146 = vector.broadcast %145 : vector<1x64xf32> to vector<16x64xf32>
    %147 = arith.addf %144, %146 : vector<16x64xf32>
    %cst_100 = arith.constant 5.000000e-01 : f32
    %148 = vector.broadcast %cst_100 : f32 to vector<16x64xf32>
    %149 = arith.mulf %148, %147 : vector<16x64xf32>
    %cst_101 = arith.constant 4.471500e-02 : f32
    %150 = vector.broadcast %cst_101 : f32 to vector<16x64xf32>
    %151 = arith.mulf %150, %147 : vector<16x64xf32>
    %152 = arith.mulf %151, %147 : vector<16x64xf32>
    %153 = arith.mulf %152, %147 : vector<16x64xf32>
    %154 = arith.addf %147, %153 : vector<16x64xf32>
    %cst_102 = arith.constant 0.797884583 : f32
    %155 = vector.broadcast %cst_102 : f32 to vector<16x64xf32>
    %156 = arith.mulf %155, %154 : vector<16x64xf32>
    %157 = math.tanh %156 : vector<16x64xf32>
    %cst_103 = arith.constant 1.000000e+00 : f32
    %158 = vector.broadcast %cst_103 : f32 to vector<16x64xf32>
    %159 = arith.addf %158, %157 : vector<16x64xf32>
    %160 = arith.mulf %149, %159 : vector<16x64xf32>
    %c0_104 = arith.constant 0 : index
    %c0_105 = arith.constant 0 : index
    %161 = vector.load %arg12[%c0_104, %c0_105] : memref<64x32xf32, #tpu.memory_space<vmem>>, vector<64x32xf32>
    %cst_106 = arith.constant dense<0.000000e+00> : vector<16x32xf32>
    %162 = tpu.matmul %160, %161, %cst_106 {dimension_numbers = #tpu.dot_dimension_numbers<[1], [0], [0], [1], [0, 0, 1, 1], [], []>} : vector<16x64xf32>, vector<64x32xf32>, vector<16x32xf32> -> vector<16x32xf32>
    %c0_107 = arith.constant 0 : index
    %c0_108 = arith.constant 0 : index
    %163 = vector.load %arg13[%c0_107, %c0_108] : memref<1x32xf32, #tpu.memory_space<vmem>>, vector<1x32xf32>
    %164 = vector.broadcast %163 : vector<1x32xf32> to vector<16x32xf32>
    %165 = arith.addf %162, %164 : vector<16x32xf32>
    %166 = arith.addf %165, %142 : vector<16x32xf32>
    %c0_109 = arith.constant 0 : index
    %c0_110 = arith.constant 0 : index
    %167 = vector.load %arg8[%c0_109, %c0_110] : memref<1x32xf32, #tpu.memory_space<vmem>>, vector<1x32xf32>
    %c0_111 = arith.constant 0 : index
    %c0_112 = arith.constant 0 : index
    %168 = vector.load %arg9[%c0_111, %c0_112] : memref<1x32xf32, #tpu.memory_space<vmem>>, vector<1x32xf32>
    %cst_113 = arith.constant dense<0.000000e+00> : vector<16xf32>
    %169 = vector.multi_reduction <add>, %166, %cst_113 [1] : vector<16x32xf32> to vector<16xf32>
    %170 = vector.shape_cast %169 : vector<16xf32> to vector<16x1xf32>
    %cst_114 = arith.constant 3.200000e+01 : f32
    %171 = vector.broadcast %cst_114 : f32 to vector<16x1xf32>
    %172 = arith.divf %170, %171 : vector<16x1xf32>
    %173 = vector.broadcast %172 : vector<16x1xf32> to vector<16x32xf32>
    %174 = arith.subf %166, %173 : vector<16x32xf32>
    %175 = arith.mulf %174, %174 : vector<16x32xf32>
    %cst_115 = arith.constant dense<0.000000e+00> : vector<16xf32>
    %176 = vector.multi_reduction <add>, %175, %cst_115 [1] : vector<16x32xf32> to vector<16xf32>
    %177 = vector.shape_cast %176 : vector<16xf32> to vector<16x1xf32>
    %cst_116 = arith.constant 3.200000e+01 : f32
    %178 = vector.broadcast %cst_116 : f32 to vector<16x1xf32>
    %179 = arith.divf %177, %178 : vector<16x1xf32>
    %180 = vector.broadcast %172 : vector<16x1xf32> to vector<16x32xf32>
    %181 = arith.subf %166, %180 : vector<16x32xf32>
    %cst_117 = arith.constant 9.99999974E-6 : f32
    %182 = vector.broadcast %cst_117 : f32 to vector<16x1xf32>
    %183 = arith.addf %179, %182 : vector<16x1xf32>
    %184 = math.rsqrt %183 : vector<16x1xf32>
    %185 = vector.broadcast %184 : vector<16x1xf32> to vector<16x32xf32>
    %186 = arith.mulf %181, %185 : vector<16x32xf32>
    %187 = vector.broadcast %167 : vector<1x32xf32> to vector<16x32xf32>
    %188 = arith.mulf %186, %187 : vector<16x32xf32>
    %189 = vector.broadcast %168 : vector<1x32xf32> to vector<16x32xf32>
    %190 = arith.addf %188, %189 : vector<16x32xf32>
    %c0_118 = arith.constant 0 : index
    %c0_119 = arith.constant 0 : index
    %c0_120 = arith.constant 0 : index
    %191 = vector.load %arg14[%c0_118, %c0_119, %c0_120] : memref<1x16x32xf32, #tpu.memory_space<vmem>>, vector<1x16x32xf32>
    %192 = vector.shape_cast %191 : vector<1x16x32xf32> to vector<16x32xf32>
    %193 = vector.shape_cast %190 : vector<16x32xf32> to vector<1x16x32xf32>
    tpu.vector_store %arg14[%c0_118, %c0_119, %c0_120], %193 {strides = array<i32>} : memref<1x16x32xf32, #tpu.memory_space<vmem>>, vector<1x16x32xf32>,
    return
  }
  func.func @transform_0(%arg0: i32) -> (i32, i32, i32) {
    %c0_i32 = arith.constant 0 : i32
    %c0_i32_0 = arith.constant 0 : i32
    %c0_i32_1 = arith.constant 0 : i32
    return %arg0, %c0_i32, %c0_i32_0 : i32, i32, i32
  }
  func.func @transform_1(%arg0: i32) -> (i32, i32, i32) {
    %c0_i32 = arith.constant 0 : i32
    %c0_i32_0 = arith.constant 0 : i32
    %c0_i32_1 = arith.constant 0 : i32
    return %arg0, %c0_i32, %c0_i32_0 : i32, i32, i32
  }
  func.func @transform_2(%arg0: i32) -> (i32, i32) {
    %c0_i32 = arith.constant 0 : i32
    %c0_i32_0 = arith.constant 0 : i32
    %c0_i32_1 = arith.constant 0 : i32
    return %c0_i32, %c0_i32_0 : i32, i32
  }
  func.func @transform_3(%arg0: i32) -> (i32, i32) {
    %c0_i32 = arith.constant 0 : i32
    %c0_i32_0 = arith.constant 0 : i32
    %c0_i32_1 = arith.constant 0 : i32
    return %c0_i32, %c0_i32_0 : i32, i32
  }
  func.func @transform_4(%arg0: i32) -> (i32, i32, i32) {
    %c0_i32 = arith.constant 0 : i32
    %c0_i32_0 = arith.constant 0 : i32
    %c0_i32_1 = arith.constant 0 : i32
    %c0_i32_2 = arith.constant 0 : i32
    return %c0_i32, %c0_i32_0, %c0_i32_1 : i32, i32, i32
  }
  func.func @transform_5(%arg0: i32) -> (i32, i32, i32) {
    %c0_i32 = arith.constant 0 : i32
    %c0_i32_0 = arith.constant 0 : i32
    %c0_i32_1 = arith.constant 0 : i32
    %c0_i32_2 = arith.constant 0 : i32
    return %c0_i32, %c0_i32_0, %c0_i32_1 : i32, i32, i32
  }
  func.func @transform_6(%arg0: i32) -> (i32, i32) {
    %c0_i32 = arith.constant 0 : i32
    %c0_i32_0 = arith.constant 0 : i32
    %c0_i32_1 = arith.constant 0 : i32
    return %c0_i32, %c0_i32_0 : i32, i32
  }
  func.func @transform_7(%arg0: i32) -> (i32, i32) {
    %c0_i32 = arith.constant 0 : i32
    %c0_i32_0 = arith.constant 0 : i32
    %c0_i32_1 = arith.constant 0 : i32
    return %c0_i32, %c0_i32_0 : i32, i32
  }
  func.func @transform_8(%arg0: i32) -> (i32, i32) {
    %c0_i32 = arith.constant 0 : i32
    %c0_i32_0 = arith.constant 0 : i32
    %c0_i32_1 = arith.constant 0 : i32
    return %c0_i32, %c0_i32_0 : i32, i32
  }
  func.func @transform_9(%arg0: i32) -> (i32, i32) {
    %c0_i32 = arith.constant 0 : i32
    %c0_i32_0 = arith.constant 0 : i32
    %c0_i32_1 = arith.constant 0 : i32
    return %c0_i32, %c0_i32_0 : i32, i32
  }
  func.func @transform_10(%arg0: i32) -> (i32, i32) {
    %c0_i32 = arith.constant 0 : i32
    %c0_i32_0 = arith.constant 0 : i32
    %c0_i32_1 = arith.constant 0 : i32
    return %c0_i32, %c0_i32_0 : i32, i32
  }
  func.func @transform_11(%arg0: i32) -> (i32, i32) {
    %c0_i32 = arith.constant 0 : i32
    %c0_i32_0 = arith.constant 0 : i32
    %c0_i32_1 = arith.constant 0 : i32
    return %c0_i32, %c0_i32_0 : i32, i32
  }
  func.func @transform_12(%arg0: i32) -> (i32, i32) {
    %c0_i32 = arith.constant 0 : i32
    %c0_i32_0 = arith.constant 0 : i32
    %c0_i32_1 = arith.constant 0 : i32
    return %c0_i32, %c0_i32_0 : i32, i32
  }
  func.func @transform_13(%arg0: i32) -> (i32, i32, i32) {
    %c0_i32 = arith.constant 0 : i32
    %c0_i32_0 = arith.constant 0 : i32
    %c0_i32_1 = arith.constant 0 : i32
    return %arg0, %c0_i32, %c0_i32_0 : i32, i32, i32
  }
}

module attributes {stable_mosaic.version = 11 : i64} {
  func.func @_fused_layer_kernel(%arg0: i32, %arg1: memref<1x16x32xf32, #tpu.memory_space<vmem>>, %arg2: memref<12x32x8xf32, #tpu.memory_space<vmem>>, %arg3: memref<4x8x32xf32, #tpu.memory_space<vmem>>, %arg4: memref<1x32xf32, #tpu.memory_space<vmem>>, %arg5: memref<1x32xf32, #tpu.memory_space<vmem>>, %arg6: memref<1x32xf32, #tpu.memory_space<vmem>>, %arg7: memref<32x64xf32, #tpu.memory_space<vmem>>, %arg8: memref<1x64xf32, #tpu.memory_space<vmem>>, %arg9: memref<64x32xf32, #tpu.memory_space<vmem>>, %arg10: memref<1x32xf32, #tpu.memory_space<vmem>>, %arg11: memref<1x16x32xf32, #tpu.memory_space<vmem>>) attributes {dimension_semantics = [#tpu.dimension_semantics<parallel>], iteration_bounds = array<i64: 2>, scalar_prefetch = 0 : i64, scratch_operands = 0 : i64, tpu.core_type = #tpu.core_type<tc>, window_params = [{transform_indices = @transform_0, window_bounds = array<i64: 1, 16, 32>}, {pipeline_mode = #tpu.pipeline_mode<synchronous>, transform_indices = @transform_1, window_bounds = array<i64: 12, 32, 8>}, {pipeline_mode = #tpu.pipeline_mode<synchronous>, transform_indices = @transform_2, window_bounds = array<i64: 4, 8, 32>}, {pipeline_mode = #tpu.pipeline_mode<synchronous>, transform_indices = @transform_3, window_bounds = array<i64: 1, 32>}, {pipeline_mode = #tpu.pipeline_mode<synchronous>, transform_indices = @transform_4, window_bounds = array<i64: 1, 32>}, {pipeline_mode = #tpu.pipeline_mode<synchronous>, transform_indices = @transform_5, window_bounds = array<i64: 1, 32>}, {pipeline_mode = #tpu.pipeline_mode<synchronous>, transform_indices = @transform_6, window_bounds = array<i64: 32, 64>}, {pipeline_mode = #tpu.pipeline_mode<synchronous>, transform_indices = @transform_7, window_bounds = array<i64: 1, 64>}, {pipeline_mode = #tpu.pipeline_mode<synchronous>, transform_indices = @transform_8, window_bounds = array<i64: 64, 32>}, {pipeline_mode = #tpu.pipeline_mode<synchronous>, transform_indices = @transform_9, window_bounds = array<i64: 1, 32>}, {transform_indices = @transform_10, window_bounds = array<i64: 1, 16, 32>}]} {
    %c0 = arith.constant 0 : index
    %c0_0 = arith.constant 0 : index
    %c0_1 = arith.constant 0 : index
    %0 = vector.load %arg1[%c0, %c0_0, %c0_1] : memref<1x16x32xf32, #tpu.memory_space<vmem>>, vector<1x16x32xf32>
    %1 = vector.shape_cast %0 : vector<1x16x32xf32> to vector<16x32xf32>
    %c0_2 = arith.constant 0 : index
    %c0_3 = arith.constant 0 : index
    %2 = vector.load %arg4[%c0_2, %c0_3] : memref<1x32xf32, #tpu.memory_space<vmem>>, vector<1x32xf32>
    %c0_4 = arith.constant 0 : index
    %c0_5 = arith.constant 0 : index
    %c0_6 = arith.constant 0 : index
    %3 = vector.load %arg2[%c0_4, %c0_5, %c0_6] : memref<12x32x8xf32, #tpu.memory_space<vmem>>, vector<1x32x8xf32>
    %4 = vector.shape_cast %3 : vector<1x32x8xf32> to vector<32x8xf32>
    %cst = arith.constant dense<0.000000e+00> : vector<16x8xf32>
    %5 = tpu.matmul %1, %4, %cst {dimension_numbers = #tpu.dot_dimension_numbers<[1], [0], [0], [1], [0, 0, 1, 1], [], []>} : vector<16x32xf32>, vector<32x8xf32>, vector<16x8xf32> -> vector<16x8xf32>
    %c4 = arith.constant 4 : index
    %c0_7 = arith.constant 0 : index
    %c0_8 = arith.constant 0 : index
    %6 = vector.load %arg2[%c4, %c0_7, %c0_8] : memref<12x32x8xf32, #tpu.memory_space<vmem>>, vector<1x32x8xf32>
    %7 = vector.shape_cast %6 : vector<1x32x8xf32> to vector<32x8xf32>
    %cst_9 = arith.constant dense<0.000000e+00> : vector<16x8xf32>
    %8 = tpu.matmul %1, %7, %cst_9 {dimension_numbers = #tpu.dot_dimension_numbers<[1], [0], [0], [1], [0, 0, 1, 1], [], []>} : vector<16x32xf32>, vector<32x8xf32>, vector<16x8xf32> -> vector<16x8xf32>
    %c8 = arith.constant 8 : index
    %c0_10 = arith.constant 0 : index
    %c0_11 = arith.constant 0 : index
    %9 = vector.load %arg2[%c8, %c0_10, %c0_11] : memref<12x32x8xf32, #tpu.memory_space<vmem>>, vector<1x32x8xf32>
    %10 = vector.shape_cast %9 : vector<1x32x8xf32> to vector<32x8xf32>
    %cst_12 = arith.constant dense<0.000000e+00> : vector<16x8xf32>
    %11 = tpu.matmul %1, %10, %cst_12 {dimension_numbers = #tpu.dot_dimension_numbers<[1], [0], [0], [1], [0, 0, 1, 1], [], []>} : vector<16x32xf32>, vector<32x8xf32>, vector<16x8xf32> -> vector<16x8xf32>
    %cst_13 = arith.constant dense<0.000000e+00> : vector<16x16xf32>
    %12 = tpu.matmul %5, %8, %cst_13 {dimension_numbers = #tpu.dot_dimension_numbers<[1], [1], [0], [0], [0, 0, 1, 0], [], []>} : vector<16x8xf32>, vector<16x8xf32>, vector<16x16xf32> -> vector<16x16xf32>
    %cst_14 = arith.constant 0.353553385 : f32
    %13 = vector.broadcast %cst_14 : f32 to vector<16x16xf32>
    %14 = arith.mulf %12, %13 : vector<16x16xf32>
    %cst_15 = arith.constant dense<0xFF800000> : vector<16xf32>
    %15 = vector.multi_reduction <maximumf>, %14, %cst_15 [1] : vector<16x16xf32> to vector<16xf32>
    %16 = vector.shape_cast %15 : vector<16xf32> to vector<16x1xf32>
    %17 = vector.broadcast %16 : vector<16x1xf32> to vector<16x16xf32>
    %18 = arith.subf %14, %17 : vector<16x16xf32>
    %19 = math.exp %18 : vector<16x16xf32>
    %cst_16 = arith.constant dense<0.000000e+00> : vector<16xf32>
    %20 = vector.multi_reduction <add>, %19, %cst_16 [1] : vector<16x16xf32> to vector<16xf32>
    %21 = vector.shape_cast %20 : vector<16xf32> to vector<16x1xf32>
    %22 = vector.broadcast %21 : vector<16x1xf32> to vector<16x16xf32>
    %23 = arith.divf %19, %22 : vector<16x16xf32>
    %cst_17 = arith.constant dense<0.000000e+00> : vector<16x8xf32>
    %24 = tpu.matmul %23, %11, %cst_17 {dimension_numbers = #tpu.dot_dimension_numbers<[1], [0], [0], [1], [0, 0, 1, 1], [], []>} : vector<16x16xf32>, vector<16x8xf32>, vector<16x8xf32> -> vector<16x8xf32>
    %c0_18 = arith.constant 0 : index
    %c0_19 = arith.constant 0 : index
    %c0_20 = arith.constant 0 : index
    %25 = vector.load %arg3[%c0_18, %c0_19, %c0_20] : memref<4x8x32xf32, #tpu.memory_space<vmem>>, vector<1x8x32xf32>
    %26 = vector.shape_cast %25 : vector<1x8x32xf32> to vector<8x32xf32>
    %cst_21 = arith.constant dense<0.000000e+00> : vector<16x32xf32>
    %27 = tpu.matmul %24, %26, %cst_21 {dimension_numbers = #tpu.dot_dimension_numbers<[1], [0], [0], [1], [0, 0, 1, 1], [], []>} : vector<16x8xf32>, vector<8x32xf32>, vector<16x32xf32> -> vector<16x32xf32>
    %28 = vector.broadcast %2 : vector<1x32xf32> to vector<16x32xf32>
    %29 = arith.addf %28, %27 : vector<16x32xf32>
    %c1 = arith.constant 1 : index
    %c0_22 = arith.constant 0 : index
    %c0_23 = arith.constant 0 : index
    %30 = vector.load %arg2[%c1, %c0_22, %c0_23] : memref<12x32x8xf32, #tpu.memory_space<vmem>>, vector<1x32x8xf32>
    %31 = vector.shape_cast %30 : vector<1x32x8xf32> to vector<32x8xf32>
    %cst_24 = arith.constant dense<0.000000e+00> : vector<16x8xf32>
    %32 = tpu.matmul %1, %31, %cst_24 {dimension_numbers = #tpu.dot_dimension_numbers<[1], [0], [0], [1], [0, 0, 1, 1], [], []>} : vector<16x32xf32>, vector<32x8xf32>, vector<16x8xf32> -> vector<16x8xf32>
    %c5 = arith.constant 5 : index
    %c0_25 = arith.constant 0 : index
    %c0_26 = arith.constant 0 : index
    %33 = vector.load %arg2[%c5, %c0_25, %c0_26] : memref<12x32x8xf32, #tpu.memory_space<vmem>>, vector<1x32x8xf32>
    %34 = vector.shape_cast %33 : vector<1x32x8xf32> to vector<32x8xf32>
    %cst_27 = arith.constant dense<0.000000e+00> : vector<16x8xf32>
    %35 = tpu.matmul %1, %34, %cst_27 {dimension_numbers = #tpu.dot_dimension_numbers<[1], [0], [0], [1], [0, 0, 1, 1], [], []>} : vector<16x32xf32>, vector<32x8xf32>, vector<16x8xf32> -> vector<16x8xf32>
    %c9 = arith.constant 9 : index
    %c0_28 = arith.constant 0 : index
    %c0_29 = arith.constant 0 : index
    %36 = vector.load %arg2[%c9, %c0_28, %c0_29] : memref<12x32x8xf32, #tpu.memory_space<vmem>>, vector<1x32x8xf32>
    %37 = vector.shape_cast %36 : vector<1x32x8xf32> to vector<32x8xf32>
    %cst_30 = arith.constant dense<0.000000e+00> : vector<16x8xf32>
    %38 = tpu.matmul %1, %37, %cst_30 {dimension_numbers = #tpu.dot_dimension_numbers<[1], [0], [0], [1], [0, 0, 1, 1], [], []>} : vector<16x32xf32>, vector<32x8xf32>, vector<16x8xf32> -> vector<16x8xf32>
    %cst_31 = arith.constant dense<0.000000e+00> : vector<16x16xf32>
    %39 = tpu.matmul %32, %35, %cst_31 {dimension_numbers = #tpu.dot_dimension_numbers<[1], [1], [0], [0], [0, 0, 1, 0], [], []>} : vector<16x8xf32>, vector<16x8xf32>, vector<16x16xf32> -> vector<16x16xf32>
    %cst_32 = arith.constant 0.353553385 : f32
    %40 = vector.broadcast %cst_32 : f32 to vector<16x16xf32>
    %41 = arith.mulf %39, %40 : vector<16x16xf32>
    %cst_33 = arith.constant dense<0xFF800000> : vector<16xf32>
    %42 = vector.multi_reduction <maximumf>, %41, %cst_33 [1] : vector<16x16xf32> to vector<16xf32>
    %43 = vector.shape_cast %42 : vector<16xf32> to vector<16x1xf32>
    %44 = vector.broadcast %43 : vector<16x1xf32> to vector<16x16xf32>
    %45 = arith.subf %41, %44 : vector<16x16xf32>
    %46 = math.exp %45 : vector<16x16xf32>
    %cst_34 = arith.constant dense<0.000000e+00> : vector<16xf32>
    %47 = vector.multi_reduction <add>, %46, %cst_34 [1] : vector<16x16xf32> to vector<16xf32>
    %48 = vector.shape_cast %47 : vector<16xf32> to vector<16x1xf32>
    %49 = vector.broadcast %48 : vector<16x1xf32> to vector<16x16xf32>
    %50 = arith.divf %46, %49 : vector<16x16xf32>
    %cst_35 = arith.constant dense<0.000000e+00> : vector<16x8xf32>
    %51 = tpu.matmul %50, %38, %cst_35 {dimension_numbers = #tpu.dot_dimension_numbers<[1], [0], [0], [1], [0, 0, 1, 1], [], []>} : vector<16x16xf32>, vector<16x8xf32>, vector<16x8xf32> -> vector<16x8xf32>
    %c1_36 = arith.constant 1 : index
    %c0_37 = arith.constant 0 : index
    %c0_38 = arith.constant 0 : index
    %52 = vector.load %arg3[%c1_36, %c0_37, %c0_38] : memref<4x8x32xf32, #tpu.memory_space<vmem>>, vector<1x8x32xf32>
    %53 = vector.shape_cast %52 : vector<1x8x32xf32> to vector<8x32xf32>
    %cst_39 = arith.constant dense<0.000000e+00> : vector<16x32xf32>
    %54 = tpu.matmul %51, %53, %cst_39 {dimension_numbers = #tpu.dot_dimension_numbers<[1], [0], [0], [1], [0, 0, 1, 1], [], []>} : vector<16x8xf32>, vector<8x32xf32>, vector<16x32xf32> -> vector<16x32xf32>
    %55 = arith.addf %29, %54 : vector<16x32xf32>
    %c2 = arith.constant 2 : index
    %c0_40 = arith.constant 0 : index
    %c0_41 = arith.constant 0 : index
    %56 = vector.load %arg2[%c2, %c0_40, %c0_41] : memref<12x32x8xf32, #tpu.memory_space<vmem>>, vector<1x32x8xf32>
    %57 = vector.shape_cast %56 : vector<1x32x8xf32> to vector<32x8xf32>
    %cst_42 = arith.constant dense<0.000000e+00> : vector<16x8xf32>
    %58 = tpu.matmul %1, %57, %cst_42 {dimension_numbers = #tpu.dot_dimension_numbers<[1], [0], [0], [1], [0, 0, 1, 1], [], []>} : vector<16x32xf32>, vector<32x8xf32>, vector<16x8xf32> -> vector<16x8xf32>
    %c6 = arith.constant 6 : index
    %c0_43 = arith.constant 0 : index
    %c0_44 = arith.constant 0 : index
    %59 = vector.load %arg2[%c6, %c0_43, %c0_44] : memref<12x32x8xf32, #tpu.memory_space<vmem>>, vector<1x32x8xf32>
    %60 = vector.shape_cast %59 : vector<1x32x8xf32> to vector<32x8xf32>
    %cst_45 = arith.constant dense<0.000000e+00> : vector<16x8xf32>
    %61 = tpu.matmul %1, %60, %cst_45 {dimension_numbers = #tpu.dot_dimension_numbers<[1], [0], [0], [1], [0, 0, 1, 1], [], []>} : vector<16x32xf32>, vector<32x8xf32>, vector<16x8xf32> -> vector<16x8xf32>
    %c10 = arith.constant 10 : index
    %c0_46 = arith.constant 0 : index
    %c0_47 = arith.constant 0 : index
    %62 = vector.load %arg2[%c10, %c0_46, %c0_47] : memref<12x32x8xf32, #tpu.memory_space<vmem>>, vector<1x32x8xf32>
    %63 = vector.shape_cast %62 : vector<1x32x8xf32> to vector<32x8xf32>
    %cst_48 = arith.constant dense<0.000000e+00> : vector<16x8xf32>
    %64 = tpu.matmul %1, %63, %cst_48 {dimension_numbers = #tpu.dot_dimension_numbers<[1], [0], [0], [1], [0, 0, 1, 1], [], []>} : vector<16x32xf32>, vector<32x8xf32>, vector<16x8xf32> -> vector<16x8xf32>
    %cst_49 = arith.constant dense<0.000000e+00> : vector<16x16xf32>
    %65 = tpu.matmul %58, %61, %cst_49 {dimension_numbers = #tpu.dot_dimension_numbers<[1], [1], [0], [0], [0, 0, 1, 0], [], []>} : vector<16x8xf32>, vector<16x8xf32>, vector<16x16xf32> -> vector<16x16xf32>
    %cst_50 = arith.constant 0.353553385 : f32
    %66 = vector.broadcast %cst_50 : f32 to vector<16x16xf32>
    %67 = arith.mulf %65, %66 : vector<16x16xf32>
    %cst_51 = arith.constant dense<0xFF800000> : vector<16xf32>
    %68 = vector.multi_reduction <maximumf>, %67, %cst_51 [1] : vector<16x16xf32> to vector<16xf32>
    %69 = vector.shape_cast %68 : vector<16xf32> to vector<16x1xf32>
    %70 = vector.broadcast %69 : vector<16x1xf32> to vector<16x16xf32>
    %71 = arith.subf %67, %70 : vector<16x16xf32>
    %72 = math.exp %71 : vector<16x16xf32>
    %cst_52 = arith.constant dense<0.000000e+00> : vector<16xf32>
    %73 = vector.multi_reduction <add>, %72, %cst_52 [1] : vector<16x16xf32> to vector<16xf32>
    %74 = vector.shape_cast %73 : vector<16xf32> to vector<16x1xf32>
    %75 = vector.broadcast %74 : vector<16x1xf32> to vector<16x16xf32>
    %76 = arith.divf %72, %75 : vector<16x16xf32>
    %cst_53 = arith.constant dense<0.000000e+00> : vector<16x8xf32>
    %77 = tpu.matmul %76, %64, %cst_53 {dimension_numbers = #tpu.dot_dimension_numbers<[1], [0], [0], [1], [0, 0, 1, 1], [], []>} : vector<16x16xf32>, vector<16x8xf32>, vector<16x8xf32> -> vector<16x8xf32>
    %c2_54 = arith.constant 2 : index
    %c0_55 = arith.constant 0 : index
    %c0_56 = arith.constant 0 : index
    %78 = vector.load %arg3[%c2_54, %c0_55, %c0_56] : memref<4x8x32xf32, #tpu.memory_space<vmem>>, vector<1x8x32xf32>
    %79 = vector.shape_cast %78 : vector<1x8x32xf32> to vector<8x32xf32>
    %cst_57 = arith.constant dense<0.000000e+00> : vector<16x32xf32>
    %80 = tpu.matmul %77, %79, %cst_57 {dimension_numbers = #tpu.dot_dimension_numbers<[1], [0], [0], [1], [0, 0, 1, 1], [], []>} : vector<16x8xf32>, vector<8x32xf32>, vector<16x32xf32> -> vector<16x32xf32>
    %81 = arith.addf %55, %80 : vector<16x32xf32>
    %c3 = arith.constant 3 : index
    %c0_58 = arith.constant 0 : index
    %c0_59 = arith.constant 0 : index
    %82 = vector.load %arg2[%c3, %c0_58, %c0_59] : memref<12x32x8xf32, #tpu.memory_space<vmem>>, vector<1x32x8xf32>
    %83 = vector.shape_cast %82 : vector<1x32x8xf32> to vector<32x8xf32>
    %cst_60 = arith.constant dense<0.000000e+00> : vector<16x8xf32>
    %84 = tpu.matmul %1, %83, %cst_60 {dimension_numbers = #tpu.dot_dimension_numbers<[1], [0], [0], [1], [0, 0, 1, 1], [], []>} : vector<16x32xf32>, vector<32x8xf32>, vector<16x8xf32> -> vector<16x8xf32>
    %c7 = arith.constant 7 : index
    %c0_61 = arith.constant 0 : index
    %c0_62 = arith.constant 0 : index
    %85 = vector.load %arg2[%c7, %c0_61, %c0_62] : memref<12x32x8xf32, #tpu.memory_space<vmem>>, vector<1x32x8xf32>
    %86 = vector.shape_cast %85 : vector<1x32x8xf32> to vector<32x8xf32>
    %cst_63 = arith.constant dense<0.000000e+00> : vector<16x8xf32>
    %87 = tpu.matmul %1, %86, %cst_63 {dimension_numbers = #tpu.dot_dimension_numbers<[1], [0], [0], [1], [0, 0, 1, 1], [], []>} : vector<16x32xf32>, vector<32x8xf32>, vector<16x8xf32> -> vector<16x8xf32>
    %c11 = arith.constant 11 : index
    %c0_64 = arith.constant 0 : index
    %c0_65 = arith.constant 0 : index
    %88 = vector.load %arg2[%c11, %c0_64, %c0_65] : memref<12x32x8xf32, #tpu.memory_space<vmem>>, vector<1x32x8xf32>
    %89 = vector.shape_cast %88 : vector<1x32x8xf32> to vector<32x8xf32>
    %cst_66 = arith.constant dense<0.000000e+00> : vector<16x8xf32>
    %90 = tpu.matmul %1, %89, %cst_66 {dimension_numbers = #tpu.dot_dimension_numbers<[1], [0], [0], [1], [0, 0, 1, 1], [], []>} : vector<16x32xf32>, vector<32x8xf32>, vector<16x8xf32> -> vector<16x8xf32>
    %cst_67 = arith.constant dense<0.000000e+00> : vector<16x16xf32>
    %91 = tpu.matmul %84, %87, %cst_67 {dimension_numbers = #tpu.dot_dimension_numbers<[1], [1], [0], [0], [0, 0, 1, 0], [], []>} : vector<16x8xf32>, vector<16x8xf32>, vector<16x16xf32> -> vector<16x16xf32>
    %cst_68 = arith.constant 0.353553385 : f32
    %92 = vector.broadcast %cst_68 : f32 to vector<16x16xf32>
    %93 = arith.mulf %91, %92 : vector<16x16xf32>
    %cst_69 = arith.constant dense<0xFF800000> : vector<16xf32>
    %94 = vector.multi_reduction <maximumf>, %93, %cst_69 [1] : vector<16x16xf32> to vector<16xf32>
    %95 = vector.shape_cast %94 : vector<16xf32> to vector<16x1xf32>
    %96 = vector.broadcast %95 : vector<16x1xf32> to vector<16x16xf32>
    %97 = arith.subf %93, %96 : vector<16x16xf32>
    %98 = math.exp %97 : vector<16x16xf32>
    %cst_70 = arith.constant dense<0.000000e+00> : vector<16xf32>
    %99 = vector.multi_reduction <add>, %98, %cst_70 [1] : vector<16x16xf32> to vector<16xf32>
    %100 = vector.shape_cast %99 : vector<16xf32> to vector<16x1xf32>
    %101 = vector.broadcast %100 : vector<16x1xf32> to vector<16x16xf32>
    %102 = arith.divf %98, %101 : vector<16x16xf32>
    %cst_71 = arith.constant dense<0.000000e+00> : vector<16x8xf32>
    %103 = tpu.matmul %102, %90, %cst_71 {dimension_numbers = #tpu.dot_dimension_numbers<[1], [0], [0], [1], [0, 0, 1, 1], [], []>} : vector<16x16xf32>, vector<16x8xf32>, vector<16x8xf32> -> vector<16x8xf32>
    %c3_72 = arith.constant 3 : index
    %c0_73 = arith.constant 0 : index
    %c0_74 = arith.constant 0 : index
    %104 = vector.load %arg3[%c3_72, %c0_73, %c0_74] : memref<4x8x32xf32, #tpu.memory_space<vmem>>, vector<1x8x32xf32>
    %105 = vector.shape_cast %104 : vector<1x8x32xf32> to vector<8x32xf32>
    %cst_75 = arith.constant dense<0.000000e+00> : vector<16x32xf32>
    %106 = tpu.matmul %103, %105, %cst_75 {dimension_numbers = #tpu.dot_dimension_numbers<[1], [0], [0], [1], [0, 0, 1, 1], [], []>} : vector<16x8xf32>, vector<8x32xf32>, vector<16x32xf32> -> vector<16x32xf32>
    %107 = arith.addf %81, %106 : vector<16x32xf32>
    %108 = arith.addf %107, %1 : vector<16x32xf32>
    %c0_76 = arith.constant 0 : index
    %c0_77 = arith.constant 0 : index
    %109 = vector.load %arg5[%c0_76, %c0_77] : memref<1x32xf32, #tpu.memory_space<vmem>>, vector<1x32xf32>
    %c0_78 = arith.constant 0 : index
    %c0_79 = arith.constant 0 : index
    %110 = vector.load %arg6[%c0_78, %c0_79] : memref<1x32xf32, #tpu.memory_space<vmem>>, vector<1x32xf32>
    %cst_80 = arith.constant dense<0.000000e+00> : vector<16xf32>
    %111 = vector.multi_reduction <add>, %108, %cst_80 [1] : vector<16x32xf32> to vector<16xf32>
    %112 = vector.shape_cast %111 : vector<16xf32> to vector<16x1xf32>
    %cst_81 = arith.constant 3.200000e+01 : f32
    %113 = vector.broadcast %cst_81 : f32 to vector<16x1xf32>
    %114 = arith.divf %112, %113 : vector<16x1xf32>
    %115 = vector.broadcast %114 : vector<16x1xf32> to vector<16x32xf32>
    %116 = arith.subf %108, %115 : vector<16x32xf32>
    %117 = arith.mulf %116, %116 : vector<16x32xf32>
    %cst_82 = arith.constant dense<0.000000e+00> : vector<16xf32>
    %118 = vector.multi_reduction <add>, %117, %cst_82 [1] : vector<16x32xf32> to vector<16xf32>
    %119 = vector.shape_cast %118 : vector<16xf32> to vector<16x1xf32>
    %cst_83 = arith.constant 3.200000e+01 : f32
    %120 = vector.broadcast %cst_83 : f32 to vector<16x1xf32>
    %121 = arith.divf %119, %120 : vector<16x1xf32>
    %122 = vector.broadcast %114 : vector<16x1xf32> to vector<16x32xf32>
    %123 = arith.subf %108, %122 : vector<16x32xf32>
    %cst_84 = arith.constant 9.99999974E-6 : f32
    %124 = vector.broadcast %cst_84 : f32 to vector<16x1xf32>
    %125 = arith.addf %121, %124 : vector<16x1xf32>
    %126 = math.rsqrt %125 : vector<16x1xf32>
    %127 = vector.broadcast %126 : vector<16x1xf32> to vector<16x32xf32>
    %128 = arith.mulf %123, %127 : vector<16x32xf32>
    %129 = vector.broadcast %109 : vector<1x32xf32> to vector<16x32xf32>
    %130 = arith.mulf %128, %129 : vector<16x32xf32>
    %131 = vector.broadcast %110 : vector<1x32xf32> to vector<16x32xf32>
    %132 = arith.addf %130, %131 : vector<16x32xf32>
    %c0_85 = arith.constant 0 : index
    %c0_86 = arith.constant 0 : index
    %133 = vector.load %arg7[%c0_85, %c0_86] : memref<32x64xf32, #tpu.memory_space<vmem>>, vector<32x64xf32>
    %cst_87 = arith.constant dense<0.000000e+00> : vector<16x64xf32>
    %134 = tpu.matmul %132, %133, %cst_87 {dimension_numbers = #tpu.dot_dimension_numbers<[1], [0], [0], [1], [0, 0, 1, 1], [], []>} : vector<16x32xf32>, vector<32x64xf32>, vector<16x64xf32> -> vector<16x64xf32>
    %c0_88 = arith.constant 0 : index
    %c0_89 = arith.constant 0 : index
    %135 = vector.load %arg8[%c0_88, %c0_89] : memref<1x64xf32, #tpu.memory_space<vmem>>, vector<1x64xf32>
    %136 = vector.broadcast %135 : vector<1x64xf32> to vector<16x64xf32>
    %137 = arith.addf %134, %136 : vector<16x64xf32>
    %cst_90 = arith.constant 5.000000e-01 : f32
    %138 = vector.broadcast %cst_90 : f32 to vector<16x64xf32>
    %139 = arith.mulf %138, %137 : vector<16x64xf32>
    %cst_91 = arith.constant 4.471500e-02 : f32
    %140 = vector.broadcast %cst_91 : f32 to vector<16x64xf32>
    %141 = arith.mulf %140, %137 : vector<16x64xf32>
    %142 = arith.mulf %141, %137 : vector<16x64xf32>
    %143 = arith.mulf %142, %137 : vector<16x64xf32>
    %144 = arith.addf %137, %143 : vector<16x64xf32>
    %cst_92 = arith.constant 0.797884583 : f32
    %145 = vector.broadcast %cst_92 : f32 to vector<16x64xf32>
    %146 = arith.mulf %145, %144 : vector<16x64xf32>
    %147 = math.tanh %146 : vector<16x64xf32>
    %cst_93 = arith.constant 1.000000e+00 : f32
    %148 = vector.broadcast %cst_93 : f32 to vector<16x64xf32>
    %149 = arith.addf %148, %147 : vector<16x64xf32>
    %150 = arith.mulf %139, %149 : vector<16x64xf32>
    %c0_94 = arith.constant 0 : index
    %c0_95 = arith.constant 0 : index
    %151 = vector.load %arg9[%c0_94, %c0_95] : memref<64x32xf32, #tpu.memory_space<vmem>>, vector<64x32xf32>
    %cst_96 = arith.constant dense<0.000000e+00> : vector<16x32xf32>
    %152 = tpu.matmul %150, %151, %cst_96 {dimension_numbers = #tpu.dot_dimension_numbers<[1], [0], [0], [1], [0, 0, 1, 1], [], []>} : vector<16x64xf32>, vector<64x32xf32>, vector<16x32xf32> -> vector<16x32xf32>
    %c0_97 = arith.constant 0 : index
    %c0_98 = arith.constant 0 : index
    %153 = vector.load %arg10[%c0_97, %c0_98] : memref<1x32xf32, #tpu.memory_space<vmem>>, vector<1x32xf32>
    %154 = vector.broadcast %153 : vector<1x32xf32> to vector<16x32xf32>
    %155 = arith.addf %152, %154 : vector<16x32xf32>
    %156 = arith.addf %155, %132 : vector<16x32xf32>
    %c0_99 = arith.constant 0 : index
    %c0_100 = arith.constant 0 : index
    %157 = vector.load %arg5[%c0_99, %c0_100] : memref<1x32xf32, #tpu.memory_space<vmem>>, vector<1x32xf32>
    %c0_101 = arith.constant 0 : index
    %c0_102 = arith.constant 0 : index
    %158 = vector.load %arg6[%c0_101, %c0_102] : memref<1x32xf32, #tpu.memory_space<vmem>>, vector<1x32xf32>
    %cst_103 = arith.constant dense<0.000000e+00> : vector<16xf32>
    %159 = vector.multi_reduction <add>, %156, %cst_103 [1] : vector<16x32xf32> to vector<16xf32>
    %160 = vector.shape_cast %159 : vector<16xf32> to vector<16x1xf32>
    %cst_104 = arith.constant 3.200000e+01 : f32
    %161 = vector.broadcast %cst_104 : f32 to vector<16x1xf32>
    %162 = arith.divf %160, %161 : vector<16x1xf32>
    %163 = vector.broadcast %162 : vector<16x1xf32> to vector<16x32xf32>
    %164 = arith.subf %156, %163 : vector<16x32xf32>
    %165 = arith.mulf %164, %164 : vector<16x32xf32>
    %cst_105 = arith.constant dense<0.000000e+00> : vector<16xf32>
    %166 = vector.multi_reduction <add>, %165, %cst_105 [1] : vector<16x32xf32> to vector<16xf32>
    %167 = vector.shape_cast %166 : vector<16xf32> to vector<16x1xf32>
    %cst_106 = arith.constant 3.200000e+01 : f32
    %168 = vector.broadcast %cst_106 : f32 to vector<16x1xf32>
    %169 = arith.divf %167, %168 : vector<16x1xf32>
    %170 = vector.broadcast %162 : vector<16x1xf32> to vector<16x32xf32>
    %171 = arith.subf %156, %170 : vector<16x32xf32>
    %cst_107 = arith.constant 9.99999974E-6 : f32
    %172 = vector.broadcast %cst_107 : f32 to vector<16x1xf32>
    %173 = arith.addf %169, %172 : vector<16x1xf32>
    %174 = math.rsqrt %173 : vector<16x1xf32>
    %175 = vector.broadcast %174 : vector<16x1xf32> to vector<16x32xf32>
    %176 = arith.mulf %171, %175 : vector<16x32xf32>
    %177 = vector.broadcast %157 : vector<1x32xf32> to vector<16x32xf32>
    %178 = arith.mulf %176, %177 : vector<16x32xf32>
    %179 = vector.broadcast %158 : vector<1x32xf32> to vector<16x32xf32>
    %180 = arith.addf %178, %179 : vector<16x32xf32>
    %c0_108 = arith.constant 0 : index
    %c0_109 = arith.constant 0 : index
    %c0_110 = arith.constant 0 : index
    %181 = vector.load %arg11[%c0_108, %c0_109, %c0_110] : memref<1x16x32xf32, #tpu.memory_space<vmem>>, vector<1x16x32xf32>
    %182 = vector.shape_cast %181 : vector<1x16x32xf32> to vector<16x32xf32>
    %183 = vector.shape_cast %180 : vector<16x32xf32> to vector<1x16x32xf32>
    tpu.vector_store %arg11[%c0_108, %c0_109, %c0_110], %183 {strides = array<i32>} : memref<1x16x32xf32, #tpu.memory_space<vmem>>, vector<1x16x32xf32>,
    return
  }
  func.func @transform_0(%arg0: i32) -> (i32, i32, i32) {
    %c0_i32 = arith.constant 0 : i32
    %c0_i32_0 = arith.constant 0 : i32
    %c0_i32_1 = arith.constant 0 : i32
    return %arg0, %c0_i32, %c0_i32_0 : i32, i32, i32
  }
  func.func @transform_1(%arg0: i32) -> (i32, i32, i32) {
    %c0_i32 = arith.constant 0 : i32
    %c0_i32_0 = arith.constant 0 : i32
    %c0_i32_1 = arith.constant 0 : i32
    %c0_i32_2 = arith.constant 0 : i32
    return %c0_i32, %c0_i32_0, %c0_i32_1 : i32, i32, i32
  }
  func.func @transform_2(%arg0: i32) -> (i32, i32, i32) {
    %c0_i32 = arith.constant 0 : i32
    %c0_i32_0 = arith.constant 0 : i32
    %c0_i32_1 = arith.constant 0 : i32
    %c0_i32_2 = arith.constant 0 : i32
    return %c0_i32, %c0_i32_0, %c0_i32_1 : i32, i32, i32
  }
  func.func @transform_3(%arg0: i32) -> (i32, i32) {
    %c0_i32 = arith.constant 0 : i32
    %c0_i32_0 = arith.constant 0 : i32
    %c0_i32_1 = arith.constant 0 : i32
    return %c0_i32, %c0_i32_0 : i32, i32
  }
  func.func @transform_4(%arg0: i32) -> (i32, i32) {
    %c0_i32 = arith.constant 0 : i32
    %c0_i32_0 = arith.constant 0 : i32
    %c0_i32_1 = arith.constant 0 : i32
    return %c0_i32, %c0_i32_0 : i32, i32
  }
  func.func @transform_5(%arg0: i32) -> (i32, i32) {
    %c0_i32 = arith.constant 0 : i32
    %c0_i32_0 = arith.constant 0 : i32
    %c0_i32_1 = arith.constant 0 : i32
    return %c0_i32, %c0_i32_0 : i32, i32
  }
  func.func @transform_6(%arg0: i32) -> (i32, i32) {
    %c0_i32 = arith.constant 0 : i32
    %c0_i32_0 = arith.constant 0 : i32
    %c0_i32_1 = arith.constant 0 : i32
    return %c0_i32, %c0_i32_0 : i32, i32
  }
  func.func @transform_7(%arg0: i32) -> (i32, i32) {
    %c0_i32 = arith.constant 0 : i32
    %c0_i32_0 = arith.constant 0 : i32
    %c0_i32_1 = arith.constant 0 : i32
    return %c0_i32, %c0_i32_0 : i32, i32
  }
  func.func @transform_8(%arg0: i32) -> (i32, i32) {
    %c0_i32 = arith.constant 0 : i32
    %c0_i32_0 = arith.constant 0 : i32
    %c0_i32_1 = arith.constant 0 : i32
    return %c0_i32, %c0_i32_0 : i32, i32
  }
  func.func @transform_9(%arg0: i32) -> (i32, i32) {
    %c0_i32 = arith.constant 0 : i32
    %c0_i32_0 = arith.constant 0 : i32
    %c0_i32_1 = arith.constant 0 : i32
    return %c0_i32, %c0_i32_0 : i32, i32
  }
  func.func @transform_10(%arg0: i32) -> (i32, i32, i32) {
    %c0_i32 = arith.constant 0 : i32
    %c0_i32_0 = arith.constant 0 : i32
    %c0_i32_1 = arith.constant 0 : i32
    return %arg0, %c0_i32, %c0_i32_0 : i32, i32, i32
  }
}

module attributes {stable_mosaic.version = 11 : i64} {
  func.func @_fused_layer_kernel(%arg0: i32, %arg1: memref<1x16x32xf32, #tpu.memory_space<vmem>>, %arg2: memref<1x16x32xf32, #tpu.memory_space<vmem>>, %arg3: memref<1x16x32xf32, #tpu.memory_space<vmem>>, %arg4: memref<96x32xf32, #tpu.memory_space<vmem>>, %arg5: memref<1x32xf32, #tpu.memory_space<vmem>>, %arg6: memref<12x32x8xf32, #tpu.memory_space<vmem>>, %arg7: memref<4x8x32xf32, #tpu.memory_space<vmem>>, %arg8: memref<1x32xf32, #tpu.memory_space<vmem>>, %arg9: memref<1x32xf32, #tpu.memory_space<vmem>>, %arg10: memref<1x32xf32, #tpu.memory_space<vmem>>, %arg11: memref<32x64xf32, #tpu.memory_space<vmem>>, %arg12: memref<1x64xf32, #tpu.memory_space<vmem>>, %arg13: memref<64x32xf32, #tpu.memory_space<vmem>>, %arg14: memref<1x32xf32, #tpu.memory_space<vmem>>, %arg15: memref<1x16x32xf32, #tpu.memory_space<vmem>>) attributes {dimension_semantics = [#tpu.dimension_semantics<parallel>], iteration_bounds = array<i64: 2>, scalar_prefetch = 0 : i64, scratch_operands = 0 : i64, tpu.core_type = #tpu.core_type<tc>, window_params = [{transform_indices = @transform_0, window_bounds = array<i64: 1, 16, 32>}, {transform_indices = @transform_1, window_bounds = array<i64: 1, 16, 32>}, {transform_indices = @transform_2, window_bounds = array<i64: 1, 16, 32>}, {pipeline_mode = #tpu.pipeline_mode<synchronous>, transform_indices = @transform_3, window_bounds = array<i64: 96, 32>}, {pipeline_mode = #tpu.pipeline_mode<synchronous>, transform_indices = @transform_4, window_bounds = array<i64: 1, 32>}, {pipeline_mode = #tpu.pipeline_mode<synchronous>, transform_indices = @transform_5, window_bounds = array<i64: 12, 32, 8>}, {pipeline_mode = #tpu.pipeline_mode<synchronous>, transform_indices = @transform_6, window_bounds = array<i64: 4, 8, 32>}, {pipeline_mode = #tpu.pipeline_mode<synchronous>, transform_indices = @transform_7, window_bounds = array<i64: 1, 32>}, {pipeline_mode = #tpu.pipeline_mode<synchronous>, transform_indices = @transform_8, window_bounds = array<i64: 1, 32>}, {pipeline_mode = #tpu.pipeline_mode<synchronous>, transform_indices = @transform_9, window_bounds = array<i64: 1, 32>}, {pipeline_mode = #tpu.pipeline_mode<synchronous>, transform_indices = @transform_10, window_bounds = array<i64: 32, 64>}, {pipeline_mode = #tpu.pipeline_mode<synchronous>, transform_indices = @transform_11, window_bounds = array<i64: 1, 64>}, {pipeline_mode = #tpu.pipeline_mode<synchronous>, transform_indices = @transform_12, window_bounds = array<i64: 64, 32>}, {pipeline_mode = #tpu.pipeline_mode<synchronous>, transform_indices = @transform_13, window_bounds = array<i64: 1, 32>}, {transform_indices = @transform_14, window_bounds = array<i64: 1, 16, 32>}]} {
    %c0 = arith.constant 0 : index
    %c0_0 = arith.constant 0 : index
    %0 = vector.load %arg5[%c0, %c0_0] : memref<1x32xf32, #tpu.memory_space<vmem>>, vector<1x32xf32>
    %c0_1 = arith.constant 0 : index
    %c0_2 = arith.constant 0 : index
    %c0_3 = arith.constant 0 : index
    %1 = vector.load %arg1[%c0_1, %c0_2, %c0_3] : memref<1x16x32xf32, #tpu.memory_space<vmem>>, vector<1x16x32xf32>
    %2 = vector.shape_cast %1 : vector<1x16x32xf32> to vector<16x32xf32>
    %c0_4 = arith.constant 0 : index
    %c0_5 = arith.constant 0 : index
    %3 = vector.load %arg4[%c0_4, %c0_5] : memref<96x32xf32, #tpu.memory_space<vmem>>, vector<32x32xf32>
    %cst = arith.constant dense<0.000000e+00> : vector<16x32xf32>
    %4 = tpu.matmul %2, %3, %cst {dimension_numbers = #tpu.dot_dimension_numbers<[1], [0], [0], [1], [0, 0, 1, 1], [], []>} : vector<16x32xf32>, vector<32x32xf32>, vector<16x32xf32> -> vector<16x32xf32>
    %5 = vector.broadcast %0 : vector<1x32xf32> to vector<16x32xf32>
    %6 = arith.addf %5, %4 : vector<16x32xf32>
    %c0_6 = arith.constant 0 : index
    %c0_7 = arith.constant 0 : index
    %c0_8 = arith.constant 0 : index
    %7 = vector.load %arg2[%c0_6, %c0_7, %c0_8] : memref<1x16x32xf32, #tpu.memory_space<vmem>>, vector<1x16x32xf32>
    %8 = vector.shape_cast %7 : vector<1x16x32xf32> to vector<16x32xf32>
    %c32 = arith.constant 32 : index
    %c0_9 = arith.constant 0 : index
    %9 = vector.load %arg4[%c32, %c0_9] : memref<96x32xf32, #tpu.memory_space<vmem>>, vector<32x32xf32>
    %cst_10 = arith.constant dense<0.000000e+00> : vector<16x32xf32>
    %10 = tpu.matmul %8, %9, %cst_10 {dimension_numbers = #tpu.dot_dimension_numbers<[1], [0], [0], [1], [0, 0, 1, 1], [], []>} : vector<16x32xf32>, vector<32x32xf32>, vector<16x32xf32> -> vector<16x32xf32>
    %11 = arith.addf %6, %10 : vector<16x32xf32>
    %c0_11 = arith.constant 0 : index
    %c0_12 = arith.constant 0 : index
    %c0_13 = arith.constant 0 : index
    %12 = vector.load %arg3[%c0_11, %c0_12, %c0_13] : memref<1x16x32xf32, #tpu.memory_space<vmem>>, vector<1x16x32xf32>
    %13 = vector.shape_cast %12 : vector<1x16x32xf32> to vector<16x32xf32>
    %c64 = arith.constant 64 : index
    %c0_14 = arith.constant 0 : index
    %14 = vector.load %arg4[%c64, %c0_14] : memref<96x32xf32, #tpu.memory_space<vmem>>, vector<32x32xf32>
    %cst_15 = arith.constant dense<0.000000e+00> : vector<16x32xf32>
    %15 = tpu.matmul %13, %14, %cst_15 {dimension_numbers = #tpu.dot_dimension_numbers<[1], [0], [0], [1], [0, 0, 1, 1], [], []>} : vector<16x32xf32>, vector<32x32xf32>, vector<16x32xf32> -> vector<16x32xf32>
    %16 = arith.addf %11, %15 : vector<16x32xf32>
    %c0_16 = arith.constant 0 : index
    %c0_17 = arith.constant 0 : index
    %17 = vector.load %arg8[%c0_16, %c0_17] : memref<1x32xf32, #tpu.memory_space<vmem>>, vector<1x32xf32>
    %c0_18 = arith.constant 0 : index
    %c0_19 = arith.constant 0 : index
    %c0_20 = arith.constant 0 : index
    %18 = vector.load %arg6[%c0_18, %c0_19, %c0_20] : memref<12x32x8xf32, #tpu.memory_space<vmem>>, vector<1x32x8xf32>
    %19 = vector.shape_cast %18 : vector<1x32x8xf32> to vector<32x8xf32>
    %cst_21 = arith.constant dense<0.000000e+00> : vector<16x8xf32>
    %20 = tpu.matmul %16, %19, %cst_21 {dimension_numbers = #tpu.dot_dimension_numbers<[1], [0], [0], [1], [0, 0, 1, 1], [], []>} : vector<16x32xf32>, vector<32x8xf32>, vector<16x8xf32> -> vector<16x8xf32>
    %c4 = arith.constant 4 : index
    %c0_22 = arith.constant 0 : index
    %c0_23 = arith.constant 0 : index
    %21 = vector.load %arg6[%c4, %c0_22, %c0_23] : memref<12x32x8xf32, #tpu.memory_space<vmem>>, vector<1x32x8xf32>
    %22 = vector.shape_cast %21 : vector<1x32x8xf32> to vector<32x8xf32>
    %cst_24 = arith.constant dense<0.000000e+00> : vector<16x8xf32>
    %23 = tpu.matmul %16, %22, %cst_24 {dimension_numbers = #tpu.dot_dimension_numbers<[1], [0], [0], [1], [0, 0, 1, 1], [], []>} : vector<16x32xf32>, vector<32x8xf32>, vector<16x8xf32> -> vector<16x8xf32>
    %c8 = arith.constant 8 : index
    %c0_25 = arith.constant 0 : index
    %c0_26 = arith.constant 0 : index
    %24 = vector.load %arg6[%c8, %c0_25, %c0_26] : memref<12x32x8xf32, #tpu.memory_space<vmem>>, vector<1x32x8xf32>
    %25 = vector.shape_cast %24 : vector<1x32x8xf32> to vector<32x8xf32>
    %cst_27 = arith.constant dense<0.000000e+00> : vector<16x8xf32>
    %26 = tpu.matmul %16, %25, %cst_27 {dimension_numbers = #tpu.dot_dimension_numbers<[1], [0], [0], [1], [0, 0, 1, 1], [], []>} : vector<16x32xf32>, vector<32x8xf32>, vector<16x8xf32> -> vector<16x8xf32>
    %cst_28 = arith.constant dense<0.000000e+00> : vector<16x16xf32>
    %27 = tpu.matmul %20, %23, %cst_28 {dimension_numbers = #tpu.dot_dimension_numbers<[1], [1], [0], [0], [0, 0, 1, 0], [], []>} : vector<16x8xf32>, vector<16x8xf32>, vector<16x16xf32> -> vector<16x16xf32>
    %cst_29 = arith.constant 0.353553385 : f32
    %28 = vector.broadcast %cst_29 : f32 to vector<16x16xf32>
    %29 = arith.mulf %27, %28 : vector<16x16xf32>
    %cst_30 = arith.constant dense<0xFF800000> : vector<16xf32>
    %30 = vector.multi_reduction <maximumf>, %29, %cst_30 [1] : vector<16x16xf32> to vector<16xf32>
    %31 = vector.shape_cast %30 : vector<16xf32> to vector<16x1xf32>
    %32 = vector.broadcast %31 : vector<16x1xf32> to vector<16x16xf32>
    %33 = arith.subf %29, %32 : vector<16x16xf32>
    %34 = math.exp %33 : vector<16x16xf32>
    %cst_31 = arith.constant dense<0.000000e+00> : vector<16xf32>
    %35 = vector.multi_reduction <add>, %34, %cst_31 [1] : vector<16x16xf32> to vector<16xf32>
    %36 = vector.shape_cast %35 : vector<16xf32> to vector<16x1xf32>
    %37 = vector.broadcast %36 : vector<16x1xf32> to vector<16x16xf32>
    %38 = arith.divf %34, %37 : vector<16x16xf32>
    %cst_32 = arith.constant dense<0.000000e+00> : vector<16x8xf32>
    %39 = tpu.matmul %38, %26, %cst_32 {dimension_numbers = #tpu.dot_dimension_numbers<[1], [0], [0], [1], [0, 0, 1, 1], [], []>} : vector<16x16xf32>, vector<16x8xf32>, vector<16x8xf32> -> vector<16x8xf32>
    %c0_33 = arith.constant 0 : index
    %c0_34 = arith.constant 0 : index
    %c0_35 = arith.constant 0 : index
    %40 = vector.load %arg7[%c0_33, %c0_34, %c0_35] : memref<4x8x32xf32, #tpu.memory_space<vmem>>, vector<1x8x32xf32>
    %41 = vector.shape_cast %40 : vector<1x8x32xf32> to vector<8x32xf32>
    %cst_36 = arith.constant dense<0.000000e+00> : vector<16x32xf32>
    %42 = tpu.matmul %39, %41, %cst_36 {dimension_numbers = #tpu.dot_dimension_numbers<[1], [0], [0], [1], [0, 0, 1, 1], [], []>} : vector<16x8xf32>, vector<8x32xf32>, vector<16x32xf32> -> vector<16x32xf32>
    %43 = vector.broadcast %17 : vector<1x32xf32> to vector<16x32xf32>
    %44 = arith.addf %43, %42 : vector<16x32xf32>
    %c1 = arith.constant 1 : index
    %c0_37 = arith.constant 0 : index
    %c0_38 = arith.constant 0 : index
    %45 = vector.load %arg6[%c1, %c0_37, %c0_38] : memref<12x32x8xf32, #tpu.memory_space<vmem>>, vector<1x32x8xf32>
    %46 = vector.shape_cast %45 : vector<1x32x8xf32> to vector<32x8xf32>
    %cst_39 = arith.constant dense<0.000000e+00> : vector<16x8xf32>
    %47 = tpu.matmul %16, %46, %cst_39 {dimension_numbers = #tpu.dot_dimension_numbers<[1], [0], [0], [1], [0, 0, 1, 1], [], []>} : vector<16x32xf32>, vector<32x8xf32>, vector<16x8xf32> -> vector<16x8xf32>
    %c5 = arith.constant 5 : index
    %c0_40 = arith.constant 0 : index
    %c0_41 = arith.constant 0 : index
    %48 = vector.load %arg6[%c5, %c0_40, %c0_41] : memref<12x32x8xf32, #tpu.memory_space<vmem>>, vector<1x32x8xf32>
    %49 = vector.shape_cast %48 : vector<1x32x8xf32> to vector<32x8xf32>
    %cst_42 = arith.constant dense<0.000000e+00> : vector<16x8xf32>
    %50 = tpu.matmul %16, %49, %cst_42 {dimension_numbers = #tpu.dot_dimension_numbers<[1], [0], [0], [1], [0, 0, 1, 1], [], []>} : vector<16x32xf32>, vector<32x8xf32>, vector<16x8xf32> -> vector<16x8xf32>
    %c9 = arith.constant 9 : index
    %c0_43 = arith.constant 0 : index
    %c0_44 = arith.constant 0 : index
    %51 = vector.load %arg6[%c9, %c0_43, %c0_44] : memref<12x32x8xf32, #tpu.memory_space<vmem>>, vector<1x32x8xf32>
    %52 = vector.shape_cast %51 : vector<1x32x8xf32> to vector<32x8xf32>
    %cst_45 = arith.constant dense<0.000000e+00> : vector<16x8xf32>
    %53 = tpu.matmul %16, %52, %cst_45 {dimension_numbers = #tpu.dot_dimension_numbers<[1], [0], [0], [1], [0, 0, 1, 1], [], []>} : vector<16x32xf32>, vector<32x8xf32>, vector<16x8xf32> -> vector<16x8xf32>
    %cst_46 = arith.constant dense<0.000000e+00> : vector<16x16xf32>
    %54 = tpu.matmul %47, %50, %cst_46 {dimension_numbers = #tpu.dot_dimension_numbers<[1], [1], [0], [0], [0, 0, 1, 0], [], []>} : vector<16x8xf32>, vector<16x8xf32>, vector<16x16xf32> -> vector<16x16xf32>
    %cst_47 = arith.constant 0.353553385 : f32
    %55 = vector.broadcast %cst_47 : f32 to vector<16x16xf32>
    %56 = arith.mulf %54, %55 : vector<16x16xf32>
    %cst_48 = arith.constant dense<0xFF800000> : vector<16xf32>
    %57 = vector.multi_reduction <maximumf>, %56, %cst_48 [1] : vector<16x16xf32> to vector<16xf32>
    %58 = vector.shape_cast %57 : vector<16xf32> to vector<16x1xf32>
    %59 = vector.broadcast %58 : vector<16x1xf32> to vector<16x16xf32>
    %60 = arith.subf %56, %59 : vector<16x16xf32>
    %61 = math.exp %60 : vector<16x16xf32>
    %cst_49 = arith.constant dense<0.000000e+00> : vector<16xf32>
    %62 = vector.multi_reduction <add>, %61, %cst_49 [1] : vector<16x16xf32> to vector<16xf32>
    %63 = vector.shape_cast %62 : vector<16xf32> to vector<16x1xf32>
    %64 = vector.broadcast %63 : vector<16x1xf32> to vector<16x16xf32>
    %65 = arith.divf %61, %64 : vector<16x16xf32>
    %cst_50 = arith.constant dense<0.000000e+00> : vector<16x8xf32>
    %66 = tpu.matmul %65, %53, %cst_50 {dimension_numbers = #tpu.dot_dimension_numbers<[1], [0], [0], [1], [0, 0, 1, 1], [], []>} : vector<16x16xf32>, vector<16x8xf32>, vector<16x8xf32> -> vector<16x8xf32>
    %c1_51 = arith.constant 1 : index
    %c0_52 = arith.constant 0 : index
    %c0_53 = arith.constant 0 : index
    %67 = vector.load %arg7[%c1_51, %c0_52, %c0_53] : memref<4x8x32xf32, #tpu.memory_space<vmem>>, vector<1x8x32xf32>
    %68 = vector.shape_cast %67 : vector<1x8x32xf32> to vector<8x32xf32>
    %cst_54 = arith.constant dense<0.000000e+00> : vector<16x32xf32>
    %69 = tpu.matmul %66, %68, %cst_54 {dimension_numbers = #tpu.dot_dimension_numbers<[1], [0], [0], [1], [0, 0, 1, 1], [], []>} : vector<16x8xf32>, vector<8x32xf32>, vector<16x32xf32> -> vector<16x32xf32>
    %70 = arith.addf %44, %69 : vector<16x32xf32>
    %c2 = arith.constant 2 : index
    %c0_55 = arith.constant 0 : index
    %c0_56 = arith.constant 0 : index
    %71 = vector.load %arg6[%c2, %c0_55, %c0_56] : memref<12x32x8xf32, #tpu.memory_space<vmem>>, vector<1x32x8xf32>
    %72 = vector.shape_cast %71 : vector<1x32x8xf32> to vector<32x8xf32>
    %cst_57 = arith.constant dense<0.000000e+00> : vector<16x8xf32>
    %73 = tpu.matmul %16, %72, %cst_57 {dimension_numbers = #tpu.dot_dimension_numbers<[1], [0], [0], [1], [0, 0, 1, 1], [], []>} : vector<16x32xf32>, vector<32x8xf32>, vector<16x8xf32> -> vector<16x8xf32>
    %c6 = arith.constant 6 : index
    %c0_58 = arith.constant 0 : index
    %c0_59 = arith.constant 0 : index
    %74 = vector.load %arg6[%c6, %c0_58, %c0_59] : memref<12x32x8xf32, #tpu.memory_space<vmem>>, vector<1x32x8xf32>
    %75 = vector.shape_cast %74 : vector<1x32x8xf32> to vector<32x8xf32>
    %cst_60 = arith.constant dense<0.000000e+00> : vector<16x8xf32>
    %76 = tpu.matmul %16, %75, %cst_60 {dimension_numbers = #tpu.dot_dimension_numbers<[1], [0], [0], [1], [0, 0, 1, 1], [], []>} : vector<16x32xf32>, vector<32x8xf32>, vector<16x8xf32> -> vector<16x8xf32>
    %c10 = arith.constant 10 : index
    %c0_61 = arith.constant 0 : index
    %c0_62 = arith.constant 0 : index
    %77 = vector.load %arg6[%c10, %c0_61, %c0_62] : memref<12x32x8xf32, #tpu.memory_space<vmem>>, vector<1x32x8xf32>
    %78 = vector.shape_cast %77 : vector<1x32x8xf32> to vector<32x8xf32>
    %cst_63 = arith.constant dense<0.000000e+00> : vector<16x8xf32>
    %79 = tpu.matmul %16, %78, %cst_63 {dimension_numbers = #tpu.dot_dimension_numbers<[1], [0], [0], [1], [0, 0, 1, 1], [], []>} : vector<16x32xf32>, vector<32x8xf32>, vector<16x8xf32> -> vector<16x8xf32>
    %cst_64 = arith.constant dense<0.000000e+00> : vector<16x16xf32>
    %80 = tpu.matmul %73, %76, %cst_64 {dimension_numbers = #tpu.dot_dimension_numbers<[1], [1], [0], [0], [0, 0, 1, 0], [], []>} : vector<16x8xf32>, vector<16x8xf32>, vector<16x16xf32> -> vector<16x16xf32>
    %cst_65 = arith.constant 0.353553385 : f32
    %81 = vector.broadcast %cst_65 : f32 to vector<16x16xf32>
    %82 = arith.mulf %80, %81 : vector<16x16xf32>
    %cst_66 = arith.constant dense<0xFF800000> : vector<16xf32>
    %83 = vector.multi_reduction <maximumf>, %82, %cst_66 [1] : vector<16x16xf32> to vector<16xf32>
    %84 = vector.shape_cast %83 : vector<16xf32> to vector<16x1xf32>
    %85 = vector.broadcast %84 : vector<16x1xf32> to vector<16x16xf32>
    %86 = arith.subf %82, %85 : vector<16x16xf32>
    %87 = math.exp %86 : vector<16x16xf32>
    %cst_67 = arith.constant dense<0.000000e+00> : vector<16xf32>
    %88 = vector.multi_reduction <add>, %87, %cst_67 [1] : vector<16x16xf32> to vector<16xf32>
    %89 = vector.shape_cast %88 : vector<16xf32> to vector<16x1xf32>
    %90 = vector.broadcast %89 : vector<16x1xf32> to vector<16x16xf32>
    %91 = arith.divf %87, %90 : vector<16x16xf32>
    %cst_68 = arith.constant dense<0.000000e+00> : vector<16x8xf32>
    %92 = tpu.matmul %91, %79, %cst_68 {dimension_numbers = #tpu.dot_dimension_numbers<[1], [0], [0], [1], [0, 0, 1, 1], [], []>} : vector<16x16xf32>, vector<16x8xf32>, vector<16x8xf32> -> vector<16x8xf32>
    %c2_69 = arith.constant 2 : index
    %c0_70 = arith.constant 0 : index
    %c0_71 = arith.constant 0 : index
    %93 = vector.load %arg7[%c2_69, %c0_70, %c0_71] : memref<4x8x32xf32, #tpu.memory_space<vmem>>, vector<1x8x32xf32>
    %94 = vector.shape_cast %93 : vector<1x8x32xf32> to vector<8x32xf32>
    %cst_72 = arith.constant dense<0.000000e+00> : vector<16x32xf32>
    %95 = tpu.matmul %92, %94, %cst_72 {dimension_numbers = #tpu.dot_dimension_numbers<[1], [0], [0], [1], [0, 0, 1, 1], [], []>} : vector<16x8xf32>, vector<8x32xf32>, vector<16x32xf32> -> vector<16x32xf32>
    %96 = arith.addf %70, %95 : vector<16x32xf32>
    %c3 = arith.constant 3 : index
    %c0_73 = arith.constant 0 : index
    %c0_74 = arith.constant 0 : index
    %97 = vector.load %arg6[%c3, %c0_73, %c0_74] : memref<12x32x8xf32, #tpu.memory_space<vmem>>, vector<1x32x8xf32>
    %98 = vector.shape_cast %97 : vector<1x32x8xf32> to vector<32x8xf32>
    %cst_75 = arith.constant dense<0.000000e+00> : vector<16x8xf32>
    %99 = tpu.matmul %16, %98, %cst_75 {dimension_numbers = #tpu.dot_dimension_numbers<[1], [0], [0], [1], [0, 0, 1, 1], [], []>} : vector<16x32xf32>, vector<32x8xf32>, vector<16x8xf32> -> vector<16x8xf32>
    %c7 = arith.constant 7 : index
    %c0_76 = arith.constant 0 : index
    %c0_77 = arith.constant 0 : index
    %100 = vector.load %arg6[%c7, %c0_76, %c0_77] : memref<12x32x8xf32, #tpu.memory_space<vmem>>, vector<1x32x8xf32>
    %101 = vector.shape_cast %100 : vector<1x32x8xf32> to vector<32x8xf32>
    %cst_78 = arith.constant dense<0.000000e+00> : vector<16x8xf32>
    %102 = tpu.matmul %16, %101, %cst_78 {dimension_numbers = #tpu.dot_dimension_numbers<[1], [0], [0], [1], [0, 0, 1, 1], [], []>} : vector<16x32xf32>, vector<32x8xf32>, vector<16x8xf32> -> vector<16x8xf32>
    %c11 = arith.constant 11 : index
    %c0_79 = arith.constant 0 : index
    %c0_80 = arith.constant 0 : index
    %103 = vector.load %arg6[%c11, %c0_79, %c0_80] : memref<12x32x8xf32, #tpu.memory_space<vmem>>, vector<1x32x8xf32>
    %104 = vector.shape_cast %103 : vector<1x32x8xf32> to vector<32x8xf32>
    %cst_81 = arith.constant dense<0.000000e+00> : vector<16x8xf32>
    %105 = tpu.matmul %16, %104, %cst_81 {dimension_numbers = #tpu.dot_dimension_numbers<[1], [0], [0], [1], [0, 0, 1, 1], [], []>} : vector<16x32xf32>, vector<32x8xf32>, vector<16x8xf32> -> vector<16x8xf32>
    %cst_82 = arith.constant dense<0.000000e+00> : vector<16x16xf32>
    %106 = tpu.matmul %99, %102, %cst_82 {dimension_numbers = #tpu.dot_dimension_numbers<[1], [1], [0], [0], [0, 0, 1, 0], [], []>} : vector<16x8xf32>, vector<16x8xf32>, vector<16x16xf32> -> vector<16x16xf32>
    %cst_83 = arith.constant 0.353553385 : f32
    %107 = vector.broadcast %cst_83 : f32 to vector<16x16xf32>
    %108 = arith.mulf %106, %107 : vector<16x16xf32>
    %cst_84 = arith.constant dense<0xFF800000> : vector<16xf32>
    %109 = vector.multi_reduction <maximumf>, %108, %cst_84 [1] : vector<16x16xf32> to vector<16xf32>
    %110 = vector.shape_cast %109 : vector<16xf32> to vector<16x1xf32>
    %111 = vector.broadcast %110 : vector<16x1xf32> to vector<16x16xf32>
    %112 = arith.subf %108, %111 : vector<16x16xf32>
    %113 = math.exp %112 : vector<16x16xf32>
    %cst_85 = arith.constant dense<0.000000e+00> : vector<16xf32>
    %114 = vector.multi_reduction <add>, %113, %cst_85 [1] : vector<16x16xf32> to vector<16xf32>
    %115 = vector.shape_cast %114 : vector<16xf32> to vector<16x1xf32>
    %116 = vector.broadcast %115 : vector<16x1xf32> to vector<16x16xf32>
    %117 = arith.divf %113, %116 : vector<16x16xf32>
    %cst_86 = arith.constant dense<0.000000e+00> : vector<16x8xf32>
    %118 = tpu.matmul %117, %105, %cst_86 {dimension_numbers = #tpu.dot_dimension_numbers<[1], [0], [0], [1], [0, 0, 1, 1], [], []>} : vector<16x16xf32>, vector<16x8xf32>, vector<16x8xf32> -> vector<16x8xf32>
    %c3_87 = arith.constant 3 : index
    %c0_88 = arith.constant 0 : index
    %c0_89 = arith.constant 0 : index
    %119 = vector.load %arg7[%c3_87, %c0_88, %c0_89] : memref<4x8x32xf32, #tpu.memory_space<vmem>>, vector<1x8x32xf32>
    %120 = vector.shape_cast %119 : vector<1x8x32xf32> to vector<8x32xf32>
    %cst_90 = arith.constant dense<0.000000e+00> : vector<16x32xf32>
    %121 = tpu.matmul %118, %120, %cst_90 {dimension_numbers = #tpu.dot_dimension_numbers<[1], [0], [0], [1], [0, 0, 1, 1], [], []>} : vector<16x8xf32>, vector<8x32xf32>, vector<16x32xf32> -> vector<16x32xf32>
    %122 = arith.addf %96, %121 : vector<16x32xf32>
    %123 = arith.addf %122, %16 : vector<16x32xf32>
    %c0_91 = arith.constant 0 : index
    %c0_92 = arith.constant 0 : index
    %124 = vector.load %arg9[%c0_91, %c0_92] : memref<1x32xf32, #tpu.memory_space<vmem>>, vector<1x32xf32>
    %c0_93 = arith.constant 0 : index
    %c0_94 = arith.constant 0 : index
    %125 = vector.load %arg10[%c0_93, %c0_94] : memref<1x32xf32, #tpu.memory_space<vmem>>, vector<1x32xf32>
    %cst_95 = arith.constant dense<0.000000e+00> : vector<16xf32>
    %126 = vector.multi_reduction <add>, %123, %cst_95 [1] : vector<16x32xf32> to vector<16xf32>
    %127 = vector.shape_cast %126 : vector<16xf32> to vector<16x1xf32>
    %cst_96 = arith.constant 3.200000e+01 : f32
    %128 = vector.broadcast %cst_96 : f32 to vector<16x1xf32>
    %129 = arith.divf %127, %128 : vector<16x1xf32>
    %130 = vector.broadcast %129 : vector<16x1xf32> to vector<16x32xf32>
    %131 = arith.subf %123, %130 : vector<16x32xf32>
    %132 = arith.mulf %131, %131 : vector<16x32xf32>
    %cst_97 = arith.constant dense<0.000000e+00> : vector<16xf32>
    %133 = vector.multi_reduction <add>, %132, %cst_97 [1] : vector<16x32xf32> to vector<16xf32>
    %134 = vector.shape_cast %133 : vector<16xf32> to vector<16x1xf32>
    %cst_98 = arith.constant 3.200000e+01 : f32
    %135 = vector.broadcast %cst_98 : f32 to vector<16x1xf32>
    %136 = arith.divf %134, %135 : vector<16x1xf32>
    %137 = vector.broadcast %129 : vector<16x1xf32> to vector<16x32xf32>
    %138 = arith.subf %123, %137 : vector<16x32xf32>
    %cst_99 = arith.constant 9.99999974E-6 : f32
    %139 = vector.broadcast %cst_99 : f32 to vector<16x1xf32>
    %140 = arith.addf %136, %139 : vector<16x1xf32>
    %141 = math.rsqrt %140 : vector<16x1xf32>
    %142 = vector.broadcast %141 : vector<16x1xf32> to vector<16x32xf32>
    %143 = arith.mulf %138, %142 : vector<16x32xf32>
    %144 = vector.broadcast %124 : vector<1x32xf32> to vector<16x32xf32>
    %145 = arith.mulf %143, %144 : vector<16x32xf32>
    %146 = vector.broadcast %125 : vector<1x32xf32> to vector<16x32xf32>
    %147 = arith.addf %145, %146 : vector<16x32xf32>
    %c0_100 = arith.constant 0 : index
    %c0_101 = arith.constant 0 : index
    %148 = vector.load %arg11[%c0_100, %c0_101] : memref<32x64xf32, #tpu.memory_space<vmem>>, vector<32x64xf32>
    %cst_102 = arith.constant dense<0.000000e+00> : vector<16x64xf32>
    %149 = tpu.matmul %147, %148, %cst_102 {dimension_numbers = #tpu.dot_dimension_numbers<[1], [0], [0], [1], [0, 0, 1, 1], [], []>} : vector<16x32xf32>, vector<32x64xf32>, vector<16x64xf32> -> vector<16x64xf32>
    %c0_103 = arith.constant 0 : index
    %c0_104 = arith.constant 0 : index
    %150 = vector.load %arg12[%c0_103, %c0_104] : memref<1x64xf32, #tpu.memory_space<vmem>>, vector<1x64xf32>
    %151 = vector.broadcast %150 : vector<1x64xf32> to vector<16x64xf32>
    %152 = arith.addf %149, %151 : vector<16x64xf32>
    %cst_105 = arith.constant 5.000000e-01 : f32
    %153 = vector.broadcast %cst_105 : f32 to vector<16x64xf32>
    %154 = arith.mulf %153, %152 : vector<16x64xf32>
    %cst_106 = arith.constant 4.471500e-02 : f32
    %155 = vector.broadcast %cst_106 : f32 to vector<16x64xf32>
    %156 = arith.mulf %155, %152 : vector<16x64xf32>
    %157 = arith.mulf %156, %152 : vector<16x64xf32>
    %158 = arith.mulf %157, %152 : vector<16x64xf32>
    %159 = arith.addf %152, %158 : vector<16x64xf32>
    %cst_107 = arith.constant 0.797884583 : f32
    %160 = vector.broadcast %cst_107 : f32 to vector<16x64xf32>
    %161 = arith.mulf %160, %159 : vector<16x64xf32>
    %162 = math.tanh %161 : vector<16x64xf32>
    %cst_108 = arith.constant 1.000000e+00 : f32
    %163 = vector.broadcast %cst_108 : f32 to vector<16x64xf32>
    %164 = arith.addf %163, %162 : vector<16x64xf32>
    %165 = arith.mulf %154, %164 : vector<16x64xf32>
    %c0_109 = arith.constant 0 : index
    %c0_110 = arith.constant 0 : index
    %166 = vector.load %arg13[%c0_109, %c0_110] : memref<64x32xf32, #tpu.memory_space<vmem>>, vector<64x32xf32>
    %cst_111 = arith.constant dense<0.000000e+00> : vector<16x32xf32>
    %167 = tpu.matmul %165, %166, %cst_111 {dimension_numbers = #tpu.dot_dimension_numbers<[1], [0], [0], [1], [0, 0, 1, 1], [], []>} : vector<16x64xf32>, vector<64x32xf32>, vector<16x32xf32> -> vector<16x32xf32>
    %c0_112 = arith.constant 0 : index
    %c0_113 = arith.constant 0 : index
    %168 = vector.load %arg14[%c0_112, %c0_113] : memref<1x32xf32, #tpu.memory_space<vmem>>, vector<1x32xf32>
    %169 = vector.broadcast %168 : vector<1x32xf32> to vector<16x32xf32>
    %170 = arith.addf %167, %169 : vector<16x32xf32>
    %171 = arith.addf %170, %147 : vector<16x32xf32>
    %c0_114 = arith.constant 0 : index
    %c0_115 = arith.constant 0 : index
    %172 = vector.load %arg9[%c0_114, %c0_115] : memref<1x32xf32, #tpu.memory_space<vmem>>, vector<1x32xf32>
    %c0_116 = arith.constant 0 : index
    %c0_117 = arith.constant 0 : index
    %173 = vector.load %arg10[%c0_116, %c0_117] : memref<1x32xf32, #tpu.memory_space<vmem>>, vector<1x32xf32>
    %cst_118 = arith.constant dense<0.000000e+00> : vector<16xf32>
    %174 = vector.multi_reduction <add>, %171, %cst_118 [1] : vector<16x32xf32> to vector<16xf32>
    %175 = vector.shape_cast %174 : vector<16xf32> to vector<16x1xf32>
    %cst_119 = arith.constant 3.200000e+01 : f32
    %176 = vector.broadcast %cst_119 : f32 to vector<16x1xf32>
    %177 = arith.divf %175, %176 : vector<16x1xf32>
    %178 = vector.broadcast %177 : vector<16x1xf32> to vector<16x32xf32>
    %179 = arith.subf %171, %178 : vector<16x32xf32>
    %180 = arith.mulf %179, %179 : vector<16x32xf32>
    %cst_120 = arith.constant dense<0.000000e+00> : vector<16xf32>
    %181 = vector.multi_reduction <add>, %180, %cst_120 [1] : vector<16x32xf32> to vector<16xf32>
    %182 = vector.shape_cast %181 : vector<16xf32> to vector<16x1xf32>
    %cst_121 = arith.constant 3.200000e+01 : f32
    %183 = vector.broadcast %cst_121 : f32 to vector<16x1xf32>
    %184 = arith.divf %182, %183 : vector<16x1xf32>
    %185 = vector.broadcast %177 : vector<16x1xf32> to vector<16x32xf32>
    %186 = arith.subf %171, %185 : vector<16x32xf32>
    %cst_122 = arith.constant 9.99999974E-6 : f32
    %187 = vector.broadcast %cst_122 : f32 to vector<16x1xf32>
    %188 = arith.addf %184, %187 : vector<16x1xf32>
    %189 = math.rsqrt %188 : vector<16x1xf32>
    %190 = vector.broadcast %189 : vector<16x1xf32> to vector<16x32xf32>
    %191 = arith.mulf %186, %190 : vector<16x32xf32>
    %192 = vector.broadcast %172 : vector<1x32xf32> to vector<16x32xf32>
    %193 = arith.mulf %191, %192 : vector<16x32xf32>
    %194 = vector.broadcast %173 : vector<1x32xf32> to vector<16x32xf32>
    %195 = arith.addf %193, %194 : vector<16x32xf32>
    %c0_123 = arith.constant 0 : index
    %c0_124 = arith.constant 0 : index
    %c0_125 = arith.constant 0 : index
    %196 = vector.load %arg15[%c0_123, %c0_124, %c0_125] : memref<1x16x32xf32, #tpu.memory_space<vmem>>, vector<1x16x32xf32>
    %197 = vector.shape_cast %196 : vector<1x16x32xf32> to vector<16x32xf32>
    %198 = vector.shape_cast %195 : vector<16x32xf32> to vector<1x16x32xf32>
    tpu.vector_store %arg15[%c0_123, %c0_124, %c0_125], %198 {strides = array<i32>} : memref<1x16x32xf32, #tpu.memory_space<vmem>>, vector<1x16x32xf32>,
    return
  }
  func.func @transform_0(%arg0: i32) -> (i32, i32, i32) {
    %c0_i32 = arith.constant 0 : i32
    %c0_i32_0 = arith.constant 0 : i32
    %c0_i32_1 = arith.constant 0 : i32
    return %arg0, %c0_i32, %c0_i32_0 : i32, i32, i32
  }
  func.func @transform_1(%arg0: i32) -> (i32, i32, i32) {
    %c0_i32 = arith.constant 0 : i32
    %c0_i32_0 = arith.constant 0 : i32
    %c0_i32_1 = arith.constant 0 : i32
    return %arg0, %c0_i32, %c0_i32_0 : i32, i32, i32
  }
  func.func @transform_2(%arg0: i32) -> (i32, i32, i32) {
    %c0_i32 = arith.constant 0 : i32
    %c0_i32_0 = arith.constant 0 : i32
    %c0_i32_1 = arith.constant 0 : i32
    return %arg0, %c0_i32, %c0_i32_0 : i32, i32, i32
  }
  func.func @transform_3(%arg0: i32) -> (i32, i32) {
    %c0_i32 = arith.constant 0 : i32
    %c0_i32_0 = arith.constant 0 : i32
    %c0_i32_1 = arith.constant 0 : i32
    return %c0_i32, %c0_i32_0 : i32, i32
  }
  func.func @transform_4(%arg0: i32) -> (i32, i32) {
    %c0_i32 = arith.constant 0 : i32
    %c0_i32_0 = arith.constant 0 : i32
    %c0_i32_1 = arith.constant 0 : i32
    return %c0_i32, %c0_i32_0 : i32, i32
  }
  func.func @transform_5(%arg0: i32) -> (i32, i32, i32) {
    %c0_i32 = arith.constant 0 : i32
    %c0_i32_0 = arith.constant 0 : i32
    %c0_i32_1 = arith.constant 0 : i32
    %c0_i32_2 = arith.constant 0 : i32
    return %c0_i32, %c0_i32_0, %c0_i32_1 : i32, i32, i32
  }
  func.func @transform_6(%arg0: i32) -> (i32, i32, i32) {
    %c0_i32 = arith.constant 0 : i32
    %c0_i32_0 = arith.constant 0 : i32
    %c0_i32_1 = arith.constant 0 : i32
    %c0_i32_2 = arith.constant 0 : i32
    return %c0_i32, %c0_i32_0, %c0_i32_1 : i32, i32, i32
  }
  func.func @transform_7(%arg0: i32) -> (i32, i32) {
    %c0_i32 = arith.constant 0 : i32
    %c0_i32_0 = arith.constant 0 : i32
    %c0_i32_1 = arith.constant 0 : i32
    return %c0_i32, %c0_i32_0 : i32, i32
  }
  func.func @transform_8(%arg0: i32) -> (i32, i32) {
    %c0_i32 = arith.constant 0 : i32
    %c0_i32_0 = arith.constant 0 : i32
    %c0_i32_1 = arith.constant 0 : i32
    return %c0_i32, %c0_i32_0 : i32, i32
  }
  func.func @transform_9(%arg0: i32) -> (i32, i32) {
    %c0_i32 = arith.constant 0 : i32
    %c0_i32_0 = arith.constant 0 : i32
    %c0_i32_1 = arith.constant 0 : i32
    return %c0_i32, %c0_i32_0 : i32, i32
  }
  func.func @transform_10(%arg0: i32) -> (i32, i32) {
    %c0_i32 = arith.constant 0 : i32
    %c0_i32_0 = arith.constant 0 : i32
    %c0_i32_1 = arith.constant 0 : i32
    return %c0_i32, %c0_i32_0 : i32, i32
  }
  func.func @transform_11(%arg0: i32) -> (i32, i32) {
    %c0_i32 = arith.constant 0 : i32
    %c0_i32_0 = arith.constant 0 : i32
    %c0_i32_1 = arith.constant 0 : i32
    return %c0_i32, %c0_i32_0 : i32, i32
  }
  func.func @transform_12(%arg0: i32) -> (i32, i32) {
    %c0_i32 = arith.constant 0 : i32
    %c0_i32_0 = arith.constant 0 : i32
    %c0_i32_1 = arith.constant 0 : i32
    return %c0_i32, %c0_i32_0 : i32, i32
  }
  func.func @transform_13(%arg0: i32) -> (i32, i32) {
    %c0_i32 = arith.constant 0 : i32
    %c0_i32_0 = arith.constant 0 : i32
    %c0_i32_1 = arith.constant 0 : i32
    return %c0_i32, %c0_i32_0 : i32, i32
  }
  func.func @transform_14(%arg0: i32) -> (i32, i32, i32) {
    %c0_i32 = arith.constant 0 : i32
    %c0_i32_0 = arith.constant 0 : i32
    %c0_i32_1 = arith.constant 0 : i32
    return %arg0, %c0_i32, %c0_i32_0 : i32, i32, i32
  }
}

module attributes {stable_mosaic.version = 11 : i64} {
  func.func @_fused_layer_kernel(%arg0: i32, %arg1: memref<1x16x32xf32, #tpu.memory_space<vmem>>, %arg2: memref<12x32x8xf32, #tpu.memory_space<vmem>>, %arg3: memref<4x8x32xf32, #tpu.memory_space<vmem>>, %arg4: memref<1x32xf32, #tpu.memory_space<vmem>>, %arg5: memref<1x32xf32, #tpu.memory_space<vmem>>, %arg6: memref<1x32xf32, #tpu.memory_space<vmem>>, %arg7: memref<32x64xf32, #tpu.memory_space<vmem>>, %arg8: memref<1x64xf32, #tpu.memory_space<vmem>>, %arg9: memref<64x32xf32, #tpu.memory_space<vmem>>, %arg10: memref<1x32xf32, #tpu.memory_space<vmem>>, %arg11: memref<1x16x32xf32, #tpu.memory_space<vmem>>, %arg12: memref<1x4x16x16xf32, #tpu.memory_space<vmem>>) attributes {dimension_semantics = [#tpu.dimension_semantics<parallel>], iteration_bounds = array<i64: 2>, scalar_prefetch = 0 : i64, scratch_operands = 0 : i64, tpu.core_type = #tpu.core_type<tc>, window_params = [{transform_indices = @transform_0, window_bounds = array<i64: 1, 16, 32>}, {pipeline_mode = #tpu.pipeline_mode<synchronous>, transform_indices = @transform_1, window_bounds = array<i64: 12, 32, 8>}, {pipeline_mode = #tpu.pipeline_mode<synchronous>, transform_indices = @transform_2, window_bounds = array<i64: 4, 8, 32>}, {pipeline_mode = #tpu.pipeline_mode<synchronous>, transform_indices = @transform_3, window_bounds = array<i64: 1, 32>}, {pipeline_mode = #tpu.pipeline_mode<synchronous>, transform_indices = @transform_4, window_bounds = array<i64: 1, 32>}, {pipeline_mode = #tpu.pipeline_mode<synchronous>, transform_indices = @transform_5, window_bounds = array<i64: 1, 32>}, {pipeline_mode = #tpu.pipeline_mode<synchronous>, transform_indices = @transform_6, window_bounds = array<i64: 32, 64>}, {pipeline_mode = #tpu.pipeline_mode<synchronous>, transform_indices = @transform_7, window_bounds = array<i64: 1, 64>}, {pipeline_mode = #tpu.pipeline_mode<synchronous>, transform_indices = @transform_8, window_bounds = array<i64: 64, 32>}, {pipeline_mode = #tpu.pipeline_mode<synchronous>, transform_indices = @transform_9, window_bounds = array<i64: 1, 32>}, {transform_indices = @transform_10, window_bounds = array<i64: 1, 16, 32>}, {transform_indices = @transform_11, window_bounds = array<i64: 1, 4, 16, 16>}]} {
    %c0 = arith.constant 0 : index
    %c0_0 = arith.constant 0 : index
    %c0_1 = arith.constant 0 : index
    %0 = vector.load %arg1[%c0, %c0_0, %c0_1] : memref<1x16x32xf32, #tpu.memory_space<vmem>>, vector<1x16x32xf32>
    %1 = vector.shape_cast %0 : vector<1x16x32xf32> to vector<16x32xf32>
    %c0_2 = arith.constant 0 : index
    %c0_3 = arith.constant 0 : index
    %2 = vector.load %arg4[%c0_2, %c0_3] : memref<1x32xf32, #tpu.memory_space<vmem>>, vector<1x32xf32>
    %c0_4 = arith.constant 0 : index
    %c0_5 = arith.constant 0 : index
    %c0_6 = arith.constant 0 : index
    %3 = vector.load %arg2[%c0_4, %c0_5, %c0_6] : memref<12x32x8xf32, #tpu.memory_space<vmem>>, vector<1x32x8xf32>
    %4 = vector.shape_cast %3 : vector<1x32x8xf32> to vector<32x8xf32>
    %cst = arith.constant dense<0.000000e+00> : vector<16x8xf32>
    %5 = tpu.matmul %1, %4, %cst {dimension_numbers = #tpu.dot_dimension_numbers<[1], [0], [0], [1], [0, 0, 1, 1], [], []>} : vector<16x32xf32>, vector<32x8xf32>, vector<16x8xf32> -> vector<16x8xf32>
    %c4 = arith.constant 4 : index
    %c0_7 = arith.constant 0 : index
    %c0_8 = arith.constant 0 : index
    %6 = vector.load %arg2[%c4, %c0_7, %c0_8] : memref<12x32x8xf32, #tpu.memory_space<vmem>>, vector<1x32x8xf32>
    %7 = vector.shape_cast %6 : vector<1x32x8xf32> to vector<32x8xf32>
    %cst_9 = arith.constant dense<0.000000e+00> : vector<16x8xf32>
    %8 = tpu.matmul %1, %7, %cst_9 {dimension_numbers = #tpu.dot_dimension_numbers<[1], [0], [0], [1], [0, 0, 1, 1], [], []>} : vector<16x32xf32>, vector<32x8xf32>, vector<16x8xf32> -> vector<16x8xf32>
    %c8 = arith.constant 8 : index
    %c0_10 = arith.constant 0 : index
    %c0_11 = arith.constant 0 : index
    %9 = vector.load %arg2[%c8, %c0_10, %c0_11] : memref<12x32x8xf32, #tpu.memory_space<vmem>>, vector<1x32x8xf32>
    %10 = vector.shape_cast %9 : vector<1x32x8xf32> to vector<32x8xf32>
    %cst_12 = arith.constant dense<0.000000e+00> : vector<16x8xf32>
    %11 = tpu.matmul %1, %10, %cst_12 {dimension_numbers = #tpu.dot_dimension_numbers<[1], [0], [0], [1], [0, 0, 1, 1], [], []>} : vector<16x32xf32>, vector<32x8xf32>, vector<16x8xf32> -> vector<16x8xf32>
    %cst_13 = arith.constant dense<0.000000e+00> : vector<16x16xf32>
    %12 = tpu.matmul %5, %8, %cst_13 {dimension_numbers = #tpu.dot_dimension_numbers<[1], [1], [0], [0], [0, 0, 1, 0], [], []>} : vector<16x8xf32>, vector<16x8xf32>, vector<16x16xf32> -> vector<16x16xf32>
    %cst_14 = arith.constant 0.353553385 : f32
    %13 = vector.broadcast %cst_14 : f32 to vector<16x16xf32>
    %14 = arith.mulf %12, %13 : vector<16x16xf32>
    %c0_15 = arith.constant 0 : index
    %c0_16 = arith.constant 0 : index
    %c0_17 = arith.constant 0 : index
    %c0_18 = arith.constant 0 : index
    %15 = vector.load %arg12[%c0_15, %c0_16, %c0_17, %c0_18] : memref<1x4x16x16xf32, #tpu.memory_space<vmem>>, vector<1x1x16x16xf32>
    %16 = vector.shape_cast %15 : vector<1x1x16x16xf32> to vector<16x16xf32>
    %17 = vector.shape_cast %14 : vector<16x16xf32> to vector<1x1x16x16xf32>
    tpu.vector_store %arg12[%c0_15, %c0_16, %c0_17, %c0_18], %17 {strides = array<i32>} : memref<1x4x16x16xf32, #tpu.memory_space<vmem>>, vector<1x1x16x16xf32>,
    %cst_19 = arith.constant dense<0xFF800000> : vector<16xf32>
    %18 = vector.multi_reduction <maximumf>, %14, %cst_19 [1] : vector<16x16xf32> to vector<16xf32>
    %19 = vector.shape_cast %18 : vector<16xf32> to vector<16x1xf32>
    %20 = vector.broadcast %19 : vector<16x1xf32> to vector<16x16xf32>
    %21 = arith.subf %14, %20 : vector<16x16xf32>
    %22 = math.exp %21 : vector<16x16xf32>
    %cst_20 = arith.constant dense<0.000000e+00> : vector<16xf32>
    %23 = vector.multi_reduction <add>, %22, %cst_20 [1] : vector<16x16xf32> to vector<16xf32>
    %24 = vector.shape_cast %23 : vector<16xf32> to vector<16x1xf32>
    %25 = vector.broadcast %24 : vector<16x1xf32> to vector<16x16xf32>
    %26 = arith.divf %22, %25 : vector<16x16xf32>
    %cst_21 = arith.constant dense<0.000000e+00> : vector<16x8xf32>
    %27 = tpu.matmul %26, %11, %cst_21 {dimension_numbers = #tpu.dot_dimension_numbers<[1], [0], [0], [1], [0, 0, 1, 1], [], []>} : vector<16x16xf32>, vector<16x8xf32>, vector<16x8xf32> -> vector<16x8xf32>
    %c0_22 = arith.constant 0 : index
    %c0_23 = arith.constant 0 : index
    %c0_24 = arith.constant 0 : index
    %28 = vector.load %arg3[%c0_22, %c0_23, %c0_24] : memref<4x8x32xf32, #tpu.memory_space<vmem>>, vector<1x8x32xf32>
    %29 = vector.shape_cast %28 : vector<1x8x32xf32> to vector<8x32xf32>
    %cst_25 = arith.constant dense<0.000000e+00> : vector<16x32xf32>
    %30 = tpu.matmul %27, %29, %cst_25 {dimension_numbers = #tpu.dot_dimension_numbers<[1], [0], [0], [1], [0, 0, 1, 1], [], []>} : vector<16x8xf32>, vector<8x32xf32>, vector<16x32xf32> -> vector<16x32xf32>
    %31 = vector.broadcast %2 : vector<1x32xf32> to vector<16x32xf32>
    %32 = arith.addf %31, %30 : vector<16x32xf32>
    %c1 = arith.constant 1 : index
    %c0_26 = arith.constant 0 : index
    %c0_27 = arith.constant 0 : index
    %33 = vector.load %arg2[%c1, %c0_26, %c0_27] : memref<12x32x8xf32, #tpu.memory_space<vmem>>, vector<1x32x8xf32>
    %34 = vector.shape_cast %33 : vector<1x32x8xf32> to vector<32x8xf32>
    %cst_28 = arith.constant dense<0.000000e+00> : vector<16x8xf32>
    %35 = tpu.matmul %1, %34, %cst_28 {dimension_numbers = #tpu.dot_dimension_numbers<[1], [0], [0], [1], [0, 0, 1, 1], [], []>} : vector<16x32xf32>, vector<32x8xf32>, vector<16x8xf32> -> vector<16x8xf32>
    %c5 = arith.constant 5 : index
    %c0_29 = arith.constant 0 : index
    %c0_30 = arith.constant 0 : index
    %36 = vector.load %arg2[%c5, %c0_29, %c0_30] : memref<12x32x8xf32, #tpu.memory_space<vmem>>, vector<1x32x8xf32>
    %37 = vector.shape_cast %36 : vector<1x32x8xf32> to vector<32x8xf32>
    %cst_31 = arith.constant dense<0.000000e+00> : vector<16x8xf32>
    %38 = tpu.matmul %1, %37, %cst_31 {dimension_numbers = #tpu.dot_dimension_numbers<[1], [0], [0], [1], [0, 0, 1, 1], [], []>} : vector<16x32xf32>, vector<32x8xf32>, vector<16x8xf32> -> vector<16x8xf32>
    %c9 = arith.constant 9 : index
    %c0_32 = arith.constant 0 : index
    %c0_33 = arith.constant 0 : index
    %39 = vector.load %arg2[%c9, %c0_32, %c0_33] : memref<12x32x8xf32, #tpu.memory_space<vmem>>, vector<1x32x8xf32>
    %40 = vector.shape_cast %39 : vector<1x32x8xf32> to vector<32x8xf32>
    %cst_34 = arith.constant dense<0.000000e+00> : vector<16x8xf32>
    %41 = tpu.matmul %1, %40, %cst_34 {dimension_numbers = #tpu.dot_dimension_numbers<[1], [0], [0], [1], [0, 0, 1, 1], [], []>} : vector<16x32xf32>, vector<32x8xf32>, vector<16x8xf32> -> vector<16x8xf32>
    %cst_35 = arith.constant dense<0.000000e+00> : vector<16x16xf32>
    %42 = tpu.matmul %35, %38, %cst_35 {dimension_numbers = #tpu.dot_dimension_numbers<[1], [1], [0], [0], [0, 0, 1, 0], [], []>} : vector<16x8xf32>, vector<16x8xf32>, vector<16x16xf32> -> vector<16x16xf32>
    %cst_36 = arith.constant 0.353553385 : f32
    %43 = vector.broadcast %cst_36 : f32 to vector<16x16xf32>
    %44 = arith.mulf %42, %43 : vector<16x16xf32>
    %c0_37 = arith.constant 0 : index
    %c1_38 = arith.constant 1 : index
    %c0_39 = arith.constant 0 : index
    %c0_40 = arith.constant 0 : index
    %45 = vector.load %arg12[%c0_37, %c1_38, %c0_39, %c0_40] : memref<1x4x16x16xf32, #tpu.memory_space<vmem>>, vector<1x1x16x16xf32>
    %46 = vector.shape_cast %45 : vector<1x1x16x16xf32> to vector<16x16xf32>
    %47 = vector.shape_cast %44 : vector<16x16xf32> to vector<1x1x16x16xf32>
    tpu.vector_store %arg12[%c0_37, %c1_38, %c0_39, %c0_40], %47 {strides = array<i32>} : memref<1x4x16x16xf32, #tpu.memory_space<vmem>>, vector<1x1x16x16xf32>,
    %cst_41 = arith.constant dense<0xFF800000> : vector<16xf32>
    %48 = vector.multi_reduction <maximumf>, %44, %cst_41 [1] : vector<16x16xf32> to vector<16xf32>
    %49 = vector.shape_cast %48 : vector<16xf32> to vector<16x1xf32>
    %50 = vector.broadcast %49 : vector<16x1xf32> to vector<16x16xf32>
    %51 = arith.subf %44, %50 : vector<16x16xf32>
    %52 = math.exp %51 : vector<16x16xf32>
    %cst_42 = arith.constant dense<0.000000e+00> : vector<16xf32>
    %53 = vector.multi_reduction <add>, %52, %cst_42 [1] : vector<16x16xf32> to vector<16xf32>
    %54 = vector.shape_cast %53 : vector<16xf32> to vector<16x1xf32>
    %55 = vector.broadcast %54 : vector<16x1xf32> to vector<16x16xf32>
    %56 = arith.divf %52, %55 : vector<16x16xf32>
    %cst_43 = arith.constant dense<0.000000e+00> : vector<16x8xf32>
    %57 = tpu.matmul %56, %41, %cst_43 {dimension_numbers = #tpu.dot_dimension_numbers<[1], [0], [0], [1], [0, 0, 1, 1], [], []>} : vector<16x16xf32>, vector<16x8xf32>, vector<16x8xf32> -> vector<16x8xf32>
    %c1_44 = arith.constant 1 : index
    %c0_45 = arith.constant 0 : index
    %c0_46 = arith.constant 0 : index
    %58 = vector.load %arg3[%c1_44, %c0_45, %c0_46] : memref<4x8x32xf32, #tpu.memory_space<vmem>>, vector<1x8x32xf32>
    %59 = vector.shape_cast %58 : vector<1x8x32xf32> to vector<8x32xf32>
    %cst_47 = arith.constant dense<0.000000e+00> : vector<16x32xf32>
    %60 = tpu.matmul %57, %59, %cst_47 {dimension_numbers = #tpu.dot_dimension_numbers<[1], [0], [0], [1], [0, 0, 1, 1], [], []>} : vector<16x8xf32>, vector<8x32xf32>, vector<16x32xf32> -> vector<16x32xf32>
    %61 = arith.addf %32, %60 : vector<16x32xf32>
    %c2 = arith.constant 2 : index
    %c0_48 = arith.constant 0 : index
    %c0_49 = arith.constant 0 : index
    %62 = vector.load %arg2[%c2, %c0_48, %c0_49] : memref<12x32x8xf32, #tpu.memory_space<vmem>>, vector<1x32x8xf32>
    %63 = vector.shape_cast %62 : vector<1x32x8xf32> to vector<32x8xf32>
    %cst_50 = arith.constant dense<0.000000e+00> : vector<16x8xf32>
    %64 = tpu.matmul %1, %63, %cst_50 {dimension_numbers = #tpu.dot_dimension_numbers<[1], [0], [0], [1], [0, 0, 1, 1], [], []>} : vector<16x32xf32>, vector<32x8xf32>, vector<16x8xf32> -> vector<16x8xf32>
    %c6 = arith.constant 6 : index
    %c0_51 = arith.constant 0 : index
    %c0_52 = arith.constant 0 : index
    %65 = vector.load %arg2[%c6, %c0_51, %c0_52] : memref<12x32x8xf32, #tpu.memory_space<vmem>>, vector<1x32x8xf32>
    %66 = vector.shape_cast %65 : vector<1x32x8xf32> to vector<32x8xf32>
    %cst_53 = arith.constant dense<0.000000e+00> : vector<16x8xf32>
    %67 = tpu.matmul %1, %66, %cst_53 {dimension_numbers = #tpu.dot_dimension_numbers<[1], [0], [0], [1], [0, 0, 1, 1], [], []>} : vector<16x32xf32>, vector<32x8xf32>, vector<16x8xf32> -> vector<16x8xf32>
    %c10 = arith.constant 10 : index
    %c0_54 = arith.constant 0 : index
    %c0_55 = arith.constant 0 : index
    %68 = vector.load %arg2[%c10, %c0_54, %c0_55] : memref<12x32x8xf32, #tpu.memory_space<vmem>>, vector<1x32x8xf32>
    %69 = vector.shape_cast %68 : vector<1x32x8xf32> to vector<32x8xf32>
    %cst_56 = arith.constant dense<0.000000e+00> : vector<16x8xf32>
    %70 = tpu.matmul %1, %69, %cst_56 {dimension_numbers = #tpu.dot_dimension_numbers<[1], [0], [0], [1], [0, 0, 1, 1], [], []>} : vector<16x32xf32>, vector<32x8xf32>, vector<16x8xf32> -> vector<16x8xf32>
    %cst_57 = arith.constant dense<0.000000e+00> : vector<16x16xf32>
    %71 = tpu.matmul %64, %67, %cst_57 {dimension_numbers = #tpu.dot_dimension_numbers<[1], [1], [0], [0], [0, 0, 1, 0], [], []>} : vector<16x8xf32>, vector<16x8xf32>, vector<16x16xf32> -> vector<16x16xf32>
    %cst_58 = arith.constant 0.353553385 : f32
    %72 = vector.broadcast %cst_58 : f32 to vector<16x16xf32>
    %73 = arith.mulf %71, %72 : vector<16x16xf32>
    %c0_59 = arith.constant 0 : index
    %c2_60 = arith.constant 2 : index
    %c0_61 = arith.constant 0 : index
    %c0_62 = arith.constant 0 : index
    %74 = vector.load %arg12[%c0_59, %c2_60, %c0_61, %c0_62] : memref<1x4x16x16xf32, #tpu.memory_space<vmem>>, vector<1x1x16x16xf32>
    %75 = vector.shape_cast %74 : vector<1x1x16x16xf32> to vector<16x16xf32>
    %76 = vector.shape_cast %73 : vector<16x16xf32> to vector<1x1x16x16xf32>
    tpu.vector_store %arg12[%c0_59, %c2_60, %c0_61, %c0_62], %76 {strides = array<i32>} : memref<1x4x16x16xf32, #tpu.memory_space<vmem>>, vector<1x1x16x16xf32>,
    %cst_63 = arith.constant dense<0xFF800000> : vector<16xf32>
    %77 = vector.multi_reduction <maximumf>, %73, %cst_63 [1] : vector<16x16xf32> to vector<16xf32>
    %78 = vector.shape_cast %77 : vector<16xf32> to vector<16x1xf32>
    %79 = vector.broadcast %78 : vector<16x1xf32> to vector<16x16xf32>
    %80 = arith.subf %73, %79 : vector<16x16xf32>
    %81 = math.exp %80 : vector<16x16xf32>
    %cst_64 = arith.constant dense<0.000000e+00> : vector<16xf32>
    %82 = vector.multi_reduction <add>, %81, %cst_64 [1] : vector<16x16xf32> to vector<16xf32>
    %83 = vector.shape_cast %82 : vector<16xf32> to vector<16x1xf32>
    %84 = vector.broadcast %83 : vector<16x1xf32> to vector<16x16xf32>
    %85 = arith.divf %81, %84 : vector<16x16xf32>
    %cst_65 = arith.constant dense<0.000000e+00> : vector<16x8xf32>
    %86 = tpu.matmul %85, %70, %cst_65 {dimension_numbers = #tpu.dot_dimension_numbers<[1], [0], [0], [1], [0, 0, 1, 1], [], []>} : vector<16x16xf32>, vector<16x8xf32>, vector<16x8xf32> -> vector<16x8xf32>
    %c2_66 = arith.constant 2 : index
    %c0_67 = arith.constant 0 : index
    %c0_68 = arith.constant 0 : index
    %87 = vector.load %arg3[%c2_66, %c0_67, %c0_68] : memref<4x8x32xf32, #tpu.memory_space<vmem>>, vector<1x8x32xf32>
    %88 = vector.shape_cast %87 : vector<1x8x32xf32> to vector<8x32xf32>
    %cst_69 = arith.constant dense<0.000000e+00> : vector<16x32xf32>
    %89 = tpu.matmul %86, %88, %cst_69 {dimension_numbers = #tpu.dot_dimension_numbers<[1], [0], [0], [1], [0, 0, 1, 1], [], []>} : vector<16x8xf32>, vector<8x32xf32>, vector<16x32xf32> -> vector<16x32xf32>
    %90 = arith.addf %61, %89 : vector<16x32xf32>
    %c3 = arith.constant 3 : index
    %c0_70 = arith.constant 0 : index
    %c0_71 = arith.constant 0 : index
    %91 = vector.load %arg2[%c3, %c0_70, %c0_71] : memref<12x32x8xf32, #tpu.memory_space<vmem>>, vector<1x32x8xf32>
    %92 = vector.shape_cast %91 : vector<1x32x8xf32> to vector<32x8xf32>
    %cst_72 = arith.constant dense<0.000000e+00> : vector<16x8xf32>
    %93 = tpu.matmul %1, %92, %cst_72 {dimension_numbers = #tpu.dot_dimension_numbers<[1], [0], [0], [1], [0, 0, 1, 1], [], []>} : vector<16x32xf32>, vector<32x8xf32>, vector<16x8xf32> -> vector<16x8xf32>
    %c7 = arith.constant 7 : index
    %c0_73 = arith.constant 0 : index
    %c0_74 = arith.constant 0 : index
    %94 = vector.load %arg2[%c7, %c0_73, %c0_74] : memref<12x32x8xf32, #tpu.memory_space<vmem>>, vector<1x32x8xf32>
    %95 = vector.shape_cast %94 : vector<1x32x8xf32> to vector<32x8xf32>
    %cst_75 = arith.constant dense<0.000000e+00> : vector<16x8xf32>
    %96 = tpu.matmul %1, %95, %cst_75 {dimension_numbers = #tpu.dot_dimension_numbers<[1], [0], [0], [1], [0, 0, 1, 1], [], []>} : vector<16x32xf32>, vector<32x8xf32>, vector<16x8xf32> -> vector<16x8xf32>
    %c11 = arith.constant 11 : index
    %c0_76 = arith.constant 0 : index
    %c0_77 = arith.constant 0 : index
    %97 = vector.load %arg2[%c11, %c0_76, %c0_77] : memref<12x32x8xf32, #tpu.memory_space<vmem>>, vector<1x32x8xf32>
    %98 = vector.shape_cast %97 : vector<1x32x8xf32> to vector<32x8xf32>
    %cst_78 = arith.constant dense<0.000000e+00> : vector<16x8xf32>
    %99 = tpu.matmul %1, %98, %cst_78 {dimension_numbers = #tpu.dot_dimension_numbers<[1], [0], [0], [1], [0, 0, 1, 1], [], []>} : vector<16x32xf32>, vector<32x8xf32>, vector<16x8xf32> -> vector<16x8xf32>
    %cst_79 = arith.constant dense<0.000000e+00> : vector<16x16xf32>
    %100 = tpu.matmul %93, %96, %cst_79 {dimension_numbers = #tpu.dot_dimension_numbers<[1], [1], [0], [0], [0, 0, 1, 0], [], []>} : vector<16x8xf32>, vector<16x8xf32>, vector<16x16xf32> -> vector<16x16xf32>
    %cst_80 = arith.constant 0.353553385 : f32
    %101 = vector.broadcast %cst_80 : f32 to vector<16x16xf32>
    %102 = arith.mulf %100, %101 : vector<16x16xf32>
    %c0_81 = arith.constant 0 : index
    %c3_82 = arith.constant 3 : index
    %c0_83 = arith.constant 0 : index
    %c0_84 = arith.constant 0 : index
    %103 = vector.load %arg12[%c0_81, %c3_82, %c0_83, %c0_84] : memref<1x4x16x16xf32, #tpu.memory_space<vmem>>, vector<1x1x16x16xf32>
    %104 = vector.shape_cast %103 : vector<1x1x16x16xf32> to vector<16x16xf32>
    %105 = vector.shape_cast %102 : vector<16x16xf32> to vector<1x1x16x16xf32>
    tpu.vector_store %arg12[%c0_81, %c3_82, %c0_83, %c0_84], %105 {strides = array<i32>} : memref<1x4x16x16xf32, #tpu.memory_space<vmem>>, vector<1x1x16x16xf32>,
    %cst_85 = arith.constant dense<0xFF800000> : vector<16xf32>
    %106 = vector.multi_reduction <maximumf>, %102, %cst_85 [1] : vector<16x16xf32> to vector<16xf32>
    %107 = vector.shape_cast %106 : vector<16xf32> to vector<16x1xf32>
    %108 = vector.broadcast %107 : vector<16x1xf32> to vector<16x16xf32>
    %109 = arith.subf %102, %108 : vector<16x16xf32>
    %110 = math.exp %109 : vector<16x16xf32>
    %cst_86 = arith.constant dense<0.000000e+00> : vector<16xf32>
    %111 = vector.multi_reduction <add>, %110, %cst_86 [1] : vector<16x16xf32> to vector<16xf32>
    %112 = vector.shape_cast %111 : vector<16xf32> to vector<16x1xf32>
    %113 = vector.broadcast %112 : vector<16x1xf32> to vector<16x16xf32>
    %114 = arith.divf %110, %113 : vector<16x16xf32>
    %cst_87 = arith.constant dense<0.000000e+00> : vector<16x8xf32>
    %115 = tpu.matmul %114, %99, %cst_87 {dimension_numbers = #tpu.dot_dimension_numbers<[1], [0], [0], [1], [0, 0, 1, 1], [], []>} : vector<16x16xf32>, vector<16x8xf32>, vector<16x8xf32> -> vector<16x8xf32>
    %c3_88 = arith.constant 3 : index
    %c0_89 = arith.constant 0 : index
    %c0_90 = arith.constant 0 : index
    %116 = vector.load %arg3[%c3_88, %c0_89, %c0_90] : memref<4x8x32xf32, #tpu.memory_space<vmem>>, vector<1x8x32xf32>
    %117 = vector.shape_cast %116 : vector<1x8x32xf32> to vector<8x32xf32>
    %cst_91 = arith.constant dense<0.000000e+00> : vector<16x32xf32>
    %118 = tpu.matmul %115, %117, %cst_91 {dimension_numbers = #tpu.dot_dimension_numbers<[1], [0], [0], [1], [0, 0, 1, 1], [], []>} : vector<16x8xf32>, vector<8x32xf32>, vector<16x32xf32> -> vector<16x32xf32>
    %119 = arith.addf %90, %118 : vector<16x32xf32>
    %120 = arith.addf %119, %1 : vector<16x32xf32>
    %c0_92 = arith.constant 0 : index
    %c0_93 = arith.constant 0 : index
    %121 = vector.load %arg5[%c0_92, %c0_93] : memref<1x32xf32, #tpu.memory_space<vmem>>, vector<1x32xf32>
    %c0_94 = arith.constant 0 : index
    %c0_95 = arith.constant 0 : index
    %122 = vector.load %arg6[%c0_94, %c0_95] : memref<1x32xf32, #tpu.memory_space<vmem>>, vector<1x32xf32>
    %cst_96 = arith.constant dense<0.000000e+00> : vector<16xf32>
    %123 = vector.multi_reduction <add>, %120, %cst_96 [1] : vector<16x32xf32> to vector<16xf32>
    %124 = vector.shape_cast %123 : vector<16xf32> to vector<16x1xf32>
    %cst_97 = arith.constant 3.200000e+01 : f32
    %125 = vector.broadcast %cst_97 : f32 to vector<16x1xf32>
    %126 = arith.divf %124, %125 : vector<16x1xf32>
    %127 = vector.broadcast %126 : vector<16x1xf32> to vector<16x32xf32>
    %128 = arith.subf %120, %127 : vector<16x32xf32>
    %129 = arith.mulf %128, %128 : vector<16x32xf32>
    %cst_98 = arith.constant dense<0.000000e+00> : vector<16xf32>
    %130 = vector.multi_reduction <add>, %129, %cst_98 [1] : vector<16x32xf32> to vector<16xf32>
    %131 = vector.shape_cast %130 : vector<16xf32> to vector<16x1xf32>
    %cst_99 = arith.constant 3.200000e+01 : f32
    %132 = vector.broadcast %cst_99 : f32 to vector<16x1xf32>
    %133 = arith.divf %131, %132 : vector<16x1xf32>
    %134 = vector.broadcast %126 : vector<16x1xf32> to vector<16x32xf32>
    %135 = arith.subf %120, %134 : vector<16x32xf32>
    %cst_100 = arith.constant 9.99999974E-6 : f32
    %136 = vector.broadcast %cst_100 : f32 to vector<16x1xf32>
    %137 = arith.addf %133, %136 : vector<16x1xf32>
    %138 = math.rsqrt %137 : vector<16x1xf32>
    %139 = vector.broadcast %138 : vector<16x1xf32> to vector<16x32xf32>
    %140 = arith.mulf %135, %139 : vector<16x32xf32>
    %141 = vector.broadcast %121 : vector<1x32xf32> to vector<16x32xf32>
    %142 = arith.mulf %140, %141 : vector<16x32xf32>
    %143 = vector.broadcast %122 : vector<1x32xf32> to vector<16x32xf32>
    %144 = arith.addf %142, %143 : vector<16x32xf32>
    %c0_101 = arith.constant 0 : index
    %c0_102 = arith.constant 0 : index
    %145 = vector.load %arg7[%c0_101, %c0_102] : memref<32x64xf32, #tpu.memory_space<vmem>>, vector<32x64xf32>
    %cst_103 = arith.constant dense<0.000000e+00> : vector<16x64xf32>
    %146 = tpu.matmul %144, %145, %cst_103 {dimension_numbers = #tpu.dot_dimension_numbers<[1], [0], [0], [1], [0, 0, 1, 1], [], []>} : vector<16x32xf32>, vector<32x64xf32>, vector<16x64xf32> -> vector<16x64xf32>
    %c0_104 = arith.constant 0 : index
    %c0_105 = arith.constant 0 : index
    %147 = vector.load %arg8[%c0_104, %c0_105] : memref<1x64xf32, #tpu.memory_space<vmem>>, vector<1x64xf32>
    %148 = vector.broadcast %147 : vector<1x64xf32> to vector<16x64xf32>
    %149 = arith.addf %146, %148 : vector<16x64xf32>
    %cst_106 = arith.constant 5.000000e-01 : f32
    %150 = vector.broadcast %cst_106 : f32 to vector<16x64xf32>
    %151 = arith.mulf %150, %149 : vector<16x64xf32>
    %cst_107 = arith.constant 4.471500e-02 : f32
    %152 = vector.broadcast %cst_107 : f32 to vector<16x64xf32>
    %153 = arith.mulf %152, %149 : vector<16x64xf32>
    %154 = arith.mulf %153, %149 : vector<16x64xf32>
    %155 = arith.mulf %154, %149 : vector<16x64xf32>
    %156 = arith.addf %149, %155 : vector<16x64xf32>
    %cst_108 = arith.constant 0.797884583 : f32
    %157 = vector.broadcast %cst_108 : f32 to vector<16x64xf32>
    %158 = arith.mulf %157, %156 : vector<16x64xf32>
    %159 = math.tanh %158 : vector<16x64xf32>
    %cst_109 = arith.constant 1.000000e+00 : f32
    %160 = vector.broadcast %cst_109 : f32 to vector<16x64xf32>
    %161 = arith.addf %160, %159 : vector<16x64xf32>
    %162 = arith.mulf %151, %161 : vector<16x64xf32>
    %c0_110 = arith.constant 0 : index
    %c0_111 = arith.constant 0 : index
    %163 = vector.load %arg9[%c0_110, %c0_111] : memref<64x32xf32, #tpu.memory_space<vmem>>, vector<64x32xf32>
    %cst_112 = arith.constant dense<0.000000e+00> : vector<16x32xf32>
    %164 = tpu.matmul %162, %163, %cst_112 {dimension_numbers = #tpu.dot_dimension_numbers<[1], [0], [0], [1], [0, 0, 1, 1], [], []>} : vector<16x64xf32>, vector<64x32xf32>, vector<16x32xf32> -> vector<16x32xf32>
    %c0_113 = arith.constant 0 : index
    %c0_114 = arith.constant 0 : index
    %165 = vector.load %arg10[%c0_113, %c0_114] : memref<1x32xf32, #tpu.memory_space<vmem>>, vector<1x32xf32>
    %166 = vector.broadcast %165 : vector<1x32xf32> to vector<16x32xf32>
    %167 = arith.addf %164, %166 : vector<16x32xf32>
    %168 = arith.addf %167, %144 : vector<16x32xf32>
    %c0_115 = arith.constant 0 : index
    %c0_116 = arith.constant 0 : index
    %169 = vector.load %arg5[%c0_115, %c0_116] : memref<1x32xf32, #tpu.memory_space<vmem>>, vector<1x32xf32>
    %c0_117 = arith.constant 0 : index
    %c0_118 = arith.constant 0 : index
    %170 = vector.load %arg6[%c0_117, %c0_118] : memref<1x32xf32, #tpu.memory_space<vmem>>, vector<1x32xf32>
    %cst_119 = arith.constant dense<0.000000e+00> : vector<16xf32>
    %171 = vector.multi_reduction <add>, %168, %cst_119 [1] : vector<16x32xf32> to vector<16xf32>
    %172 = vector.shape_cast %171 : vector<16xf32> to vector<16x1xf32>
    %cst_120 = arith.constant 3.200000e+01 : f32
    %173 = vector.broadcast %cst_120 : f32 to vector<16x1xf32>
    %174 = arith.divf %172, %173 : vector<16x1xf32>
    %175 = vector.broadcast %174 : vector<16x1xf32> to vector<16x32xf32>
    %176 = arith.subf %168, %175 : vector<16x32xf32>
    %177 = arith.mulf %176, %176 : vector<16x32xf32>
    %cst_121 = arith.constant dense<0.000000e+00> : vector<16xf32>
    %178 = vector.multi_reduction <add>, %177, %cst_121 [1] : vector<16x32xf32> to vector<16xf32>
    %179 = vector.shape_cast %178 : vector<16xf32> to vector<16x1xf32>
    %cst_122 = arith.constant 3.200000e+01 : f32
    %180 = vector.broadcast %cst_122 : f32 to vector<16x1xf32>
    %181 = arith.divf %179, %180 : vector<16x1xf32>
    %182 = vector.broadcast %174 : vector<16x1xf32> to vector<16x32xf32>
    %183 = arith.subf %168, %182 : vector<16x32xf32>
    %cst_123 = arith.constant 9.99999974E-6 : f32
    %184 = vector.broadcast %cst_123 : f32 to vector<16x1xf32>
    %185 = arith.addf %181, %184 : vector<16x1xf32>
    %186 = math.rsqrt %185 : vector<16x1xf32>
    %187 = vector.broadcast %186 : vector<16x1xf32> to vector<16x32xf32>
    %188 = arith.mulf %183, %187 : vector<16x32xf32>
    %189 = vector.broadcast %169 : vector<1x32xf32> to vector<16x32xf32>
    %190 = arith.mulf %188, %189 : vector<16x32xf32>
    %191 = vector.broadcast %170 : vector<1x32xf32> to vector<16x32xf32>
    %192 = arith.addf %190, %191 : vector<16x32xf32>
    %c0_124 = arith.constant 0 : index
    %c0_125 = arith.constant 0 : index
    %c0_126 = arith.constant 0 : index
    %193 = vector.load %arg11[%c0_124, %c0_125, %c0_126] : memref<1x16x32xf32, #tpu.memory_space<vmem>>, vector<1x16x32xf32>
    %194 = vector.shape_cast %193 : vector<1x16x32xf32> to vector<16x32xf32>
    %195 = vector.shape_cast %192 : vector<16x32xf32> to vector<1x16x32xf32>
    tpu.vector_store %arg11[%c0_124, %c0_125, %c0_126], %195 {strides = array<i32>} : memref<1x16x32xf32, #tpu.memory_space<vmem>>, vector<1x16x32xf32>,
    return
  }
  func.func @transform_0(%arg0: i32) -> (i32, i32, i32) {
    %c0_i32 = arith.constant 0 : i32
    %c0_i32_0 = arith.constant 0 : i32
    %c0_i32_1 = arith.constant 0 : i32
    return %arg0, %c0_i32, %c0_i32_0 : i32, i32, i32
  }
  func.func @transform_1(%arg0: i32) -> (i32, i32, i32) {
    %c0_i32 = arith.constant 0 : i32
    %c0_i32_0 = arith.constant 0 : i32
    %c0_i32_1 = arith.constant 0 : i32
    %c0_i32_2 = arith.constant 0 : i32
    return %c0_i32, %c0_i32_0, %c0_i32_1 : i32, i32, i32
  }
  func.func @transform_2(%arg0: i32) -> (i32, i32, i32) {
    %c0_i32 = arith.constant 0 : i32
    %c0_i32_0 = arith.constant 0 : i32
    %c0_i32_1 = arith.constant 0 : i32
    %c0_i32_2 = arith.constant 0 : i32
    return %c0_i32, %c0_i32_0, %c0_i32_1 : i32, i32, i32
  }
  func.func @transform_3(%arg0: i32) -> (i32, i32) {
    %c0_i32 = arith.constant 0 : i32
    %c0_i32_0 = arith.constant 0 : i32
    %c0_i32_1 = arith.constant 0 : i32
    return %c0_i32, %c0_i32_0 : i32, i32
  }
  func.func @transform_4(%arg0: i32) -> (i32, i32) {
    %c0_i32 = arith.constant 0 : i32
    %c0_i32_0 = arith.constant 0 : i32
    %c0_i32_1 = arith.constant 0 : i32
    return %c0_i32, %c0_i32_0 : i32, i32
  }
  func.func @transform_5(%arg0: i32) -> (i32, i32) {
    %c0_i32 = arith.constant 0 : i32
    %c0_i32_0 = arith.constant 0 : i32
    %c0_i32_1 = arith.constant 0 : i32
    return %c0_i32, %c0_i32_0 : i32, i32
  }
  func.func @transform_6(%arg0: i32) -> (i32, i32) {
    %c0_i32 = arith.constant 0 : i32
    %c0_i32_0 = arith.constant 0 : i32
    %c0_i32_1 = arith.constant 0 : i32
    return %c0_i32, %c0_i32_0 : i32, i32
  }
  func.func @transform_7(%arg0: i32) -> (i32, i32) {
    %c0_i32 = arith.constant 0 : i32
    %c0_i32_0 = arith.constant 0 : i32
    %c0_i32_1 = arith.constant 0 : i32
    return %c0_i32, %c0_i32_0 : i32, i32
  }
  func.func @transform_8(%arg0: i32) -> (i32, i32) {
    %c0_i32 = arith.constant 0 : i32
    %c0_i32_0 = arith.constant 0 : i32
    %c0_i32_1 = arith.constant 0 : i32
    return %c0_i32, %c0_i32_0 : i32, i32
  }
  func.func @transform_9(%arg0: i32) -> (i32, i32) {
    %c0_i32 = arith.constant 0 : i32
    %c0_i32_0 = arith.constant 0 : i32
    %c0_i32_1 = arith.constant 0 : i32
    return %c0_i32, %c0_i32_0 : i32, i32
  }
  func.func @transform_10(%arg0: i32) -> (i32, i32, i32) {
    %c0_i32 = arith.constant 0 : i32
    %c0_i32_0 = arith.constant 0 : i32
    %c0_i32_1 = arith.constant 0 : i32
    return %arg0, %c0_i32, %c0_i32_0 : i32, i32, i32
  }
  func.func @transform_11(%arg0: i32) -> (i32, i32, i32, i32) {
    %c0_i32 = arith.constant 0 : i32
    %c0_i32_0 = arith.constant 0 : i32
    %c0_i32_1 = arith.constant 0 : i32
    %c0_i32_2 = arith.constant 0 : i32
    return %arg0, %c0_i32, %c0_i32_0, %c0_i32_1 : i32, i32, i32, i32
  }
}

</mosaic_0001>

<bundles_post_ra>
// kernel: _lambda_.5
= control target key start
LH: loop header
LB: loop body
LE: loop exit
PB: predicated region body
PF: predicated region fallthrough
CT: control target
= control target key end

     0   :  { %s3397_s13 = smov 0   ;;  %s3784_s0 = inlined_call_operand.vmem [shape: f32[2,16,32], index: 0, kind: input, shape index: {}]   ;;  %s3785_s1 = inlined_call_operand.vmem [shape: f32[12,32,8], index: 1, kind: input, shape index: {}]   ;;  %s3786_s2 = inlined_call_operand.vmem [shape: f32[4,8,32], index: 2, kind: input, shape index: {}]   ;;  %s3787_s3 = inlined_call_operand.vmem [shape: f32[1,32], index: 3, kind: input, shape index: {}]   ;;  %s3788_s4 = inlined_call_operand.vmem [shape: f32[1,32], index: 4, kind: input, shape index: {}]   ;;  %s3789_s5 = inlined_call_operand.vmem [shape: f32[1,32], index: 5, kind: input, shape index: {}]   ;;  %s3790_s6 = inlined_call_operand.vmem [shape: f32[32,64], index: 6, kind: input, shape index: {}]   ;;  %s3791_s7 = inlined_call_operand.vmem [shape: f32[1,64], index: 7, kind: input, shape index: {}]   ;;  %s3792_s8 = inlined_call_operand.vmem [shape: f32[64,32], index: 8, kind: input, shape index: {}]   ;;  %s3793_s9 = inlined_call_operand.vmem [shape: f32[1,32], index: 9, kind: input, shape index: {}]   ;;  %s3794_s10 = inlined_call_operand.vmem [shape: f32[2,16,32], index: 10, kind: output, shape index: {}]  }
   0x1 LB: > { %s2787_s14 = sadd.s32 4294967295, %s3340_s13   ;;  %p2791_p0 = scmp.ge.s32.totalorder %s3340_s13, 1  ;;  %s3340_s13 = sphi %s3397_s13, %s20_s13  }
   0x2   : > { %p312_p1 = scmp.lt.s32.totalorder %s3340_s13, 3 }
   0x4   : > { %p313_p2 = pnand %p2791_p0, %p312_p1 }
   0x5   : > { %p350_p3 = scmp.lt.s32.totalorder (!%p313_p2), %s2787_s14, 1 }
   0x6   : > { %316 = sbr.rel (%p313_p2) target bundleno = 4912 (0x1330), region = 60 }
   0xb   : > { %v2801_v0 = vld [vmem:[%s3785_s1 + $0x98] sm:$0xff]  ;;  %v2800_v1 = vld [vmem:[%s3785_s1 + $0x90] sm:$0xff]  ;;  %v2799_v4 = vld [vmem:[%s3785_s1 + $0x88] sm:$0xff]  ;;  %s3796_s14 = smov (!%p350_p3, %s2787_s14), 1  ;;  %vm367_vm0 = vcmask 261120   ;;  %vm609_vm1 = vcmask 64512  }
   0xc   : > { %v366_v2 = vld [vmem:[%s3785_s1 + $0x18] sm:$0xff]  ;;  %3055 = vmatprep.subr.mxu1 %v2801_v0  ;;  %v365_v3 = vld [vmem:[%s3785_s1 + $0x10] sm:$0xff]  ;;  %v364_v5 = vld [vmem:[%s3785_s1 + $0x8] sm:$0xff]  ;;  %s2910_s29 = sshll.u32 %s3796_s14, 4  ;;  %vm699_vm2 = vcmask 130048   ;;  %vm2616_vm3 = vcmask 523264  }
   0xd   : > { %3044 = vmatprep.subr.mxu0 %v366_v2  ;;  %3056 = vmatpush3.msra.mxu1 %v2801_v0  ;;  %v2798_v6 = vld [vmem:[%s3785_s1 + $0x80] sm:$0xff]  ;;  %s354_s12 = scalar_lea.vmem %s3784_s0, %s2910_s29  ;;  %v2807_v14 = vld [vmem:[%s3785_s1 + $0x118] sm:$0xff]  ;;  %v2806_v15 = vld [vmem:[%s3785_s1 + $0x110] sm:$0xff]  ;;  %s359_s22 = scalar_lea.vmem %s3794_s10, %s2910_s29 }
   0xe   : > { %3045 = vmatpush3.msra.mxu0 %v366_v2  ;;  %3057 = vmatprep.subr.mxu1 %v2800_v1  ;;  %v363_v7 = vld [vmem:[%s3785_s1] sm:$0xff]  ;;  %v3439_v9 = vld [vmem:[%s354_s12 + $0x8] sm:$0xff]  ;;  %v2828_v36 = vld [vmem:[%s3785_s1 + $0xb8] sm:$0xff] }
   0xf   : > { %3046 = vmatprep.subr.mxu0 %v365_v3  ;;  %3058 = vmatpush3.msra.mxu1 %v2800_v1  ;;  %v3437_v8 = vld [vmem:[%s354_s12] sm:$0xff]  ;;  %v2805_v16 = vld [vmem:[%s3785_s1 + $0x108] sm:$0xff]  ;;  %v2827_v37 = vld [vmem:[%s3785_s1 + $0xb0] sm:$0xff] }
  0x10   : > { %3047 = vmatpush3.msra.mxu0 %v365_v3  ;;  %3059 = vmatprep.subr.mxu1 %v2799_v4  ;;  %v2804_v17 = vld [vmem:[%s3785_s1 + $0x100] sm:$0xff]  ;;  %v2826_v39 = vld [vmem:[%s3785_s1 + $0xa8] sm:$0xff]  ;;  %v2822_v47 = vld [vmem:[%s3785_s1 + $0x38] sm:$0xff] }
  0x11   : > { %3048 = vmatprep.subr.mxu0 %v364_v5  ;;  %3060 = vmatpush3.msra.mxu1 %v2799_v4  ;;  %v803_v38 = vld [vmem:[%s3786_s2] sm:$0xff]  ;;  %v2821_v51 = vld [vmem:[%s3785_s1 + $0x30] sm:$0xff]  ;;  %v2820_v52 = vld [vmem:[%s3785_s1 + $0x28] sm:$0xff] }
  0x12   : > { %3049 = vmatpush3.msra.mxu0 %v364_v5  ;;  %3061 = vmatprep.subr.mxu1 %v2798_v6  ;;  %v2825_v40 = vld [vmem:[%s3785_s1 + $0xa0] sm:$0xff]  ;;  %v2834_v59 = vld [vmem:[%s3785_s1 + $0x138] sm:$0xff]  ;;  %v2833_v60 = vld [vmem:[%s3785_s1 + $0x130] sm:$0xff] }
  0x13   : > { %3063 = vmatprep.mubr.msk.f32.mxu1 %vm367_vm0, %v3437_v8  ;;  %3062 = vmatpush3.msra.mxu1 %v2798_v6  ;;  %v2819_v53 = vld [vmem:[%s3785_s1 + $0x20] sm:$0xff]  ;;  %v2832_v61 = vld [vmem:[%s3785_s1 + $0x128] sm:$0xff] }
  0x14   : > { %3050 = vmatprep.subr.mxu0 %v363_v7  ;;  %3064 = vmatmul.mubr.msk.f32.vlgmr.msra.gmra.mxu1 %vm367_vm0, %v3439_v9  ;;  %v2831_v62 = vld [vmem:[%s3785_s1 + $0x120] sm:$0xff] }
  0x15   : > { %3051 = vmatpush3.msra.mxu0 %v363_v7  ;;  %3052 = vmatprep.mubr.msk.f32.mxu0 %vm367_vm0, %v3437_v8 }
  0x16   : > { %3053 = vmatmul.mubr.msk.f32.vlgmr.msra.gmra.mxu0 %vm367_vm0, %v3439_v9  ;;  %3066 = vmatprep.subr.mxu0 %v2807_v14 }
  0x17   : > { %3074 = vmatprep.mubr.msk.f32.mxu0 %vm367_vm0, %v3437_v8  ;;  %3067 = vmatpush3.msra.mxu0 %v2807_v14 }
  0x18   : > { %3068 = vmatprep.subr.mxu0 %v2806_v15 }
  0x19   : > { %3069 = vmatpush3.msra.mxu0 %v2806_v15 }
  0x1a   : > { %3070 = vmatprep.subr.mxu0 %v2805_v16 }
  0x1b   : > { %3071 = vmatpush3.msra.mxu0 %v2805_v16 }
  0x1c   : > { %3072 = vmatprep.subr.mxu0 %v2804_v17 }
  0x1d   : > { %3073 = vmatpush3.msra.mxu0 %v2804_v17 }
  0x1e   : > { %3075 = vmatmul.mubr.msk.f32.vlgmr.msra.gmra.mxu0 %vm367_vm0, %v3439_v9 }
  0xd4   : > { %v3065_v10 = vpop.f32.mrf.mxu1 }
  0xd5   : > { %3077 = vmatprep.subr.msk.mxu1 %vm609_vm1, %v3065_v10 }
  0xd6   : > { %v520_v11 = vpop.f32.mrf.mxu1  ;;  %3078 = vmatpush3.xpose.msk.msra.mxu1 %vm609_vm1, %v3065_v10  ;;  %v3054_v12 = vpop.f32.mrf.mxu0 }
  0xd7   : > { %3079 = vmatprep.subr.msk.mxu1 %vm609_vm1, %v520_v11 }
  0xd8   : > { %v440_v13 = vpop.f32.mrf.mxu0 }
  0xd9   : > { %3081 = vmatprep.mubr.msk.f32.mxu1 %vm609_vm1, %v440_v13 }
  0xda   : > { %3080 = vmatpush3.xpose.msk.msra.mxu1 %vm609_vm1, %v520_v11 }
  0xdb   : > { %3107 = vmatprep.subr.mxu1 %v2828_v36 }
  0xdd   : > { %3082 = vmatmul.mubr.msk.f32.vlgmr.msra.gmra.mxu1 %vm609_vm1, %v3054_v12 }
  0xde   : > { %3115 = vmatprep.mubr.msk.f32.mxu1 %vm367_vm0, %v3437_v8  ;;  %v3076_v34 = vpop.f32.mrf.mxu0  ;;  %3108 = vmatpush3.msra.mxu1 %v2828_v36 }
  0xdf   : > { %3084 = vmatprep.subr.mxu0 %v3076_v34  ;;  %3109 = vmatprep.subr.mxu1 %v2827_v37 }
  0xe0   : > { %v600_v35 = vpop.f32.mrf.mxu0  ;;  %3085 = vmatpush3.msra.mxu0 %v3076_v34  ;;  %3110 = vmatpush3.msra.mxu1 %v2827_v37  ;;  %v2853_v34 = vld [vmem:[%s3785_s1 + $0xc8] sm:$0xff] }
  0xe1   : > { %3086 = vmatprep.subr.mxu0 %v600_v35  ;;  %3111 = vmatprep.subr.mxu1 %v2826_v39 }
  0xe2   : > { %3087 = vmatpush3.msra.mxu0 %v600_v35  ;;  %3112 = vmatpush3.msra.mxu1 %v2826_v39  ;;  %v2852_v35 = vld [vmem:[%s3785_s1 + $0xc0] sm:$0xff] }
  0xe3   : > { %3091 = vmatprep.subr.mxu0 %v803_v38  ;;  %3113 = vmatprep.subr.mxu1 %v2825_v40 }
  0xe4   : > { %3114 = vmatpush3.msra.mxu1 %v2825_v40 }
  0xe5   : > { %3116 = vmatmul.mubr.msk.f32.vlgmr.msra.gmra.mxu1 %vm367_vm0, %v3439_v9 }
 0x19d   : > { %v3083_v18 = vpop.f32.mrf.mxu1 }
 0x19e   : > { %v698_v21 = vmul.f32 0.35355338, %v3083_v18 }
 0x19f   : > { %v688_v19 = vpop.f32.mrf.mxu1 }
 0x1a0   : > { %v697_v20 = vmul.f32 0.35355338, %v688_v19  ;;  %v703_v23 = vsel %vm699_vm2, %v698_v21, -inf  ;;  %v2843_v19 = vld [vmem:[%s3786_s2 + $0x8] sm:$0xff] }
 0x1a2   : > { %v700_v22 = vsel %vm699_vm2, %v697_v20, -inf }
 0x1a3   : > { %701 = vmax.xlane.f32.xlu0 %v700_v22 }
 0x1a5   : > { %v3117_v48 = vpop.f32.mrf.mxu1 }
 0x1a6   : > { %3129 = vmatprep.subr.msk.mxu1 %vm609_vm1, %v3117_v48 }
 0x1a7   : > { %704 = vmax.xlane.f32.xlu0 %v703_v23  ;;  %3130 = vmatpush3.xpose.msk.msra.mxu1 %vm609_vm1, %v3117_v48  ;;  %v1044_v54 = vpop.f32.mrf.mxu1  ;;  %v2860_v48 = vld [vmem:[%s3785_s1 + $0x150] sm:$0xff] }
 0x1a8   : > { %3131 = vmatprep.subr.msk.mxu1 %vm609_vm1, %v1044_v54 }
 0x1ab   : > { %3132 = vmatpush3.xpose.msk.msra.mxu1 %vm609_vm1, %v1044_v54 }
 0x1ac   : > { %3143 = vmatprep.subr.mxu1 %v2843_v19 }
 0x22c   : > { %v702_v24 = vpop.xlane.xlu0 %701 }
 0x22d   : > { %v706_v25 = vsub.f32 %v697_v20, %v702_v24 }
 0x22f   : > { %v708_v26 = vmul.f32 1.442695, %v706_v25 }
 0x230   : > { %v705_v27 = vpop.xlane.xlu0 %704 }
 0x231   : > { %3290 = vpow2.f32 %v708_v26  ;;  %v707_v28 = vsub.f32 %v698_v21, %v705_v27  ;;  %v2855_v26 = vld [vmem:[%s3785_s1 + $0xd8] sm:$0xff] }
 0x232   : > { %v2849_v27 = vld [vmem:[%s3785_s1 + $0x58] sm:$0xff] }
 0x233   : > { %v710_v29 = vmul.f32 1.442695, %v707_v28  ;;  %v2848_v28 = vld [vmem:[%s3785_s1 + $0x50] sm:$0xff] }
 0x235   : > { %3292 = vpow2.f32 %v710_v29  ;;  %v2847_v29 = vld [vmem:[%s3785_s1 + $0x48] sm:$0xff] }
 0x23e   : > { %v3291_v30 = vpop.eup %3290 }
 0x23f   : > { %v712_v31 = vsel %vm699_vm2, %v3291_v30, 0.0 }
 0x240   : > { %713 = vadd.xlane.f32.xlu1 %v712_v31 }
 0x242   : > { %v3293_v32 = vpop.eup %3292 }
 0x243   : > { %v715_v33 = vsel %vm699_vm2, %v3293_v32, 0.0 }
 0x244   : > { %716 = vadd.xlane.f32.xlu1 %v715_v33  ;;  %v2854_v33 = vld [vmem:[%s3785_s1 + $0xd0] sm:$0xff] }
 0x2c9   : > { %v714_v41 = vpop.xlane.xlu1 %713 }
 0x2ca   : > { %3294 = vrcp.f32 %v714_v41 }
 0x2cd   : > { %v717_v42 = vpop.xlane.xlu1 %716 }
 0x2ce   : > { %3296 = vrcp.f32 %v717_v42 }
 0x2d7   : > { %v3295_v43 = vpop.eup %3294 }
 0x2d8   : > { %v719_v44 = vmul.f32 %v3295_v43, %v3291_v30  ;;  %v2846_v30 = vld [vmem:[%s3785_s1 + $0x40] sm:$0xff] }
 0x2da   : > { %3088 = vmatprep.mubr.msk.f32.mxu0 %vm699_vm2, %v719_v44 }
 0x2db   : > { %v3297_v45 = vpop.eup %3296 }
 0x2dc   : > { %v721_v46 = vmul.f32 %v3297_v45, %v3293_v32 }
 0x2de   : > { %3089 = vmatmul.mubr.msk.f32.vlgmr.msra.gmra.mxu0 %vm699_vm2, %v721_v46 }
 0x2df   : > { %3092 = vmatpush3.msra.mxu0 %v803_v38  ;;  %v2818_v38 = vld [vmem:[%s3787_s3] ss:$0 sm:$0xff] }
 0x2e0   : > { %3096 = vmatprep.subr.mxu0 %v2822_v47 }
 0x39e   : > { %v3090_v49 = vpop.f32.mrf.mxu0 }
 0x3a0   : > { %v794_v50 = vpop.f32.mrf.mxu0 }
 0x3a1   : > { %3093 = vmatprep.mubr.msk.f32.mxu0 %vm609_vm1, %v794_v50  ;;  %v2858_v50 = vld [vmem:[%s3785_s1 + $0x140] sm:$0xff] }
 0x3a2   : > { %3094 = vmatmul.mubr.msk.f32.vlgmr.msra.gmra.mxu0 %vm609_vm1, %v3090_v49  ;;  %v2859_v49 = vld [vmem:[%s3785_s1 + $0x148] sm:$0xff] }
 0x3a3   : > { %3097 = vmatpush3.msra.mxu0 %v2822_v47  ;;  %3104 = vmatprep.mubr.msk.f32.mxu0 %vm367_vm0, %v3437_v8  ;;  %v2861_v47 = vld [vmem:[%s3785_s1 + $0x158] sm:$0xff] }
 0x3a4   : > { %3098 = vmatprep.subr.mxu0 %v2821_v51 }
 0x3a5   : > { %3099 = vmatpush3.msra.mxu0 %v2821_v51 }
 0x3a6   : > { %3100 = vmatprep.subr.mxu0 %v2820_v52 }
 0x3a7   : > { %3101 = vmatpush3.msra.mxu0 %v2820_v52 }
 0x3a8   : > { %3102 = vmatprep.subr.mxu0 %v2819_v53 }
 0x3a9   : > { %3103 = vmatpush3.msra.mxu0 %v2819_v53 }
 0x3aa   : > { %3105 = vmatmul.mubr.msk.f32.vlgmr.msra.gmra.mxu0 %vm367_vm0, %v3439_v9  ;;  %3118 = vmatprep.subr.mxu0 %v2834_v59 }
 0x3ab   : > { %3126 = vmatprep.mubr.msk.f32.mxu0 %vm367_vm0, %v3437_v8  ;;  %3119 = vmatpush3.msra.mxu0 %v2834_v59 }
 0x3ac   : > { %3120 = vmatprep.subr.mxu0 %v2833_v60 }
 0x3ad   : > { %3121 = vmatpush3.msra.mxu0 %v2833_v60 }
 0x3ae   : > { %3122 = vmatprep.subr.mxu0 %v2832_v61 }
 0x3af   : > { %3123 = vmatpush3.msra.mxu0 %v2832_v61 }
 0x3b0   : > { %3124 = vmatprep.subr.mxu0 %v2831_v62 }
 0x3b1   : > { %3125 = vmatpush3.msra.mxu0 %v2831_v62 }
 0x3b2   : > { %3127 = vmatmul.mubr.msk.f32.vlgmr.msra.gmra.mxu0 %vm367_vm0, %v3439_v9 }
 0x462   : > { %v3520_v55 = vpop.f32.mrf.mxu0 }
 0x463   : > { %v892_v39 = vadd.f32 %v3520_v55, %v2818_v38 }
 0x464   : > { %v3522_v56 = vpop.f32.mrf.mxu0 }
 0x465   : > { %v891_v41 = vadd.f32 %v2818_v38, %v3522_v56 }
 0x46a   : > { %v3106_v57 = vpop.f32.mrf.mxu0 }
 0x46c   : > { %v964_v58 = vpop.f32.mrf.mxu0 }
 0x46d   : > { %3133 = vmatprep.mubr.msk.f32.mxu1 %vm609_vm1, %v964_v58 }
 0x46e   : > { %3134 = vmatmul.mubr.msk.f32.vlgmr.msra.gmra.mxu1 %vm609_vm1, %v3106_v57 }
 0x46f   : > { %3144 = vmatpush3.msra.mxu1 %v2843_v19 }
 0x470   : > { %3159 = vmatprep.subr.mxu1 %v2855_v26 }
 0x472   : > { %v3128_v17 = vpop.f32.mrf.mxu0 }
 0x473   : > { %3136 = vmatprep.subr.mxu0 %v3128_v17 }
 0x474   : > { %v1124_v18 = vpop.f32.mrf.mxu0  ;;  %3137 = vmatpush3.msra.mxu0 %v3128_v17  ;;  %v2874_v17 = vld [vmem:[%s3785_s1 + $0x68] sm:$0xff] }
 0x475   : > { %3138 = vmatprep.subr.mxu0 %v1124_v18 }
 0x476   : > { %3139 = vmatpush3.msra.mxu0 %v1124_v18  ;;  %v2873_v18 = vld [vmem:[%s3785_s1 + $0x60] sm:$0xff] }
 0x477   : > { %3148 = vmatprep.subr.mxu0 %v2849_v27 }
 0x52e   : > { %v3135_v63 = vpop.f32.mrf.mxu1 }
 0x52f   : > { %v1221_v0 = vmul.f32 0.35355338, %v3135_v63 }
 0x530   : > { %v1211_v1 = vpop.f32.mrf.mxu1 }
 0x531   : > { %v1220_v2 = vmul.f32 0.35355338, %v1211_v1  ;;  %v1225_v3 = vsel %vm699_vm2, %v1221_v0, -inf }
 0x532   : > { %1226 = vmax.xlane.f32.xlu1 %v1225_v3 }
 0x533   : > { %v1222_v4 = vsel %vm699_vm2, %v1220_v2, -inf }
 0x534   : > { %1223 = vmax.xlane.f32.xlu0 %v1222_v4 }
 0x5bb   : > { %v1227_v5 = vpop.xlane.xlu1 %1226 }
 0x5bc   : > { %v1229_v6 = vsub.f32 %v1221_v0, %v1227_v5  ;;  %v2870_v5 = vld [vmem:[%s3786_s2 + $0x10] sm:$0xff] }
 0x5bd   : > { %v1224_v7 = vpop.xlane.xlu0 %1223 }
 0x5be   : > { %v1232_v10 = vmul.f32 1.442695, %v1229_v6  ;;  %v1228_v11 = vsub.f32 %v1220_v2, %v1224_v7 }
 0x5c0   : > { %3298 = vpow2.f32 %v1232_v10  ;;  %v1230_v12 = vmul.f32 1.442695, %v1228_v11 }
 0x5c2   : > { %3300 = vpow2.f32 %v1230_v12 }
 0x5cd   : > { %v3299_v13 = vpop.eup %3298 }
 0x5ce   : > { %v1237_v14 = vsel %vm699_vm2, %v3299_v13, 0.0 }
 0x5cf   : > { %v3301_v15 = vpop.eup %3300  ;;  %1238 = vadd.xlane.f32.xlu1 %v1237_v14  ;;  %v2882_v14 = vld [vmem:[%s3785_s1 + $0xf8] sm:$0xff] }
 0x5d0   : > { %v1234_v16 = vsel %vm699_vm2, %v3301_v15, 0.0 }
 0x5d1   : > { %1235 = vadd.xlane.f32.xlu0 %v1234_v16  ;;  %v2875_v16 = vld [vmem:[%s3785_s1 + $0x70] sm:$0xff] }
 0x658   : > { %v1239_v20 = vpop.xlane.xlu1 %1238 }
 0x659   : > { %3302 = vrcp.f32 %v1239_v20 }
 0x65a   : > { %v1236_v21 = vpop.xlane.xlu0 %1235 }
 0x65b   : > { %3304 = vrcp.f32 %v1236_v21  ;;  %v2881_v21 = vld [vmem:[%s3785_s1 + $0xf0] sm:$0xff] }
 0x666   : > { %v3303_v22 = vpop.eup %3302 }
 0x667   : > { %v1243_v25 = vmul.f32 %v3303_v22, %v3299_v13  ;;  %v2880_v22 = vld [vmem:[%s3785_s1 + $0xe8] sm:$0xff] }
 0x668   : > { %v3305_v23 = vpop.eup %3304 }
 0x669   : > { %v1241_v24 = vmul.f32 %v3305_v23, %v3301_v15  ;;  %v2876_v15 = vld [vmem:[%s3785_s1 + $0x78] sm:$0xff]  ;;  %v2879_v23 = vld [vmem:[%s3785_s1 + $0xe0] sm:$0xff] }
 0x66b   : > { %3140 = vmatprep.mubr.msk.f32.mxu0 %vm699_vm2, %v1241_v24 }
 0x66c   : > { %3141 = vmatmul.mubr.msk.f32.vlgmr.msra.gmra.mxu0 %vm699_vm2, %v1243_v25 }
 0x66d   : > { %3156 = vmatprep.mubr.msk.f32.mxu0 %vm367_vm0, %v3437_v8  ;;  %3149 = vmatpush3.msra.mxu0 %v2849_v27 }
 0x66e   : > { %3150 = vmatprep.subr.mxu0 %v2848_v28 }
 0x66f   : > { %3151 = vmatpush3.msra.mxu0 %v2848_v28 }
 0x670   : > { %3152 = vmatprep.subr.mxu0 %v2847_v29 }
 0x671   : > { %3153 = vmatpush3.msra.mxu0 %v2847_v29 }
 0x672   : > { %3154 = vmatprep.subr.mxu0 %v2846_v30 }
 0x673   : > { %3155 = vmatpush3.msra.mxu0 %v2846_v30 }
 0x674   : > { %3157 = vmatmul.mubr.msk.f32.vlgmr.msra.gmra.mxu0 %vm367_vm0, %v3439_v9  ;;  %3170 = vmatprep.subr.mxu0 %v2861_v47 }
 0x675   : > { %3178 = vmatprep.mubr.msk.f32.mxu0 %vm367_vm0, %v3437_v8  ;;  %3171 = vmatpush3.msra.mxu0 %v2861_v47 }
 0x676   : > { %3172 = vmatprep.subr.mxu0 %v2860_v48 }
 0x677   : > { %3173 = vmatpush3.msra.mxu0 %v2860_v48 }
 0x678   : > { %3174 = vmatprep.subr.mxu0 %v2859_v49 }
 0x679   : > { %3175 = vmatpush3.msra.mxu0 %v2859_v49 }
 0x67a   : > { %3176 = vmatprep.subr.mxu0 %v2858_v50 }
 0x67b   : > { %3177 = vmatpush3.msra.mxu0 %v2858_v50 }
 0x67c   : > { %3179 = vmatmul.mubr.msk.f32.vlgmr.msra.gmra.mxu0 %vm367_vm0, %v3439_v9 }
 0x72c   : > { %v3142_v31 = vpop.f32.mrf.mxu0 }
 0x72e   : > { %v1316_v32 = vpop.f32.mrf.mxu0 }
 0x72f   : > { %3145 = vmatprep.mubr.msk.f32.mxu1 %vm609_vm1, %v1316_v32  ;;  %v2888_v32 = vld [vmem:[%s3785_s1 + $0x178] sm:$0xff] }
 0x730   : > { %3146 = vmatmul.mubr.msk.f32.vlgmr.msra.gmra.mxu1 %vm609_vm1, %v3142_v31 }
 0x731   : > { %3160 = vmatpush3.msra.mxu1 %v2855_v26  ;;  %3167 = vmatprep.mubr.msk.f32.mxu1 %vm367_vm0, %v3437_v8 }
 0x732   : > { %3161 = vmatprep.subr.mxu1 %v2854_v33 }
 0x733   : > { %3162 = vmatpush3.msra.mxu1 %v2854_v33  ;;  %v2887_v33 = vld [vmem:[%s3785_s1 + $0x170] sm:$0xff] }
 0x734   : > { %3163 = vmatprep.subr.mxu1 %v2853_v34  ;;  %v3158_v36 = vpop.f32.mrf.mxu0 }
 0x735   : > { %3164 = vmatpush3.msra.mxu1 %v2853_v34  ;;  %v2886_v34 = vld [vmem:[%s3785_s1 + $0x168] sm:$0xff] }
 0x736   : > { %3165 = vmatprep.subr.mxu1 %v2852_v35  ;;  %v1481_v37 = vpop.f32.mrf.mxu0 }
 0x737   : > { %3166 = vmatpush3.msra.mxu1 %v2852_v35  ;;  %v2885_v35 = vld [vmem:[%s3785_s1 + $0x160] sm:$0xff] }
 0x738   : > { %3168 = vmatmul.mubr.msk.f32.vlgmr.msra.gmra.mxu1 %vm367_vm0, %v3439_v9 }
 0x739   : > { %3185 = vmatprep.mubr.msk.f32.mxu1 %vm609_vm1, %v1481_v37 }
 0x73c   : > { %v3180_v3 = vpop.f32.mrf.mxu0 }
 0x73d   : > { %3188 = vmatprep.subr.mxu0 %v3180_v3 }
 0x73e   : > { %v1641_v4 = vpop.f32.mrf.mxu0  ;;  %3189 = vmatpush3.msra.mxu0 %v3180_v3 }
 0x73f   : > { %3190 = vmatprep.subr.mxu0 %v1641_v4 }
 0x740   : > { %3191 = vmatpush3.msra.mxu0 %v1641_v4 }
 0x741   : > { %3200 = vmatprep.subr.mxu0 %v2876_v15 }
 0x7f0   : > { %v3147_v40 = vpop.f32.mrf.mxu1 }
 0x7f1   : > { %v3591_v42 = vadd.f32 %v3147_v40, %v892_v39 }
 0x7f2   : > { %v1399_v43 = vpop.f32.mrf.mxu1 }
 0x7f3   : > { %v3593_v44 = vadd.f32 %v1399_v43, %v891_v41 }
 0x7f8   : > { %v3169_v45 = vpop.f32.mrf.mxu1 }
 0x7f9   : > { %3181 = vmatprep.subr.msk.mxu1 %vm609_vm1, %v3169_v45 }
 0x7fa   : > { %v1561_v46 = vpop.f32.mrf.mxu1  ;;  %3182 = vmatpush3.xpose.msk.msra.mxu1 %vm609_vm1, %v3169_v45 }
 0x7fb   : > { %3183 = vmatprep.subr.msk.mxu1 %vm609_vm1, %v1561_v46 }
 0x7fe   : > { %3184 = vmatpush3.xpose.msk.msra.mxu1 %vm609_vm1, %v1561_v46 }
 0x7ff   : > { %3195 = vmatprep.subr.mxu1 %v2870_v5 }
 0x801   : > { %3186 = vmatmul.mubr.msk.f32.vlgmr.msra.gmra.mxu1 %vm609_vm1, %v3158_v36 }
 0x802   : > { %3196 = vmatpush3.msra.mxu1 %v2870_v5 }
 0x803   : > { %3211 = vmatprep.subr.mxu1 %v2882_v14 }
 0x8c1   : > { %v3187_v51 = vpop.f32.mrf.mxu1 }
 0x8c2   : > { %v1738_v52 = vmul.f32 0.35355338, %v3187_v51 }
 0x8c3   : > { %v1728_v53 = vpop.f32.mrf.mxu1 }
 0x8c4   : > { %v1737_v54 = vmul.f32 0.35355338, %v1728_v53  ;;  %v1742_v55 = vsel %vm699_vm2, %v1738_v52, -inf }
 0x8c5   : > { %1743 = vmax.xlane.f32.xlu1 %v1742_v55 }
 0x8c6   : > { %v1739_v56 = vsel %vm699_vm2, %v1737_v54, -inf }
 0x8c7   : > { %1740 = vmax.xlane.f32.xlu0 %v1739_v56 }
 0x94e   : > { %v1744_v57 = vpop.xlane.xlu1 %1743 }
 0x94f   : > { %v1746_v58 = vsub.f32 %v1738_v52, %v1744_v57 }
 0x950   : > { %v1741_v59 = vpop.xlane.xlu0 %1740 }
 0x951   : > { %v1749_v60 = vmul.f32 1.442695, %v1746_v58  ;;  %v1745_v61 = vsub.f32 %v1737_v54, %v1741_v59  ;;  %v2897_v54 = vld [vmem:[%s3786_s2 + $0x18] sm:$0xff] }
 0x953   : > { %3306 = vpow2.f32 %v1749_v60  ;;  %v1747_v62 = vmul.f32 1.442695, %v1745_v61 }
 0x955   : > { %3308 = vpow2.f32 %v1747_v62 }
 0x960   : > { %v3307_v63 = vpop.eup %3306 }
 0x961   : > { %v1754_v0 = vsel %vm699_vm2, %v3307_v63, 0.0 }
 0x962   : > { %v3309_v1 = vpop.eup %3308  ;;  %1755 = vadd.xlane.f32.xlu1 %v1754_v0 }
 0x963   : > { %v1751_v2 = vsel %vm699_vm2, %v3309_v1, 0.0 }
 0x964   : > { %1752 = vadd.xlane.f32.xlu0 %v1751_v2 }
 0x9eb   : > { %v1756_v6 = vpop.xlane.xlu1 %1755 }
 0x9ec   : > { %3310 = vrcp.f32 %v1756_v6 }
 0x9ed   : > { %v1753_v7 = vpop.xlane.xlu0 %1752 }
 0x9ee   : > { %3312 = vrcp.f32 %v1753_v7 }
 0x9f9   : > { %v3311_v10 = vpop.eup %3310 }
 0x9fa   : > { %v1760_v13 = vmul.f32 %v3311_v10, %v3307_v63 }
 0x9fb   : > { %v3313_v11 = vpop.eup %3312 }
 0x9fc   : > { %v1758_v12 = vmul.f32 %v3313_v11, %v3309_v1 }
 0x9fe   : > { %3192 = vmatprep.mubr.msk.f32.mxu0 %vm699_vm2, %v1758_v12 }
 0x9ff   : > { %3193 = vmatmul.mubr.msk.f32.vlgmr.msra.gmra.mxu0 %vm699_vm2, %v1760_v13 }
 0xa00   : > { %3208 = vmatprep.mubr.msk.f32.mxu0 %vm367_vm0, %v3437_v8  ;;  %3201 = vmatpush3.msra.mxu0 %v2876_v15 }
 0xa01   : > { %3202 = vmatprep.subr.mxu0 %v2875_v16 }
 0xa02   : > { %3203 = vmatpush3.msra.mxu0 %v2875_v16 }
 0xa03   : > { %3204 = vmatprep.subr.mxu0 %v2874_v17 }
 0xa04   : > { %3205 = vmatpush3.msra.mxu0 %v2874_v17 }
 0xa05   : > { %3206 = vmatprep.subr.mxu0 %v2873_v18 }
 0xa06   : > { %3207 = vmatpush3.msra.mxu0 %v2873_v18  ;;  %v2493_v18 = vld [vmem:[%s3790_s6 + $0x10] sm:$0xff] }
 0xa07   : > { %3209 = vmatmul.mubr.msk.f32.vlgmr.msra.gmra.mxu0 %vm367_vm0, %v3439_v9  ;;  %3222 = vmatprep.subr.mxu0 %v2888_v32 }
 0xa08   : > { %3230 = vmatprep.mubr.msk.f32.mxu0 %vm367_vm0, %v3437_v8  ;;  %3223 = vmatpush3.msra.mxu0 %v2888_v32 }
 0xa09   : > { %3224 = vmatprep.subr.mxu0 %v2887_v33 }
 0xa0a   : > { %3225 = vmatpush3.msra.mxu0 %v2887_v33  ;;  %v3725_v33 = vld [vmem:[%s3789_s5] ss:$0 sm:$0xff] }
 0xa0b   : > { %3226 = vmatprep.subr.mxu0 %v2886_v34 }
 0xa0c   : > { %3227 = vmatpush3.msra.mxu0 %v2886_v34 }
 0xa0d   : > { %3228 = vmatprep.subr.mxu0 %v2885_v35 }
 0xa0e   : > { %3229 = vmatpush3.msra.mxu0 %v2885_v35 }
 0xa0f   : > { %3231 = vmatmul.mubr.msk.f32.vlgmr.msra.gmra.mxu0 %vm367_vm0, %v3439_v9 }
 0xabf   : > { %v3194_v19 = vpop.f32.mrf.mxu0 }
 0xac1   : > { %v1833_v20 = vpop.f32.mrf.mxu0 }
 0xac2   : > { %3197 = vmatprep.mubr.msk.f32.mxu1 %vm609_vm1, %v1833_v20  ;;  %v2491_v20 = vld [vmem:[%s3790_s6] sm:$0xff] }
 0xac3   : > { %3198 = vmatmul.mubr.msk.f32.vlgmr.msra.gmra.mxu1 %vm609_vm1, %v3194_v19  ;;  %v2492_v19 = vld [vmem:[%s3790_s6 + $0x8] sm:$0xff] }
 0xac4   : > { %3212 = vmatpush3.msra.mxu1 %v2882_v14  ;;  %3219 = vmatprep.mubr.msk.f32.mxu1 %vm367_vm0, %v3437_v8 }
 0xac5   : > { %3213 = vmatprep.subr.mxu1 %v2881_v21 }
 0xac6   : > { %3214 = vmatpush3.msra.mxu1 %v2881_v21 }
 0xac7   : > { %3215 = vmatprep.subr.mxu1 %v2880_v22  ;;  %v3210_v24 = vpop.f32.mrf.mxu0 }
 0xac8   : > { %3216 = vmatpush3.msra.mxu1 %v2880_v22 }
 0xac9   : > { %3217 = vmatprep.subr.mxu1 %v2879_v23  ;;  %v1998_v25 = vpop.f32.mrf.mxu0 }
 0xaca   : > { %3218 = vmatpush3.msra.mxu1 %v2879_v23 }
 0xacb   : > { %3220 = vmatmul.mubr.msk.f32.vlgmr.msra.gmra.mxu1 %vm367_vm0, %v3439_v9 }
 0xacc   : > { %3237 = vmatprep.mubr.msk.f32.mxu1 %vm609_vm1, %v1998_v25 }
 0xacf   : > { %v3232_v52 = vpop.f32.mrf.mxu0 }
 0xad0   : > { %3240 = vmatprep.subr.mxu0 %v3232_v52 }
 0xad1   : > { %v2158_v53 = vpop.f32.mrf.mxu0  ;;  %3241 = vmatpush3.msra.mxu0 %v3232_v52 }
 0xad2   : > { %3242 = vmatprep.subr.mxu0 %v2158_v53 }
 0xad3   : > { %3243 = vmatpush3.msra.mxu0 %v2158_v53 }
 0xb83   : > { %v3199_v26 = vpop.f32.mrf.mxu1 }
 0xb84   : > { %v3661_v27 = vadd.f32 %v3199_v26, %v3591_v42 }
 0xb85   : > { %v1916_v28 = vpop.f32.mrf.mxu1 }
 0xb86   : > { %v3664_v29 = vadd.f32 %v1916_v28, %v3593_v44 }
 0xb8b   : > { %v3221_v30 = vpop.f32.mrf.mxu1 }
 0xb8c   : > { %3233 = vmatprep.subr.msk.mxu1 %vm609_vm1, %v3221_v30 }
 0xb8d   : > { %v2078_v31 = vpop.f32.mrf.mxu1  ;;  %3234 = vmatpush3.xpose.msk.msra.mxu1 %vm609_vm1, %v3221_v30 }
 0xb8e   : > { %3235 = vmatprep.subr.msk.mxu1 %vm609_vm1, %v2078_v31 }
 0xb91   : > { %3236 = vmatpush3.xpose.msk.msra.mxu1 %vm609_vm1, %v2078_v31 }
 0xb92   : > { %3247 = vmatprep.subr.mxu1 %v2897_v54 }
 0xb94   : > { %3238 = vmatmul.mubr.msk.f32.vlgmr.msra.gmra.mxu1 %vm609_vm1, %v3210_v24 }
 0xb95   : > { %3248 = vmatpush3.msra.mxu1 %v2897_v54 }
 0xc54   : > { %v3239_v36 = vpop.f32.mrf.mxu1 }
 0xc55   : > { %v2255_v37 = vmul.f32 0.35355338, %v3239_v36 }
 0xc56   : > { %v2245_v38 = vpop.f32.mrf.mxu1 }
 0xc57   : > { %v2254_v39 = vmul.f32 0.35355338, %v2245_v38  ;;  %v2259_v40 = vsel %vm699_vm2, %v2255_v37, -inf  ;;  %v2607_v38 = vld [vmem:[%s3792_s8 + $0x30] sm:$0xff] }
 0xc58   : > { %2260 = vmax.xlane.f32.xlu1 %v2259_v40  ;;  %v2605_v40 = vld [vmem:[%s3792_s8 + $0x20] sm:$0xff] }
 0xc59   : > { %v2256_v41 = vsel %vm699_vm2, %v2254_v39, -inf }
 0xc5a   : > { %2257 = vmax.xlane.f32.xlu0 %v2256_v41  ;;  %v2604_v41 = vld [vmem:[%s3792_s8 + $0x18] sm:$0xff] }
 0xce1   : > { %v2261_v42 = vpop.xlane.xlu1 %2260 }
 0xce2   : > { %v2263_v43 = vsub.f32 %v2255_v37, %v2261_v42  ;;  %v2608_v37 = vld [vmem:[%s3792_s8 + $0x38] sm:$0xff]  ;;  %v2603_v42 = vld [vmem:[%s3792_s8 + $0x10] sm:$0xff] }
 0xce3   : > { %v2258_v44 = vpop.xlane.xlu0 %2257  ;;  %3263 = vmatprep.subr.mxu1 %v2608_v37 }
 0xce4   : > { %v2266_v45 = vmul.f32 1.442695, %v2263_v43  ;;  %v2262_v46 = vsub.f32 %v2254_v39, %v2258_v44  ;;  %v2606_v39 = vld [vmem:[%s3792_s8 + $0x28] sm:$0xff]  ;;  %v2601_v44 = vld [vmem:[%s3792_s8] sm:$0xff] }
 0xce5   : > { %v2602_v43 = vld [vmem:[%s3792_s8 + $0x8] sm:$0xff] }
 0xce6   : > { %3314 = vpow2.f32 %v2266_v45  ;;  %v2264_v47 = vmul.f32 1.442695, %v2262_v46  ;;  %v2902_v45 = vld [vmem:[%s3791_s7] ss:$0 sm:$0xff] }
 0xce8   : > { %3316 = vpow2.f32 %v2264_v47 }
 0xcf3   : > { %v3315_v48 = vpop.eup %3314 }
 0xcf4   : > { %v2271_v49 = vsel %vm699_vm2, %v3315_v48, 0.0 }
 0xcf5   : > { %v3317_v50 = vpop.eup %3316  ;;  %2272 = vadd.xlane.f32.xlu1 %v2271_v49 }
 0xcf6   : > { %v2268_v51 = vsel %vm699_vm2, %v3317_v50, 0.0 }
 0xcf7   : > { %2269 = vadd.xlane.f32.xlu0 %v2268_v51 }
 0xd7e   : > { %v2273_v55 = vpop.xlane.xlu1 %2272 }
 0xd7f   : > { %3318 = vrcp.f32 %v2273_v55 }
 0xd80   : > { %v2270_v56 = vpop.xlane.xlu0 %2269 }
 0xd81   : > { %3320 = vrcp.f32 %v2270_v56 }
 0xd8c   : > { %v3319_v57 = vpop.eup %3318 }
 0xd8d   : > { %v2277_v60 = vmul.f32 %v3319_v57, %v3315_v48 }
 0xd8e   : > { %v3321_v58 = vpop.eup %3320 }
 0xd8f   : > { %v2275_v59 = vmul.f32 %v3321_v58, %v3317_v50 }
 0xd91   : > { %3244 = vmatprep.mubr.msk.f32.mxu0 %vm699_vm2, %v2275_v59 }
 0xd92   : > { %3245 = vmatmul.mubr.msk.f32.vlgmr.msra.gmra.mxu0 %vm699_vm2, %v2277_v60 }
 0xe52   : > { %v3246_v61 = vpop.f32.mrf.mxu0 }
 0xe54   : > { %v2350_v62 = vpop.f32.mrf.mxu0 }
 0xe55   : > { %3249 = vmatprep.mubr.msk.f32.mxu1 %vm609_vm1, %v2350_v62 }
 0xe56   : > { %3250 = vmatmul.mubr.msk.f32.vlgmr.msra.gmra.mxu1 %vm609_vm1, %v3246_v61 }
 0xe57   : > { %3264 = vmatpush3.msra.mxu1 %v2608_v37 }
 0xe58   : > { %3265 = vmatprep.subr.mxu1 %v2607_v38 }
 0xe59   : > { %3266 = vmatpush3.msra.mxu1 %v2607_v38 }
 0xe5a   : > { %3267 = vmatprep.subr.mxu1 %v2606_v39 }
 0xe5b   : > { %3268 = vmatpush3.msra.mxu1 %v2606_v39 }
 0xe5c   : > { %3269 = vmatprep.subr.mxu1 %v2605_v40 }
 0xe5d   : > { %3270 = vmatpush3.msra.mxu1 %v2605_v40 }
 0xe5e   : > { %3271 = vmatprep.subr.mxu1 %v2604_v41 }
 0xe5f   : > { %3272 = vmatpush3.msra.mxu1 %v2604_v41 }
 0xe60   : > { %3273 = vmatprep.subr.mxu1 %v2603_v42 }
 0xe61   : > { %3274 = vmatpush3.msra.mxu1 %v2603_v42 }
 0xe62   : > { %3275 = vmatprep.subr.mxu1 %v2602_v43 }
 0xe63   : > { %3276 = vmatpush3.msra.mxu1 %v2602_v43 }
 0xe64   : > { %3277 = vmatprep.subr.mxu1 %v2601_v44 }
 0xe65   : > { %3278 = vmatpush3.msra.mxu1 %v2601_v44 }
 0xf16   : > { %v3251_v63 = vpop.f32.mrf.mxu1 }
 0xf17   : > { %v2443_v0 = vadd.f32 %v3251_v63, %v3661_v27 }
 0xf18   : > { %v2433_v1 = vpop.f32.mrf.mxu1 }
 0xf19   : > { %v2442_v2 = vadd.f32 %v2433_v1, %v3664_v29  ;;  %v2445_v3 = vadd.f32 %v2443_v0, %v3439_v9  ;;  %v3719_v29 = vld [vmem:[%s3788_s4] ss:$0 sm:$0xff] }
 0xf1b   : > { %v2451_v4 = vsel %vm367_vm0, %v2445_v3, 0.0  ;;  %v2444_v5 = vadd.f32 %v2442_v2, %v3437_v8  ;;  %v2494_v8 = vld [vmem:[%s3790_s6 + $0x18] sm:$0xff] }
 0xf1c   : > { %2452 = vadd.xlane.f32.xlu1 %v2451_v4  ;;  %3252 = vmatprep.subr.mxu0 %v2494_v8  ;;  %v2905_v4 = vld [vmem:[%s3793_s9] ss:$0 sm:$0xff] }
 0xf1d   : > { %v2448_v6 = vsel %vm367_vm0, %v2444_v5, 0.0  ;;  %3253 = vmatpush3.msra.mxu0 %v2494_v8 }
 0xf1e   : > { %2449 = vadd.xlane.f32.xlu0 %v2448_v6  ;;  %3254 = vmatprep.subr.mxu0 %v2493_v18 }
 0xf1f   : > { %3255 = vmatpush3.msra.mxu0 %v2493_v18 }
 0xf20   : > { %3256 = vmatprep.subr.mxu0 %v2492_v19 }
 0xf21   : > { %3257 = vmatpush3.msra.mxu0 %v2492_v19 }
 0xf22   : > { %3258 = vmatprep.subr.mxu0 %v2491_v20 }
 0xf23   : > { %3259 = vmatpush3.msra.mxu0 %v2491_v20 }
 0xfa5   : > { %v2453_v7 = vpop.xlane.xlu1 %2452 }
 0xfa6   : > { %v2456_v10 = vmul.f32 0.03125, %v2453_v7 }
 0xfa7   : > { %v2450_v11 = vpop.xlane.xlu0 %2449 }
 0xfa8   : > { %v2458_v12 = vsub.f32 %v2445_v3, %v2456_v10  ;;  %v2455_v13 = vmul.f32 0.03125, %v2450_v11 }
 0xfaa   : > { %v2457_v14 = vsub.f32 %v2444_v5, %v2455_v13  ;;  %v2460_v15 = vmul.f32 %v2458_v12, %v2458_v12 }
 0xfac   : > { %v2464_v16 = vsel %vm367_vm0, %v2460_v15, 0.0  ;;  %v2459_v17 = vmul.f32 %v2457_v14, %v2457_v14 }
 0xfad   : > { %2465 = vadd.xlane.f32.xlu1 %v2464_v16 }
 0xfae   : > { %v2461_v9 = vsel %vm367_vm0, %v2459_v17, 0.0 }
 0xfaf   : > { %2462 = vadd.xlane.f32.xlu0 %v2461_v9 }
0x1036   : > { %v2466_v21 = vpop.xlane.xlu1 %2465 }
0x1037   : > { %v2468_v22 = vmul.f32 0.03125, %v2466_v21 }
0x1038   : > { %v2463_v23 = vpop.xlane.xlu0 %2462 }
0x1039   : > { %v2470_v24 = vadd.f32 1e-05, %v2468_v22  ;;  %v2467_v25 = vmul.f32 0.03125, %v2463_v23 }
0x103b   : > { %3322 = vrsqrt.f32 %v2470_v24  ;;  %v2469_v26 = vadd.f32 1e-05, %v2467_v25 }
0x103d   : > { %3324 = vrsqrt.f32 %v2469_v26 }
0x1048   : > { %v3323_v27 = vpop.eup %3322 }
0x1049   : > { %v2474_v28 = vmul.f32 %v3323_v27, %v2458_v12 }
0x104a   : > { %v3325_v30 = vpop.eup %3324 }
0x104b   : > { %v2473_v31 = vmul.f32 %v3325_v30, %v2457_v14  ;;  %v2482_v32 = vmul.f32 %v3719_v29, %v2474_v28 }
0x104d   : > { %v2481_v34 = vmul.f32 %v3719_v29, %v2473_v31  ;;  %v2490_v36 = vadd.f32 %v3725_v33, %v2482_v32 }
0x104f   : > { %v3729_v35 = vadd.f32 %v3725_v33, %v2481_v34 }
0x1051   : > { %3260 = vmatprep.mubr.msk.f32.mxu0 %vm367_vm0, %v3729_v35 }
0x1052   : > { %3261 = vmatmul.mubr.msk.f32.vlgmr.msra.gmra.mxu0 %vm367_vm0, %v2490_v36 }
0x1112   : > { %v3262_v46 = vpop.f32.mrf.mxu0 }
0x1113   : > { %v2580_v47 = vadd.f32 %v3262_v46, %v2902_v45 }
0x1114   : > { %v2574_v48 = vpop.f32.mrf.mxu0 }
0x1115   : > { %v2586_v49 = vmul.f32 0.044715, %v2580_v47  ;;  %v2575_v50 = vadd.f32 %v2902_v45, %v2574_v48  ;;  %v2584_v1 = vmul.f32 0.5, %v2580_v47 }
0x1117   : > { %v2588_v51 = vmul.f32 %v2586_v49, %v2580_v47  ;;  %v2585_v52 = vmul.f32 0.044715, %v2575_v50  ;;  %v2583_v63 = vmul.f32 0.5, %v2575_v50 }
0x1119   : > { %v2590_v53 = vmul.f32 %v2588_v51, %v2580_v47  ;;  %v2587_v54 = vmul.f32 %v2585_v52, %v2575_v50 }
0x111b   : > { %v2592_v55 = vadd.f32 %v2590_v53, %v2580_v47  ;;  %v2589_v56 = vmul.f32 %v2587_v54, %v2575_v50 }
0x111d   : > { %v2594_v57 = vmul.f32 0.7978846, %v2592_v55  ;;  %v2591_v58 = vadd.f32 %v2589_v56, %v2575_v50 }
0x111f   : > { %3326 = vtanh.f32 %v2594_v57  ;;  %v2593_v59 = vmul.f32 0.7978846, %v2591_v58 }
0x1121   : > { %3328 = vtanh.f32 %v2593_v59 }
0x112c   : > { %v3327_v60 = vpop.eup %3326 }
0x112d   : > { %v2598_v62 = vadd.f32 1.0, %v3327_v60 }
0x112e   : > { %v3329_v61 = vpop.eup %3328 }
0x112f   : > { %v2597_v0 = vadd.f32 1.0, %v3329_v61  ;;  %v2600_v3 = vmul.f32 %v2598_v62, %v2584_v1 }
0x1131   : > { %v2599_v2 = vmul.f32 %v2597_v0, %v2583_v63 }
0x1133   : > { %3279 = vmatprep.mubr.msk.f32.mxu1 %vm2616_vm3, %v2599_v2 }
0x1134   : > { %3280 = vmatmul.mubr.msk.f32.vlgmr.msra.gmra.mxu1 %vm2616_vm3, %v2600_v3 }
0x11f4   : > { %v3281_v5 = vpop.f32.mrf.mxu1 }
0x11f5   : > { %v2695_v6 = vadd.f32 %v3281_v5, %v2905_v4 }
0x11f6   : > { %v2689_v7 = vpop.f32.mrf.mxu1 }
0x11f7   : > { %v2690_v10 = vadd.f32 %v2905_v4, %v2689_v7  ;;  %v2699_v11 = vadd.f32 %v2695_v6, %v2490_v36 }
0x11f9   : > { %v2703_v12 = vsel %vm367_vm0, %v2699_v11, 0.0  ;;  %v2698_v13 = vadd.f32 %v2690_v10, %v3729_v35 }
0x11fa   : > { %2704 = vadd.xlane.f32.xlu1 %v2703_v12 }
0x11fb   : > { %v2700_v14 = vsel %vm367_vm0, %v2698_v13, 0.0 }
0x11fc   : > { %2701 = vadd.xlane.f32.xlu0 %v2700_v14 }
0x1283   : > { %v2705_v15 = vpop.xlane.xlu1 %2704 }
0x1284   : > { %v2707_v16 = vmul.f32 0.03125, %v2705_v15 }
0x1285   : > { %v2702_v17 = vpop.xlane.xlu0 %2701 }
0x1286   : > { %v2709_v9 = vsub.f32 %v2699_v11, %v2707_v16  ;;  %v2706_v8 = vmul.f32 0.03125, %v2702_v17 }
0x1288   : > { %v2708_v18 = vsub.f32 %v2698_v13, %v2706_v8  ;;  %v2711_v19 = vmul.f32 %v2709_v9, %v2709_v9 }
0x128a   : > { %v2715_v20 = vsel %vm367_vm0, %v2711_v19, 0.0  ;;  %v2710_v21 = vmul.f32 %v2708_v18, %v2708_v18 }
0x128b   : > { %2716 = vadd.xlane.f32.xlu1 %v2715_v20 }
0x128c   : > { %v2712_v22 = vsel %vm367_vm0, %v2710_v21, 0.0 }
0x128d   : > { %2713 = vadd.xlane.f32.xlu0 %v2712_v22 }
0x1314   : > { %v2717_v23 = vpop.xlane.xlu1 %2716 }
0x1315   : > { %v2719_v24 = vmul.f32 0.03125, %v2717_v23 }
0x1316   : > { %v2714_v25 = vpop.xlane.xlu0 %2713 }
0x1317   : > { %v2721_v26 = vadd.f32 1e-05, %v2719_v24  ;;  %v2718_v27 = vmul.f32 0.03125, %v2714_v25 }
0x1319   : > { %3330 = vrsqrt.f32 %v2721_v26  ;;  %v2720_v28 = vadd.f32 1e-05, %v2718_v27 }
0x131b   : > { %3332 = vrsqrt.f32 %v2720_v28 }
0x1326   : > { %v3331_v30 = vpop.eup %3330 }
0x1327   : > { %v2725_v31 = vmul.f32 %v3331_v30, %v2709_v9 }
0x1328   : > { %v3333_v32 = vpop.eup %3332 }
0x1329   : > { %v2727_v34 = vmul.f32 %v3719_v29, %v2725_v31  ;;  %v2724_v35 = vmul.f32 %v3333_v32, %v2708_v18 }
0x132b   : > { %v2729_v36 = vadd.f32 %v3725_v33, %v2727_v34  ;;  %v2726_v37 = vmul.f32 %v3719_v29, %v2724_v35 }
0x132d   : > { %2731 = vst.msk [vmem:[%s359_s22 + $0x8] sm:$0xff] %vm367_vm0, %v2729_v36  ;;  %v2728_v38 = vadd.f32 %v3725_v33, %v2726_v37 }
0x132f   : > { %2730 = vst.msk [vmem:[%s359_s22] sm:$0xff] %vm367_vm0, %v2728_v38 }
0x1330 PF: > { %s20_s13 = sadd.s32 1, %s3340_s13  }
0x1331   : > { %p17_p4 = scmp.ge.s32.totalorder %s20_s13, 4  }
0x1333   :  { %19 = sbr.rel (!%p17_p4) target bundleno = 1 (0x1), region = 104 }

// kernel: _lambda_.4
= control target key start
LH: loop header
LB: loop body
LE: loop exit
PB: predicated region body
PF: predicated region fallthrough
CT: control target
= control target key end

     0   :  { %s3750_s25 = smov 0   ;;  %s4163_s0 = inlined_call_operand.vmem [shape: f32[2,16,32], index: 0, kind: input, shape index: {}]   ;;  %s4164_s1 = inlined_call_operand.vmem [shape: f32[2,16,32], index: 1, kind: input, shape index: {}]   ;;  %s4165_s2 = inlined_call_operand.vmem [shape: f32[64,32], index: 2, kind: input, shape index: {}]   ;;  %s4166_s3 = inlined_call_operand.vmem [shape: f32[1,32], index: 3, kind: input, shape index: {}]   ;;  %s4167_s4 = inlined_call_operand.vmem [shape: f32[12,32,8], index: 4, kind: input, shape index: {}]   ;;  %s4168_s5 = inlined_call_operand.vmem [shape: f32[4,8,32], index: 5, kind: input, shape index: {}]   ;;  %s4169_s6 = inlined_call_operand.vmem [shape: f32[1,32], index: 6, kind: input, shape index: {}]   ;;  %s4170_s7 = inlined_call_operand.vmem [shape: f32[1,32], index: 7, kind: input, shape index: {}]   ;;  %s4171_s8 = inlined_call_operand.vmem [shape: f32[1,32], index: 8, kind: input, shape index: {}]   ;;  %s4172_s9 = inlined_call_operand.vmem [shape: f32[32,64], index: 9, kind: input, shape index: {}]   ;;  %s4173_s10 = inlined_call_operand.vmem [shape: f32[1,64], index: 10, kind: input, shape index: {}]   ;;  %s4174_s11 = inlined_call_operand.vmem [shape: f32[64,32], index: 11, kind: input, shape index: {}]   ;;  %s4175_s12 = inlined_call_operand.vmem [shape: f32[1,32], index: 12, kind: input, shape index: {}]   ;;  %s4176_s13 = inlined_call_operand.vmem [shape: f32[2,16,32], index: 13, kind: output, shape index: {}]  }
   0x1 LB: > { %s3083_s26 = sadd.s32 4294967295, %s3678_s25   ;;  %p3087_p0 = scmp.ge.s32.totalorder %s3678_s25, 1  ;;  %s3678_s25 = sphi %s3750_s25, %s23_s25  }
   0x2   : > { %p397_p1 = scmp.lt.s32.totalorder %s3678_s25, 3 }
   0x4   : > { %p398_p2 = pnand %p3087_p0, %p397_p1 }
   0x5   : > { %p446_p3 = scmp.lt.s32.totalorder (!%p398_p2), %s3083_s26, 1 }
   0x6   : > { %401 = sbr.rel (%p398_p2) target bundleno = 5113 (0x13f9), region = 72 }
   0xb   : > { %v467_v0 = vld [vmem:[%s4165_s2 + $0x18] sm:$0xff]  ;;  %v466_v2 = vld [vmem:[%s4165_s2 + $0x10] sm:$0xff]  ;;  %v465_v4 = vld [vmem:[%s4165_s2 + $0x8] sm:$0xff]  ;;  %s4178_s26 = smov (!%p446_p3, %s3083_s26), 1  ;;  %vm468_vm0 = vcmask 261120   ;;  %vm893_vm1 = vcmask 64512  }
   0xc   : > { %v563_v1 = vld [vmem:[%s4165_s2 + $0x38] sm:$0xff]  ;;  %3360 = vmatprep.subr.mxu0 %v467_v0  ;;  %v562_v3 = vld [vmem:[%s4165_s2 + $0x30] sm:$0xff]  ;;  %v561_v5 = vld [vmem:[%s4165_s2 + $0x28] sm:$0xff]  ;;  %s3782_s28 = sshll.u32 %s4178_s26, 4  ;;  %vm983_vm2 = vcmask 130048   ;;  %vm2900_vm3 = vcmask 523264  }
   0xd   : > { %3371 = vmatprep.subr.mxu1 %v563_v1  ;;  %3361 = vmatpush3.msra.mxu0 %v467_v0  ;;  %v464_v6 = vld [vmem:[%s4165_s2] sm:$0xff]  ;;  %s450_s14 = scalar_lea.vmem %s4163_s0, %s3782_s28  ;;  %s455_s17 = scalar_lea.vmem %s4164_s1, %s3782_s28  ;;  %v651_v12 = vld [vmem:[%s4167_s4 + $0x18] sm:$0xff]  ;;  %v650_v14 = vld [vmem:[%s4167_s4 + $0x10] sm:$0xff] }
   0xe   : > { %3372 = vmatpush3.msra.mxu1 %v563_v1  ;;  %3362 = vmatprep.subr.mxu0 %v466_v2  ;;  %v560_v7 = vld [vmem:[%s4165_s2 + $0x20] sm:$0xff]  ;;  %v463_v9 = vld [vmem:[%s450_s14 + $0x8] sm:$0xff]  ;;  %v3104_v13 = vld [vmem:[%s4167_s4 + $0x98] sm:$0xff]  ;;  %s460_s24 = scalar_lea.vmem %s4176_s13, %s3782_s28 }
   0xf   : > { %3373 = vmatprep.subr.mxu1 %v562_v3  ;;  %3363 = vmatpush3.msra.mxu0 %v466_v2  ;;  %v462_v8 = vld [vmem:[%s450_s14] sm:$0xff]  ;;  %v559_v11 = vld [vmem:[%s455_s17 + $0x8] sm:$0xff]  ;;  %v3103_v15 = vld [vmem:[%s4167_s4 + $0x90] sm:$0xff] }
  0x10   : > { %3374 = vmatpush3.msra.mxu1 %v562_v3  ;;  %3364 = vmatprep.subr.mxu0 %v465_v4  ;;  %v558_v10 = vld [vmem:[%s455_s17] sm:$0xff]  ;;  %v649_v16 = vld [vmem:[%s4167_s4 + $0x8] sm:$0xff]  ;;  %v3110_v20 = vld [vmem:[%s4167_s4 + $0x118] sm:$0xff] }
  0x11   : > { %3375 = vmatprep.subr.mxu1 %v561_v5  ;;  %3365 = vmatpush3.msra.mxu0 %v465_v4  ;;  %v3102_v17 = vld [vmem:[%s4167_s4 + $0x88] sm:$0xff]  ;;  %v648_v18 = vld [vmem:[%s4167_s4] sm:$0xff]  ;;  %v3109_v30 = vld [vmem:[%s4167_s4 + $0x110] sm:$0xff] }
  0x12   : > { %3376 = vmatpush3.msra.mxu1 %v561_v5  ;;  %3366 = vmatprep.subr.mxu0 %v464_v6  ;;  %v3101_v19 = vld [vmem:[%s4167_s4 + $0x80] sm:$0xff]  ;;  %v3108_v31 = vld [vmem:[%s4167_s4 + $0x108] sm:$0xff]  ;;  %v3131_v37 = vld [vmem:[%s4167_s4 + $0xb8] sm:$0xff] }
  0x13   : > { %3377 = vmatprep.subr.mxu1 %v560_v7  ;;  %3367 = vmatpush3.msra.mxu0 %v464_v6  ;;  %v3096_v21 = vld [vmem:[%s4166_s3] ss:$0 sm:$0xff]  ;;  %v3130_v39 = vld [vmem:[%s4167_s4 + $0xb0] sm:$0xff]  ;;  %v3129_v41 = vld [vmem:[%s4167_s4 + $0xa8] sm:$0xff] }
  0x14   : > { %3368 = vmatprep.mubr.msk.f32.mxu0 %vm468_vm0, %v462_v8  ;;  %3378 = vmatpush3.msra.mxu1 %v560_v7  ;;  %v3107_v32 = vld [vmem:[%s4167_s4 + $0x100] sm:$0xff]  ;;  %v3125_v4 = vld [vmem:[%s4167_s4 + $0x38] sm:$0xff]  ;;  %v3124_v7 = vld [vmem:[%s4167_s4 + $0x30] sm:$0xff] }
  0x15   : > { %3379 = vmatprep.mubr.msk.f32.mxu1 %vm468_vm0, %v558_v10  ;;  %3369 = vmatmul.mubr.msk.f32.vlgmr.msra.gmra.mxu0 %vm468_vm0, %v463_v9  ;;  %v3128_v42 = vld [vmem:[%s4167_s4 + $0xa0] sm:$0xff]  ;;  %v3123_v8 = vld [vmem:[%s4167_s4 + $0x28] sm:$0xff]  ;;  %v3137_v10 = vld [vmem:[%s4167_s4 + $0x138] sm:$0xff] }
  0x16   : > { %3380 = vmatmul.mubr.msk.f32.vlgmr.msra.gmra.mxu1 %vm468_vm0, %v559_v11  ;;  %3382 = vmatprep.subr.mxu0 %v651_v12  ;;  %v1087_v61 = vld [vmem:[%s4168_s5] sm:$0xff]  ;;  %v3136_v11 = vld [vmem:[%s4167_s4 + $0x130] sm:$0xff] }
  0x17   : > { %3383 = vmatpush3.msra.mxu0 %v651_v12  ;;  %3393 = vmatprep.subr.mxu1 %v3104_v13  ;;  %v3122_v9 = vld [vmem:[%s4167_s4 + $0x20] sm:$0xff]  ;;  %v3135_v12 = vld [vmem:[%s4167_s4 + $0x128] sm:$0xff] }
  0x18   : > { %3384 = vmatprep.subr.mxu0 %v650_v14  ;;  %3394 = vmatpush3.msra.mxu1 %v3104_v13  ;;  %v3134_v13 = vld [vmem:[%s4167_s4 + $0x120] sm:$0xff] }
  0x19   : > { %3385 = vmatpush3.msra.mxu0 %v650_v14  ;;  %3395 = vmatprep.subr.mxu1 %v3103_v15 }
  0x1a   : > { %3386 = vmatprep.subr.mxu0 %v649_v16  ;;  %3396 = vmatpush3.msra.mxu1 %v3103_v15 }
  0x1b   : > { %3387 = vmatpush3.msra.mxu0 %v649_v16  ;;  %3397 = vmatprep.subr.mxu1 %v3102_v17 }
  0x1c   : > { %3388 = vmatprep.subr.mxu0 %v648_v18  ;;  %3398 = vmatpush3.msra.mxu1 %v3102_v17 }
  0x1d   : > { %3389 = vmatpush3.msra.mxu0 %v648_v18  ;;  %3399 = vmatprep.subr.mxu1 %v3101_v19 }
  0x1e   : > { %3400 = vmatpush3.msra.mxu1 %v3101_v19  ;;  %3404 = vmatprep.subr.mxu0 %v3110_v20 }
  0xd5   : > { %v3370_v22 = vpop.f32.mrf.mxu0 }
  0xd6   : > { %v3381_v23 = vpop.f32.mrf.mxu1  ;;  %v557_v24 = vadd.f32 %v3370_v22, %v3096_v21 }
  0xd7   : > { %v541_v25 = vpop.f32.mrf.mxu0 }
  0xd8   : > { %v556_v26 = vadd.f32 %v3096_v21, %v541_v25  ;;  %v636_v27 = vpop.f32.mrf.mxu1  ;;  %v3828_v29 = vadd.f32 %v3381_v23, %v557_v24 }
  0xda   : > { %v3826_v28 = vadd.f32 %v636_v27, %v556_v26 }
  0xdc   : > { %3390 = vmatprep.mubr.msk.f32.mxu0 %vm468_vm0, %v3826_v28  ;;  %3401 = vmatprep.mubr.msk.f32.mxu1 %vm468_vm0, %v3826_v28 }
  0xdd   : > { %3391 = vmatmul.mubr.msk.f32.vlgmr.msra.gmra.mxu0 %vm468_vm0, %v3828_v29  ;;  %3402 = vmatmul.mubr.msk.f32.vlgmr.msra.gmra.mxu1 %vm468_vm0, %v3828_v29 }
  0xde   : > { %3405 = vmatpush3.msra.mxu0 %v3110_v20  ;;  %3412 = vmatprep.mubr.msk.f32.mxu0 %vm468_vm0, %v3826_v28 }
  0xdf   : > { %3406 = vmatprep.subr.mxu0 %v3109_v30 }
  0xe0   : > { %3407 = vmatpush3.msra.mxu0 %v3109_v30 }
  0xe1   : > { %3408 = vmatprep.subr.mxu0 %v3108_v31 }
  0xe2   : > { %3409 = vmatpush3.msra.mxu0 %v3108_v31 }
  0xe3   : > { %3410 = vmatprep.subr.mxu0 %v3107_v32 }
  0xe4   : > { %3411 = vmatpush3.msra.mxu0 %v3107_v32 }
  0xe5   : > { %3413 = vmatmul.mubr.msk.f32.vlgmr.msra.gmra.mxu0 %vm468_vm0, %v3828_v29 }
 0x19d   : > { %v3392_v33 = vpop.f32.mrf.mxu0  ;;  %v3403_v34 = vpop.f32.mrf.mxu1 }
 0x19e   : > { %3415 = vmatprep.subr.msk.mxu1 %vm893_vm1, %v3403_v34 }
 0x19f   : > { %v724_v35 = vpop.f32.mrf.mxu0  ;;  %v804_v36 = vpop.f32.mrf.mxu1  ;;  %3416 = vmatpush3.xpose.msk.msra.mxu1 %vm893_vm1, %v3403_v34 }
 0x1a0   : > { %3417 = vmatprep.subr.msk.mxu1 %vm893_vm1, %v804_v36  ;;  %3419 = vmatprep.mubr.msk.f32.mxu1 %vm893_vm1, %v724_v35 }
 0x1a3   : > { %3418 = vmatpush3.xpose.msk.msra.mxu1 %vm893_vm1, %v804_v36 }
 0x1a4   : > { %3445 = vmatprep.subr.mxu1 %v3131_v37 }
 0x1a5   : > { %v3414_v38 = vpop.f32.mrf.mxu0 }
 0x1a6   : > { %3422 = vmatprep.subr.mxu0 %v3414_v38  ;;  %3420 = vmatmul.mubr.msk.f32.vlgmr.msra.gmra.mxu1 %vm893_vm1, %v3392_v33 }
 0x1a7   : > { %v884_v40 = vpop.f32.mrf.mxu0  ;;  %3423 = vmatpush3.msra.mxu0 %v3414_v38  ;;  %3446 = vmatpush3.msra.mxu1 %v3131_v37  ;;  %v3152_v38 = vld [vmem:[%s4167_s4 + $0x58] sm:$0xff] }
 0x1a8   : > { %3424 = vmatprep.subr.mxu0 %v884_v40  ;;  %3453 = vmatprep.mubr.msk.f32.mxu1 %vm468_vm0, %v3826_v28 }
 0x1a9   : > { %3425 = vmatpush3.msra.mxu0 %v884_v40  ;;  %3447 = vmatprep.subr.mxu1 %v3130_v39 }
 0x1aa   : > { %3448 = vmatpush3.msra.mxu1 %v3130_v39  ;;  %3429 = vmatprep.subr.mxu0 %v1087_v61  ;;  %v3146_v39 = vld [vmem:[%s4168_s5 + $0x8] sm:$0xff] }
 0x1ab   : > { %3449 = vmatprep.subr.mxu1 %v3129_v41 }
 0x1ac   : > { %3450 = vmatpush3.msra.mxu1 %v3129_v41 }
 0x1ad   : > { %3451 = vmatprep.subr.mxu1 %v3128_v42 }
 0x1ae   : > { %3452 = vmatpush3.msra.mxu1 %v3128_v42 }
 0x1af   : > { %3454 = vmatmul.mubr.msk.f32.vlgmr.msra.gmra.mxu1 %vm468_vm0, %v3828_v29 }
 0x266   : > { %v3421_v43 = vpop.f32.mrf.mxu1 }
 0x267   : > { %v982_v46 = vmul.f32 0.35355338, %v3421_v43 }
 0x268   : > { %v972_v44 = vpop.f32.mrf.mxu1 }
 0x269   : > { %v981_v45 = vmul.f32 0.35355338, %v972_v44  ;;  %v987_v49 = vsel %vm983_vm2, %v982_v46, -inf }
 0x26b   : > { %v984_v47 = vsel %vm983_vm2, %v981_v45, -inf }
 0x26c   : > { %985 = vmax.xlane.f32.xlu0 %v984_v47  ;;  %v3150_v47 = vld [vmem:[%s4167_s4 + $0x48] sm:$0xff] }
 0x26f   : > { %v3455_v48 = vpop.f32.mrf.mxu1 }
 0x270   : > { %3467 = vmatprep.subr.msk.mxu1 %vm893_vm1, %v3455_v48  ;;  %988 = vmax.xlane.f32.xlu0 %v987_v49  ;;  %v3164_v49 = vld [vmem:[%s4167_s4 + $0x158] sm:$0xff] }
 0x271   : > { %v1328_v50 = vpop.f32.mrf.mxu1  ;;  %3468 = vmatpush3.xpose.msk.msra.mxu1 %vm893_vm1, %v3455_v48  ;;  %v3149_v48 = vld [vmem:[%s4167_s4 + $0x40] sm:$0xff] }
 0x272   : > { %3469 = vmatprep.subr.msk.mxu1 %vm893_vm1, %v1328_v50 }
 0x275   : > { %3470 = vmatpush3.xpose.msk.msra.mxu1 %vm893_vm1, %v1328_v50  ;;  %v3163_v50 = vld [vmem:[%s4167_s4 + $0x150] sm:$0xff] }
 0x276   : > { %3481 = vmatprep.subr.mxu1 %v3146_v39 }
 0x2f5   : > { %v986_v51 = vpop.xlane.xlu0 %985 }
 0x2f6   : > { %v990_v52 = vsub.f32 %v981_v45, %v986_v51  ;;  %v3162_v51 = vld [vmem:[%s4167_s4 + $0x148] sm:$0xff] }
 0x2f8   : > { %v992_v53 = vmul.f32 1.442695, %v990_v52  ;;  %v3161_v52 = vld [vmem:[%s4167_s4 + $0x140] sm:$0xff] }
 0x2f9   : > { %v989_v54 = vpop.xlane.xlu0 %988 }
 0x2fa   : > { %3628 = vpow2.f32 %v992_v53  ;;  %v991_v55 = vsub.f32 %v982_v46, %v989_v54  ;;  %v3151_v46 = vld [vmem:[%s4167_s4 + $0x50] sm:$0xff]  ;;  %v3158_v53 = vld [vmem:[%s4167_s4 + $0xd8] sm:$0xff] }
 0x2fc   : > { %v994_v56 = vmul.f32 1.442695, %v991_v55 }
 0x2fe   : > { %3630 = vpow2.f32 %v994_v56  ;;  %v3157_v56 = vld [vmem:[%s4167_s4 + $0xd0] sm:$0xff] }
 0x307   : > { %v3629_v57 = vpop.eup %3628 }
 0x308   : > { %v996_v58 = vsel %vm983_vm2, %v3629_v57, 0.0 }
 0x309   : > { %997 = vadd.xlane.f32.xlu1 %v996_v58  ;;  %v3155_v58 = vld [vmem:[%s4167_s4 + $0xc0] sm:$0xff] }
 0x30b   : > { %v3631_v59 = vpop.eup %3630 }
 0x30c   : > { %v999_v60 = vsel %vm983_vm2, %v3631_v59, 0.0 }
 0x30d   : > { %1000 = vadd.xlane.f32.xlu1 %v999_v60 }
 0x392   : > { %v998_v62 = vpop.xlane.xlu1 %997 }
 0x393   : > { %3632 = vrcp.f32 %v998_v62 }
 0x396   : > { %v1001_v63 = vpop.xlane.xlu1 %1000 }
 0x397   : > { %3634 = vrcp.f32 %v1001_v63  ;;  %v3121_v63 = vld [vmem:[%s4169_s6] ss:$0 sm:$0xff] }
 0x3a0   : > { %v3633_v0 = vpop.eup %3632 }
 0x3a1   : > { %v1003_v1 = vmul.f32 %v3633_v0, %v3629_v57  ;;  %v3156_v57 = vld [vmem:[%s4167_s4 + $0xc8] sm:$0xff] }
 0x3a3   : > { %3426 = vmatprep.mubr.msk.f32.mxu0 %vm983_vm2, %v1003_v1 }
 0x3a4   : > { %v3635_v2 = vpop.eup %3634 }
 0x3a5   : > { %v1005_v3 = vmul.f32 %v3635_v2, %v3631_v59 }
 0x3a7   : > { %3427 = vmatmul.mubr.msk.f32.vlgmr.msra.gmra.mxu0 %vm983_vm2, %v1005_v3 }
 0x3a8   : > { %3430 = vmatpush3.msra.mxu0 %v1087_v61 }
 0x3a9   : > { %3434 = vmatprep.subr.mxu0 %v3125_v4 }
 0x467   : > { %v3428_v5 = vpop.f32.mrf.mxu0 }
 0x469   : > { %v1078_v6 = vpop.f32.mrf.mxu0 }
 0x46a   : > { %3431 = vmatprep.mubr.msk.f32.mxu0 %vm893_vm1, %v1078_v6 }
 0x46b   : > { %3432 = vmatmul.mubr.msk.f32.vlgmr.msra.gmra.mxu0 %vm893_vm1, %v3428_v5 }
 0x46c   : > { %3435 = vmatpush3.msra.mxu0 %v3125_v4  ;;  %3442 = vmatprep.mubr.msk.f32.mxu0 %vm468_vm0, %v3826_v28 }
 0x46d   : > { %3436 = vmatprep.subr.mxu0 %v3124_v7 }
 0x46e   : > { %3437 = vmatpush3.msra.mxu0 %v3124_v7 }
 0x46f   : > { %3438 = vmatprep.subr.mxu0 %v3123_v8 }
 0x470   : > { %3439 = vmatpush3.msra.mxu0 %v3123_v8 }
 0x471   : > { %3440 = vmatprep.subr.mxu0 %v3122_v9 }
 0x472   : > { %3441 = vmatpush3.msra.mxu0 %v3122_v9 }
 0x473   : > { %3443 = vmatmul.mubr.msk.f32.vlgmr.msra.gmra.mxu0 %vm468_vm0, %v3828_v29  ;;  %3456 = vmatprep.subr.mxu0 %v3137_v10 }
 0x474   : > { %3457 = vmatpush3.msra.mxu0 %v3137_v10  ;;  %3464 = vmatprep.mubr.msk.f32.mxu0 %vm468_vm0, %v3826_v28 }
 0x475   : > { %3458 = vmatprep.subr.mxu0 %v3136_v11 }
 0x476   : > { %3459 = vmatpush3.msra.mxu0 %v3136_v11 }
 0x477   : > { %3460 = vmatprep.subr.mxu0 %v3135_v12 }
 0x478   : > { %3461 = vmatpush3.msra.mxu0 %v3135_v12 }
 0x479   : > { %3462 = vmatprep.subr.mxu0 %v3134_v13 }
 0x47a   : > { %3463 = vmatpush3.msra.mxu0 %v3134_v13 }
 0x47b   : > { %3465 = vmatmul.mubr.msk.f32.vlgmr.msra.gmra.mxu0 %vm468_vm0, %v3828_v29 }
 0x52b   : > { %v3920_v14 = vpop.f32.mrf.mxu0 }
 0x52c   : > { %v1176_v0 = vadd.f32 %v3920_v14, %v3121_v63 }
 0x52d   : > { %v3922_v15 = vpop.f32.mrf.mxu0 }
 0x52e   : > { %v1175_v2 = vadd.f32 %v3121_v63, %v3922_v15 }
 0x533   : > { %v3444_v16 = vpop.f32.mrf.mxu0 }
 0x535   : > { %v1248_v17 = vpop.f32.mrf.mxu0 }
 0x536   : > { %3471 = vmatprep.mubr.msk.f32.mxu1 %vm893_vm1, %v1248_v17 }
 0x537   : > { %3472 = vmatmul.mubr.msk.f32.vlgmr.msra.gmra.mxu1 %vm893_vm1, %v3444_v16 }
 0x538   : > { %3482 = vmatpush3.msra.mxu1 %v3146_v39  ;;  %v3189_v39 = vld [vmem:[%s4167_s4 + $0x168] sm:$0xff] }
 0x539   : > { %3497 = vmatprep.subr.mxu1 %v3158_v53 }
 0x53b   : > { %v3466_v18 = vpop.f32.mrf.mxu0 }
 0x53c   : > { %3474 = vmatprep.subr.mxu0 %v3466_v18 }
 0x53d   : > { %v1408_v19 = vpop.f32.mrf.mxu0  ;;  %3475 = vmatpush3.msra.mxu0 %v3466_v18 }
 0x53e   : > { %3476 = vmatprep.subr.mxu0 %v1408_v19 }
 0x53f   : > { %3477 = vmatpush3.msra.mxu0 %v1408_v19 }
 0x540   : > { %3486 = vmatprep.subr.mxu0 %v3152_v38 }
 0x5f7   : > { %v3473_v20 = vpop.f32.mrf.mxu1 }
 0x5f8   : > { %v1505_v21 = vmul.f32 0.35355338, %v3473_v20 }
 0x5f9   : > { %v1495_v22 = vpop.f32.mrf.mxu1 }
 0x5fa   : > { %v1504_v23 = vmul.f32 0.35355338, %v1495_v22  ;;  %v1509_v24 = vsel %vm983_vm2, %v1505_v21, -inf }
 0x5fb   : > { %1510 = vmax.xlane.f32.xlu1 %v1509_v24  ;;  %v3179_v24 = vld [vmem:[%s4167_s4 + $0x78] sm:$0xff] }
 0x5fc   : > { %v1506_v25 = vsel %vm983_vm2, %v1504_v23, -inf }
 0x5fd   : > { %1507 = vmax.xlane.f32.xlu0 %v1506_v25  ;;  %v3173_v25 = vld [vmem:[%s4168_s5 + $0x10] sm:$0xff] }
 0x684   : > { %v1511_v26 = vpop.xlane.xlu1 %1510 }
 0x685   : > { %v1513_v27 = vsub.f32 %v1505_v21, %v1511_v26 }
 0x686   : > { %v1508_v30 = vpop.xlane.xlu0 %1507 }
 0x687   : > { %v1516_v31 = vmul.f32 1.442695, %v1513_v27  ;;  %v1512_v32 = vsub.f32 %v1504_v23, %v1508_v30 }
 0x689   : > { %3636 = vpow2.f32 %v1516_v31  ;;  %v1514_v33 = vmul.f32 1.442695, %v1512_v32 }
 0x68b   : > { %3638 = vpow2.f32 %v1514_v33 }
 0x696   : > { %v3637_v34 = vpop.eup %3636 }
 0x697   : > { %v1521_v35 = vsel %vm983_vm2, %v3637_v34, 0.0 }
 0x698   : > { %v3639_v36 = vpop.eup %3638  ;;  %1522 = vadd.xlane.f32.xlu1 %v1521_v35  ;;  %v3177_v35 = vld [vmem:[%s4167_s4 + $0x68] sm:$0xff] }
 0x699   : > { %v1518_v37 = vsel %vm983_vm2, %v3639_v36, 0.0 }
 0x69a   : > { %1519 = vadd.xlane.f32.xlu0 %v1518_v37  ;;  %v3191_v37 = vld [vmem:[%s4167_s4 + $0x178] sm:$0xff] }
 0x721   : > { %v1523_v40 = vpop.xlane.xlu1 %1522 }
 0x722   : > { %3640 = vrcp.f32 %v1523_v40  ;;  %v3188_v40 = vld [vmem:[%s4167_s4 + $0x160] sm:$0xff] }
 0x723   : > { %v1520_v41 = vpop.xlane.xlu0 %1519 }
 0x724   : > { %3642 = vrcp.f32 %v1520_v41  ;;  %v3185_v41 = vld [vmem:[%s4167_s4 + $0xf8] sm:$0xff] }
 0x72f   : > { %v3641_v42 = vpop.eup %3640 }
 0x730   : > { %v1527_v45 = vmul.f32 %v3641_v42, %v3637_v34  ;;  %v3178_v34 = vld [vmem:[%s4167_s4 + $0x70] sm:$0xff] }
 0x731   : > { %v3643_v43 = vpop.eup %3642 }
 0x732   : > { %v1525_v44 = vmul.f32 %v3643_v43, %v3639_v36  ;;  %v3176_v36 = vld [vmem:[%s4167_s4 + $0x60] sm:$0xff] }
 0x734   : > { %3478 = vmatprep.mubr.msk.f32.mxu0 %vm983_vm2, %v1525_v44  ;;  %v3184_v44 = vld [vmem:[%s4167_s4 + $0xf0] sm:$0xff] }
 0x735   : > { %3479 = vmatmul.mubr.msk.f32.vlgmr.msra.gmra.mxu0 %vm983_vm2, %v1527_v45  ;;  %v3183_v45 = vld [vmem:[%s4167_s4 + $0xe8] sm:$0xff] }
 0x736   : > { %3487 = vmatpush3.msra.mxu0 %v3152_v38  ;;  %3494 = vmatprep.mubr.msk.f32.mxu0 %vm468_vm0, %v3826_v28  ;;  %v3190_v38 = vld [vmem:[%s4167_s4 + $0x170] sm:$0xff] }
 0x737   : > { %3488 = vmatprep.subr.mxu0 %v3151_v46 }
 0x738   : > { %3489 = vmatpush3.msra.mxu0 %v3151_v46  ;;  %v3182_v46 = vld [vmem:[%s4167_s4 + $0xe0] sm:$0xff] }
 0x739   : > { %3490 = vmatprep.subr.mxu0 %v3150_v47 }
 0x73a   : > { %3491 = vmatpush3.msra.mxu0 %v3150_v47 }
 0x73b   : > { %3492 = vmatprep.subr.mxu0 %v3149_v48 }
 0x73c   : > { %3493 = vmatpush3.msra.mxu0 %v3149_v48 }
 0x73d   : > { %3495 = vmatmul.mubr.msk.f32.vlgmr.msra.gmra.mxu0 %vm468_vm0, %v3828_v29  ;;  %3508 = vmatprep.subr.mxu0 %v3164_v49 }
 0x73e   : > { %3509 = vmatpush3.msra.mxu0 %v3164_v49  ;;  %3516 = vmatprep.mubr.msk.f32.mxu0 %vm468_vm0, %v3826_v28 }
 0x73f   : > { %3510 = vmatprep.subr.mxu0 %v3163_v50 }
 0x740   : > { %3511 = vmatpush3.msra.mxu0 %v3163_v50 }
 0x741   : > { %3512 = vmatprep.subr.mxu0 %v3162_v51 }
 0x742   : > { %3513 = vmatpush3.msra.mxu0 %v3162_v51 }
 0x743   : > { %3514 = vmatprep.subr.mxu0 %v3161_v52 }
 0x744   : > { %3515 = vmatpush3.msra.mxu0 %v3161_v52 }
 0x745   : > { %3517 = vmatmul.mubr.msk.f32.vlgmr.msra.gmra.mxu0 %vm468_vm0, %v3828_v29 }
 0x7f5   : > { %v3480_v54 = vpop.f32.mrf.mxu0 }
 0x7f7   : > { %v1600_v55 = vpop.f32.mrf.mxu0 }
 0x7f8   : > { %3483 = vmatprep.mubr.msk.f32.mxu1 %vm893_vm1, %v1600_v55 }
 0x7f9   : > { %3484 = vmatmul.mubr.msk.f32.vlgmr.msra.gmra.mxu1 %vm893_vm1, %v3480_v54 }
 0x7fa   : > { %3498 = vmatpush3.msra.mxu1 %v3158_v53  ;;  %3505 = vmatprep.mubr.msk.f32.mxu1 %vm468_vm0, %v3826_v28 }
 0x7fb   : > { %3499 = vmatprep.subr.mxu1 %v3157_v56 }
 0x7fc   : > { %3500 = vmatpush3.msra.mxu1 %v3157_v56 }
 0x7fd   : > { %v3496_v59 = vpop.f32.mrf.mxu0  ;;  %3501 = vmatprep.subr.mxu1 %v3156_v57 }
 0x7fe   : > { %3502 = vmatpush3.msra.mxu1 %v3156_v57 }
 0x7ff   : > { %3503 = vmatprep.subr.mxu1 %v3155_v58  ;;  %v1765_v60 = vpop.f32.mrf.mxu0 }
 0x800   : > { %3504 = vmatpush3.msra.mxu1 %v3155_v58 }
 0x801   : > { %3506 = vmatmul.mubr.msk.f32.vlgmr.msra.gmra.mxu1 %vm468_vm0, %v3828_v29 }
 0x802   : > { %3523 = vmatprep.mubr.msk.f32.mxu1 %vm893_vm1, %v1765_v60 }
 0x805   : > { %v3518_v61 = vpop.f32.mrf.mxu0 }
 0x806   : > { %3526 = vmatprep.subr.mxu0 %v3518_v61 }
 0x807   : > { %v1925_v62 = vpop.f32.mrf.mxu0  ;;  %3527 = vmatpush3.msra.mxu0 %v3518_v61 }
 0x808   : > { %3528 = vmatprep.subr.mxu0 %v1925_v62 }
 0x809   : > { %3529 = vmatpush3.msra.mxu0 %v1925_v62 }
 0x80a   : > { %3538 = vmatprep.subr.mxu0 %v3179_v24 }
 0x8b9   : > { %v3485_v1 = vpop.f32.mrf.mxu1 }
 0x8ba   : > { %v3991_v3 = vadd.f32 %v3485_v1, %v1176_v0 }
 0x8bb   : > { %v1683_v4 = vpop.f32.mrf.mxu1 }
 0x8bc   : > { %v3993_v5 = vadd.f32 %v1683_v4, %v1175_v2 }
 0x8c1   : > { %v3507_v6 = vpop.f32.mrf.mxu1 }
 0x8c2   : > { %3519 = vmatprep.subr.msk.mxu1 %vm893_vm1, %v3507_v6 }
 0x8c3   : > { %v1845_v7 = vpop.f32.mrf.mxu1  ;;  %3520 = vmatpush3.xpose.msk.msra.mxu1 %vm893_vm1, %v3507_v6 }
 0x8c4   : > { %3521 = vmatprep.subr.msk.mxu1 %vm893_vm1, %v1845_v7 }
 0x8c7   : > { %3522 = vmatpush3.xpose.msk.msra.mxu1 %vm893_vm1, %v1845_v7 }
 0x8c8   : > { %3533 = vmatprep.subr.mxu1 %v3173_v25 }
 0x8ca   : > { %3524 = vmatmul.mubr.msk.f32.vlgmr.msra.gmra.mxu1 %vm893_vm1, %v3496_v59 }
 0x8cb   : > { %3534 = vmatpush3.msra.mxu1 %v3173_v25 }
 0x8cc   : > { %3549 = vmatprep.subr.mxu1 %v3185_v41 }
 0x98a   : > { %v3525_v8 = vpop.f32.mrf.mxu1 }
 0x98b   : > { %v2022_v9 = vmul.f32 0.35355338, %v3525_v8 }
 0x98c   : > { %v2012_v10 = vpop.f32.mrf.mxu1 }
 0x98d   : > { %v2021_v11 = vmul.f32 0.35355338, %v2012_v10  ;;  %v2026_v12 = vsel %vm983_vm2, %v2022_v9, -inf }
 0x98e   : > { %2027 = vmax.xlane.f32.xlu1 %v2026_v12 }
 0x98f   : > { %v2023_v13 = vsel %vm983_vm2, %v2021_v11, -inf }
 0x990   : > { %2024 = vmax.xlane.f32.xlu0 %v2023_v13 }
 0xa17   : > { %v2028_v14 = vpop.xlane.xlu1 %2027 }
 0xa18   : > { %v2030_v15 = vsub.f32 %v2022_v9, %v2028_v14  ;;  %v3200_v9 = vld [vmem:[%s4168_s5 + $0x18] sm:$0xff] }
 0xa19   : > { %v2025_v16 = vpop.xlane.xlu0 %2024 }
 0xa1a   : > { %v2033_v17 = vmul.f32 1.442695, %v2030_v15  ;;  %v2029_v18 = vsub.f32 %v2021_v11, %v2025_v16 }
 0xa1c   : > { %3644 = vpow2.f32 %v2033_v17  ;;  %v2031_v19 = vmul.f32 1.442695, %v2029_v18 }
 0xa1e   : > { %3646 = vpow2.f32 %v2031_v19 }
 0xa29   : > { %v3645_v20 = vpop.eup %3644 }
 0xa2a   : > { %v2038_v21 = vsel %vm983_vm2, %v3645_v20, 0.0 }
 0xa2b   : > { %v3647_v22 = vpop.eup %3646  ;;  %2039 = vadd.xlane.f32.xlu1 %v2038_v21 }
 0xa2c   : > { %v2035_v23 = vsel %vm983_vm2, %v3647_v22, 0.0 }
 0xa2d   : > { %2036 = vadd.xlane.f32.xlu0 %v2035_v23 }
 0xab4   : > { %v2040_v26 = vpop.xlane.xlu1 %2039 }
 0xab5   : > { %3648 = vrcp.f32 %v2040_v26 }
 0xab6   : > { %v2037_v27 = vpop.xlane.xlu0 %2036 }
 0xab7   : > { %3650 = vrcp.f32 %v2037_v27 }
 0xac2   : > { %v3649_v30 = vpop.eup %3648 }
 0xac3   : > { %v2044_v33 = vmul.f32 %v3649_v30, %v3645_v20 }
 0xac4   : > { %v3651_v31 = vpop.eup %3650 }
 0xac5   : > { %v2042_v32 = vmul.f32 %v3651_v31, %v3647_v22 }
 0xac7   : > { %3530 = vmatprep.mubr.msk.f32.mxu0 %vm983_vm2, %v2042_v32 }
 0xac8   : > { %3531 = vmatmul.mubr.msk.f32.vlgmr.msra.gmra.mxu0 %vm983_vm2, %v2044_v33 }
 0xac9   : > { %3539 = vmatpush3.msra.mxu0 %v3179_v24  ;;  %3546 = vmatprep.mubr.msk.f32.mxu0 %vm468_vm0, %v3826_v28 }
 0xaca   : > { %3540 = vmatprep.subr.mxu0 %v3178_v34 }
 0xacb   : > { %3541 = vmatpush3.msra.mxu0 %v3178_v34 }
 0xacc   : > { %3542 = vmatprep.subr.mxu0 %v3177_v35 }
 0xacd   : > { %3543 = vmatpush3.msra.mxu0 %v3177_v35 }
 0xace   : > { %3544 = vmatprep.subr.mxu0 %v3176_v36 }
 0xacf   : > { %3545 = vmatpush3.msra.mxu0 %v3176_v36 }
 0xad0   : > { %3547 = vmatmul.mubr.msk.f32.vlgmr.msra.gmra.mxu0 %vm468_vm0, %v3828_v29  ;;  %3560 = vmatprep.subr.mxu0 %v3191_v37 }
 0xad1   : > { %3561 = vmatpush3.msra.mxu0 %v3191_v37  ;;  %3568 = vmatprep.mubr.msk.f32.mxu0 %vm468_vm0, %v3826_v28  ;;  %v2777_v37 = vld [vmem:[%s4172_s9 + $0x10] sm:$0xff] }
 0xad2   : > { %3562 = vmatprep.subr.mxu0 %v3190_v38 }
 0xad3   : > { %3563 = vmatpush3.msra.mxu0 %v3190_v38  ;;  %v2776_v38 = vld [vmem:[%s4172_s9 + $0x8] sm:$0xff] }
 0xad4   : > { %3564 = vmatprep.subr.mxu0 %v3189_v39 }
 0xad5   : > { %3565 = vmatpush3.msra.mxu0 %v3189_v39  ;;  %v2775_v39 = vld [vmem:[%s4172_s9] sm:$0xff] }
 0xad6   : > { %3566 = vmatprep.subr.mxu0 %v3188_v40 }
 0xad7   : > { %3567 = vmatpush3.msra.mxu0 %v3188_v40 }
 0xad8   : > { %3569 = vmatmul.mubr.msk.f32.vlgmr.msra.gmra.mxu0 %vm468_vm0, %v3828_v29 }
 0xb88   : > { %v3532_v42 = vpop.f32.mrf.mxu0 }
 0xb8a   : > { %v2117_v43 = vpop.f32.mrf.mxu0 }
 0xb8b   : > { %3535 = vmatprep.mubr.msk.f32.mxu1 %vm893_vm1, %v2117_v43 }
 0xb8c   : > { %3536 = vmatmul.mubr.msk.f32.vlgmr.msra.gmra.mxu1 %vm893_vm1, %v3532_v42 }
 0xb8d   : > { %3550 = vmatpush3.msra.mxu1 %v3185_v41  ;;  %3557 = vmatprep.mubr.msk.f32.mxu1 %vm468_vm0, %v3826_v28 }
 0xb8e   : > { %3551 = vmatprep.subr.mxu1 %v3184_v44 }
 0xb8f   : > { %3552 = vmatpush3.msra.mxu1 %v3184_v44 }
 0xb90   : > { %v3548_v47 = vpop.f32.mrf.mxu0  ;;  %3553 = vmatprep.subr.mxu1 %v3183_v45 }
 0xb91   : > { %3554 = vmatpush3.msra.mxu1 %v3183_v45 }
 0xb92   : > { %3555 = vmatprep.subr.mxu1 %v3182_v46  ;;  %v2282_v48 = vpop.f32.mrf.mxu0 }
 0xb93   : > { %3556 = vmatpush3.msra.mxu1 %v3182_v46 }
 0xb94   : > { %3558 = vmatmul.mubr.msk.f32.vlgmr.msra.gmra.mxu1 %vm468_vm0, %v3828_v29 }
 0xb95   : > { %3575 = vmatprep.mubr.msk.f32.mxu1 %vm893_vm1, %v2282_v48  ;;  %v4099_v48 = vld [vmem:[%s4170_s7] ss:$0 sm:$0xff] }
 0xb98   : > { %v3570_v49 = vpop.f32.mrf.mxu0 }
 0xb99   : > { %3578 = vmatprep.subr.mxu0 %v3570_v49 }
 0xb9a   : > { %v2442_v50 = vpop.f32.mrf.mxu0  ;;  %3579 = vmatpush3.msra.mxu0 %v3570_v49 }
 0xb9b   : > { %3580 = vmatprep.subr.mxu0 %v2442_v50 }
 0xb9c   : > { %3581 = vmatpush3.msra.mxu0 %v2442_v50 }
 0xc4c   : > { %v3537_v51 = vpop.f32.mrf.mxu1 }
 0xc4d   : > { %v2210_v52 = vadd.f32 %v3537_v51, %v3991_v3 }
 0xc4e   : > { %v2200_v53 = vpop.f32.mrf.mxu1 }
 0xc4f   : > { %v2209_v54 = vadd.f32 %v2200_v53, %v3993_v5 }
 0xc54   : > { %v3559_v55 = vpop.f32.mrf.mxu1 }
 0xc55   : > { %3571 = vmatprep.subr.msk.mxu1 %vm893_vm1, %v3559_v55 }
 0xc56   : > { %v2362_v56 = vpop.f32.mrf.mxu1  ;;  %3572 = vmatpush3.xpose.msk.msra.mxu1 %vm893_vm1, %v3559_v55 }
 0xc57   : > { %3573 = vmatprep.subr.msk.mxu1 %vm893_vm1, %v2362_v56 }
 0xc5a   : > { %3574 = vmatpush3.xpose.msk.msra.mxu1 %vm893_vm1, %v2362_v56  ;;  %v2892_v56 = vld [vmem:[%s4174_s11 + $0x38] sm:$0xff] }
 0xc5b   : > { %3585 = vmatprep.subr.mxu1 %v3200_v9 }
 0xc5d   : > { %3576 = vmatmul.mubr.msk.f32.vlgmr.msra.gmra.mxu1 %vm893_vm1, %v3548_v47 }
 0xc5e   : > { %3586 = vmatpush3.msra.mxu1 %v3200_v9 }
 0xc5f   : > { %3601 = vmatprep.subr.mxu1 %v2892_v56 }
 0xd1d   : > { %v3577_v57 = vpop.f32.mrf.mxu1 }
 0xd1e   : > { %v2539_v58 = vmul.f32 0.35355338, %v3577_v57  ;;  %v2891_v57 = vld [vmem:[%s4174_s11 + $0x30] sm:$0xff] }
 0xd1f   : > { %v2529_v59 = vpop.f32.mrf.mxu1 }
 0xd20   : > { %v2538_v60 = vmul.f32 0.35355338, %v2529_v59  ;;  %v2543_v61 = vsel %vm983_vm2, %v2539_v58, -inf  ;;  %v2889_v59 = vld [vmem:[%s4174_s11 + $0x20] sm:$0xff] }
 0xd21   : > { %2544 = vmax.xlane.f32.xlu1 %v2543_v61  ;;  %v2887_v61 = vld [vmem:[%s4174_s11 + $0x10] sm:$0xff] }
 0xd22   : > { %v2540_v62 = vsel %vm983_vm2, %v2538_v60, -inf }
 0xd23   : > { %2541 = vmax.xlane.f32.xlu0 %v2540_v62  ;;  %v2886_v62 = vld [vmem:[%s4174_s11 + $0x8] sm:$0xff] }
 0xdaa   : > { %v2545_v63 = vpop.xlane.xlu1 %2544 }
 0xdab   : > { %v2547_v0 = vsub.f32 %v2539_v58, %v2545_v63  ;;  %v2890_v58 = vld [vmem:[%s4174_s11 + $0x28] sm:$0xff]  ;;  %v2885_v63 = vld [vmem:[%s4174_s11] sm:$0xff] }
 0xdac   : > { %v2542_v1 = vpop.xlane.xlu0 %2541 }
 0xdad   : > { %v2550_v2 = vmul.f32 1.442695, %v2547_v0  ;;  %v2546_v3 = vsub.f32 %v2538_v60, %v2542_v1  ;;  %v2888_v60 = vld [vmem:[%s4174_s11 + $0x18] sm:$0xff]  ;;  %v3205_v0 = vld [vmem:[%s4173_s10] ss:$0 sm:$0xff] }
 0xdaf   : > { %3652 = vpow2.f32 %v2550_v2  ;;  %v2548_v4 = vmul.f32 1.442695, %v2546_v3 }
 0xdb1   : > { %3654 = vpow2.f32 %v2548_v4 }
 0xdbc   : > { %v3653_v5 = vpop.eup %3652 }
 0xdbd   : > { %v2555_v6 = vsel %vm983_vm2, %v3653_v5, 0.0 }
 0xdbe   : > { %v3655_v7 = vpop.eup %3654  ;;  %2556 = vadd.xlane.f32.xlu1 %v2555_v6 }
 0xdbf   : > { %v2552_v8 = vsel %vm983_vm2, %v3655_v7, 0.0 }
 0xdc0   : > { %2553 = vadd.xlane.f32.xlu0 %v2552_v8 }
 0xe47   : > { %v2557_v10 = vpop.xlane.xlu1 %2556 }
 0xe48   : > { %3656 = vrcp.f32 %v2557_v10 }
 0xe49   : > { %v2554_v11 = vpop.xlane.xlu0 %2553 }
 0xe4a   : > { %3658 = vrcp.f32 %v2554_v11 }
 0xe55   : > { %v3657_v12 = vpop.eup %3656 }
 0xe56   : > { %v2561_v15 = vmul.f32 %v3657_v12, %v3653_v5 }
 0xe57   : > { %v3659_v13 = vpop.eup %3658 }
 0xe58   : > { %v2559_v14 = vmul.f32 %v3659_v13, %v3655_v7 }
 0xe5a   : > { %3582 = vmatprep.mubr.msk.f32.mxu0 %vm983_vm2, %v2559_v14 }
 0xe5b   : > { %3583 = vmatmul.mubr.msk.f32.vlgmr.msra.gmra.mxu0 %vm983_vm2, %v2561_v15 }
 0xf1b   : > { %v3584_v16 = vpop.f32.mrf.mxu0 }
 0xf1d   : > { %v2634_v17 = vpop.f32.mrf.mxu0 }
 0xf1e   : > { %3587 = vmatprep.mubr.msk.f32.mxu1 %vm893_vm1, %v2634_v17 }
 0xf1f   : > { %3588 = vmatmul.mubr.msk.f32.vlgmr.msra.gmra.mxu1 %vm893_vm1, %v3584_v16 }
 0xf20   : > { %3602 = vmatpush3.msra.mxu1 %v2892_v56 }
 0xf21   : > { %3603 = vmatprep.subr.mxu1 %v2891_v57 }
 0xf22   : > { %3604 = vmatpush3.msra.mxu1 %v2891_v57 }
 0xf23   : > { %3605 = vmatprep.subr.mxu1 %v2890_v58 }
 0xf24   : > { %3606 = vmatpush3.msra.mxu1 %v2890_v58 }
 0xf25   : > { %3607 = vmatprep.subr.mxu1 %v2889_v59 }
 0xf26   : > { %3608 = vmatpush3.msra.mxu1 %v2889_v59 }
 0xf27   : > { %3609 = vmatprep.subr.mxu1 %v2888_v60 }
 0xf28   : > { %3610 = vmatpush3.msra.mxu1 %v2888_v60 }
 0xf29   : > { %3611 = vmatprep.subr.mxu1 %v2887_v61 }
 0xf2a   : > { %3612 = vmatpush3.msra.mxu1 %v2887_v61 }
 0xf2b   : > { %3613 = vmatprep.subr.mxu1 %v2886_v62 }
 0xf2c   : > { %3614 = vmatpush3.msra.mxu1 %v2886_v62 }
 0xf2d   : > { %3615 = vmatprep.subr.mxu1 %v2885_v63 }
 0xf2e   : > { %3616 = vmatpush3.msra.mxu1 %v2885_v63 }
 0xfdf   : > { %v3589_v18 = vpop.f32.mrf.mxu1 }
 0xfe0   : > { %v2727_v19 = vadd.f32 %v3589_v18, %v2210_v52  ;;  %v4105_v52 = vld [vmem:[%s4171_s8] ss:$0 sm:$0xff] }
 0xfe1   : > { %v2717_v20 = vpop.f32.mrf.mxu1 }
 0xfe2   : > { %v2726_v21 = vadd.f32 %v2717_v20, %v2209_v54  ;;  %v2729_v22 = vadd.f32 %v2727_v19, %v3828_v29 }
 0xfe4   : > { %v2735_v23 = vsel %vm468_vm0, %v2729_v22, 0.0  ;;  %v2728_v24 = vadd.f32 %v2726_v21, %v3826_v28  ;;  %v2778_v28 = vld [vmem:[%s4172_s9 + $0x18] sm:$0xff] }
 0xfe5   : > { %2736 = vadd.xlane.f32.xlu1 %v2735_v23  ;;  %3590 = vmatprep.subr.mxu0 %v2778_v28  ;;  %v3208_v23 = vld [vmem:[%s4175_s12] ss:$0 sm:$0xff] }
 0xfe6   : > { %v2732_v25 = vsel %vm468_vm0, %v2728_v24, 0.0  ;;  %3591 = vmatpush3.msra.mxu0 %v2778_v28 }
 0xfe7   : > { %2733 = vadd.xlane.f32.xlu0 %v2732_v25  ;;  %3592 = vmatprep.subr.mxu0 %v2777_v37 }
 0xfe8   : > { %3593 = vmatpush3.msra.mxu0 %v2777_v37 }
 0xfe9   : > { %3594 = vmatprep.subr.mxu0 %v2776_v38 }
 0xfea   : > { %3595 = vmatpush3.msra.mxu0 %v2776_v38 }
 0xfeb   : > { %3596 = vmatprep.subr.mxu0 %v2775_v39 }
 0xfec   : > { %3597 = vmatpush3.msra.mxu0 %v2775_v39 }
0x106e   : > { %v2737_v26 = vpop.xlane.xlu1 %2736 }
0x106f   : > { %v2740_v27 = vmul.f32 0.03125, %v2737_v26 }
0x1070   : > { %v2734_v30 = vpop.xlane.xlu0 %2733 }
0x1071   : > { %v2742_v31 = vsub.f32 %v2729_v22, %v2740_v27  ;;  %v2739_v32 = vmul.f32 0.03125, %v2734_v30 }
0x1073   : > { %v2741_v33 = vsub.f32 %v2728_v24, %v2739_v32  ;;  %v2744_v34 = vmul.f32 %v2742_v31, %v2742_v31 }
0x1075   : > { %v2748_v35 = vsel %vm468_vm0, %v2744_v34, 0.0  ;;  %v2743_v36 = vmul.f32 %v2741_v33, %v2741_v33 }
0x1076   : > { %2749 = vadd.xlane.f32.xlu1 %v2748_v35 }
0x1077   : > { %v2745_v29 = vsel %vm468_vm0, %v2743_v36, 0.0 }
0x1078   : > { %2746 = vadd.xlane.f32.xlu0 %v2745_v29 }
0x10ff   : > { %v2750_v40 = vpop.xlane.xlu1 %2749 }
0x1100   : > { %v2752_v41 = vmul.f32 0.03125, %v2750_v40 }
0x1101   : > { %v2747_v42 = vpop.xlane.xlu0 %2746 }
0x1102   : > { %v2754_v43 = vadd.f32 1e-05, %v2752_v41  ;;  %v2751_v44 = vmul.f32 0.03125, %v2747_v42 }
0x1104   : > { %3660 = vrsqrt.f32 %v2754_v43  ;;  %v2753_v45 = vadd.f32 1e-05, %v2751_v44 }
0x1106   : > { %3662 = vrsqrt.f32 %v2753_v45 }
0x1111   : > { %v3661_v46 = vpop.eup %3660 }
0x1112   : > { %v2758_v47 = vmul.f32 %v3661_v46, %v2742_v31 }
0x1113   : > { %v3663_v49 = vpop.eup %3662 }
0x1114   : > { %v2757_v50 = vmul.f32 %v3663_v49, %v2741_v33  ;;  %v2766_v51 = vmul.f32 %v4099_v48, %v2758_v47 }
0x1116   : > { %v2765_v53 = vmul.f32 %v4099_v48, %v2757_v50  ;;  %v2774_v55 = vadd.f32 %v4105_v52, %v2766_v51 }
0x1118   : > { %v4109_v54 = vadd.f32 %v4105_v52, %v2765_v53 }
0x111a   : > { %3598 = vmatprep.mubr.msk.f32.mxu0 %vm468_vm0, %v4109_v54 }
0x111b   : > { %3599 = vmatmul.mubr.msk.f32.vlgmr.msra.gmra.mxu0 %vm468_vm0, %v2774_v55 }
0x11db   : > { %v3600_v1 = vpop.f32.mrf.mxu0 }
0x11dc   : > { %v2864_v2 = vadd.f32 %v3600_v1, %v3205_v0 }
0x11dd   : > { %v2858_v3 = vpop.f32.mrf.mxu0 }
0x11de   : > { %v2870_v4 = vmul.f32 0.044715, %v2864_v2  ;;  %v2859_v5 = vadd.f32 %v3205_v0, %v2858_v3  ;;  %v2868_v20 = vmul.f32 0.5, %v2864_v2 }
0x11e0   : > { %v2872_v6 = vmul.f32 %v2870_v4, %v2864_v2  ;;  %v2869_v7 = vmul.f32 0.044715, %v2859_v5  ;;  %v2867_v18 = vmul.f32 0.5, %v2859_v5 }
0x11e2   : > { %v2874_v8 = vmul.f32 %v2872_v6, %v2864_v2  ;;  %v2871_v9 = vmul.f32 %v2869_v7, %v2859_v5 }
0x11e4   : > { %v2876_v10 = vadd.f32 %v2874_v8, %v2864_v2  ;;  %v2873_v11 = vmul.f32 %v2871_v9, %v2859_v5 }
0x11e6   : > { %v2878_v12 = vmul.f32 0.7978846, %v2876_v10  ;;  %v2875_v13 = vadd.f32 %v2873_v11, %v2859_v5 }
0x11e8   : > { %3664 = vtanh.f32 %v2878_v12  ;;  %v2877_v14 = vmul.f32 0.7978846, %v2875_v13 }
0x11ea   : > { %3666 = vtanh.f32 %v2877_v14 }
0x11f5   : > { %v3665_v15 = vpop.eup %3664 }
0x11f6   : > { %v2882_v17 = vadd.f32 1.0, %v3665_v15 }
0x11f7   : > { %v3667_v16 = vpop.eup %3666 }
0x11f8   : > { %v2881_v19 = vadd.f32 1.0, %v3667_v16  ;;  %v2884_v22 = vmul.f32 %v2882_v17, %v2868_v20 }
0x11fa   : > { %v2883_v21 = vmul.f32 %v2881_v19, %v2867_v18 }
0x11fc   : > { %3617 = vmatprep.mubr.msk.f32.mxu1 %vm2900_vm3, %v2883_v21 }
0x11fd   : > { %3618 = vmatmul.mubr.msk.f32.vlgmr.msra.gmra.mxu1 %vm2900_vm3, %v2884_v22 }
0x12bd   : > { %v3619_v24 = vpop.f32.mrf.mxu1 }
0x12be   : > { %v2979_v25 = vadd.f32 %v3619_v24, %v3208_v23 }
0x12bf   : > { %v2973_v26 = vpop.f32.mrf.mxu1 }
0x12c0   : > { %v2974_v27 = vadd.f32 %v3208_v23, %v2973_v26  ;;  %v2983_v30 = vadd.f32 %v2979_v25, %v2774_v55 }
0x12c2   : > { %v2987_v31 = vsel %vm468_vm0, %v2983_v30, 0.0  ;;  %v2982_v32 = vadd.f32 %v2974_v27, %v4109_v54 }
0x12c3   : > { %2988 = vadd.xlane.f32.xlu1 %v2987_v31 }
0x12c4   : > { %v2984_v33 = vsel %vm468_vm0, %v2982_v32, 0.0 }
0x12c5   : > { %2985 = vadd.xlane.f32.xlu0 %v2984_v33 }
0x134c   : > { %v2989_v34 = vpop.xlane.xlu1 %2988 }
0x134d   : > { %v2991_v35 = vmul.f32 0.03125, %v2989_v34 }
0x134e   : > { %v2986_v36 = vpop.xlane.xlu0 %2985 }
0x134f   : > { %v2993_v29 = vsub.f32 %v2983_v30, %v2991_v35  ;;  %v2990_v28 = vmul.f32 0.03125, %v2986_v36 }
0x1351   : > { %v2992_v37 = vsub.f32 %v2982_v32, %v2990_v28  ;;  %v2995_v38 = vmul.f32 %v2993_v29, %v2993_v29 }
0x1353   : > { %v2999_v39 = vsel %vm468_vm0, %v2995_v38, 0.0  ;;  %v2994_v40 = vmul.f32 %v2992_v37, %v2992_v37 }
0x1354   : > { %3000 = vadd.xlane.f32.xlu1 %v2999_v39 }
0x1355   : > { %v2996_v41 = vsel %vm468_vm0, %v2994_v40, 0.0 }
0x1356   : > { %2997 = vadd.xlane.f32.xlu0 %v2996_v41 }
0x13dd   : > { %v3001_v42 = vpop.xlane.xlu1 %3000 }
0x13de   : > { %v3003_v43 = vmul.f32 0.03125, %v3001_v42 }
0x13df   : > { %v2998_v44 = vpop.xlane.xlu0 %2997 }
0x13e0   : > { %v3005_v45 = vadd.f32 1e-05, %v3003_v43  ;;  %v3002_v46 = vmul.f32 0.03125, %v2998_v44 }
0x13e2   : > { %3668 = vrsqrt.f32 %v3005_v45  ;;  %v3004_v47 = vadd.f32 1e-05, %v3002_v46 }
0x13e4   : > { %3670 = vrsqrt.f32 %v3004_v47 }
0x13ef   : > { %v3669_v49 = vpop.eup %3668 }
0x13f0   : > { %v3009_v50 = vmul.f32 %v3669_v49, %v2993_v29 }
0x13f1   : > { %v3671_v51 = vpop.eup %3670 }
0x13f2   : > { %v3011_v53 = vmul.f32 %v4099_v48, %v3009_v50  ;;  %v3008_v54 = vmul.f32 %v3671_v51, %v2992_v37 }
0x13f4   : > { %v3013_v55 = vadd.f32 %v4105_v52, %v3011_v53  ;;  %v3010_v56 = vmul.f32 %v4099_v48, %v3008_v54 }
0x13f6   : > { %3015 = vst.msk [vmem:[%s460_s24 + $0x8] sm:$0xff] %vm468_vm0, %v3013_v55  ;;  %v3012_v57 = vadd.f32 %v4105_v52, %v3010_v56 }
0x13f8   : > { %3014 = vst.msk [vmem:[%s460_s24] sm:$0xff] %vm468_vm0, %v3012_v57 }
0x13f9 PF: > { %s23_s25 = sadd.s32 1, %s3678_s25  }
0x13fa   : > { %p20_p4 = scmp.ge.s32.totalorder %s23_s25, 4  }
0x13fc   :  { %22 = sbr.rel (!%p20_p4) target bundleno = 1 (0x1), region = 119 }

// kernel: _lambda_.7
= control target key start
LH: loop header
LB: loop body
LE: loop exit
PB: predicated region body
PF: predicated region fallthrough
CT: control target
= control target key end

     0   :  { %s4184_s0 = inlined_call_operand.vmem [shape: f32[2,16,32], index: 0, kind: input, shape index: {}]   ;;  %s4185_s1 = inlined_call_operand.vmem [shape: f32[12,32,8], index: 1, kind: input, shape index: {}]   ;;  %s4186_s2 = inlined_call_operand.vmem [shape: f32[4,8,32], index: 2, kind: input, shape index: {}]   ;;  %s4187_s3 = inlined_call_operand.vmem [shape: f32[1,32], index: 3, kind: input, shape index: {}]   ;;  %s4188_s4 = inlined_call_operand.vmem [shape: f32[1,32], index: 4, kind: input, shape index: {}]   ;;  %s4189_s5 = inlined_call_operand.vmem [shape: f32[1,32], index: 5, kind: input, shape index: {}]   ;;  %s4190_s6 = inlined_call_operand.vmem [shape: f32[32,64], index: 6, kind: input, shape index: {}]   ;;  %s4191_s7 = inlined_call_operand.vmem [shape: f32[1,64], index: 7, kind: input, shape index: {}]   ;;  %s4192_s8 = inlined_call_operand.vmem [shape: f32[64,32], index: 8, kind: input, shape index: {}]   ;;  %s4193_s9 = inlined_call_operand.vmem [shape: f32[1,32], index: 9, kind: input, shape index: {}]   ;;  %s4194_s10 = inlined_call_operand.hbm [shape: f32[2,16,32], index: 10, kind: output, shape index: {0}]   ;;  %s4195_s11 = inlined_call_operand.hbm [shape: f32[2,4,16,16], index: 11, kind: output, shape index: {1}]  }
   0x1   :  { %4197 = sst [smem:[#allocation8_spill]] %s4184_s0 }
   0x2   :  { %4198 = sst [smem:[#allocation9_spill]] %s4185_s1 }
   0x3   :  { %17 = vsyncpa [#allocation3], 0 }
   0x4   :  { %19 = vsyncpa [#allocation3 + $0x1], 0 }
   0x5   :  { %20 = vsyncpa [#allocation5], 0 }
   0x6   :  { %22 = vsyncpa [#allocation5 + $0x1], 0  ;;  %s3661_s17 = smov 0   ;;  %s3663_s18 = smov 0  }
   0x7   :  { %s3665_s19 = smov 0   ;;  %s3667_s20 = smov 0  }
   0x8 LB: > { %s3682_s21 = sadd.s32 4294967295, %s3595_s20   ;;  %s2908_s22 = sadd.s32 4294967294, %s3595_s20   ;;  %s3595_s20 = sphi %s3667_s20, %s4208_s20   ;;  %s3591_s19 = sphi %s3665_s19, %s4207_s19   ;;  %s3587_s18 = sphi %s3663_s18, %s4206_s18   ;;  %s3583_s17 = sphi %s3661_s17, %s4205_s17  }
   0x9   : > { %s3686_s23 = sadd.s32 1, %s3595_s20   ;;  %s250_s24 = sadd.s32 1, %s3591_s19 }
   0xa   : > { %s247_s25 = ssub.s32 %s3595_s20, %s3686_s23  ;;  %p260_p0 = scmp.ne.s32.totalorder %s3591_s19, %s3587_s18 }
   0xb   : > { %p248_p1 = scmp.eq.s32.totalorder %s247_s25, 0  ;;  %p261_p2 = scmp.eq.s32.totalorder %s3682_s21, 1 }
   0xc   : > { %p266_p3 = scmp.ne.s32.totalorder %s3587_s18, %s3583_s17  ;;  %p267_p4 = scmp.eq.s32.totalorder %s2908_s22, 1 }
   0xd   : > { %s3697_s26 = scalar_select %p248_p1, %s3591_s19, %s250_s24  }
   0xe   : > { %p3699_p5 = por %p261_p2, %p260_p0  ;;  %p3703_p6 = por %p267_p4, %p266_p3 }
   0xf   : > { %p2911_p7 = scmp.ge.s32.totalorder %s3595_s20, 1  ;;  %p346_p8 = scmp.lt.s32.totalorder %s3595_s20, 3 }
  0x11   : > { %p347_p9 = pnand %p2911_p7, %p346_p8 }
  0x12   : > { %s4201_s1 = sld [smem:[#allocation9_spill]] (!%p347_p9)  ;;  %p391_p10 = scmp.lt.s32.totalorder (!%p347_p9), %s3682_s21, 1 }
  0x13   : > { %350 = sbr.rel (%p347_p9) target bundleno = 4938 (0x134a), region = 60  ;;  %s4202_s0 = sld [smem:[#allocation8_spill]] (!%p347_p9) }
  0x14   : > { %s3775_s25 = sand.u32 (!%p347_p9), 1, %s3587_s18   ;;  %s3044_s22 = sshll.u32 (!%p347_p9), %s3682_s21, 10 }
  0x15   : > { %s2913_s29 = sshll.u32 (!%p347_p9), %s3775_s25, 6 }
  0x16   : > { %s3778_s30 = scalar_lea.vmem (!%p347_p9), [#allocation4], %s2913_s29 }
  0x18   : > { %v2921_v0 = vld [vmem:[%s4201_s1 + $0x98] sm:$0xff]  ;;  %v2920_v1 = vld [vmem:[%s4201_s1 + $0x90] sm:$0xff]  ;;  %v2919_v4 = vld [vmem:[%s4201_s1 + $0x88] sm:$0xff]  ;;  %s392_s12 = scalar_select %p391_p10, %s3682_s21, 1  ;;  %vm403_vm0 = vcmask 261120   ;;  %vm645_vm1 = vcmask 64512  }
  0x19   : > { %v402_v2 = vld [vmem:[%s4201_s1 + $0x18] sm:$0xff]  ;;  %3188 = vmatprep.subr.mxu1 %v2921_v0  ;;  %v401_v3 = vld [vmem:[%s4201_s1 + $0x10] sm:$0xff]  ;;  %v400_v5 = vld [vmem:[%s4201_s1 + $0x8] sm:$0xff]  ;;  %vm735_vm2 = vcmask 130048   ;;  %vm2663_vm3 = vcmask 523264  }
  0x1a   : > { %3177 = vmatprep.subr.mxu0 %v402_v2  ;;  %3189 = vmatpush3.msra.mxu1 %v2921_v0  ;;  %v2918_v6 = vld [vmem:[%s4201_s1 + $0x80] sm:$0xff]  ;;  %s3042_s15 = sshll.u32 %s392_s12, 4  ;;  %v2927_v14 = vld [vmem:[%s4201_s1 + $0x118] sm:$0xff]  ;;  %v2926_v15 = vld [vmem:[%s4201_s1 + $0x110] sm:$0xff]  ;;  %s4097_s12 = scalar_lea.hbm %s4195_s11, %s3044_s22 }
  0x1b   : > { %3178 = vmatpush3.msra.mxu0 %v402_v2  ;;  %3190 = vmatprep.subr.mxu1 %v2920_v1  ;;  %s395_s24 = scalar_lea.vmem %s4202_s0, %s3042_s15  ;;  %v399_v7 = vld [vmem:[%s4201_s1] sm:$0xff]  ;;  %v2925_v16 = vld [vmem:[%s4201_s1 + $0x108] sm:$0xff]  ;;  %v2948_v36 = vld [vmem:[%s4201_s1 + $0xb8] sm:$0xff]  ;;  %s2814_s0 = sshll.u32 %s3778_s30, 4  ;;  %s4100_s0 = int_to_ptr.vmem [resolvable:$true] %s2814_s0 }
  0x1c   : > { %3179 = vmatprep.subr.mxu0 %v401_v3  ;;  %3191 = vmatpush3.msra.mxu1 %v2920_v1  ;;  %v3738_v8 = vld [vmem:[%s395_s24] sm:$0xff]  ;;  %v3740_v9 = vld [vmem:[%s395_s24 + $0x8] sm:$0xff]  ;;  %v2947_v37 = vld [vmem:[%s4201_s1 + $0xb0] sm:$0xff]  ;;  %s3505_s14 = scalar_lea.vmem %s4100_s0, 1024  ;;  %s3597_s15 = smov [#allocation4]  }
  0x1d   : > { %3180 = vmatpush3.msra.mxu0 %v401_v3  ;;  %3192 = vmatprep.subr.mxu1 %v2919_v4  ;;  %v2924_v17 = vld [vmem:[%s4201_s1 + $0x100] sm:$0xff]  ;;  %v2946_v39 = vld [vmem:[%s4201_s1 + $0xa8] sm:$0xff]  ;;  %v2942_v47 = vld [vmem:[%s4201_s1 + $0x38] sm:$0xff]  ;;  %p3506_p11 = scmp.ne.s32.totalorder %s4100_s0, %s3505_s14  ;;  %s3509_s16 = sshll.u32 %s3597_s15, 4  ;;  %s3510_s16 = int_to_ptr.vmem [resolvable:$false] %s3509_s16 }
  0x1e   : > { %3181 = vmatprep.subr.mxu0 %v400_v5  ;;  %3193 = vmatpush3.msra.mxu1 %v2919_v4  ;;  %v841_v38 = vld [vmem:[%s4186_s2] sm:$0xff]  ;;  %v2941_v51 = vld [vmem:[%s4201_s1 + $0x30] sm:$0xff]  ;;  %v2940_v52 = vld [vmem:[%s4201_s1 + $0x28] sm:$0xff]  ;;  %p3512_p0 = scmp.lt.s32.totalorder %s4100_s0, %s3510_s16 }
  0x1f   : > { %3182 = vmatpush3.msra.mxu0 %v400_v5  ;;  %3194 = vmatprep.subr.mxu1 %v2918_v6  ;;  %v2945_v40 = vld [vmem:[%s4201_s1 + $0xa0] sm:$0xff]  ;;  %v2954_v59 = vld [vmem:[%s4201_s1 + $0x138] sm:$0xff]  ;;  %v2953_v60 = vld [vmem:[%s4201_s1 + $0x130] sm:$0xff]  ;;  %p3507_p12 = pnand %p3506_p11, %p3699_p5 }
  0x20   : > { %3196 = vmatprep.mubr.msk.f32.mxu1 %vm403_vm0, %v3738_v8  ;;  %3195 = vmatpush3.msra.mxu1 %v2918_v6  ;;  %v2939_v53 = vld [vmem:[%s4201_s1 + $0x20] sm:$0xff]  ;;  %v2952_v61 = vld [vmem:[%s4201_s1 + $0x128] sm:$0xff] }
  0x21   : > { %3183 = vmatprep.subr.mxu0 %v399_v7  ;;  %3197 = vmatmul.mubr.msk.f32.vlgmr.msra.gmra.mxu1 %vm403_vm0, %v3740_v9  ;;  %v2951_v62 = vld [vmem:[%s4201_s1 + $0x120] sm:$0xff]  ;;  %p3508_p13 = pneg %p3507_p12 }
  0x22   : > { %3184 = vmatpush3.msra.mxu0 %v399_v7  ;;  %3185 = vmatprep.mubr.msk.f32.mxu0 %vm403_vm0, %v3738_v8 }
  0x23   : > { %3186 = vmatmul.mubr.msk.f32.vlgmr.msra.gmra.mxu0 %vm403_vm0, %v3740_v9  ;;  %3199 = vmatprep.subr.mxu0 %v2927_v14 }
  0x24   : > { %3207 = vmatprep.mubr.msk.f32.mxu0 %vm403_vm0, %v3738_v8  ;;  %3200 = vmatpush3.msra.mxu0 %v2927_v14 }
  0x25   : > { %3201 = vmatprep.subr.mxu0 %v2926_v15 }
  0x26   : > { %3202 = vmatpush3.msra.mxu0 %v2926_v15 }
  0x27   : > { %3203 = vmatprep.subr.mxu0 %v2925_v16 }
  0x28   : > { %3204 = vmatpush3.msra.mxu0 %v2925_v16 }
  0x29   : > { %3205 = vmatprep.subr.mxu0 %v2924_v17 }
  0x2a   : > { %3206 = vmatpush3.msra.mxu0 %v2924_v17 }
  0x2b   : > { %3208 = vmatmul.mubr.msk.f32.vlgmr.msra.gmra.mxu0 %vm403_vm0, %v3740_v9 }
  0xe1   : > { %v3198_v10 = vpop.f32.mrf.mxu1 }
  0xe2   : > { %3210 = vmatprep.subr.msk.mxu1 %vm645_vm1, %v3198_v10 }
  0xe3   : > { %v556_v11 = vpop.f32.mrf.mxu1  ;;  %3211 = vmatpush3.xpose.msk.msra.mxu1 %vm645_vm1, %v3198_v10  ;;  %v3187_v12 = vpop.f32.mrf.mxu0 }
  0xe4   : > { %3212 = vmatprep.subr.msk.mxu1 %vm645_vm1, %v556_v11 }
  0xe5   : > { %v476_v13 = vpop.f32.mrf.mxu0 }
  0xe6   : > { %3214 = vmatprep.mubr.msk.f32.mxu1 %vm645_vm1, %v476_v13 }
  0xe7   : > { %3213 = vmatpush3.xpose.msk.msra.mxu1 %vm645_vm1, %v556_v11 }
  0xe8   : > { %3240 = vmatprep.subr.mxu1 %v2948_v36 }
  0xea   : > { %3215 = vmatmul.mubr.msk.f32.vlgmr.msra.gmra.mxu1 %vm645_vm1, %v3187_v12 }
  0xeb   : > { %3248 = vmatprep.mubr.msk.f32.mxu1 %vm403_vm0, %v3738_v8  ;;  %v3209_v34 = vpop.f32.mrf.mxu0  ;;  %3241 = vmatpush3.msra.mxu1 %v2948_v36 }
  0xec   : > { %3217 = vmatprep.subr.mxu0 %v3209_v34  ;;  %3242 = vmatprep.subr.mxu1 %v2947_v37 }
  0xed   : > { %v636_v35 = vpop.f32.mrf.mxu0  ;;  %3218 = vmatpush3.msra.mxu0 %v3209_v34  ;;  %3243 = vmatpush3.msra.mxu1 %v2947_v37  ;;  %v2975_v34 = vld [vmem:[%s4201_s1 + $0xc8] sm:$0xff] }
  0xee   : > { %3219 = vmatprep.subr.mxu0 %v636_v35  ;;  %3244 = vmatprep.subr.mxu1 %v2946_v39 }
  0xef   : > { %3220 = vmatpush3.msra.mxu0 %v636_v35  ;;  %3245 = vmatpush3.msra.mxu1 %v2946_v39  ;;  %v2974_v35 = vld [vmem:[%s4201_s1 + $0xc0] sm:$0xff] }
  0xf0   : > { %3224 = vmatprep.subr.mxu0 %v841_v38  ;;  %3246 = vmatprep.subr.mxu1 %v2945_v40 }
  0xf1   : > { %3247 = vmatpush3.msra.mxu1 %v2945_v40 }
  0xf2   : > { %3249 = vmatmul.mubr.msk.f32.vlgmr.msra.gmra.mxu1 %vm403_vm0, %v3740_v9 }
 0x1aa   : > { %v3216_v18 = vpop.f32.mrf.mxu1 }
 0x1ab   : > { %v734_v19 = vmul.f32 0.35355338, %v3216_v18 }
 0x1ac   : > { %v724_v20 = vpop.f32.mrf.mxu1 }
 0x1ad   : > { %737 = vst.msk [vmem:[%s3778_s30 + $0x8] sm:$0xff] %vm735_vm2, %v734_v19  ;;  %v733_v21 = vmul.f32 0.35355338, %v724_v20  ;;  %v741_v23 = vsel %vm735_vm2, %v734_v19, -inf }
 0x1af   : > { %736 = vst.msk [vmem:[%s3778_s30] sm:$0xff] %vm735_vm2, %v733_v21  ;;  %v738_v22 = vsel %vm735_vm2, %v733_v21, -inf }
 0x1b0   : > { %739 = vmax.xlane.f32.xlu0 %v738_v22 }
 0x1b2   : > { %v3250_v48 = vpop.f32.mrf.mxu1 }
 0x1b3   : > { %3262 = vmatprep.subr.msk.mxu1 %vm645_vm1, %v3250_v48 }
 0x1b4   : > { %742 = vmax.xlane.f32.xlu0 %v741_v23  ;;  %3263 = vmatpush3.xpose.msk.msra.mxu1 %vm645_vm1, %v3250_v48  ;;  %v1082_v54 = vpop.f32.mrf.mxu1  ;;  %v2982_v48 = vld [vmem:[%s4201_s1 + $0x150] sm:$0xff] }
 0x1b5   : > { %3264 = vmatprep.subr.msk.mxu1 %vm645_vm1, %v1082_v54 }
 0x1b8   : > { %3265 = vmatpush3.xpose.msk.msra.mxu1 %vm645_vm1, %v1082_v54 }
 0x239   : > { %v740_v24 = vpop.xlane.xlu0 %739 }
 0x23a   : > { %v744_v25 = vsub.f32 %v733_v21, %v740_v24 }
 0x23c   : > { %v746_v26 = vmul.f32 1.442695, %v744_v25 }
 0x23d   : > { %v743_v27 = vpop.xlane.xlu0 %742 }
 0x23e   : > { %3461 = vpow2.f32 %v746_v26  ;;  %v745_v28 = vsub.f32 %v734_v19, %v743_v27  ;;  %v2965_v19 = vld [vmem:[%s4186_s2 + $0x8] sm:$0xff]  ;;  %v2977_v26 = vld [vmem:[%s4201_s1 + $0xd8] sm:$0xff] }
 0x23f   : > { %3276 = vmatprep.subr.mxu1 %v2965_v19  ;;  %v2971_v27 = vld [vmem:[%s4201_s1 + $0x58] sm:$0xff] }
 0x240   : > { %v748_v29 = vmul.f32 1.442695, %v745_v28  ;;  %v2970_v28 = vld [vmem:[%s4201_s1 + $0x50] sm:$0xff] }
 0x242   : > { %3463 = vpow2.f32 %v748_v29  ;;  %v2969_v29 = vld [vmem:[%s4201_s1 + $0x48] sm:$0xff] }
 0x24b   : > { %v3462_v30 = vpop.eup %3461 }
 0x24c   : > { %v750_v31 = vsel %vm735_vm2, %v3462_v30, 0.0 }
 0x24d   : > { %751 = vadd.xlane.f32.xlu1 %v750_v31 }
 0x24f   : > { %v3464_v32 = vpop.eup %3463 }
 0x250   : > { %v753_v33 = vsel %vm735_vm2, %v3464_v32, 0.0 }
 0x251   : > { %754 = vadd.xlane.f32.xlu1 %v753_v33  ;;  %v2976_v33 = vld [vmem:[%s4201_s1 + $0xd0] sm:$0xff] }
 0x2d6   : > { %v752_v41 = vpop.xlane.xlu1 %751 }
 0x2d7   : > { %3465 = vrcp.f32 %v752_v41 }
 0x2da   : > { %v755_v42 = vpop.xlane.xlu1 %754 }
 0x2db   : > { %3467 = vrcp.f32 %v755_v42 }
 0x2e4   : > { %v3466_v43 = vpop.eup %3465 }
 0x2e5   : > { %v757_v44 = vmul.f32 %v3466_v43, %v3462_v30  ;;  %v2968_v30 = vld [vmem:[%s4201_s1 + $0x40] sm:$0xff] }
 0x2e7   : > { %3221 = vmatprep.mubr.msk.f32.mxu0 %vm735_vm2, %v757_v44 }
 0x2e8   : > { %v3468_v45 = vpop.eup %3467 }
 0x2e9   : > { %v759_v46 = vmul.f32 %v3468_v45, %v3464_v32 }
 0x2eb   : > { %3222 = vmatmul.mubr.msk.f32.vlgmr.msra.gmra.mxu0 %vm735_vm2, %v759_v46 }
 0x2ec   : > { %3225 = vmatpush3.msra.mxu0 %v841_v38  ;;  %v2938_v38 = vld [vmem:[%s4187_s3] ss:$0 sm:$0xff] }
 0x2ed   : > { %3229 = vmatprep.subr.mxu0 %v2942_v47 }
 0x3ab   : > { %v3223_v49 = vpop.f32.mrf.mxu0 }
 0x3ad   : > { %v832_v50 = vpop.f32.mrf.mxu0 }
 0x3ae   : > { %3226 = vmatprep.mubr.msk.f32.mxu0 %vm645_vm1, %v832_v50  ;;  %v2980_v50 = vld [vmem:[%s4201_s1 + $0x140] sm:$0xff] }
 0x3af   : > { %3227 = vmatmul.mubr.msk.f32.vlgmr.msra.gmra.mxu0 %vm645_vm1, %v3223_v49  ;;  %v2981_v49 = vld [vmem:[%s4201_s1 + $0x148] sm:$0xff] }
 0x3b0   : > { %3230 = vmatpush3.msra.mxu0 %v2942_v47  ;;  %3237 = vmatprep.mubr.msk.f32.mxu0 %vm403_vm0, %v3738_v8  ;;  %v2983_v47 = vld [vmem:[%s4201_s1 + $0x158] sm:$0xff] }
 0x3b1   : > { %3231 = vmatprep.subr.mxu0 %v2941_v51 }
 0x3b2   : > { %3232 = vmatpush3.msra.mxu0 %v2941_v51 }
 0x3b3   : > { %3233 = vmatprep.subr.mxu0 %v2940_v52 }
 0x3b4   : > { %3234 = vmatpush3.msra.mxu0 %v2940_v52 }
 0x3b5   : > { %3235 = vmatprep.subr.mxu0 %v2939_v53 }
 0x3b6   : > { %3236 = vmatpush3.msra.mxu0 %v2939_v53 }
 0x3b7   : > { %3238 = vmatmul.mubr.msk.f32.vlgmr.msra.gmra.mxu0 %vm403_vm0, %v3740_v9  ;;  %3251 = vmatprep.subr.mxu0 %v2954_v59 }
 0x3b8   : > { %3259 = vmatprep.mubr.msk.f32.mxu0 %vm403_vm0, %v3738_v8  ;;  %3252 = vmatpush3.msra.mxu0 %v2954_v59 }
 0x3b9   : > { %3253 = vmatprep.subr.mxu0 %v2953_v60 }
 0x3ba   : > { %3254 = vmatpush3.msra.mxu0 %v2953_v60 }
 0x3bb   : > { %3255 = vmatprep.subr.mxu0 %v2952_v61 }
 0x3bc   : > { %3256 = vmatpush3.msra.mxu0 %v2952_v61 }
 0x3bd   : > { %3257 = vmatprep.subr.mxu0 %v2951_v62 }
 0x3be   : > { %3258 = vmatpush3.msra.mxu0 %v2951_v62 }
 0x3bf   : > { %3260 = vmatmul.mubr.msk.f32.vlgmr.msra.gmra.mxu0 %vm403_vm0, %v3740_v9 }
 0x46f   : > { %v3831_v55 = vpop.f32.mrf.mxu0 }
 0x470   : > { %v930_v39 = vadd.f32 %v3831_v55, %v2938_v38 }
 0x471   : > { %v3833_v56 = vpop.f32.mrf.mxu0 }
 0x472   : > { %v929_v41 = vadd.f32 %v2938_v38, %v3833_v56 }
 0x477   : > { %v3239_v57 = vpop.f32.mrf.mxu0 }
 0x479   : > { %v1002_v58 = vpop.f32.mrf.mxu0 }
 0x47a   : > { %3266 = vmatprep.mubr.msk.f32.mxu1 %vm645_vm1, %v1002_v58 }
 0x47b   : > { %3267 = vmatmul.mubr.msk.f32.vlgmr.msra.gmra.mxu1 %vm645_vm1, %v3239_v57 }
 0x47c   : > { %3277 = vmatpush3.msra.mxu1 %v2965_v19 }
 0x47d   : > { %3292 = vmatprep.subr.mxu1 %v2977_v26 }
 0x47f   : > { %v3261_v17 = vpop.f32.mrf.mxu0 }
 0x480   : > { %3269 = vmatprep.subr.mxu0 %v3261_v17 }
 0x481   : > { %v1162_v18 = vpop.f32.mrf.mxu0  ;;  %3270 = vmatpush3.msra.mxu0 %v3261_v17  ;;  %v2998_v17 = vld [vmem:[%s4201_s1 + $0x68] sm:$0xff] }
 0x482   : > { %3271 = vmatprep.subr.mxu0 %v1162_v18 }
 0x483   : > { %3272 = vmatpush3.msra.mxu0 %v1162_v18  ;;  %v2997_v18 = vld [vmem:[%s4201_s1 + $0x60] sm:$0xff] }
 0x484   : > { %3281 = vmatprep.subr.mxu0 %v2971_v27 }
 0x53b   : > { %v3268_v63 = vpop.f32.mrf.mxu1 }
 0x53c   : > { %v1259_v0 = vmul.f32 0.35355338, %v3268_v63 }
 0x53d   : > { %v1249_v1 = vpop.f32.mrf.mxu1 }
 0x53e   : > { %2962 = vst.msk [vmem:[%s3778_s30 + $0x18] sm:$0xff] %vm735_vm2, %v1259_v0  ;;  %v1258_v2 = vmul.f32 0.35355338, %v1249_v1  ;;  %v1266_v3 = vsel %vm735_vm2, %v1259_v0, -inf }
 0x53f   : > { %1267 = vmax.xlane.f32.xlu1 %v1266_v3 }
 0x540   : > { %2961 = vst.msk [vmem:[%s3778_s30 + $0x10] sm:$0xff] %vm735_vm2, %v1258_v2  ;;  %v1263_v4 = vsel %vm735_vm2, %v1258_v2, -inf }
 0x541   : > { %1264 = vmax.xlane.f32.xlu0 %v1263_v4 }
 0x5c8   : > { %v1268_v5 = vpop.xlane.xlu1 %1267 }
 0x5c9   : > { %v1270_v6 = vsub.f32 %v1259_v0, %v1268_v5  ;;  %v2994_v5 = vld [vmem:[%s4186_s2 + $0x10] sm:$0xff] }
 0x5ca   : > { %v1265_v7 = vpop.xlane.xlu0 %1264 }
 0x5cb   : > { %v1273_v10 = vmul.f32 1.442695, %v1270_v6  ;;  %v1269_v11 = vsub.f32 %v1258_v2, %v1265_v7 }
 0x5cd   : > { %3469 = vpow2.f32 %v1273_v10  ;;  %v1271_v12 = vmul.f32 1.442695, %v1269_v11 }
 0x5cf   : > { %3471 = vpow2.f32 %v1271_v12 }
 0x5da   : > { %v3470_v13 = vpop.eup %3469 }
 0x5db   : > { %v1278_v14 = vsel %vm735_vm2, %v3470_v13, 0.0 }
 0x5dc   : > { %v3472_v15 = vpop.eup %3471  ;;  %1279 = vadd.xlane.f32.xlu1 %v1278_v14  ;;  %v3006_v14 = vld [vmem:[%s4201_s1 + $0xf8] sm:$0xff] }
 0x5dd   : > { %v1275_v16 = vsel %vm735_vm2, %v3472_v15, 0.0 }
 0x5de   : > { %1276 = vadd.xlane.f32.xlu0 %v1275_v16  ;;  %v2999_v16 = vld [vmem:[%s4201_s1 + $0x70] sm:$0xff] }
 0x665   : > { %v1280_v20 = vpop.xlane.xlu1 %1279 }
 0x666   : > { %3473 = vrcp.f32 %v1280_v20 }
 0x667   : > { %v1277_v21 = vpop.xlane.xlu0 %1276 }
 0x668   : > { %3475 = vrcp.f32 %v1277_v21  ;;  %v3005_v21 = vld [vmem:[%s4201_s1 + $0xf0] sm:$0xff] }
 0x673   : > { %v3474_v22 = vpop.eup %3473 }
 0x674   : > { %v1284_v25 = vmul.f32 %v3474_v22, %v3470_v13  ;;  %v3004_v22 = vld [vmem:[%s4201_s1 + $0xe8] sm:$0xff] }
 0x675   : > { %v3476_v23 = vpop.eup %3475 }
 0x676   : > { %v1282_v24 = vmul.f32 %v3476_v23, %v3472_v15  ;;  %v3000_v15 = vld [vmem:[%s4201_s1 + $0x78] sm:$0xff]  ;;  %v3003_v23 = vld [vmem:[%s4201_s1 + $0xe0] sm:$0xff] }
 0x678   : > { %3273 = vmatprep.mubr.msk.f32.mxu0 %vm735_vm2, %v1282_v24 }
 0x679   : > { %3274 = vmatmul.mubr.msk.f32.vlgmr.msra.gmra.mxu0 %vm735_vm2, %v1284_v25 }
 0x67a   : > { %3289 = vmatprep.mubr.msk.f32.mxu0 %vm403_vm0, %v3738_v8  ;;  %3282 = vmatpush3.msra.mxu0 %v2971_v27 }
 0x67b   : > { %3283 = vmatprep.subr.mxu0 %v2970_v28 }
 0x67c   : > { %3284 = vmatpush3.msra.mxu0 %v2970_v28 }
 0x67d   : > { %3285 = vmatprep.subr.mxu0 %v2969_v29 }
 0x67e   : > { %3286 = vmatpush3.msra.mxu0 %v2969_v29 }
 0x67f   : > { %3287 = vmatprep.subr.mxu0 %v2968_v30 }
 0x680   : > { %3288 = vmatpush3.msra.mxu0 %v2968_v30 }
 0x681   : > { %3290 = vmatmul.mubr.msk.f32.vlgmr.msra.gmra.mxu0 %vm403_vm0, %v3740_v9  ;;  %3303 = vmatprep.subr.mxu0 %v2983_v47 }
 0x682   : > { %3311 = vmatprep.mubr.msk.f32.mxu0 %vm403_vm0, %v3738_v8  ;;  %3304 = vmatpush3.msra.mxu0 %v2983_v47 }
 0x683   : > { %3305 = vmatprep.subr.mxu0 %v2982_v48 }
 0x684   : > { %3306 = vmatpush3.msra.mxu0 %v2982_v48 }
 0x685   : > { %3307 = vmatprep.subr.mxu0 %v2981_v49 }
 0x686   : > { %3308 = vmatpush3.msra.mxu0 %v2981_v49 }
 0x687   : > { %3309 = vmatprep.subr.mxu0 %v2980_v50 }
 0x688   : > { %3310 = vmatpush3.msra.mxu0 %v2980_v50 }
 0x689   : > { %3312 = vmatmul.mubr.msk.f32.vlgmr.msra.gmra.mxu0 %vm403_vm0, %v3740_v9 }
 0x739   : > { %v3275_v31 = vpop.f32.mrf.mxu0 }
 0x73b   : > { %v1357_v32 = vpop.f32.mrf.mxu0 }
 0x73c   : > { %3278 = vmatprep.mubr.msk.f32.mxu1 %vm645_vm1, %v1357_v32  ;;  %v3012_v32 = vld [vmem:[%s4201_s1 + $0x178] sm:$0xff] }
 0x73d   : > { %3279 = vmatmul.mubr.msk.f32.vlgmr.msra.gmra.mxu1 %vm645_vm1, %v3275_v31 }
 0x73e   : > { %3293 = vmatpush3.msra.mxu1 %v2977_v26  ;;  %3300 = vmatprep.mubr.msk.f32.mxu1 %vm403_vm0, %v3738_v8 }
 0x73f   : > { %3294 = vmatprep.subr.mxu1 %v2976_v33 }
 0x740   : > { %3295 = vmatpush3.msra.mxu1 %v2976_v33  ;;  %v3011_v33 = vld [vmem:[%s4201_s1 + $0x170] sm:$0xff] }
 0x741   : > { %3296 = vmatprep.subr.mxu1 %v2975_v34  ;;  %v3291_v36 = vpop.f32.mrf.mxu0 }
 0x742   : > { %3297 = vmatpush3.msra.mxu1 %v2975_v34  ;;  %v3010_v34 = vld [vmem:[%s4201_s1 + $0x168] sm:$0xff] }
 0x743   : > { %3298 = vmatprep.subr.mxu1 %v2974_v35  ;;  %v1522_v37 = vpop.f32.mrf.mxu0 }
 0x744   : > { %3299 = vmatpush3.msra.mxu1 %v2974_v35  ;;  %v3009_v35 = vld [vmem:[%s4201_s1 + $0x160] sm:$0xff]  ;;  %s3511_s1 = scalar_lea.vmem %s3510_s16, 2048 }
 0x745   : > { %3301 = vmatmul.mubr.msk.f32.vlgmr.msra.gmra.mxu1 %vm403_vm0, %v3740_v9  ;;  %p3513_p1 = scmp.lt.s32.totalorder %s3511_s1, %s3505_s14 }
 0x746   : > { %3318 = vmatprep.mubr.msk.f32.mxu1 %vm645_vm1, %v1522_v37 }
 0x747   : > { %p3514_p2 = por %p3513_p1, %p3512_p0 }
 0x749   : > { %v3313_v3 = vpop.f32.mrf.mxu0  ;;  %p3515_p3 = pnand %p3514_p2, %p3508_p13 }
 0x74a   : > { %3321 = vmatprep.subr.mxu0 %v3313_v3 }
 0x74b   : > { %v1682_v4 = vpop.f32.mrf.mxu0  ;;  %3322 = vmatpush3.msra.mxu0 %v3313_v3 }
 0x74c   : > { %3323 = vmatprep.subr.mxu0 %v1682_v4 }
 0x74d   : > { %3324 = vmatpush3.msra.mxu0 %v1682_v4 }
 0x74e   : > { %3333 = vmatprep.subr.mxu0 %v3000_v15 }
 0x7fd   : > { %v3280_v40 = vpop.f32.mrf.mxu1 }
 0x7fe   : > { %v3906_v42 = vadd.f32 %v3280_v40, %v930_v39 }
 0x7ff   : > { %v1440_v43 = vpop.f32.mrf.mxu1 }
 0x800   : > { %v3908_v44 = vadd.f32 %v1440_v43, %v929_v41 }
 0x805   : > { %v3302_v45 = vpop.f32.mrf.mxu1 }
 0x806   : > { %3314 = vmatprep.subr.msk.mxu1 %vm645_vm1, %v3302_v45 }
 0x807   : > { %v1602_v46 = vpop.f32.mrf.mxu1  ;;  %3315 = vmatpush3.xpose.msk.msra.mxu1 %vm645_vm1, %v3302_v45 }
 0x808   : > { %3316 = vmatprep.subr.msk.mxu1 %vm645_vm1, %v1602_v46 }
 0x80b   : > { %3317 = vmatpush3.xpose.msk.msra.mxu1 %vm645_vm1, %v1602_v46 }
 0x80c   : > { %3328 = vmatprep.subr.mxu1 %v2994_v5 }
 0x80e   : > { %3319 = vmatmul.mubr.msk.f32.vlgmr.msra.gmra.mxu1 %vm645_vm1, %v3291_v36 }
 0x80f   : > { %3329 = vmatpush3.msra.mxu1 %v2994_v5 }
 0x810   : > { %3344 = vmatprep.subr.mxu1 %v3006_v14 }
 0x8ce   : > { %v3320_v51 = vpop.f32.mrf.mxu1 }
 0x8cf   : > { %v1779_v52 = vmul.f32 0.35355338, %v3320_v51 }
 0x8d0   : > { %v1769_v53 = vpop.f32.mrf.mxu1 }
 0x8d1   : > { %2991 = vst.msk [vmem:[%s3778_s30 + $0x28] sm:$0xff] %vm735_vm2, %v1779_v52  ;;  %v1778_v54 = vmul.f32 0.35355338, %v1769_v53  ;;  %v1786_v55 = vsel %vm735_vm2, %v1779_v52, -inf }
 0x8d2   : > { %1787 = vmax.xlane.f32.xlu1 %v1786_v55 }
 0x8d3   : > { %2990 = vst.msk [vmem:[%s3778_s30 + $0x20] sm:$0xff] %vm735_vm2, %v1778_v54  ;;  %v1783_v56 = vsel %vm735_vm2, %v1778_v54, -inf }
 0x8d4   : > { %1784 = vmax.xlane.f32.xlu0 %v1783_v56 }
 0x95b   : > { %v1788_v57 = vpop.xlane.xlu1 %1787 }
 0x95c   : > { %v1790_v58 = vsub.f32 %v1779_v52, %v1788_v57 }
 0x95d   : > { %v1785_v59 = vpop.xlane.xlu0 %1784 }
 0x95e   : > { %v1793_v60 = vmul.f32 1.442695, %v1790_v58  ;;  %v1789_v61 = vsub.f32 %v1778_v54, %v1785_v59  ;;  %v3023_v54 = vld [vmem:[%s4186_s2 + $0x18] sm:$0xff] }
 0x960   : > { %3477 = vpow2.f32 %v1793_v60  ;;  %v1791_v62 = vmul.f32 1.442695, %v1789_v61 }
 0x962   : > { %3479 = vpow2.f32 %v1791_v62 }
 0x96d   : > { %v3478_v63 = vpop.eup %3477 }
 0x96e   : > { %v1798_v0 = vsel %vm735_vm2, %v3478_v63, 0.0 }
 0x96f   : > { %v3480_v1 = vpop.eup %3479  ;;  %1799 = vadd.xlane.f32.xlu1 %v1798_v0 }
 0x970   : > { %v1795_v2 = vsel %vm735_vm2, %v3480_v1, 0.0 }
 0x971   : > { %1796 = vadd.xlane.f32.xlu0 %v1795_v2 }
 0x9f8   : > { %v1800_v6 = vpop.xlane.xlu1 %1799 }
 0x9f9   : > { %3481 = vrcp.f32 %v1800_v6 }
 0x9fa   : > { %v1797_v7 = vpop.xlane.xlu0 %1796 }
 0x9fb   : > { %3483 = vrcp.f32 %v1797_v7 }
 0xa06   : > { %v3482_v10 = vpop.eup %3481 }
 0xa07   : > { %v1804_v13 = vmul.f32 %v3482_v10, %v3478_v63 }
 0xa08   : > { %v3484_v11 = vpop.eup %3483 }
 0xa09   : > { %v1802_v12 = vmul.f32 %v3484_v11, %v3480_v1 }
 0xa0b   : > { %3325 = vmatprep.mubr.msk.f32.mxu0 %vm735_vm2, %v1802_v12 }
 0xa0c   : > { %3326 = vmatmul.mubr.msk.f32.vlgmr.msra.gmra.mxu0 %vm735_vm2, %v1804_v13 }
 0xa0d   : > { %3341 = vmatprep.mubr.msk.f32.mxu0 %vm403_vm0, %v3738_v8  ;;  %3334 = vmatpush3.msra.mxu0 %v3000_v15 }
 0xa0e   : > { %3335 = vmatprep.subr.mxu0 %v2999_v16 }
 0xa0f   : > { %3336 = vmatpush3.msra.mxu0 %v2999_v16 }
 0xa10   : > { %3337 = vmatprep.subr.mxu0 %v2998_v17 }
 0xa11   : > { %3338 = vmatpush3.msra.mxu0 %v2998_v17 }
 0xa12   : > { %3339 = vmatprep.subr.mxu0 %v2997_v18 }
 0xa13   : > { %3340 = vmatpush3.msra.mxu0 %v2997_v18  ;;  %v2540_v18 = vld [vmem:[%s4190_s6 + $0x10] sm:$0xff] }
 0xa14   : > { %3342 = vmatmul.mubr.msk.f32.vlgmr.msra.gmra.mxu0 %vm403_vm0, %v3740_v9  ;;  %3355 = vmatprep.subr.mxu0 %v3012_v32 }
 0xa15   : > { %3363 = vmatprep.mubr.msk.f32.mxu0 %vm403_vm0, %v3738_v8  ;;  %3356 = vmatpush3.msra.mxu0 %v3012_v32 }
 0xa16   : > { %3357 = vmatprep.subr.mxu0 %v3011_v33 }
 0xa17   : > { %3358 = vmatpush3.msra.mxu0 %v3011_v33  ;;  %v4048_v33 = vld [vmem:[%s4189_s5] ss:$0 sm:$0xff] }
 0xa18   : > { %3359 = vmatprep.subr.mxu0 %v3010_v34 }
 0xa19   : > { %3360 = vmatpush3.msra.mxu0 %v3010_v34 }
 0xa1a   : > { %3361 = vmatprep.subr.mxu0 %v3009_v35 }
 0xa1b   : > { %3362 = vmatpush3.msra.mxu0 %v3009_v35 }
 0xa1c   : > { %3364 = vmatmul.mubr.msk.f32.vlgmr.msra.gmra.mxu0 %vm403_vm0, %v3740_v9 }
 0xacc   : > { %v3327_v19 = vpop.f32.mrf.mxu0 }
 0xace   : > { %v1877_v20 = vpop.f32.mrf.mxu0 }
 0xacf   : > { %3330 = vmatprep.mubr.msk.f32.mxu1 %vm645_vm1, %v1877_v20  ;;  %v2538_v20 = vld [vmem:[%s4190_s6] sm:$0xff] }
 0xad0   : > { %3331 = vmatmul.mubr.msk.f32.vlgmr.msra.gmra.mxu1 %vm645_vm1, %v3327_v19  ;;  %v2539_v19 = vld [vmem:[%s4190_s6 + $0x8] sm:$0xff] }
 0xad1   : > { %3345 = vmatpush3.msra.mxu1 %v3006_v14  ;;  %3352 = vmatprep.mubr.msk.f32.mxu1 %vm403_vm0, %v3738_v8 }
 0xad2   : > { %3346 = vmatprep.subr.mxu1 %v3005_v21 }
 0xad3   : > { %3347 = vmatpush3.msra.mxu1 %v3005_v21 }
 0xad4   : > { %3348 = vmatprep.subr.mxu1 %v3004_v22  ;;  %v3343_v24 = vpop.f32.mrf.mxu0 }
 0xad5   : > { %3349 = vmatpush3.msra.mxu1 %v3004_v22 }
 0xad6   : > { %3350 = vmatprep.subr.mxu1 %v3003_v23  ;;  %v2042_v25 = vpop.f32.mrf.mxu0 }
 0xad7   : > { %3351 = vmatpush3.msra.mxu1 %v3003_v23 }
 0xad8   : > { %3353 = vmatmul.mubr.msk.f32.vlgmr.msra.gmra.mxu1 %vm403_vm0, %v3740_v9 }
 0xad9   : > { %3370 = vmatprep.mubr.msk.f32.mxu1 %vm645_vm1, %v2042_v25 }
 0xadc   : > { %v3365_v52 = vpop.f32.mrf.mxu0 }
 0xadd   : > { %3373 = vmatprep.subr.mxu0 %v3365_v52 }
 0xade   : > { %v2202_v53 = vpop.f32.mrf.mxu0  ;;  %3374 = vmatpush3.msra.mxu0 %v3365_v52 }
 0xadf   : > { %3375 = vmatprep.subr.mxu0 %v2202_v53 }
 0xae0   : > { %3376 = vmatpush3.msra.mxu0 %v2202_v53 }
 0xb90   : > { %v3332_v26 = vpop.f32.mrf.mxu1 }
 0xb91   : > { %v3980_v27 = vadd.f32 %v3332_v26, %v3906_v42 }
 0xb92   : > { %v1960_v28 = vpop.f32.mrf.mxu1 }
 0xb93   : > { %v3983_v29 = vadd.f32 %v1960_v28, %v3908_v44 }
 0xb98   : > { %v3354_v30 = vpop.f32.mrf.mxu1 }
 0xb99   : > { %3366 = vmatprep.subr.msk.mxu1 %vm645_vm1, %v3354_v30 }
 0xb9a   : > { %v2122_v31 = vpop.f32.mrf.mxu1  ;;  %3367 = vmatpush3.xpose.msk.msra.mxu1 %vm645_vm1, %v3354_v30 }
 0xb9b   : > { %3368 = vmatprep.subr.msk.mxu1 %vm645_vm1, %v2122_v31 }
 0xb9e   : > { %3369 = vmatpush3.xpose.msk.msra.mxu1 %vm645_vm1, %v2122_v31 }
 0xb9f   : > { %3380 = vmatprep.subr.mxu1 %v3023_v54 }
 0xba1   : > { %3371 = vmatmul.mubr.msk.f32.vlgmr.msra.gmra.mxu1 %vm645_vm1, %v3343_v24 }
 0xba2   : > { %3381 = vmatpush3.msra.mxu1 %v3023_v54 }
 0xc61   : > { %v3372_v36 = vpop.f32.mrf.mxu1 }
 0xc62   : > { %v2299_v37 = vmul.f32 0.35355338, %v3372_v36 }
 0xc63   : > { %v2289_v38 = vpop.f32.mrf.mxu1 }
 0xc64   : > { %3020 = vst.msk [vmem:[%s3778_s30 + $0x38] sm:$0xff] %vm735_vm2, %v2299_v37  ;;  %v2298_v39 = vmul.f32 0.35355338, %v2289_v38  ;;  %v2306_v40 = vsel %vm735_vm2, %v2299_v37, -inf  ;;  %v2654_v38 = vld [vmem:[%s4192_s8 + $0x30] sm:$0xff] }
 0xc65   : > { %2307 = vmax.xlane.f32.xlu1 %v2306_v40  ;;  %v2652_v40 = vld [vmem:[%s4192_s8 + $0x20] sm:$0xff] }
 0xc66   : > { %3019 = vst.msk [vmem:[%s3778_s30 + $0x30] sm:$0xff] %vm735_vm2, %v2298_v39  ;;  %v2303_v41 = vsel %vm735_vm2, %v2298_v39, -inf }
 0xc67   : > { %2304 = vmax.xlane.f32.xlu0 %v2303_v41  ;;  %v2651_v41 = vld [vmem:[%s4192_s8 + $0x18] sm:$0xff] }
 0xcee   : > { %v2308_v42 = vpop.xlane.xlu1 %2307 }
 0xcef   : > { %v2310_v43 = vsub.f32 %v2299_v37, %v2308_v42  ;;  %v2655_v37 = vld [vmem:[%s4192_s8 + $0x38] sm:$0xff]  ;;  %v2650_v42 = vld [vmem:[%s4192_s8 + $0x10] sm:$0xff] }
 0xcf0   : > { %v2305_v44 = vpop.xlane.xlu0 %2304  ;;  %3396 = vmatprep.subr.mxu1 %v2655_v37 }
 0xcf1   : > { %v2313_v45 = vmul.f32 1.442695, %v2310_v43  ;;  %v2309_v46 = vsub.f32 %v2298_v39, %v2305_v44  ;;  %v2653_v39 = vld [vmem:[%s4192_s8 + $0x28] sm:$0xff]  ;;  %v2648_v44 = vld [vmem:[%s4192_s8] sm:$0xff] }
 0xcf2   : > { %v2649_v43 = vld [vmem:[%s4192_s8 + $0x8] sm:$0xff] }
 0xcf3   : > { %3485 = vpow2.f32 %v2313_v45  ;;  %v2311_v47 = vmul.f32 1.442695, %v2309_v46  ;;  %v3028_v45 = vld [vmem:[%s4191_s7] ss:$0 sm:$0xff] }
 0xcf5   : > { %3487 = vpow2.f32 %v2311_v47 }
 0xd00   : > { %v3486_v48 = vpop.eup %3485 }
 0xd01   : > { %v2318_v49 = vsel %vm735_vm2, %v3486_v48, 0.0 }
 0xd02   : > { %v3488_v50 = vpop.eup %3487  ;;  %2319 = vadd.xlane.f32.xlu1 %v2318_v49 }
 0xd03   : > { %v2315_v51 = vsel %vm735_vm2, %v3488_v50, 0.0 }
 0xd04   : > { %2316 = vadd.xlane.f32.xlu0 %v2315_v51 }
 0xd8b   : > { %v2320_v55 = vpop.xlane.xlu1 %2319 }
 0xd8c   : > { %3489 = vrcp.f32 %v2320_v55 }
 0xd8d   : > { %v2317_v56 = vpop.xlane.xlu0 %2316 }
 0xd8e   : > { %3491 = vrcp.f32 %v2317_v56 }
 0xd99   : > { %v3490_v57 = vpop.eup %3489 }
 0xd9a   : > { %v2324_v60 = vmul.f32 %v3490_v57, %v3486_v48 }
 0xd9b   : > { %v3492_v58 = vpop.eup %3491 }
 0xd9c   : > { %v2322_v59 = vmul.f32 %v3492_v58, %v3488_v50 }
 0xd9e   : > { %3377 = vmatprep.mubr.msk.f32.mxu0 %vm735_vm2, %v2322_v59 }
 0xd9f   : > { %3378 = vmatmul.mubr.msk.f32.vlgmr.msra.gmra.mxu0 %vm735_vm2, %v2324_v60 }
 0xe5f   : > { %v3379_v61 = vpop.f32.mrf.mxu0 }
 0xe61   : > { %v2397_v62 = vpop.f32.mrf.mxu0 }
 0xe62   : > { %3382 = vmatprep.mubr.msk.f32.mxu1 %vm645_vm1, %v2397_v62 }
 0xe63   : > { %3383 = vmatmul.mubr.msk.f32.vlgmr.msra.gmra.mxu1 %vm645_vm1, %v3379_v61 }
 0xe64   : > { %3397 = vmatpush3.msra.mxu1 %v2655_v37 }
 0xe65   : > { %3398 = vmatprep.subr.mxu1 %v2654_v38 }
 0xe66   : > { %3399 = vmatpush3.msra.mxu1 %v2654_v38 }
 0xe67   : > { %3400 = vmatprep.subr.mxu1 %v2653_v39 }
 0xe68   : > { %3401 = vmatpush3.msra.mxu1 %v2653_v39 }
 0xe69   : > { %3402 = vmatprep.subr.mxu1 %v2652_v40 }
 0xe6a   : > { %3403 = vmatpush3.msra.mxu1 %v2652_v40 }
 0xe6b   : > { %3404 = vmatprep.subr.mxu1 %v2651_v41 }
 0xe6c   : > { %3405 = vmatpush3.msra.mxu1 %v2651_v41 }
 0xe6d   : > { %3406 = vmatprep.subr.mxu1 %v2650_v42 }
 0xe6e   : > { %3407 = vmatpush3.msra.mxu1 %v2650_v42 }
 0xe6f   : > { %3408 = vmatprep.subr.mxu1 %v2649_v43 }
 0xe70   : > { %3409 = vmatpush3.msra.mxu1 %v2649_v43 }
 0xe71   : > { %3410 = vmatprep.subr.mxu1 %v2648_v44 }
 0xe72   : > { %3411 = vmatpush3.msra.mxu1 %v2648_v44 }
 0xf23   : > { %v3384_v63 = vpop.f32.mrf.mxu1 }
 0xf24   : > { %v2490_v0 = vadd.f32 %v3384_v63, %v3980_v27 }
 0xf25   : > { %v2480_v1 = vpop.f32.mrf.mxu1 }
 0xf26   : > { %v2489_v2 = vadd.f32 %v2480_v1, %v3983_v29  ;;  %v2492_v3 = vadd.f32 %v2490_v0, %v3740_v9  ;;  %v4042_v29 = vld [vmem:[%s4188_s4] ss:$0 sm:$0xff] }
 0xf28   : > { %v2498_v4 = vsel %vm403_vm0, %v2492_v3, 0.0  ;;  %v2491_v5 = vadd.f32 %v2489_v2, %v3738_v8  ;;  %v2541_v8 = vld [vmem:[%s4190_s6 + $0x18] sm:$0xff] }
 0xf29   : > { %2499 = vadd.xlane.f32.xlu1 %v2498_v4  ;;  %3385 = vmatprep.subr.mxu0 %v2541_v8  ;;  %v3031_v4 = vld [vmem:[%s4193_s9] ss:$0 sm:$0xff] }
 0xf2a   : > { %v2495_v6 = vsel %vm403_vm0, %v2491_v5, 0.0  ;;  %3386 = vmatpush3.msra.mxu0 %v2541_v8 }
 0xf2b   : > { %2496 = vadd.xlane.f32.xlu0 %v2495_v6  ;;  %3387 = vmatprep.subr.mxu0 %v2540_v18 }
 0xf2c   : > { %3388 = vmatpush3.msra.mxu0 %v2540_v18 }
 0xf2d   : > { %3389 = vmatprep.subr.mxu0 %v2539_v19 }
 0xf2e   : > { %3390 = vmatpush3.msra.mxu0 %v2539_v19 }
 0xf2f   : > { %3391 = vmatprep.subr.mxu0 %v2538_v20 }
 0xf30   : > { %3392 = vmatpush3.msra.mxu0 %v2538_v20 }
 0xfb2   : > { %v2500_v7 = vpop.xlane.xlu1 %2499 }
 0xfb3   : > { %v2503_v10 = vmul.f32 0.03125, %v2500_v7 }
 0xfb4   : > { %v2497_v11 = vpop.xlane.xlu0 %2496 }
 0xfb5   : > { %v2505_v12 = vsub.f32 %v2492_v3, %v2503_v10  ;;  %v2502_v13 = vmul.f32 0.03125, %v2497_v11 }
 0xfb7   : > { %v2504_v14 = vsub.f32 %v2491_v5, %v2502_v13  ;;  %v2507_v15 = vmul.f32 %v2505_v12, %v2505_v12 }
 0xfb9   : > { %v2511_v16 = vsel %vm403_vm0, %v2507_v15, 0.0  ;;  %v2506_v17 = vmul.f32 %v2504_v14, %v2504_v14 }
 0xfba   : > { %2512 = vadd.xlane.f32.xlu1 %v2511_v16 }
 0xfbb   : > { %v2508_v9 = vsel %vm403_vm0, %v2506_v17, 0.0 }
 0xfbc   : > { %2509 = vadd.xlane.f32.xlu0 %v2508_v9 }
0x1043   : > { %v2513_v21 = vpop.xlane.xlu1 %2512 }
0x1044   : > { %v2515_v22 = vmul.f32 0.03125, %v2513_v21 }
0x1045   : > { %v2510_v23 = vpop.xlane.xlu0 %2509 }
0x1046   : > { %v2517_v24 = vadd.f32 1e-05, %v2515_v22  ;;  %v2514_v25 = vmul.f32 0.03125, %v2510_v23 }
0x1048   : > { %3493 = vrsqrt.f32 %v2517_v24  ;;  %v2516_v26 = vadd.f32 1e-05, %v2514_v25 }
0x104a   : > { %3495 = vrsqrt.f32 %v2516_v26 }
0x1055   : > { %v3494_v27 = vpop.eup %3493 }
0x1056   : > { %v2521_v28 = vmul.f32 %v3494_v27, %v2505_v12 }
0x1057   : > { %v3496_v30 = vpop.eup %3495 }
0x1058   : > { %v2520_v31 = vmul.f32 %v3496_v30, %v2504_v14  ;;  %v2529_v32 = vmul.f32 %v4042_v29, %v2521_v28 }
0x105a   : > { %v2528_v34 = vmul.f32 %v4042_v29, %v2520_v31  ;;  %v2537_v36 = vadd.f32 %v4048_v33, %v2529_v32 }
0x105c   : > { %v4052_v35 = vadd.f32 %v4048_v33, %v2528_v34 }
0x105e   : > { %3393 = vmatprep.mubr.msk.f32.mxu0 %vm403_vm0, %v4052_v35 }
0x105f   : > { %3394 = vmatmul.mubr.msk.f32.vlgmr.msra.gmra.mxu0 %vm403_vm0, %v2537_v36 }
0x111f   : > { %v3395_v46 = vpop.f32.mrf.mxu0 }
0x1120   : > { %v2627_v47 = vadd.f32 %v3395_v46, %v3028_v45 }
0x1121   : > { %v2621_v48 = vpop.f32.mrf.mxu0 }
0x1122   : > { %v2633_v49 = vmul.f32 0.044715, %v2627_v47  ;;  %v2622_v50 = vadd.f32 %v3028_v45, %v2621_v48  ;;  %v2631_v1 = vmul.f32 0.5, %v2627_v47 }
0x1124   : > { %v2635_v51 = vmul.f32 %v2633_v49, %v2627_v47  ;;  %v2632_v52 = vmul.f32 0.044715, %v2622_v50  ;;  %v2630_v63 = vmul.f32 0.5, %v2622_v50 }
0x1126   : > { %v2637_v53 = vmul.f32 %v2635_v51, %v2627_v47  ;;  %v2634_v54 = vmul.f32 %v2632_v52, %v2622_v50 }
0x1128   : > { %v2639_v55 = vadd.f32 %v2637_v53, %v2627_v47  ;;  %v2636_v56 = vmul.f32 %v2634_v54, %v2622_v50 }
0x112a   : > { %v2641_v57 = vmul.f32 0.7978846, %v2639_v55  ;;  %v2638_v58 = vadd.f32 %v2636_v56, %v2622_v50 }
0x112c   : > { %3497 = vtanh.f32 %v2641_v57  ;;  %v2640_v59 = vmul.f32 0.7978846, %v2638_v58 }
0x112e   : > { %3499 = vtanh.f32 %v2640_v59 }
0x1139   : > { %v3498_v60 = vpop.eup %3497 }
0x113a   : > { %v2645_v62 = vadd.f32 1.0, %v3498_v60 }
0x113b   : > { %v3500_v61 = vpop.eup %3499 }
0x113c   : > { %v2644_v0 = vadd.f32 1.0, %v3500_v61  ;;  %v2647_v3 = vmul.f32 %v2645_v62, %v2631_v1 }
0x113e   : > { %v2646_v2 = vmul.f32 %v2644_v0, %v2630_v63 }
0x1140   : > { %3412 = vmatprep.mubr.msk.f32.mxu1 %vm2663_vm3, %v2646_v2 }
0x1141   : > { %3413 = vmatmul.mubr.msk.f32.vlgmr.msra.gmra.mxu1 %vm2663_vm3, %v2647_v3 }
0x1201   : > { %v3414_v5 = vpop.f32.mrf.mxu1 }
0x1202   : > { %v2742_v6 = vadd.f32 %v3414_v5, %v3031_v4 }
0x1203   : > { %v2736_v7 = vpop.f32.mrf.mxu1 }
0x1204   : > { %v2737_v10 = vadd.f32 %v3031_v4, %v2736_v7  ;;  %v2746_v11 = vadd.f32 %v2742_v6, %v2537_v36 }
0x1206   : > { %v2750_v12 = vsel %vm403_vm0, %v2746_v11, 0.0  ;;  %v2745_v13 = vadd.f32 %v2737_v10, %v4052_v35 }
0x1207   : > { %2751 = vadd.xlane.f32.xlu1 %v2750_v12 }
0x1208   : > { %v2747_v14 = vsel %vm403_vm0, %v2745_v13, 0.0 }
0x1209   : > { %2748 = vadd.xlane.f32.xlu0 %v2747_v14 }
0x1290   : > { %v2752_v15 = vpop.xlane.xlu1 %2751 }
0x1291   : > { %v2754_v16 = vmul.f32 0.03125, %v2752_v15 }
0x1292   : > { %v2749_v17 = vpop.xlane.xlu0 %2748 }
0x1293   : > { %v2756_v9 = vsub.f32 %v2746_v11, %v2754_v16  ;;  %v2753_v8 = vmul.f32 0.03125, %v2749_v17 }
0x1295   : > { %v2755_v18 = vsub.f32 %v2745_v13, %v2753_v8  ;;  %v2758_v19 = vmul.f32 %v2756_v9, %v2756_v9 }
0x1297   : > { %v2762_v20 = vsel %vm403_vm0, %v2758_v19, 0.0  ;;  %v2757_v21 = vmul.f32 %v2755_v18, %v2755_v18 }
0x1298   : > { %2763 = vadd.xlane.f32.xlu1 %v2762_v20 }
0x1299   : > { %v2759_v22 = vsel %vm403_vm0, %v2757_v21, 0.0 }
0x129a   : > { %2760 = vadd.xlane.f32.xlu0 %v2759_v22 }
0x129b   : > { %3518 = shalt.err (!%p3515_p3)
}
0x129c   : > { %s3519_s30 = scalar_lea.hbm %s4097_s12, 1024  ;;  %s3523_s29 = scalar_lea.hbm %s4195_s11, 2048 }
0x129d   : > { %p3520_p4 = scmp.ne.s32.totalorder %s4097_s12, %s3519_s30  ;;  %p3524_p9 = scmp.lt.s32.totalorder %s4097_s12, %s4195_s11 }
0x129e   : > { %p3525_p10 = scmp.lt.s32.totalorder %s3523_s29, %s3519_s30 }
0x129f   : > { %p3521_p7 = pnand %p3520_p4, %p3699_p5 }
0x12a0   : > { %p3526_p11 = por %p3525_p10, %p3524_p9 }
0x12a1   : > { %p3522_p8 = pneg %p3521_p7 }
0x12a3   : > { %p3527_p12 = pnand %p3526_p11, %p3522_p8 }
0x12a5   : > { %3530 = shalt.err (!%p3527_p12)
}
0x12a6   : > { %s4196_s1 = smov 128   ;;  %s3599_s14 = smov 8  }
0x12a7   : > { %s4203_s16 = scalar_lea.sflag [#allocation5], %s3775_s25  ;;  %s2912_s13 = sshll.u32 %s3775_s25, 4 }
0x12a8   : > { %3416 = dma.vmem_to_hbm [thread:$0]  (%p3699_p5), %s4100_s0, 1024, %s4097_s12, %s4203_s16, %s4196_s1, %s4196_s1, %s3599_s14  }
0x12a9   : > { %s3043_s30 = sshll.u32 %s3682_s21, 8  ;;  %s383_s22 = scalar_lea.vmem [#allocation2], %s2912_s13 }
0x12aa   : > { %s2798_s12 = sshll.u32 %s383_s22, 4  ;;  %s4138_s29 = scalar_lea.hbm %s4194_s10, %s3043_s30  ;;  %s4140_s12 = int_to_ptr.vmem [resolvable:$true] %s2798_s12 }
0x12ab   : > { %s2780_s21 = scalar_lea.sflag [#allocation3], %s3775_s25  ;;  %s3531_s15 = scalar_lea.vmem %s4140_s12, 256 }
0x12ac   : > { %p3532_p13 = scmp.ne.s32.totalorder %s4140_s12, %s3531_s15  ;;  %s3600_s16 = smov [#allocation2]  }
0x12ad   : > { %s3535_s13 = sshll.u32 %s3600_s16, 4  ;;  %s3536_s13 = int_to_ptr.vmem [resolvable:$false] %s3535_s13 }
0x12ae   : > { %p3533_p0 = pnand %p3532_p13, %p3699_p5  ;;  %s3537_s1 = scalar_lea.vmem %s3536_s13, 512 }
0x12af   : > { %p3538_p2 = scmp.lt.s32.totalorder %s4140_s12, %s3536_s13  ;;  %p3539_p3 = scmp.lt.s32.totalorder %s3537_s1, %s3531_s15 }
0x12b0   : > { %p3534_p1 = pneg %p3533_p0 }
0x12b1   : > { %p3540_p4 = por %p3539_p3, %p3538_p2 }
0x12b3   : > { %p3541_p7 = pnand %p3540_p4, %p3534_p1 }
0x1321   : > { %v2764_v23 = vpop.xlane.xlu1 %2763 }
0x1322   : > { %v2766_v24 = vmul.f32 0.03125, %v2764_v23 }
0x1323   : > { %v2761_v25 = vpop.xlane.xlu0 %2760 }
0x1324   : > { %v2768_v26 = vadd.f32 1e-05, %v2766_v24  ;;  %v2765_v27 = vmul.f32 0.03125, %v2761_v25 }
0x1326   : > { %3501 = vrsqrt.f32 %v2768_v26  ;;  %v2767_v28 = vadd.f32 1e-05, %v2765_v27 }
0x1328   : > { %3503 = vrsqrt.f32 %v2767_v28 }
0x1333   : > { %v3502_v30 = vpop.eup %3501 }
0x1334   : > { %v2772_v31 = vmul.f32 %v3502_v30, %v2756_v9 }
0x1335   : > { %v3504_v32 = vpop.eup %3503 }
0x1336   : > { %v2774_v34 = vmul.f32 %v4042_v29, %v2772_v31  ;;  %v2771_v35 = vmul.f32 %v3504_v32, %v2755_v18 }
0x1338   : > { %v2773_v36 = vmul.f32 %v4042_v29, %v2771_v35  ;;  %v2776_v37 = vadd.f32 %v4048_v33, %v2774_v34 }
0x133a   : > { %v2775_v38 = vadd.f32 %v4048_v33, %v2773_v36  ;;  %2778 = vst.msk [vmem:[%s383_s22 + $0x8] sm:$0xff] %vm403_vm0, %v2776_v37 }
0x133c   : > { %2777 = vst.msk [vmem:[%s383_s22] sm:$0xff] %vm403_vm0, %v2775_v38 }
0x133d   : > { %3544 = shalt.err (!%p3541_p7)
}
0x133e   : > { %s3545_s30 = scalar_lea.hbm %s4138_s29, 256  ;;  %s3549_s0 = scalar_lea.hbm %s4194_s10, 512 }
0x133f   : > { %p3546_p8 = scmp.ne.s32.totalorder %s4138_s29, %s3545_s30  ;;  %p3550_p11 = scmp.lt.s32.totalorder %s4138_s29, %s4194_s10 }
0x1340   : > { %p3551_p12 = scmp.lt.s32.totalorder %s3549_s0, %s3545_s30 }
0x1341   : > { %p3547_p9 = pnand %p3546_p8, %p3699_p5 }
0x1342   : > { %p3552_p13 = por %p3551_p12, %p3550_p11 }
0x1343   : > { %p3548_p10 = pneg %p3547_p9 }
0x1345   : > { %p3553_p0 = pnand %p3552_p13, %p3548_p10 }
0x1347   : > { %3556 = shalt.err (!%p3553_p0)
}
0x1348   : > { %s4204_s1 = smov 128  }
0x1349   : > { %3415 = dma.vmem_to_hbm [thread:$0]  (%p3699_p5), %s4140_s12, 256, %s4138_s29, %s2780_s21, %s4204_s1, %s4204_s1, %s3599_s14  }
0x134a PF: > { %p3426_p1 = scmp.ge.s32.totalorder %s3595_s20, 2  ;;  %s2829_s15 = sand.u32 1, %s3583_s17  }
0x134b   : > { %s2830_s13 = scalar_lea.sflag [#allocation3], %s2829_s15 }
0x134c   : > { %p3420_p2 = pnand %p3426_p1, %p3703_p6 }
0x134e   : > { %p3421_p3 = pneg %p3420_p2 }
0x1350   : > { %3574 = dma.done.wait (%p3421_p3), %s2830_s13, 256  }
0x1351   : > { %3576 = vsyncadd (%p3421_p3), %s2830_s13, 4294967040  ;;  %s2839_s30 = scalar_lea.sflag [#allocation5], %s2829_s15 }
0x1352   : > { %3578 = dma.done.wait (%p3421_p3), %s2839_s30, 1024  }
0x1353   : > { %3580 = vsyncadd (%p3421_p3), %s2839_s30, 4294966272  ;;  %p25_p5 = scmp.ge.s32.totalorder %s3686_s23, 4   ;;  %s4205_s17 = smov %s3587_s18 }
0x1354   : > { %s4206_s18 = smov %s3591_s19  ;;  %s4207_s19 = smov %s3697_s26 }
0x1355   : > { %s4208_s20 = smov %s3686_s23  ;;  %27 = sbr.rel (!%p25_p5) target bundleno = 8 (0x8), region = 129 }
0x135a   :  { %2844 = vsyncpa [#allocation3], 1 }
0x135b   :  { %2846 = vsyncpa [#allocation3 + $0x1], 1 }
0x135c   :  { %2847 = vsyncpa [#allocation5], 1 }
0x135d   :  { %2849 = vsyncpa [#allocation5 + $0x1], 1 }

// kernel: _lambda_.6
= control target key start
LH: loop header
LB: loop body
LE: loop exit
PB: predicated region body
PF: predicated region fallthrough
CT: control target
= control target key end

     0   :  { %s3925_s29 = smov 0   ;;  %s4356_s0 = inlined_call_operand.vmem [shape: f32[2,16,32], index: 0, kind: input, shape index: {}]   ;;  %s4357_s1 = inlined_call_operand.vmem [shape: f32[2,16,32], index: 1, kind: input, shape index: {}]   ;;  %s4358_s2 = inlined_call_operand.vmem [shape: f32[2,16,32], index: 2, kind: input, shape index: {}]   ;;  %s4359_s3 = inlined_call_operand.vmem [shape: f32[96,32], index: 3, kind: input, shape index: {}]   ;;  %s4360_s4 = inlined_call_operand.vmem [shape: f32[1,32], index: 4, kind: input, shape index: {}]   ;;  %s4361_s5 = inlined_call_operand.vmem [shape: f32[12,32,8], index: 5, kind: input, shape index: {}]   ;;  %s4362_s6 = inlined_call_operand.vmem [shape: f32[4,8,32], index: 6, kind: input, shape index: {}]   ;;  %s4363_s7 = inlined_call_operand.vmem [shape: f32[1,32], index: 7, kind: input, shape index: {}]   ;;  %s4364_s8 = inlined_call_operand.vmem [shape: f32[1,32], index: 8, kind: input, shape index: {}]   ;;  %s4365_s9 = inlined_call_operand.vmem [shape: f32[1,32], index: 9, kind: input, shape index: {}]   ;;  %s4366_s10 = inlined_call_operand.vmem [shape: f32[32,64], index: 10, kind: input, shape index: {}]   ;;  %s4367_s11 = inlined_call_operand.vmem [shape: f32[1,64], index: 11, kind: input, shape index: {}]   ;;  %s4368_s12 = inlined_call_operand.vmem [shape: f32[64,32], index: 12, kind: input, shape index: {}]   ;;  %s4369_s13 = inlined_call_operand.vmem [shape: f32[1,32], index: 13, kind: input, shape index: {}]   ;;  %s4370_s14 = inlined_call_operand.vmem [shape: f32[2,16,32], index: 14, kind: output, shape index: {}]  }
   0x1 LB: > { %s3231_s30 = sadd.s32 4294967295, %s3848_s29   ;;  %p3235_p0 = scmp.ge.s32.totalorder %s3848_s29, 1  ;;  %s3848_s29 = sphi %s3925_s29, %s24_s29  }
   0x2   : > { %p432_p1 = scmp.lt.s32.totalorder %s3848_s29, 3 }
   0x4   : > { %p433_p2 = pnand %p3235_p0, %p432_p1 }
   0x5   : > { %p488_p3 = scmp.lt.s32.totalorder (!%p433_p2), %s3231_s30, 1 }
   0x6   : > { %436 = sbr.rel (%p433_p2) target bundleno = 5124 (0x1404), region = 76 }
   0xb   : > { %v514_v0 = vld [vmem:[%s4359_s3 + $0x18] sm:$0xff]  ;;  %v513_v1 = vld [vmem:[%s4359_s3 + $0x10] sm:$0xff]  ;;  %v512_v4 = vld [vmem:[%s4359_s3 + $0x8] sm:$0xff]  ;;  %s4372_s30 = smov (!%p488_p3, %s3231_s30), 1  ;;  %vm515_vm0 = vcmask 261120   ;;  %vm1029_vm1 = vcmask 64512  }
   0xc   : > { %v610_v2 = vld [vmem:[%s4359_s3 + $0x38] sm:$0xff]  ;;  %3519 = vmatprep.subr.mxu0 %v514_v0  ;;  %v609_v3 = vld [vmem:[%s4359_s3 + $0x30] sm:$0xff]  ;;  %v608_v5 = vld [vmem:[%s4359_s3 + $0x28] sm:$0xff]  ;;  %s3954_s15 = sshll.u32 %s4372_s30, 4  ;;  %vm1119_vm2 = vcmask 130048   ;;  %vm3036_vm3 = vcmask 523264  }
   0xd   : > { %3530 = vmatprep.subr.mxu1 %v610_v2  ;;  %3520 = vmatpush3.msra.mxu0 %v514_v0  ;;  %v511_v6 = vld [vmem:[%s4359_s3] sm:$0xff]  ;;  %s492_s18 = scalar_lea.vmem %s4356_s0, %s3954_s15  ;;  %v699_v10 = vld [vmem:[%s4359_s3 + $0x58] sm:$0xff]  ;;  %s497_s24 = scalar_lea.vmem %s4357_s1, %s3954_s15  ;;  %v698_v13 = vld [vmem:[%s4359_s3 + $0x50] sm:$0xff] }
   0xe   : > { %3531 = vmatpush3.msra.mxu1 %v610_v2  ;;  %3521 = vmatprep.subr.mxu0 %v513_v1  ;;  %v607_v7 = vld [vmem:[%s4359_s3 + $0x20] sm:$0xff]  ;;  %v510_v9 = vld [vmem:[%s492_s18 + $0x8] sm:$0xff]  ;;  %s502_s27 = scalar_lea.vmem %s4358_s2, %s3954_s15  ;;  %v787_v18 = vld [vmem:[%s4361_s5 + $0x18] sm:$0xff]  ;;  %s507_s22 = scalar_lea.vmem %s4370_s14, %s3954_s15 }
   0xf   : > { %3532 = vmatprep.subr.mxu1 %v609_v3  ;;  %3522 = vmatpush3.msra.mxu0 %v513_v1  ;;  %v509_v8 = vld [vmem:[%s492_s18] sm:$0xff]  ;;  %v606_v12 = vld [vmem:[%s497_s24 + $0x8] sm:$0xff]  ;;  %v3256_v19 = vld [vmem:[%s4361_s5 + $0x98] sm:$0xff] }
  0x10   : > { %3533 = vmatpush3.msra.mxu1 %v609_v3  ;;  %3523 = vmatprep.subr.mxu0 %v512_v4  ;;  %v605_v11 = vld [vmem:[%s497_s24] sm:$0xff]  ;;  %v697_v15 = vld [vmem:[%s4359_s3 + $0x48] sm:$0xff]  ;;  %v786_v20 = vld [vmem:[%s4361_s5 + $0x10] sm:$0xff] }
  0x11   : > { %3534 = vmatprep.subr.mxu1 %v608_v5  ;;  %3524 = vmatpush3.msra.mxu0 %v512_v4  ;;  %v694_v14 = vld [vmem:[%s502_s27] sm:$0xff]  ;;  %v695_v17 = vld [vmem:[%s502_s27 + $0x8] sm:$0xff]  ;;  %v3255_v21 = vld [vmem:[%s4361_s5 + $0x90] sm:$0xff] }
  0x12   : > { %3535 = vmatpush3.msra.mxu1 %v608_v5  ;;  %3525 = vmatprep.subr.mxu0 %v511_v6  ;;  %v696_v16 = vld [vmem:[%s4359_s3 + $0x40] sm:$0xff]  ;;  %v785_v22 = vld [vmem:[%s4361_s5 + $0x8] sm:$0xff]  ;;  %v3262_v26 = vld [vmem:[%s4361_s5 + $0x118] sm:$0xff] }
  0x13   : > { %3527 = vmatprep.mubr.msk.f32.mxu0 %vm515_vm0, %v509_v8  ;;  %3526 = vmatpush3.msra.mxu0 %v511_v6  ;;  %v3254_v23 = vld [vmem:[%s4361_s5 + $0x88] sm:$0xff]  ;;  %v784_v24 = vld [vmem:[%s4361_s5] sm:$0xff]  ;;  %v3261_v40 = vld [vmem:[%s4361_s5 + $0x110] sm:$0xff] }
  0x14   : > { %3536 = vmatprep.subr.mxu1 %v607_v7  ;;  %3528 = vmatmul.mubr.msk.f32.vlgmr.msra.gmra.mxu0 %vm515_vm0, %v510_v9  ;;  %v3253_v25 = vld [vmem:[%s4361_s5 + $0x80] sm:$0xff]  ;;  %v3260_v41 = vld [vmem:[%s4361_s5 + $0x108] sm:$0xff]  ;;  %v3277_v1 = vld [vmem:[%s4361_s5 + $0x38] sm:$0xff] }
  0x15   : > { %3541 = vmatprep.subr.mxu0 %v699_v10  ;;  %3537 = vmatpush3.msra.mxu1 %v607_v7  ;;  %v3246_v28 = vld [vmem:[%s4360_s4] ss:$0 sm:$0xff]  ;;  %v3276_v9 = vld [vmem:[%s4361_s5 + $0x30] sm:$0xff] }
  0x16   : > { %3538 = vmatprep.mubr.msk.f32.mxu1 %vm515_vm0, %v605_v11  ;;  %3542 = vmatpush3.msra.mxu0 %v699_v10  ;;  %v3259_v42 = vld [vmem:[%s4361_s5 + $0x100] sm:$0xff]  ;;  %v3275_v10 = vld [vmem:[%s4361_s5 + $0x28] sm:$0xff] }
  0x17   : > { %3539 = vmatmul.mubr.msk.f32.vlgmr.msra.gmra.mxu1 %vm515_vm0, %v606_v12  ;;  %3543 = vmatprep.subr.mxu0 %v698_v13  ;;  %v1223_v2 = vld [vmem:[%s4362_s6] sm:$0xff]  ;;  %v3289_v12 = vld [vmem:[%s4361_s5 + $0x138] sm:$0xff] }
  0x18   : > { %3549 = vmatprep.mubr.msk.f32.mxu0 %vm515_vm0, %v694_v14  ;;  %3544 = vmatpush3.msra.mxu0 %v698_v13  ;;  %v3274_v11 = vld [vmem:[%s4361_s5 + $0x20] sm:$0xff]  ;;  %v3288_v13 = vld [vmem:[%s4361_s5 + $0x130] sm:$0xff]  ;;  %v3287_v14 = vld [vmem:[%s4361_s5 + $0x128] sm:$0xff] }
  0x19   : > { %3545 = vmatprep.subr.mxu0 %v697_v15  ;;  %3552 = vmatprep.subr.mxu1 %v787_v18 }
  0x1a   : > { %3546 = vmatpush3.msra.mxu0 %v697_v15  ;;  %3553 = vmatpush3.msra.mxu1 %v787_v18  ;;  %v3286_v15 = vld [vmem:[%s4361_s5 + $0x120] sm:$0xff] }
  0x1b   : > { %3547 = vmatprep.subr.mxu0 %v696_v16  ;;  %3554 = vmatprep.subr.mxu1 %v786_v20 }
  0x1c   : > { %3548 = vmatpush3.msra.mxu0 %v696_v16  ;;  %3555 = vmatpush3.msra.mxu1 %v786_v20  ;;  %v3283_v16 = vld [vmem:[%s4361_s5 + $0xb8] sm:$0xff]  ;;  %v3281_v20 = vld [vmem:[%s4361_s5 + $0xa8] sm:$0xff] }
  0x1d   : > { %3550 = vmatmul.mubr.msk.f32.vlgmr.msra.gmra.mxu0 %vm515_vm0, %v695_v17  ;;  %3563 = vmatprep.subr.mxu0 %v3256_v19 }
  0x1e   : > { %3564 = vmatpush3.msra.mxu0 %v3256_v19  ;;  %3556 = vmatprep.subr.mxu1 %v785_v22  ;;  %v3282_v19 = vld [vmem:[%s4361_s5 + $0xb0] sm:$0xff] }
  0x1f   : > { %3565 = vmatprep.subr.mxu0 %v3255_v21  ;;  %3557 = vmatpush3.msra.mxu1 %v785_v22 }
  0x20   : > { %3566 = vmatpush3.msra.mxu0 %v3255_v21  ;;  %3558 = vmatprep.subr.mxu1 %v784_v24  ;;  %v3280_v21 = vld [vmem:[%s4361_s5 + $0xa0] sm:$0xff] }
  0x21   : > { %3567 = vmatprep.subr.mxu0 %v3254_v23  ;;  %3559 = vmatpush3.msra.mxu1 %v784_v24 }
  0x22   : > { %3568 = vmatpush3.msra.mxu0 %v3254_v23  ;;  %3574 = vmatprep.subr.mxu1 %v3262_v26 }
  0x23   : > { %3569 = vmatprep.subr.mxu0 %v3253_v25 }
  0x24   : > { %3570 = vmatpush3.msra.mxu0 %v3253_v25 }
  0xd4   : > { %v3529_v27 = vpop.f32.mrf.mxu0 }
  0xd5   : > { %v604_v32 = vadd.f32 %v3529_v27, %v3246_v28 }
  0xd6   : > { %v588_v29 = vpop.f32.mrf.mxu0 }
  0xd7   : > { %v3540_v30 = vpop.f32.mrf.mxu1  ;;  %v603_v31 = vadd.f32 %v3246_v28, %v588_v29 }
  0xd8   : > { %v693_v36 = vadd.f32 %v3540_v30, %v604_v32 }
  0xd9   : > { %v683_v33 = vpop.f32.mrf.mxu1 }
  0xda   : > { %v692_v35 = vadd.f32 %v683_v33, %v603_v31 }
  0xdd   : > { %v3551_v34 = vpop.f32.mrf.mxu0 }
  0xde   : > { %v4021_v39 = vadd.f32 %v3551_v34, %v693_v36 }
  0xdf   : > { %v772_v37 = vpop.f32.mrf.mxu0 }
  0xe0   : > { %v4019_v38 = vadd.f32 %v772_v37, %v692_v35 }
  0xe2   : > { %3560 = vmatprep.mubr.msk.f32.mxu1 %vm515_vm0, %v4019_v38  ;;  %3571 = vmatprep.mubr.msk.f32.mxu0 %vm515_vm0, %v4019_v38 }
  0xe3   : > { %3561 = vmatmul.mubr.msk.f32.vlgmr.msra.gmra.mxu1 %vm515_vm0, %v4021_v39  ;;  %3572 = vmatmul.mubr.msk.f32.vlgmr.msra.gmra.mxu0 %vm515_vm0, %v4021_v39 }
  0xe4   : > { %3575 = vmatpush3.msra.mxu1 %v3262_v26  ;;  %3582 = vmatprep.mubr.msk.f32.mxu1 %vm515_vm0, %v4019_v38 }
  0xe5   : > { %3576 = vmatprep.subr.mxu1 %v3261_v40 }
  0xe6   : > { %3577 = vmatpush3.msra.mxu1 %v3261_v40 }
  0xe7   : > { %3578 = vmatprep.subr.mxu1 %v3260_v41 }
  0xe8   : > { %3579 = vmatpush3.msra.mxu1 %v3260_v41 }
  0xe9   : > { %3580 = vmatprep.subr.mxu1 %v3259_v42 }
  0xea   : > { %3581 = vmatpush3.msra.mxu1 %v3259_v42 }
  0xeb   : > { %3583 = vmatmul.mubr.msk.f32.vlgmr.msra.gmra.mxu1 %vm515_vm0, %v4021_v39  ;;  %3599 = vmatprep.subr.mxu1 %v1223_v2 }
  0xec   : > { %3600 = vmatpush3.msra.mxu1 %v1223_v2  ;;  %v3309_v2 = vld [vmem:[%s4361_s5 + $0xd0] sm:$0xff] }
  0xed   : > { %3615 = vmatprep.subr.mxu1 %v3283_v16 }
 0x1a3   : > { %v3562_v43 = vpop.f32.mrf.mxu1  ;;  %v3573_v44 = vpop.f32.mrf.mxu0 }
 0x1a4   : > { %3585 = vmatprep.subr.msk.mxu0 %vm1029_vm1, %v3573_v44 }
 0x1a5   : > { %v860_v45 = vpop.f32.mrf.mxu1  ;;  %v940_v46 = vpop.f32.mrf.mxu0  ;;  %3586 = vmatpush3.xpose.msk.msra.mxu0 %vm1029_vm1, %v3573_v44 }
 0x1a6   : > { %3587 = vmatprep.subr.msk.mxu0 %vm1029_vm1, %v940_v46  ;;  %3589 = vmatprep.mubr.msk.f32.mxu0 %vm1029_vm1, %v860_v45 }
 0x1a9   : > { %3588 = vmatpush3.xpose.msk.msra.mxu0 %vm1029_vm1, %v940_v46 }
 0x1ab   : > { %v3584_v47 = vpop.f32.mrf.mxu1 }
 0x1ac   : > { %3592 = vmatprep.subr.mxu0 %v3584_v47  ;;  %3590 = vmatmul.mubr.msk.f32.vlgmr.msra.gmra.mxu0 %vm1029_vm1, %v3562_v43 }
 0x1ad   : > { %v1020_v48 = vpop.f32.mrf.mxu1  ;;  %3593 = vmatpush3.msra.mxu0 %v3584_v47 }
 0x1ae   : > { %3594 = vmatprep.subr.mxu0 %v1020_v48 }
 0x1af   : > { %3595 = vmatpush3.msra.mxu0 %v1020_v48  ;;  %v3304_v48 = vld [vmem:[%s4361_s5 + $0x58] sm:$0xff] }
 0x1b0   : > { %3604 = vmatprep.subr.mxu0 %v3277_v1 }
 0x26c   : > { %v3591_v49 = vpop.f32.mrf.mxu0 }
 0x26d   : > { %v1118_v52 = vmul.f32 0.35355338, %v3591_v49  ;;  %v3298_v49 = vld [vmem:[%s4362_s6 + $0x8] sm:$0xff] }
 0x26e   : > { %v1108_v50 = vpop.f32.mrf.mxu0 }
 0x26f   : > { %v1117_v51 = vmul.f32 0.35355338, %v1108_v50  ;;  %v1123_v54 = vsel %vm1119_vm2, %v1118_v52, -inf }
 0x271   : > { %v1120_v53 = vsel %vm1119_vm2, %v1117_v51, -inf }
 0x272   : > { %1121 = vmax.xlane.f32.xlu0 %v1120_v53 }
 0x276   : > { %1124 = vmax.xlane.f32.xlu0 %v1123_v54 }
 0x2fb   : > { %v1122_v55 = vpop.xlane.xlu0 %1121 }
 0x2fc   : > { %v1126_v56 = vsub.f32 %v1117_v51, %v1122_v55 }
 0x2fe   : > { %v1128_v57 = vmul.f32 1.442695, %v1126_v56  ;;  %v3303_v56 = vld [vmem:[%s4361_s5 + $0x50] sm:$0xff] }
 0x2ff   : > { %v1125_v58 = vpop.xlane.xlu0 %1124 }
 0x300   : > { %3798 = vpow2.f32 %v1128_v57  ;;  %v1127_v59 = vsub.f32 %v1118_v52, %v1125_v58  ;;  %v3302_v57 = vld [vmem:[%s4361_s5 + $0x48] sm:$0xff]  ;;  %v3301_v58 = vld [vmem:[%s4361_s5 + $0x40] sm:$0xff] }
 0x302   : > { %v1130_v60 = vmul.f32 1.442695, %v1127_v59  ;;  %v3316_v59 = vld [vmem:[%s4361_s5 + $0x158] sm:$0xff] }
 0x304   : > { %3800 = vpow2.f32 %v1130_v60  ;;  %v3315_v60 = vld [vmem:[%s4361_s5 + $0x150] sm:$0xff] }
 0x30d   : > { %v3799_v61 = vpop.eup %3798 }
 0x30e   : > { %v1132_v62 = vsel %vm1119_vm2, %v3799_v61, 0.0 }
 0x30f   : > { %1133 = vadd.xlane.f32.xlu1 %v1132_v62  ;;  %v3313_v62 = vld [vmem:[%s4361_s5 + $0x140] sm:$0xff] }
 0x311   : > { %v3801_v63 = vpop.eup %3800 }
 0x312   : > { %v1135_v0 = vsel %vm1119_vm2, %v3801_v63, 0.0 }
 0x313   : > { %1136 = vadd.xlane.f32.xlu1 %v1135_v0 }
 0x398   : > { %v1134_v3 = vpop.xlane.xlu1 %1133 }
 0x399   : > { %3802 = vrcp.f32 %v1134_v3  ;;  %v3308_v3 = vld [vmem:[%s4361_s5 + $0xc8] sm:$0xff] }
 0x39c   : > { %v1137_v4 = vpop.xlane.xlu1 %1136 }
 0x39d   : > { %3804 = vrcp.f32 %v1137_v4  ;;  %v3307_v4 = vld [vmem:[%s4361_s5 + $0xc0] sm:$0xff] }
 0x3a6   : > { %v3803_v5 = vpop.eup %3802 }
 0x3a7   : > { %v1139_v6 = vmul.f32 %v3803_v5, %v3799_v61  ;;  %v3314_v61 = vld [vmem:[%s4361_s5 + $0x148] sm:$0xff] }
 0x3a9   : > { %3596 = vmatprep.mubr.msk.f32.mxu0 %vm1119_vm2, %v1139_v6 }
 0x3aa   : > { %v3805_v7 = vpop.eup %3804 }
 0x3ab   : > { %v1141_v8 = vmul.f32 %v3805_v7, %v3801_v63  ;;  %v3310_v63 = vld [vmem:[%s4361_s5 + $0xd8] sm:$0xff] }
 0x3ad   : > { %3597 = vmatmul.mubr.msk.f32.vlgmr.msra.gmra.mxu0 %vm1119_vm2, %v1141_v8 }
 0x3ae   : > { %3605 = vmatpush3.msra.mxu0 %v3277_v1  ;;  %3612 = vmatprep.mubr.msk.f32.mxu0 %vm515_vm0, %v4019_v38 }
 0x3af   : > { %3606 = vmatprep.subr.mxu0 %v3276_v9 }
 0x3b0   : > { %3607 = vmatpush3.msra.mxu0 %v3276_v9  ;;  %v3273_v9 = vld [vmem:[%s4363_s7] ss:$0 sm:$0xff] }
 0x3b1   : > { %3608 = vmatprep.subr.mxu0 %v3275_v10 }
 0x3b2   : > { %3609 = vmatpush3.msra.mxu0 %v3275_v10 }
 0x3b3   : > { %3610 = vmatprep.subr.mxu0 %v3274_v11 }
 0x3b4   : > { %3611 = vmatpush3.msra.mxu0 %v3274_v11 }
 0x3b5   : > { %3613 = vmatmul.mubr.msk.f32.vlgmr.msra.gmra.mxu0 %vm515_vm0, %v4021_v39  ;;  %3626 = vmatprep.subr.mxu0 %v3289_v12 }
 0x3b6   : > { %3627 = vmatpush3.msra.mxu0 %v3289_v12  ;;  %3634 = vmatprep.mubr.msk.f32.mxu0 %vm515_vm0, %v4019_v38 }
 0x3b7   : > { %3628 = vmatprep.subr.mxu0 %v3288_v13 }
 0x3b8   : > { %3629 = vmatpush3.msra.mxu0 %v3288_v13 }
 0x3b9   : > { %3630 = vmatprep.subr.mxu0 %v3287_v14 }
 0x3ba   : > { %3631 = vmatpush3.msra.mxu0 %v3287_v14 }
 0x3bb   : > { %3632 = vmatprep.subr.mxu0 %v3286_v15 }
 0x3bc   : > { %3633 = vmatpush3.msra.mxu0 %v3286_v15 }
 0x3bd   : > { %3635 = vmatmul.mubr.msk.f32.vlgmr.msra.gmra.mxu0 %vm515_vm0, %v4021_v39 }
 0x46d   : > { %v3598_v17 = vpop.f32.mrf.mxu0 }
 0x46f   : > { %v1214_v18 = vpop.f32.mrf.mxu0 }
 0x470   : > { %3601 = vmatprep.mubr.msk.f32.mxu1 %vm1029_vm1, %v1214_v18 }
 0x471   : > { %3602 = vmatmul.mubr.msk.f32.vlgmr.msra.gmra.mxu1 %vm1029_vm1, %v3598_v17 }
 0x472   : > { %3616 = vmatpush3.msra.mxu1 %v3283_v16  ;;  %3623 = vmatprep.mubr.msk.f32.mxu1 %vm515_vm0, %v4019_v38 }
 0x473   : > { %3617 = vmatprep.subr.mxu1 %v3282_v19 }
 0x474   : > { %3618 = vmatpush3.msra.mxu1 %v3282_v19 }
 0x475   : > { %v3614_v22 = vpop.f32.mrf.mxu0  ;;  %3619 = vmatprep.subr.mxu1 %v3281_v20 }
 0x476   : > { %3620 = vmatpush3.msra.mxu1 %v3281_v20 }
 0x477   : > { %3621 = vmatprep.subr.mxu1 %v3280_v21  ;;  %v1384_v23 = vpop.f32.mrf.mxu0 }
 0x478   : > { %3622 = vmatpush3.msra.mxu1 %v3280_v21 }
 0x479   : > { %3624 = vmatmul.mubr.msk.f32.vlgmr.msra.gmra.mxu1 %vm515_vm0, %v4021_v39 }
 0x47a   : > { %3641 = vmatprep.mubr.msk.f32.mxu1 %vm1029_vm1, %v1384_v23 }
 0x47d   : > { %v3636_v24 = vpop.f32.mrf.mxu0 }
 0x47e   : > { %3644 = vmatprep.subr.mxu0 %v3636_v24 }
 0x47f   : > { %v1544_v25 = vpop.f32.mrf.mxu0  ;;  %3645 = vmatpush3.msra.mxu0 %v3636_v24 }
 0x480   : > { %3646 = vmatprep.subr.mxu0 %v1544_v25 }
 0x481   : > { %3647 = vmatpush3.msra.mxu0 %v1544_v25 }
 0x482   : > { %3656 = vmatprep.subr.mxu0 %v3304_v48 }
 0x531   : > { %v4110_v26 = vpop.f32.mrf.mxu1 }
 0x532   : > { %v1312_v10 = vadd.f32 %v4110_v26, %v3273_v9 }
 0x533   : > { %v4112_v27 = vpop.f32.mrf.mxu1 }
 0x534   : > { %v1311_v12 = vadd.f32 %v3273_v9, %v4112_v27 }
 0x539   : > { %v3625_v28 = vpop.f32.mrf.mxu1 }
 0x53a   : > { %3637 = vmatprep.subr.msk.mxu1 %vm1029_vm1, %v3625_v28 }
 0x53b   : > { %v1464_v29 = vpop.f32.mrf.mxu1  ;;  %3638 = vmatpush3.xpose.msk.msra.mxu1 %vm1029_vm1, %v3625_v28 }
 0x53c   : > { %3639 = vmatprep.subr.msk.mxu1 %vm1029_vm1, %v1464_v29 }
 0x53f   : > { %3640 = vmatpush3.xpose.msk.msra.mxu1 %vm1029_vm1, %v1464_v29 }
 0x540   : > { %3651 = vmatprep.subr.mxu1 %v3298_v49 }
 0x542   : > { %3642 = vmatmul.mubr.msk.f32.vlgmr.msra.gmra.mxu1 %vm1029_vm1, %v3614_v22 }
 0x543   : > { %3652 = vmatpush3.msra.mxu1 %v3298_v49  ;;  %v3341_v49 = vld [vmem:[%s4361_s5 + $0x168] sm:$0xff] }
 0x544   : > { %3667 = vmatprep.subr.mxu1 %v3310_v63 }
 0x602   : > { %v3643_v30 = vpop.f32.mrf.mxu1 }
 0x603   : > { %v1641_v31 = vmul.f32 0.35355338, %v3643_v30 }
 0x604   : > { %v1631_v32 = vpop.f32.mrf.mxu1 }
 0x605   : > { %v1640_v33 = vmul.f32 0.35355338, %v1631_v32  ;;  %v1645_v34 = vsel %vm1119_vm2, %v1641_v31, -inf }
 0x606   : > { %1646 = vmax.xlane.f32.xlu1 %v1645_v34  ;;  %v3331_v34 = vld [vmem:[%s4361_s5 + $0x78] sm:$0xff] }
 0x607   : > { %v1642_v35 = vsel %vm1119_vm2, %v1640_v33, -inf }
 0x608   : > { %1643 = vmax.xlane.f32.xlu0 %v1642_v35  ;;  %v3325_v35 = vld [vmem:[%s4362_s6 + $0x10] sm:$0xff] }
 0x68f   : > { %v1647_v36 = vpop.xlane.xlu1 %1646 }
 0x690   : > { %v1649_v37 = vsub.f32 %v1641_v31, %v1647_v36 }
 0x691   : > { %v1644_v40 = vpop.xlane.xlu0 %1643 }
 0x692   : > { %v1652_v41 = vmul.f32 1.442695, %v1649_v37  ;;  %v1648_v42 = vsub.f32 %v1640_v33, %v1644_v40 }
 0x694   : > { %3806 = vpow2.f32 %v1652_v41  ;;  %v1650_v43 = vmul.f32 1.442695, %v1648_v42 }
 0x696   : > { %3808 = vpow2.f32 %v1650_v43 }
 0x6a1   : > { %v3807_v44 = vpop.eup %3806 }
 0x6a2   : > { %v1657_v45 = vsel %vm1119_vm2, %v3807_v44, 0.0 }
 0x6a3   : > { %v3809_v46 = vpop.eup %3808  ;;  %1658 = vadd.xlane.f32.xlu1 %v1657_v45  ;;  %v3329_v45 = vld [vmem:[%s4361_s5 + $0x68] sm:$0xff] }
 0x6a4   : > { %v1654_v47 = vsel %vm1119_vm2, %v3809_v46, 0.0 }
 0x6a5   : > { %1655 = vadd.xlane.f32.xlu0 %v1654_v47  ;;  %v3343_v47 = vld [vmem:[%s4361_s5 + $0x178] sm:$0xff] }
 0x72c   : > { %v1659_v50 = vpop.xlane.xlu1 %1658 }
 0x72d   : > { %3810 = vrcp.f32 %v1659_v50  ;;  %v3340_v50 = vld [vmem:[%s4361_s5 + $0x160] sm:$0xff] }
 0x72e   : > { %v1656_v51 = vpop.xlane.xlu0 %1655 }
 0x72f   : > { %3812 = vrcp.f32 %v1656_v51  ;;  %v3337_v51 = vld [vmem:[%s4361_s5 + $0xf8] sm:$0xff] }
 0x73a   : > { %v3811_v52 = vpop.eup %3810 }
 0x73b   : > { %v1663_v55 = vmul.f32 %v3811_v52, %v3807_v44  ;;  %v3330_v44 = vld [vmem:[%s4361_s5 + $0x70] sm:$0xff] }
 0x73c   : > { %v3813_v53 = vpop.eup %3812 }
 0x73d   : > { %v1661_v54 = vmul.f32 %v3813_v53, %v3809_v46  ;;  %v3328_v46 = vld [vmem:[%s4361_s5 + $0x60] sm:$0xff] }
 0x73f   : > { %3648 = vmatprep.mubr.msk.f32.mxu0 %vm1119_vm2, %v1661_v54  ;;  %v3336_v54 = vld [vmem:[%s4361_s5 + $0xf0] sm:$0xff] }
 0x740   : > { %3649 = vmatmul.mubr.msk.f32.vlgmr.msra.gmra.mxu0 %vm1119_vm2, %v1663_v55  ;;  %v3335_v55 = vld [vmem:[%s4361_s5 + $0xe8] sm:$0xff] }
 0x741   : > { %3657 = vmatpush3.msra.mxu0 %v3304_v48  ;;  %3664 = vmatprep.mubr.msk.f32.mxu0 %vm515_vm0, %v4019_v38  ;;  %v3342_v48 = vld [vmem:[%s4361_s5 + $0x170] sm:$0xff] }
 0x742   : > { %3658 = vmatprep.subr.mxu0 %v3303_v56 }
 0x743   : > { %3659 = vmatpush3.msra.mxu0 %v3303_v56  ;;  %v3334_v56 = vld [vmem:[%s4361_s5 + $0xe0] sm:$0xff] }
 0x744   : > { %3660 = vmatprep.subr.mxu0 %v3302_v57 }
 0x745   : > { %3661 = vmatpush3.msra.mxu0 %v3302_v57 }
 0x746   : > { %3662 = vmatprep.subr.mxu0 %v3301_v58 }
 0x747   : > { %3663 = vmatpush3.msra.mxu0 %v3301_v58 }
 0x748   : > { %3665 = vmatmul.mubr.msk.f32.vlgmr.msra.gmra.mxu0 %vm515_vm0, %v4021_v39  ;;  %3678 = vmatprep.subr.mxu0 %v3316_v59 }
 0x749   : > { %3679 = vmatpush3.msra.mxu0 %v3316_v59  ;;  %3686 = vmatprep.mubr.msk.f32.mxu0 %vm515_vm0, %v4019_v38 }
 0x74a   : > { %3680 = vmatprep.subr.mxu0 %v3315_v60 }
 0x74b   : > { %3681 = vmatpush3.msra.mxu0 %v3315_v60 }
 0x74c   : > { %3682 = vmatprep.subr.mxu0 %v3314_v61 }
 0x74d   : > { %3683 = vmatpush3.msra.mxu0 %v3314_v61 }
 0x74e   : > { %3684 = vmatprep.subr.mxu0 %v3313_v62 }
 0x74f   : > { %3685 = vmatpush3.msra.mxu0 %v3313_v62 }
 0x750   : > { %3687 = vmatmul.mubr.msk.f32.vlgmr.msra.gmra.mxu0 %vm515_vm0, %v4021_v39 }
 0x800   : > { %v3650_v0 = vpop.f32.mrf.mxu0 }
 0x802   : > { %v1736_v1 = vpop.f32.mrf.mxu0 }
 0x803   : > { %3653 = vmatprep.mubr.msk.f32.mxu1 %vm1029_vm1, %v1736_v1 }
 0x804   : > { %3654 = vmatmul.mubr.msk.f32.vlgmr.msra.gmra.mxu1 %vm1029_vm1, %v3650_v0 }
 0x805   : > { %3668 = vmatpush3.msra.mxu1 %v3310_v63  ;;  %3675 = vmatprep.mubr.msk.f32.mxu1 %vm515_vm0, %v4019_v38 }
 0x806   : > { %3669 = vmatprep.subr.mxu1 %v3309_v2 }
 0x807   : > { %3670 = vmatpush3.msra.mxu1 %v3309_v2 }
 0x808   : > { %v3666_v5 = vpop.f32.mrf.mxu0  ;;  %3671 = vmatprep.subr.mxu1 %v3308_v3 }
 0x809   : > { %3672 = vmatpush3.msra.mxu1 %v3308_v3 }
 0x80a   : > { %3673 = vmatprep.subr.mxu1 %v3307_v4  ;;  %v1901_v6 = vpop.f32.mrf.mxu0 }
 0x80b   : > { %3674 = vmatpush3.msra.mxu1 %v3307_v4 }
 0x80c   : > { %3676 = vmatmul.mubr.msk.f32.vlgmr.msra.gmra.mxu1 %vm515_vm0, %v4021_v39 }
 0x80d   : > { %3693 = vmatprep.mubr.msk.f32.mxu1 %vm1029_vm1, %v1901_v6 }
 0x810   : > { %v3688_v7 = vpop.f32.mrf.mxu0 }
 0x811   : > { %3696 = vmatprep.subr.mxu0 %v3688_v7 }
 0x812   : > { %v2061_v8 = vpop.f32.mrf.mxu0  ;;  %3697 = vmatpush3.msra.mxu0 %v3688_v7 }
 0x813   : > { %3698 = vmatprep.subr.mxu0 %v2061_v8 }
 0x814   : > { %3699 = vmatpush3.msra.mxu0 %v2061_v8 }
 0x815   : > { %3708 = vmatprep.subr.mxu0 %v3331_v34 }
 0x8c4   : > { %v3655_v11 = vpop.f32.mrf.mxu1 }
 0x8c5   : > { %v4184_v13 = vadd.f32 %v3655_v11, %v1312_v10 }
 0x8c6   : > { %v1819_v14 = vpop.f32.mrf.mxu1 }
 0x8c7   : > { %v4186_v15 = vadd.f32 %v1819_v14, %v1311_v12 }
 0x8cc   : > { %v3677_v16 = vpop.f32.mrf.mxu1 }
 0x8cd   : > { %3689 = vmatprep.subr.msk.mxu1 %vm1029_vm1, %v3677_v16 }
 0x8ce   : > { %v1981_v17 = vpop.f32.mrf.mxu1  ;;  %3690 = vmatpush3.xpose.msk.msra.mxu1 %vm1029_vm1, %v3677_v16 }
 0x8cf   : > { %3691 = vmatprep.subr.msk.mxu1 %vm1029_vm1, %v1981_v17 }
 0x8d2   : > { %3692 = vmatpush3.xpose.msk.msra.mxu1 %vm1029_vm1, %v1981_v17 }
 0x8d3   : > { %3703 = vmatprep.subr.mxu1 %v3325_v35 }
 0x8d5   : > { %3694 = vmatmul.mubr.msk.f32.vlgmr.msra.gmra.mxu1 %vm1029_vm1, %v3666_v5 }
 0x8d6   : > { %3704 = vmatpush3.msra.mxu1 %v3325_v35 }
 0x8d7   : > { %3719 = vmatprep.subr.mxu1 %v3337_v51 }
 0x995   : > { %v3695_v18 = vpop.f32.mrf.mxu1 }
 0x996   : > { %v2158_v19 = vmul.f32 0.35355338, %v3695_v18 }
 0x997   : > { %v2148_v20 = vpop.f32.mrf.mxu1 }
 0x998   : > { %v2157_v21 = vmul.f32 0.35355338, %v2148_v20  ;;  %v2162_v22 = vsel %vm1119_vm2, %v2158_v19, -inf }
 0x999   : > { %2163 = vmax.xlane.f32.xlu1 %v2162_v22 }
 0x99a   : > { %v2159_v23 = vsel %vm1119_vm2, %v2157_v21, -inf }
 0x99b   : > { %2160 = vmax.xlane.f32.xlu0 %v2159_v23 }
 0xa22   : > { %v2164_v24 = vpop.xlane.xlu1 %2163 }
 0xa23   : > { %v2166_v25 = vsub.f32 %v2158_v19, %v2164_v24  ;;  %v3352_v19 = vld [vmem:[%s4362_s6 + $0x18] sm:$0xff] }
 0xa24   : > { %v2161_v26 = vpop.xlane.xlu0 %2160 }
 0xa25   : > { %v2169_v27 = vmul.f32 1.442695, %v2166_v25  ;;  %v2165_v28 = vsub.f32 %v2157_v21, %v2161_v26 }
 0xa27   : > { %3814 = vpow2.f32 %v2169_v27  ;;  %v2167_v29 = vmul.f32 1.442695, %v2165_v28 }
 0xa29   : > { %3816 = vpow2.f32 %v2167_v29 }
 0xa34   : > { %v3815_v30 = vpop.eup %3814 }
 0xa35   : > { %v2174_v31 = vsel %vm1119_vm2, %v3815_v30, 0.0 }
 0xa36   : > { %v3817_v32 = vpop.eup %3816  ;;  %2175 = vadd.xlane.f32.xlu1 %v2174_v31 }
 0xa37   : > { %v2171_v33 = vsel %vm1119_vm2, %v3817_v32, 0.0 }
 0xa38   : > { %2172 = vadd.xlane.f32.xlu0 %v2171_v33 }
 0xabf   : > { %v2176_v36 = vpop.xlane.xlu1 %2175 }
 0xac0   : > { %3818 = vrcp.f32 %v2176_v36 }
 0xac1   : > { %v2173_v37 = vpop.xlane.xlu0 %2172 }
 0xac2   : > { %3820 = vrcp.f32 %v2173_v37 }
 0xacd   : > { %v3819_v40 = vpop.eup %3818 }
 0xace   : > { %v2180_v43 = vmul.f32 %v3819_v40, %v3815_v30 }
 0xacf   : > { %v3821_v41 = vpop.eup %3820 }
 0xad0   : > { %v2178_v42 = vmul.f32 %v3821_v41, %v3817_v32 }
 0xad2   : > { %3700 = vmatprep.mubr.msk.f32.mxu0 %vm1119_vm2, %v2178_v42 }
 0xad3   : > { %3701 = vmatmul.mubr.msk.f32.vlgmr.msra.gmra.mxu0 %vm1119_vm2, %v2180_v43 }
 0xad4   : > { %3709 = vmatpush3.msra.mxu0 %v3331_v34  ;;  %3716 = vmatprep.mubr.msk.f32.mxu0 %vm515_vm0, %v4019_v38 }
 0xad5   : > { %3710 = vmatprep.subr.mxu0 %v3330_v44 }
 0xad6   : > { %3711 = vmatpush3.msra.mxu0 %v3330_v44 }
 0xad7   : > { %3712 = vmatprep.subr.mxu0 %v3329_v45 }
 0xad8   : > { %3713 = vmatpush3.msra.mxu0 %v3329_v45 }
 0xad9   : > { %3714 = vmatprep.subr.mxu0 %v3328_v46 }
 0xada   : > { %3715 = vmatpush3.msra.mxu0 %v3328_v46 }
 0xadb   : > { %3717 = vmatmul.mubr.msk.f32.vlgmr.msra.gmra.mxu0 %vm515_vm0, %v4021_v39  ;;  %3730 = vmatprep.subr.mxu0 %v3343_v47 }
 0xadc   : > { %3731 = vmatpush3.msra.mxu0 %v3343_v47  ;;  %3738 = vmatprep.mubr.msk.f32.mxu0 %vm515_vm0, %v4019_v38  ;;  %v2913_v47 = vld [vmem:[%s4366_s10 + $0x10] sm:$0xff] }
 0xadd   : > { %3732 = vmatprep.subr.mxu0 %v3342_v48 }
 0xade   : > { %3733 = vmatpush3.msra.mxu0 %v3342_v48  ;;  %v2912_v48 = vld [vmem:[%s4366_s10 + $0x8] sm:$0xff] }
 0xadf   : > { %3734 = vmatprep.subr.mxu0 %v3341_v49 }
 0xae0   : > { %3735 = vmatpush3.msra.mxu0 %v3341_v49  ;;  %v2911_v49 = vld [vmem:[%s4366_s10] sm:$0xff] }
 0xae1   : > { %3736 = vmatprep.subr.mxu0 %v3340_v50 }
 0xae2   : > { %3737 = vmatpush3.msra.mxu0 %v3340_v50 }
 0xae3   : > { %3739 = vmatmul.mubr.msk.f32.vlgmr.msra.gmra.mxu0 %vm515_vm0, %v4021_v39 }
 0xb93   : > { %v3702_v52 = vpop.f32.mrf.mxu0 }
 0xb95   : > { %v2253_v53 = vpop.f32.mrf.mxu0 }
 0xb96   : > { %3705 = vmatprep.mubr.msk.f32.mxu1 %vm1029_vm1, %v2253_v53 }
 0xb97   : > { %3706 = vmatmul.mubr.msk.f32.vlgmr.msra.gmra.mxu1 %vm1029_vm1, %v3702_v52 }
 0xb98   : > { %3720 = vmatpush3.msra.mxu1 %v3337_v51  ;;  %3727 = vmatprep.mubr.msk.f32.mxu1 %vm515_vm0, %v4019_v38 }
 0xb99   : > { %3721 = vmatprep.subr.mxu1 %v3336_v54 }
 0xb9a   : > { %3722 = vmatpush3.msra.mxu1 %v3336_v54 }
 0xb9b   : > { %v3718_v57 = vpop.f32.mrf.mxu0  ;;  %3723 = vmatprep.subr.mxu1 %v3335_v55 }
 0xb9c   : > { %3724 = vmatpush3.msra.mxu1 %v3335_v55 }
 0xb9d   : > { %3725 = vmatprep.subr.mxu1 %v3334_v56  ;;  %v2418_v58 = vpop.f32.mrf.mxu0 }
 0xb9e   : > { %3726 = vmatpush3.msra.mxu1 %v3334_v56 }
 0xb9f   : > { %3728 = vmatmul.mubr.msk.f32.vlgmr.msra.gmra.mxu1 %vm515_vm0, %v4021_v39 }
 0xba0   : > { %3745 = vmatprep.mubr.msk.f32.mxu1 %vm1029_vm1, %v2418_v58  ;;  %v4292_v58 = vld [vmem:[%s4364_s8] ss:$0 sm:$0xff] }
 0xba3   : > { %v3740_v59 = vpop.f32.mrf.mxu0 }
 0xba4   : > { %3748 = vmatprep.subr.mxu0 %v3740_v59 }
 0xba5   : > { %v2578_v60 = vpop.f32.mrf.mxu0  ;;  %3749 = vmatpush3.msra.mxu0 %v3740_v59 }
 0xba6   : > { %3750 = vmatprep.subr.mxu0 %v2578_v60 }
 0xba7   : > { %3751 = vmatpush3.msra.mxu0 %v2578_v60 }
 0xc57   : > { %v3707_v61 = vpop.f32.mrf.mxu1 }
 0xc58   : > { %v2346_v62 = vadd.f32 %v3707_v61, %v4184_v13 }
 0xc59   : > { %v2336_v63 = vpop.f32.mrf.mxu1 }
 0xc5a   : > { %v2345_v0 = vadd.f32 %v2336_v63, %v4186_v15 }
 0xc5f   : > { %v3729_v1 = vpop.f32.mrf.mxu1 }
 0xc60   : > { %3741 = vmatprep.subr.msk.mxu1 %vm1029_vm1, %v3729_v1 }
 0xc61   : > { %v2498_v2 = vpop.f32.mrf.mxu1  ;;  %3742 = vmatpush3.xpose.msk.msra.mxu1 %vm1029_vm1, %v3729_v1 }
 0xc62   : > { %3743 = vmatprep.subr.msk.mxu1 %vm1029_vm1, %v2498_v2 }
 0xc65   : > { %3744 = vmatpush3.xpose.msk.msra.mxu1 %vm1029_vm1, %v2498_v2  ;;  %v3028_v2 = vld [vmem:[%s4368_s12 + $0x38] sm:$0xff] }
 0xc66   : > { %3755 = vmatprep.subr.mxu1 %v3352_v19 }
 0xc68   : > { %3746 = vmatmul.mubr.msk.f32.vlgmr.msra.gmra.mxu1 %vm1029_vm1, %v3718_v57 }
 0xc69   : > { %3756 = vmatpush3.msra.mxu1 %v3352_v19 }
 0xc6a   : > { %3771 = vmatprep.subr.mxu1 %v3028_v2 }
 0xd28   : > { %v3747_v3 = vpop.f32.mrf.mxu1 }
 0xd29   : > { %v2675_v4 = vmul.f32 0.35355338, %v3747_v3  ;;  %v3027_v3 = vld [vmem:[%s4368_s12 + $0x30] sm:$0xff] }
 0xd2a   : > { %v2665_v5 = vpop.f32.mrf.mxu1 }
 0xd2b   : > { %v2674_v6 = vmul.f32 0.35355338, %v2665_v5  ;;  %v2679_v7 = vsel %vm1119_vm2, %v2675_v4, -inf  ;;  %v3025_v5 = vld [vmem:[%s4368_s12 + $0x20] sm:$0xff] }
 0xd2c   : > { %2680 = vmax.xlane.f32.xlu1 %v2679_v7  ;;  %v3023_v7 = vld [vmem:[%s4368_s12 + $0x10] sm:$0xff] }
 0xd2d   : > { %v2676_v8 = vsel %vm1119_vm2, %v2674_v6, -inf }
 0xd2e   : > { %2677 = vmax.xlane.f32.xlu0 %v2676_v8  ;;  %v3022_v8 = vld [vmem:[%s4368_s12 + $0x8] sm:$0xff] }
 0xdb5   : > { %v2681_v9 = vpop.xlane.xlu1 %2680 }
 0xdb6   : > { %v2683_v10 = vsub.f32 %v2675_v4, %v2681_v9  ;;  %v3026_v4 = vld [vmem:[%s4368_s12 + $0x28] sm:$0xff]  ;;  %v3021_v9 = vld [vmem:[%s4368_s12] sm:$0xff] }
 0xdb7   : > { %v2678_v11 = vpop.xlane.xlu0 %2677 }
 0xdb8   : > { %v2686_v12 = vmul.f32 1.442695, %v2683_v10  ;;  %v2682_v13 = vsub.f32 %v2674_v6, %v2678_v11  ;;  %v3024_v6 = vld [vmem:[%s4368_s12 + $0x18] sm:$0xff]  ;;  %v3357_v10 = vld [vmem:[%s4367_s11] ss:$0 sm:$0xff] }
 0xdba   : > { %3822 = vpow2.f32 %v2686_v12  ;;  %v2684_v14 = vmul.f32 1.442695, %v2682_v13 }
 0xdbc   : > { %3824 = vpow2.f32 %v2684_v14 }
 0xdc7   : > { %v3823_v15 = vpop.eup %3822 }
 0xdc8   : > { %v2691_v16 = vsel %vm1119_vm2, %v3823_v15, 0.0 }
 0xdc9   : > { %v3825_v17 = vpop.eup %3824  ;;  %2692 = vadd.xlane.f32.xlu1 %v2691_v16 }
 0xdca   : > { %v2688_v18 = vsel %vm1119_vm2, %v3825_v17, 0.0 }
 0xdcb   : > { %2689 = vadd.xlane.f32.xlu0 %v2688_v18 }
 0xe52   : > { %v2693_v20 = vpop.xlane.xlu1 %2692 }
 0xe53   : > { %3826 = vrcp.f32 %v2693_v20 }
 0xe54   : > { %v2690_v21 = vpop.xlane.xlu0 %2689 }
 0xe55   : > { %3828 = vrcp.f32 %v2690_v21 }
 0xe60   : > { %v3827_v22 = vpop.eup %3826 }
 0xe61   : > { %v2697_v25 = vmul.f32 %v3827_v22, %v3823_v15 }
 0xe62   : > { %v3829_v23 = vpop.eup %3828 }
 0xe63   : > { %v2695_v24 = vmul.f32 %v3829_v23, %v3825_v17 }
 0xe65   : > { %3752 = vmatprep.mubr.msk.f32.mxu0 %vm1119_vm2, %v2695_v24 }
 0xe66   : > { %3753 = vmatmul.mubr.msk.f32.vlgmr.msra.gmra.mxu0 %vm1119_vm2, %v2697_v25 }
 0xf26   : > { %v3754_v26 = vpop.f32.mrf.mxu0 }
 0xf28   : > { %v2770_v27 = vpop.f32.mrf.mxu0 }
 0xf29   : > { %3757 = vmatprep.mubr.msk.f32.mxu1 %vm1029_vm1, %v2770_v27 }
 0xf2a   : > { %3758 = vmatmul.mubr.msk.f32.vlgmr.msra.gmra.mxu1 %vm1029_vm1, %v3754_v26 }
 0xf2b   : > { %3772 = vmatpush3.msra.mxu1 %v3028_v2 }
 0xf2c   : > { %3773 = vmatprep.subr.mxu1 %v3027_v3 }
 0xf2d   : > { %3774 = vmatpush3.msra.mxu1 %v3027_v3 }
 0xf2e   : > { %3775 = vmatprep.subr.mxu1 %v3026_v4 }
 0xf2f   : > { %3776 = vmatpush3.msra.mxu1 %v3026_v4 }
 0xf30   : > { %3777 = vmatprep.subr.mxu1 %v3025_v5 }
 0xf31   : > { %3778 = vmatpush3.msra.mxu1 %v3025_v5 }
 0xf32   : > { %3779 = vmatprep.subr.mxu1 %v3024_v6 }
 0xf33   : > { %3780 = vmatpush3.msra.mxu1 %v3024_v6 }
 0xf34   : > { %3781 = vmatprep.subr.mxu1 %v3023_v7 }
 0xf35   : > { %3782 = vmatpush3.msra.mxu1 %v3023_v7 }
 0xf36   : > { %3783 = vmatprep.subr.mxu1 %v3022_v8 }
 0xf37   : > { %3784 = vmatpush3.msra.mxu1 %v3022_v8 }
 0xf38   : > { %3785 = vmatprep.subr.mxu1 %v3021_v9 }
 0xf39   : > { %3786 = vmatpush3.msra.mxu1 %v3021_v9 }
 0xfea   : > { %v3759_v28 = vpop.f32.mrf.mxu1 }
 0xfeb   : > { %v2863_v29 = vadd.f32 %v3759_v28, %v2346_v62  ;;  %v4298_v62 = vld [vmem:[%s4365_s9] ss:$0 sm:$0xff] }
 0xfec   : > { %v2853_v30 = vpop.f32.mrf.mxu1 }
 0xfed   : > { %v2862_v31 = vadd.f32 %v2853_v30, %v2345_v0  ;;  %v2865_v32 = vadd.f32 %v2863_v29, %v4021_v39 }
 0xfef   : > { %v2871_v33 = vsel %vm515_vm0, %v2865_v32, 0.0  ;;  %v2864_v34 = vadd.f32 %v2862_v31, %v4019_v38  ;;  %v2914_v38 = vld [vmem:[%s4366_s10 + $0x18] sm:$0xff] }
 0xff0   : > { %2872 = vadd.xlane.f32.xlu1 %v2871_v33  ;;  %3760 = vmatprep.subr.mxu0 %v2914_v38  ;;  %v3360_v33 = vld [vmem:[%s4369_s13] ss:$0 sm:$0xff] }
 0xff1   : > { %v2868_v35 = vsel %vm515_vm0, %v2864_v34, 0.0  ;;  %3761 = vmatpush3.msra.mxu0 %v2914_v38 }
 0xff2   : > { %2869 = vadd.xlane.f32.xlu0 %v2868_v35  ;;  %3762 = vmatprep.subr.mxu0 %v2913_v47 }
 0xff3   : > { %3763 = vmatpush3.msra.mxu0 %v2913_v47 }
 0xff4   : > { %3764 = vmatprep.subr.mxu0 %v2912_v48 }
 0xff5   : > { %3765 = vmatpush3.msra.mxu0 %v2912_v48 }
 0xff6   : > { %3766 = vmatprep.subr.mxu0 %v2911_v49 }
 0xff7   : > { %3767 = vmatpush3.msra.mxu0 %v2911_v49 }
0x1079   : > { %v2873_v36 = vpop.xlane.xlu1 %2872 }
0x107a   : > { %v2876_v37 = vmul.f32 0.03125, %v2873_v36 }
0x107b   : > { %v2870_v40 = vpop.xlane.xlu0 %2869 }
0x107c   : > { %v2878_v41 = vsub.f32 %v2865_v32, %v2876_v37  ;;  %v2875_v42 = vmul.f32 0.03125, %v2870_v40 }
0x107e   : > { %v2877_v43 = vsub.f32 %v2864_v34, %v2875_v42  ;;  %v2880_v44 = vmul.f32 %v2878_v41, %v2878_v41 }
0x1080   : > { %v2884_v45 = vsel %vm515_vm0, %v2880_v44, 0.0  ;;  %v2879_v46 = vmul.f32 %v2877_v43, %v2877_v43 }
0x1081   : > { %2885 = vadd.xlane.f32.xlu1 %v2884_v45 }
0x1082   : > { %v2881_v39 = vsel %vm515_vm0, %v2879_v46, 0.0 }
0x1083   : > { %2882 = vadd.xlane.f32.xlu0 %v2881_v39 }
0x110a   : > { %v2886_v50 = vpop.xlane.xlu1 %2885 }
0x110b   : > { %v2888_v51 = vmul.f32 0.03125, %v2886_v50 }
0x110c   : > { %v2883_v52 = vpop.xlane.xlu0 %2882 }
0x110d   : > { %v2890_v53 = vadd.f32 1e-05, %v2888_v51  ;;  %v2887_v54 = vmul.f32 0.03125, %v2883_v52 }
0x110f   : > { %3830 = vrsqrt.f32 %v2890_v53  ;;  %v2889_v55 = vadd.f32 1e-05, %v2887_v54 }
0x1111   : > { %3832 = vrsqrt.f32 %v2889_v55 }
0x111c   : > { %v3831_v56 = vpop.eup %3830 }
0x111d   : > { %v2894_v57 = vmul.f32 %v3831_v56, %v2878_v41 }
0x111e   : > { %v3833_v59 = vpop.eup %3832 }
0x111f   : > { %v2893_v60 = vmul.f32 %v3833_v59, %v2877_v43  ;;  %v2902_v61 = vmul.f32 %v4292_v58, %v2894_v57 }
0x1121   : > { %v2901_v63 = vmul.f32 %v4292_v58, %v2893_v60  ;;  %v2910_v1 = vadd.f32 %v4298_v62, %v2902_v61 }
0x1123   : > { %v4302_v0 = vadd.f32 %v4298_v62, %v2901_v63 }
0x1125   : > { %3768 = vmatprep.mubr.msk.f32.mxu0 %vm515_vm0, %v4302_v0 }
0x1126   : > { %3769 = vmatmul.mubr.msk.f32.vlgmr.msra.gmra.mxu0 %vm515_vm0, %v2910_v1 }
0x11e6   : > { %v3770_v11 = vpop.f32.mrf.mxu0 }
0x11e7   : > { %v3000_v12 = vadd.f32 %v3770_v11, %v3357_v10 }
0x11e8   : > { %v2994_v13 = vpop.f32.mrf.mxu0 }
0x11e9   : > { %v3006_v14 = vmul.f32 0.044715, %v3000_v12  ;;  %v2995_v15 = vadd.f32 %v3357_v10, %v2994_v13  ;;  %v3004_v30 = vmul.f32 0.5, %v3000_v12 }
0x11eb   : > { %v3008_v16 = vmul.f32 %v3006_v14, %v3000_v12  ;;  %v3005_v17 = vmul.f32 0.044715, %v2995_v15  ;;  %v3003_v28 = vmul.f32 0.5, %v2995_v15 }
0x11ed   : > { %v3010_v18 = vmul.f32 %v3008_v16, %v3000_v12  ;;  %v3007_v19 = vmul.f32 %v3005_v17, %v2995_v15 }
0x11ef   : > { %v3012_v20 = vadd.f32 %v3010_v18, %v3000_v12  ;;  %v3009_v21 = vmul.f32 %v3007_v19, %v2995_v15 }
0x11f1   : > { %v3014_v22 = vmul.f32 0.7978846, %v3012_v20  ;;  %v3011_v23 = vadd.f32 %v3009_v21, %v2995_v15 }
0x11f3   : > { %3834 = vtanh.f32 %v3014_v22  ;;  %v3013_v24 = vmul.f32 0.7978846, %v3011_v23 }
0x11f5   : > { %3836 = vtanh.f32 %v3013_v24 }
0x1200   : > { %v3835_v25 = vpop.eup %3834 }
0x1201   : > { %v3018_v27 = vadd.f32 1.0, %v3835_v25 }
0x1202   : > { %v3837_v26 = vpop.eup %3836 }
0x1203   : > { %v3017_v29 = vadd.f32 1.0, %v3837_v26  ;;  %v3020_v32 = vmul.f32 %v3018_v27, %v3004_v30 }
0x1205   : > { %v3019_v31 = vmul.f32 %v3017_v29, %v3003_v28 }
0x1207   : > { %3787 = vmatprep.mubr.msk.f32.mxu1 %vm3036_vm3, %v3019_v31 }
0x1208   : > { %3788 = vmatmul.mubr.msk.f32.vlgmr.msra.gmra.mxu1 %vm3036_vm3, %v3020_v32 }
0x12c8   : > { %v3789_v34 = vpop.f32.mrf.mxu1 }
0x12c9   : > { %v3115_v35 = vadd.f32 %v3789_v34, %v3360_v33 }
0x12ca   : > { %v3109_v36 = vpop.f32.mrf.mxu1 }
0x12cb   : > { %v3110_v37 = vadd.f32 %v3360_v33, %v3109_v36  ;;  %v3119_v40 = vadd.f32 %v3115_v35, %v2910_v1 }
0x12cd   : > { %v3123_v41 = vsel %vm515_vm0, %v3119_v40, 0.0  ;;  %v3118_v42 = vadd.f32 %v3110_v37, %v4302_v0 }
0x12ce   : > { %3124 = vadd.xlane.f32.xlu1 %v3123_v41 }
0x12cf   : > { %v3120_v43 = vsel %vm515_vm0, %v3118_v42, 0.0 }
0x12d0   : > { %3121 = vadd.xlane.f32.xlu0 %v3120_v43 }
0x1357   : > { %v3125_v44 = vpop.xlane.xlu1 %3124 }
0x1358   : > { %v3127_v45 = vmul.f32 0.03125, %v3125_v44 }
0x1359   : > { %v3122_v46 = vpop.xlane.xlu0 %3121 }
0x135a   : > { %v3129_v39 = vsub.f32 %v3119_v40, %v3127_v45  ;;  %v3126_v38 = vmul.f32 0.03125, %v3122_v46 }
0x135c   : > { %v3128_v47 = vsub.f32 %v3118_v42, %v3126_v38  ;;  %v3131_v48 = vmul.f32 %v3129_v39, %v3129_v39 }
0x135e   : > { %v3135_v49 = vsel %vm515_vm0, %v3131_v48, 0.0  ;;  %v3130_v50 = vmul.f32 %v3128_v47, %v3128_v47 }
0x135f   : > { %3136 = vadd.xlane.f32.xlu1 %v3135_v49 }
0x1360   : > { %v3132_v51 = vsel %vm515_vm0, %v3130_v50, 0.0 }
0x1361   : > { %3133 = vadd.xlane.f32.xlu0 %v3132_v51 }
0x13e8   : > { %v3137_v52 = vpop.xlane.xlu1 %3136 }
0x13e9   : > { %v3139_v53 = vmul.f32 0.03125, %v3137_v52 }
0x13ea   : > { %v3134_v54 = vpop.xlane.xlu0 %3133 }
0x13eb   : > { %v3141_v55 = vadd.f32 1e-05, %v3139_v53  ;;  %v3138_v56 = vmul.f32 0.03125, %v3134_v54 }
0x13ed   : > { %3838 = vrsqrt.f32 %v3141_v55  ;;  %v3140_v57 = vadd.f32 1e-05, %v3138_v56 }
0x13ef   : > { %3840 = vrsqrt.f32 %v3140_v57 }
0x13fa   : > { %v3839_v59 = vpop.eup %3838 }
0x13fb   : > { %v3145_v60 = vmul.f32 %v3839_v59, %v3129_v39 }
0x13fc   : > { %v3841_v61 = vpop.eup %3840 }
0x13fd   : > { %v3147_v63 = vmul.f32 %v4292_v58, %v3145_v60  ;;  %v3144_v0 = vmul.f32 %v3841_v61, %v3128_v47 }
0x13ff   : > { %v3149_v1 = vadd.f32 %v4298_v62, %v3147_v63  ;;  %v3146_v2 = vmul.f32 %v4292_v58, %v3144_v0 }
0x1401   : > { %3151 = vst.msk [vmem:[%s507_s22 + $0x8] sm:$0xff] %vm515_vm0, %v3149_v1  ;;  %v3148_v3 = vadd.f32 %v4298_v62, %v3146_v2 }
0x1403   : > { %3150 = vst.msk [vmem:[%s507_s22] sm:$0xff] %vm515_vm0, %v3148_v3 }
0x1404 PF: > { %s24_s29 = sadd.s32 1, %s3848_s29  }
0x1405   : > { %p21_p4 = scmp.ge.s32.totalorder %s24_s29, 4  }
0x1407   :  { %23 = sbr.rel (!%p21_p4) target bundleno = 1 (0x1), region = 126 }

</bundles_post_ra>
